<compile_context>
chip_gen: v5e
topology: v5e:2x2
jax: 0.10.0
libtpu: 0.0.40
codegen_flags: <defaults>
</compile_context>

<pallas_src>
import functools

import jax
import jax.numpy as jnp
from jax.experimental import pallas as pl
from jax.experimental.pallas import tpu as pltpu

NFC = 1024
H3 = 512
LEAKY_SLOPE = 0.2
BN_EPS = 1e-5
LANE = 128

_SINGLE_TILE_MAX_ROWS = 256   # fused single-kernel path up to this batch
_TILE_ROWS = 256              # batch tile for the tiled path (MXU M multiple)
_VMEM_LIMIT = 32 << 20        # fits v7x's 64 MiB physical VMEM with headroom


def _round_up(n, m):
    return ((n + m - 1) // m) * m


def _pad_last(a, to):
    pad = to - a.shape[-1]
    if pad == 0:
        return a
    return jnp.pad(a, [(0, 0)] * (a.ndim - 1) + [(0, pad)])


def _leaky_relu(h):
    return jnp.where(h > 0, h, LEAKY_SLOPE * h)


def _bn_scale_shift_from(h, gamma, beta):
    """Full-batch training-mode BN folded to per-feature scale/shift (f32)."""
    mean = jnp.mean(h, axis=0, keepdims=True)
    msq = jnp.mean(h * h, axis=0, keepdims=True)
    var = jnp.maximum(msq - mean * mean, 0.0)   # clamp f32 cancellation
    s = gamma * jax.lax.rsqrt(var + BN_EPS)
    t = beta - mean * s
    return s, t


# ---------------------------------------------------------------------------
# Fused single-tile kernel (B <= 256): whole MLP + in-kernel full-batch BN.
# ---------------------------------------------------------------------------
def encd_fused_kernel(x_ref, w1_ref, w2_ref, w3_ref, w4_ref, vec_ref, out_ref,
                      *, n_rows):
    v = vec_ref[...]                       # (8, 1024) f32 packed vectors
    b1, b2 = v[0:1, :], v[1:2, :]
    g2, be2 = v[2:3, :], v[3:4, :]
    b3, g3, be3 = v[4:5, :H3], v[5:6, :H3], v[6:7, :H3]
    ncls_p = out_ref.shape[-1]
    b4 = v[7:8, :ncls_p]

    n_pad_rows = x_ref.shape[0]
    if n_pad_rows != n_rows:
        # Exclude zero-padded batch rows from the BN statistics.
        row_ids = jax.lax.broadcasted_iota(jnp.int32, (n_pad_rows, 1), 0)
        row_mask = (row_ids < n_rows).astype(jnp.float32)
    else:
        row_mask = None

    def bn(h, gamma, beta):
        if row_mask is None:
            mean = jnp.mean(h, axis=0, keepdims=True)
            msq = jnp.mean(h * h, axis=0, keepdims=True)
        else:
            inv_n = 1.0 / n_rows
            hm = h * row_mask
            mean = jnp.sum(hm, axis=0, keepdims=True) * inv_n
            msq = jnp.sum(hm * h, axis=0, keepdims=True) * inv_n
        var = jnp.maximum(msq - mean * mean, 0.0)
        s = gamma * jax.lax.rsqrt(var + BN_EPS)
        t = beta - mean * s
        return h * s + t

    # Layer 1: Linear -> LeakyReLU
    h = jnp.dot(x_ref[...], w1_ref[...], preferred_element_type=jnp.float32) + b1
    h = _leaky_relu(h)
    # Layer 2: Linear -> BN -> LeakyReLU
    h = jnp.dot(h.astype(jnp.bfloat16), w2_ref[...],
                preferred_element_type=jnp.float32) + b2
    h = _leaky_relu(bn(h, g2, be2))
    # Layer 3: Linear -> BN -> LeakyReLU
    h = jnp.dot(h.astype(jnp.bfloat16), w3_ref[...],
                preferred_element_type=jnp.float32) + b3
    h = _leaky_relu(bn(h, g3, be3))
    # Layer 4: Linear -> logits (lane-padded, sliced in the wrapper)
    out = jnp.dot(h.astype(jnp.bfloat16), w4_ref[...],
                  preferred_element_type=jnp.float32) + b4
    out_ref[...] = out.astype(out_ref.dtype)


# ---------------------------------------------------------------------------
# Batch-tiled 3-stage pipeline (B > 256): weights VMEM-resident, BN stats
# handled between stages over the full batch so tiling stays exact.
# ---------------------------------------------------------------------------
def stage1_kernel(x_ref, w1_ref, w2_ref, vec_ref, h2_ref):
    v = vec_ref[...]                       # (2, 1024): b1, b2
    b1, b2 = v[0:1, :], v[1:2, :]
    h = jnp.dot(x_ref[...], w1_ref[...], preferred_element_type=jnp.float32) + b1
    h = _leaky_relu(h)
    h2 = jnp.dot(h.astype(jnp.bfloat16), w2_ref[...],
                 preferred_element_type=jnp.float32) + b2
    h2_ref[...] = h2


def stage2_kernel(h2_ref, w3_ref, vec_ref, h3_ref):
    v = vec_ref[...]                       # (3, 1024): s2, t2, b3 (padded)
    s2, t2, b3 = v[0:1, :], v[1:2, :], v[2:3, :H3]
    h = _leaky_relu(h2_ref[...] * s2 + t2)
    h3 = jnp.dot(h.astype(jnp.bfloat16), w3_ref[...],
                 preferred_element_type=jnp.float32) + b3
    h3_ref[...] = h3


def stage3_kernel(h3_ref, w4_ref, vec_ref, out_ref):
    v = vec_ref[...]                       # (3, 512): s3, t3, b4 (padded)
    ncls_p = out_ref.shape[-1]
    s3, t3, b4 = v[0:1, :], v[1:2, :], v[2:3, :ncls_p]
    h = _leaky_relu(h3_ref[...] * s3 + t3)
    out = jnp.dot(h.astype(jnp.bfloat16), w4_ref[...],
                  preferred_element_type=jnp.float32) + b4
    out_ref[...] = out.astype(out_ref.dtype)


# ---------------------------------------------------------------------------
# One-time parameter prep: padded bf16 weights + packed f32 vector slabs.
# Call once, keep the result; do NOT re-run per forward call.
# ---------------------------------------------------------------------------
def prep_params(params):
    (w1, b1, w2, b2, g2, be2, w3, b3, g3, be3, w4, b4) = params
    nlat = w1.shape[0]
    n_classes = w4.shape[1]
    nlat_p = _round_up(nlat, LANE)
    ncls_p = _round_up(n_classes, LANE)

    w1_p = jnp.pad(w1, ((0, nlat_p - nlat), (0, 0))).astype(jnp.bfloat16)
    w2_b = w2.astype(jnp.bfloat16)
    w3_b = w3.astype(jnp.bfloat16)
    w4_p = _pad_last(w4, ncls_p).astype(jnp.bfloat16)
    b4_p = _pad_last(b4, ncls_p)                      # f32, lane-padded

    def row1024(v):
        return _pad_last(v, NFC)

    vec_fused = jnp.concatenate(
        [b1, b2, g2, be2, row1024(b3), row1024(g3), row1024(be3),
         row1024(b4_p)], axis=0)                      # (8, 1024) f32
    vec_a = jnp.concatenate([b1, b2], axis=0)         # (2, 1024) f32

    return dict(
        w1=w1_p, w2=w2_b, w3=w3_b, w4=w4_p,
        vec_fused=vec_fused, vec_a=vec_a,
        b3_1024=row1024(b3), b4_512=_pad_last(b4_p, H3),
        g2=g2, be2=be2, g3=g3, be3=be3)


@functools.partial(jax.jit, static_argnames=("n_classes",))
def encd_forward(x, prep, *, n_classes):
    """Fused EncD MLP forward. x: [B, nlatentdim] -> [B, nClasses]."""
    B = x.shape[0]
    nlat_p = prep["w1"].shape[0]
    ncls_p = prep["w4"].shape[1]
    x_p = _pad_last(x, nlat_p).astype(jnp.bfloat16)

    if B <= _SINGLE_TILE_MAX_ROWS:
        # --- small batch: one fused kernel, full-batch BN in-kernel ---
        B_pad = _round_up(B, 8)
        if B_pad != B:
            x_p = jnp.pad(x_p, ((0, B_pad - B), (0, 0)))
        vmem = pl.BlockSpec(memory_space=pltpu.MemorySpace.VMEM)
        out_p = pl.pallas_call(
            functools.partial(encd_fused_kernel, n_rows=B),
            out_shape=jax.ShapeDtypeStruct((B_pad, ncls_p), jnp.float32),
            in_specs=[vmem] * 6,
            out_specs=vmem,
            compiler_params=pltpu.CompilerParams(vmem_limit_bytes=_VMEM_LIMIT),
        )(x_p, prep["w1"], prep["w2"], prep["w3"], prep["w4"],
          prep["vec_fused"])
        return out_p[:B, :n_classes]

    # --- large batch: batch-tiled 3-stage pipeline, resident weights ---
    TB = _TILE_ROWS
    B_pad = _round_up(B, TB)
    if B_pad != B:
        x_p = jnp.pad(x_p, ((0, B_pad - B), (0, 0)))
    nt = B_pad // TB
    cp = pltpu.CompilerParams(dimension_semantics=("parallel",),
                              vmem_limit_bytes=_VMEM_LIMIT)

    def tiled(shape):
        return pl.BlockSpec(shape, lambda i: (i, 0))

    def resident(shape):
        return pl.BlockSpec(shape, lambda i: (0, 0))

    # Stage 1: Linear1 + LeakyReLU + Linear2 (pre-BN activations out).
    h2 = pl.pallas_call(
        stage1_kernel,
        out_shape=jax.ShapeDtypeStruct((B_pad, NFC), jnp.float32),
        grid_spec=pltpu.PrefetchScalarGridSpec(
            num_scalar_prefetch=0, grid=(nt,),
            in_specs=[tiled((TB, nlat_p)),
                      resident((nlat_p, NFC)),
                      resident((NFC, NFC)),
                      resident((2, NFC))],
            out_specs=tiled((TB, NFC))),
        compiler_params=cp,
    )(x_p, prep["w1"], prep["w2"], prep["vec_a"])

    # Full-batch BN2 stats (exclude padded rows); fused under jit.
    s2, t2 = _bn_scale_shift_from(h2[:B], prep["g2"], prep["be2"])
    vec_b = jnp.concatenate([s2, t2, prep["b3_1024"]], axis=0)   # (3, 1024)

    # Stage 2: BN2 + LeakyReLU + Linear3 (pre-BN activations out).
    h3 = pl.pallas_call(
        stage2_kernel,
        out_shape=jax.ShapeDtypeStruct((B_pad, H3), jnp.float32),
        grid_spec=pltpu.PrefetchScalarGridSpec(
            num_scalar_prefetch=0, grid=(nt,),
            in_specs=[tiled((TB, NFC)),
                      resident((NFC, H3)),
                      resident((3, NFC))],
            out_specs=tiled((TB, H3))),
        compiler_params=cp,
    )(h2, prep["w3"], vec_b)

    s3, t3 = _bn_scale_shift_from(h3[:B], prep["g3"], prep["be3"])
    vec_c = jnp.concatenate([s3, t3, prep["b4_512"]], axis=0)    # (3, 512)

    # Stage 3: BN3 + LeakyReLU + Linear4 -> logits.
    out_p = pl.pallas_call(
        stage3_kernel,
        out_shape=jax.ShapeDtypeStruct((B_pad, ncls_p), jnp.float32),
        grid_spec=pltpu.PrefetchScalarGridSpec(
            num_scalar_prefetch=0, grid=(nt,),
            in_specs=[tiled((TB, H3)),
                      resident((H3, ncls_p)),
                      resident((3, H3))],
            out_specs=tiled((TB, ncls_p))),
        compiler_params=cp,
    )(h3, prep["w4"], vec_c)

    return out_p[:B, :n_classes]


# ---------------------------------------------------------------------------
# Parameters / pure-JAX reference
# ---------------------------------------------------------------------------
def init_params(key, nlatentdim, n_classes):
    """Deterministic synthetic parameters (Linear weights [in,out], BN affine)."""
    ks = jax.random.split(key, 8)

    def lin(kw, kb, fan_in, fan_out):
        bound = 1.0 / jnp.sqrt(fan_in)
        w = jax.random.uniform(kw, (fan_in, fan_out), jnp.float32, -bound, bound)
        b = jax.random.uniform(kb, (1, fan_out), jnp.float32, -bound, bound)
        return w, b

    w1, b1 = lin(ks[0], ks[1], nlatentdim, NFC)
    w2, b2 = lin(ks[2], ks[3], NFC, NFC)
    w3, b3 = lin(ks[4], ks[5], NFC, H3)
    w4, b4 = lin(ks[6], ks[7], H3, n_classes)

    # BatchNorm affine params (PyTorch default init: weight=1, bias=0).
    g2 = jnp.ones((1, NFC), jnp.float32)
    be2 = jnp.zeros((1, NFC), jnp.float32)
    g3 = jnp.ones((1, H3), jnp.float32)
    be3 = jnp.zeros((1, H3), jnp.float32)

    return (w1, b1, w2, b2, g2, be2, w3, b3, g3, be3, w4, b4)


def encd_reference(x, params):
    """Pure-JAX reference using the same bf16-weight / f32-accumulate recipe."""
    (w1, b1, w2, b2, g2, be2, w3, b3, g3, be3, w4, b4) = params

    def mm(h, w):
        return jnp.dot(h.astype(jnp.bfloat16), w.astype(jnp.bfloat16),
                       preferred_element_type=jnp.float32)

    def bn(h, gamma, beta):
        mean = jnp.mean(h, axis=0, keepdims=True)
        var = jnp.mean((h - mean) ** 2, axis=0, keepdims=True)
        s = gamma * jax.lax.rsqrt(var + BN_EPS)
        return h * s + (beta - mean * s)

    h = _leaky_relu(mm(x, w1) + b1)
    h = _leaky_relu(bn(mm(h, w2) + b2, g2, be2))
    h = _leaky_relu(bn(mm(h, w3) + b3, g3, be3))
    return mm(h, w4) + b4


if __name__ == "__main__":
    nlatentdim = 32
    n_classes = 10

    key = jax.random.PRNGKey(0)
    kx, kp = jax.random.split(key)
    params = init_params(kp, nlatentdim, n_classes)
    prep = prep_params(params)   # one-time: padded bf16 weights, packed vecs

    # Small batch -> fused single-kernel path.
    B = 8
    x = jax.random.normal(kx, (B, nlatentdim), jnp.float32)
    out = jax.block_until_ready(encd_forward(x, prep, n_classes=n_classes))
    ref = encd_reference(x, params)
    assert out.shape == (B, n_classes), out.shape
    assert jnp.allclose(out, ref, atol=5e-3, rtol=5e-3), (
        float(jnp.max(jnp.abs(out - ref))))

    # Larger batch -> batch-tiled 3-stage path (weights VMEM-resident).
    B2 = 272
    x2 = jax.random.normal(jax.random.PRNGKey(1), (B2, nlatentdim), jnp.float32)
    out2 = jax.block_until_ready(encd_forward(x2, prep, n_classes=n_classes))
    ref2 = encd_reference(x2, params)
    assert out2.shape == (B2, n_classes), out2.shape
    assert jnp.allclose(out2, ref2, atol=5e-3, rtol=5e-3), (
        float(jnp.max(jnp.abs(out2 - ref2))))

    print("KERNEL_OK")
</pallas_src>

<mosaic_0001>
module attributes {stable_mosaic.version = 11 : i64} {
  func.func @encd_fused_kernel(%arg0: memref<8x128xbf16, #tpu.memory_space<vmem>>, %arg1: memref<128x1024xbf16, #tpu.memory_space<vmem>>, %arg2: memref<1024x1024xbf16, #tpu.memory_space<vmem>>, %arg3: memref<1024x512xbf16, #tpu.memory_space<vmem>>, %arg4: memref<512x128xbf16, #tpu.memory_space<vmem>>, %arg5: memref<8x1024xf32, #tpu.memory_space<vmem>>, %arg6: memref<8x128xf32, #tpu.memory_space<vmem>>) attributes {dimension_semantics = [], scalar_prefetch = 0 : i64, scratch_operands = 0 : i64, tpu.core_type = #tpu.core_type<tc>} {
    %c0 = arith.constant 0 : index
    %c0_0 = arith.constant 0 : index
    %0 = vector.load %arg5[%c0, %c0_0] : memref<8x1024xf32, #tpu.memory_space<vmem>>, vector<8x1024xf32>
    %1 = vector.extract_strided_slice %0 {offsets = [0, 0], sizes = [1, 1024], strides = [1, 1]} : vector<8x1024xf32> to vector<1x1024xf32>
    %2 = vector.extract_strided_slice %0 {offsets = [1, 0], sizes = [1, 1024], strides = [1, 1]} : vector<8x1024xf32> to vector<1x1024xf32>
    %3 = vector.extract_strided_slice %0 {offsets = [2, 0], sizes = [1, 1024], strides = [1, 1]} : vector<8x1024xf32> to vector<1x1024xf32>
    %4 = vector.extract_strided_slice %0 {offsets = [3, 0], sizes = [1, 1024], strides = [1, 1]} : vector<8x1024xf32> to vector<1x1024xf32>
    %5 = vector.extract_strided_slice %0 {offsets = [4, 0], sizes = [1, 512], strides = [1, 1]} : vector<8x1024xf32> to vector<1x512xf32>
    %6 = vector.extract_strided_slice %0 {offsets = [5, 0], sizes = [1, 512], strides = [1, 1]} : vector<8x1024xf32> to vector<1x512xf32>
    %7 = vector.extract_strided_slice %0 {offsets = [6, 0], sizes = [1, 512], strides = [1, 1]} : vector<8x1024xf32> to vector<1x512xf32>
    %8 = vector.extract_strided_slice %0 {offsets = [7, 0], sizes = [1, 128], strides = [1, 1]} : vector<8x1024xf32> to vector<1x128xf32>
    %c0_1 = arith.constant 0 : index
    %c0_2 = arith.constant 0 : index
    %9 = vector.load %arg0[%c0_1, %c0_2] : memref<8x128xbf16, #tpu.memory_space<vmem>>, vector<8x128xbf16>
    %c0_3 = arith.constant 0 : index
    %c0_4 = arith.constant 0 : index
    %10 = vector.load %arg1[%c0_3, %c0_4] : memref<128x1024xbf16, #tpu.memory_space<vmem>>, vector<128x1024xbf16>
    %cst = arith.constant dense<0.000000e+00> : vector<8x1024xf32>
    %11 = tpu.matmul %9, %10, %cst {dimension_numbers = #tpu.dot_dimension_numbers<[1], [0], [0], [1], [0, 0, 1, 1], [], []>} : vector<8x128xbf16>, vector<128x1024xbf16>, vector<8x1024xf32> -> vector<8x1024xf32>
    %12 = vector.broadcast %1 : vector<1x1024xf32> to vector<8x1024xf32>
    %13 = arith.addf %11, %12 : vector<8x1024xf32>
    %cst_5 = arith.constant 0.000000e+00 : f32
    %14 = vector.broadcast %cst_5 : f32 to vector<8x1024xf32>
    %15 = arith.cmpf ogt, %13, %14 : vector<8x1024xf32>
    %cst_6 = arith.constant 2.000000e-01 : f32
    %16 = vector.broadcast %cst_6 : f32 to vector<8x1024xf32>
    %17 = arith.mulf %16, %13 : vector<8x1024xf32>
    %18 = arith.select %15, %13, %17 : vector<8x1024xi1>, vector<8x1024xf32>
    %19 = arith.truncf %18 : vector<8x1024xf32> to vector<8x1024xbf16>
    %c0_7 = arith.constant 0 : index
    %c0_8 = arith.constant 0 : index
    %20 = vector.load %arg2[%c0_7, %c0_8] : memref<1024x1024xbf16, #tpu.memory_space<vmem>>, vector<1024x1024xbf16>
    %cst_9 = arith.constant dense<0.000000e+00> : vector<8x1024xf32>
    %21 = tpu.matmul %19, %20, %cst_9 {dimension_numbers = #tpu.dot_dimension_numbers<[1], [0], [0], [1], [0, 0, 1, 1], [], []>} : vector<8x1024xbf16>, vector<1024x1024xbf16>, vector<8x1024xf32> -> vector<8x1024xf32>
    %22 = vector.broadcast %2 : vector<1x1024xf32> to vector<8x1024xf32>
    %23 = arith.addf %21, %22 : vector<8x1024xf32>
    %cst_10 = arith.constant dense<0.000000e+00> : vector<1024xf32>
    %24 = vector.multi_reduction <add>, %23, %cst_10 [0] : vector<8x1024xf32> to vector<1024xf32>
    %25 = vector.shape_cast %24 : vector<1024xf32> to vector<1x1024xf32>
    %cst_11 = arith.constant 8.000000e+00 : f32
    %26 = vector.broadcast %cst_11 : f32 to vector<1x1024xf32>
    %27 = arith.divf %25, %26 : vector<1x1024xf32>
    %28 = arith.mulf %23, %23 : vector<8x1024xf32>
    %cst_12 = arith.constant dense<0.000000e+00> : vector<1024xf32>
    %29 = vector.multi_reduction <add>, %28, %cst_12 [0] : vector<8x1024xf32> to vector<1024xf32>
    %30 = vector.shape_cast %29 : vector<1024xf32> to vector<1x1024xf32>
    %cst_13 = arith.constant 8.000000e+00 : f32
    %31 = vector.broadcast %cst_13 : f32 to vector<1x1024xf32>
    %32 = arith.divf %30, %31 : vector<1x1024xf32>
    %33 = arith.mulf %27, %27 : vector<1x1024xf32>
    %34 = arith.subf %32, %33 : vector<1x1024xf32>
    %cst_14 = arith.constant 0.000000e+00 : f32
    %35 = vector.broadcast %cst_14 : f32 to vector<1x1024xf32>
    %36 = arith.maximumf %34, %35 : vector<1x1024xf32>
    %cst_15 = arith.constant 9.99999974E-6 : f32
    %37 = vector.broadcast %cst_15 : f32 to vector<1x1024xf32>
    %38 = arith.addf %36, %37 : vector<1x1024xf32>
    %39 = math.rsqrt %38 : vector<1x1024xf32>
    %40 = arith.mulf %3, %39 : vector<1x1024xf32>
    %41 = arith.mulf %27, %40 : vector<1x1024xf32>
    %42 = arith.subf %4, %41 : vector<1x1024xf32>
    %43 = vector.broadcast %40 : vector<1x1024xf32> to vector<8x1024xf32>
    %44 = arith.mulf %23, %43 : vector<8x1024xf32>
    %45 = vector.broadcast %42 : vector<1x1024xf32> to vector<8x1024xf32>
    %46 = arith.addf %44, %45 : vector<8x1024xf32>
    %cst_16 = arith.constant 0.000000e+00 : f32
    %47 = vector.broadcast %cst_16 : f32 to vector<8x1024xf32>
    %48 = arith.cmpf ogt, %46, %47 : vector<8x1024xf32>
    %cst_17 = arith.constant 2.000000e-01 : f32
    %49 = vector.broadcast %cst_17 : f32 to vector<8x1024xf32>
    %50 = arith.mulf %49, %46 : vector<8x1024xf32>
    %51 = arith.select %48, %46, %50 : vector<8x1024xi1>, vector<8x1024xf32>
    %52 = arith.truncf %51 : vector<8x1024xf32> to vector<8x1024xbf16>
    %c0_18 = arith.constant 0 : index
    %c0_19 = arith.constant 0 : index
    %53 = vector.load %arg3[%c0_18, %c0_19] : memref<1024x512xbf16, #tpu.memory_space<vmem>>, vector<1024x512xbf16>
    %cst_20 = arith.constant dense<0.000000e+00> : vector<8x512xf32>
    %54 = tpu.matmul %52, %53, %cst_20 {dimension_numbers = #tpu.dot_dimension_numbers<[1], [0], [0], [1], [0, 0, 1, 1], [], []>} : vector<8x1024xbf16>, vector<1024x512xbf16>, vector<8x512xf32> -> vector<8x512xf32>
    %55 = vector.broadcast %5 : vector<1x512xf32> to vector<8x512xf32>
    %56 = arith.addf %54, %55 : vector<8x512xf32>
    %cst_21 = arith.constant dense<0.000000e+00> : vector<512xf32>
    %57 = vector.multi_reduction <add>, %56, %cst_21 [0] : vector<8x512xf32> to vector<512xf32>
    %58 = vector.shape_cast %57 : vector<512xf32> to vector<1x512xf32>
    %cst_22 = arith.constant 8.000000e+00 : f32
    %59 = vector.broadcast %cst_22 : f32 to vector<1x512xf32>
    %60 = arith.divf %58, %59 : vector<1x512xf32>
    %61 = arith.mulf %56, %56 : vector<8x512xf32>
    %cst_23 = arith.constant dense<0.000000e+00> : vector<512xf32>
    %62 = vector.multi_reduction <add>, %61, %cst_23 [0] : vector<8x512xf32> to vector<512xf32>
    %63 = vector.shape_cast %62 : vector<512xf32> to vector<1x512xf32>
    %cst_24 = arith.constant 8.000000e+00 : f32
    %64 = vector.broadcast %cst_24 : f32 to vector<1x512xf32>
    %65 = arith.divf %63, %64 : vector<1x512xf32>
    %66 = arith.mulf %60, %60 : vector<1x512xf32>
    %67 = arith.subf %65, %66 : vector<1x512xf32>
    %cst_25 = arith.constant 0.000000e+00 : f32
    %68 = vector.broadcast %cst_25 : f32 to vector<1x512xf32>
    %69 = arith.maximumf %67, %68 : vector<1x512xf32>
    %cst_26 = arith.constant 9.99999974E-6 : f32
    %70 = vector.broadcast %cst_26 : f32 to vector<1x512xf32>
    %71 = arith.addf %69, %70 : vector<1x512xf32>
    %72 = math.rsqrt %71 : vector<1x512xf32>
    %73 = arith.mulf %6, %72 : vector<1x512xf32>
    %74 = arith.mulf %60, %73 : vector<1x512xf32>
    %75 = arith.subf %7, %74 : vector<1x512xf32>
    %76 = vector.broadcast %73 : vector<1x512xf32> to vector<8x512xf32>
    %77 = arith.mulf %56, %76 : vector<8x512xf32>
    %78 = vector.broadcast %75 : vector<1x512xf32> to vector<8x512xf32>
    %79 = arith.addf %77, %78 : vector<8x512xf32>
    %cst_27 = arith.constant 0.000000e+00 : f32
    %80 = vector.broadcast %cst_27 : f32 to vector<8x512xf32>
    %81 = arith.cmpf ogt, %79, %80 : vector<8x512xf32>
    %cst_28 = arith.constant 2.000000e-01 : f32
    %82 = vector.broadcast %cst_28 : f32 to vector<8x512xf32>
    %83 = arith.mulf %82, %79 : vector<8x512xf32>
    %84 = arith.select %81, %79, %83 : vector<8x512xi1>, vector<8x512xf32>
    %85 = arith.truncf %84 : vector<8x512xf32> to vector<8x512xbf16>
    %c0_29 = arith.constant 0 : index
    %c0_30 = arith.constant 0 : index
    %86 = vector.load %arg4[%c0_29, %c0_30] : memref<512x128xbf16, #tpu.memory_space<vmem>>, vector<512x128xbf16>
    %cst_31 = arith.constant dense<0.000000e+00> : vector<8x128xf32>
    %87 = tpu.matmul %85, %86, %cst_31 {dimension_numbers = #tpu.dot_dimension_numbers<[1], [0], [0], [1], [0, 0, 1, 1], [], []>} : vector<8x512xbf16>, vector<512x128xbf16>, vector<8x128xf32> -> vector<8x128xf32>
    %88 = vector.broadcast %8 : vector<1x128xf32> to vector<8x128xf32>
    %89 = arith.addf %87, %88 : vector<8x128xf32>
    %c0_32 = arith.constant 0 : index
    %c0_33 = arith.constant 0 : index
    %90 = vector.load %arg6[%c0_32, %c0_33] : memref<8x128xf32, #tpu.memory_space<vmem>>, vector<8x128xf32>
    tpu.vector_store %arg6[%c0_32, %c0_33], %89 {strides = array<i32>} : memref<8x128xf32, #tpu.memory_space<vmem>>, vector<8x128xf32>,
    return
  }
}

</mosaic_0001>

<bundles_post_ra>
// kernel: encd_forward.1
= control target key start
LH: loop header
LB: loop body
LE: loop exit
PB: predicated region body
PF: predicated region fallthrough
CT: control target
= control target key end

     0   :  { %11 = vsyncpa [#allocation3], 0  ;;  %s12608_s0 = inlined_call_operand.vmem [shape: bf16[8,128], index: 0, kind: input, shape index: {}]   ;;  %s12609_s1 = inlined_call_operand.hbm [shape: bf16[128,1024], index: 1, kind: input, shape index: {}]   ;;  %s12610_s2 = inlined_call_operand.hbm [shape: bf16[1024,1024], index: 2, kind: input, shape index: {}]   ;;  %s12611_s3 = inlined_call_operand.hbm [shape: bf16[1024,512], index: 3, kind: input, shape index: {}]   ;;  %s12612_s4 = inlined_call_operand.hbm [shape: bf16[512,128], index: 4, kind: input, shape index: {}]   ;;  %s12613_s5 = inlined_call_operand.hbm [shape: f32[8,1024], index: 5, kind: input, shape index: {}]   ;;  %s12614_s6 = inlined_call_operand.hbm [shape: f32[8,128], index: 6, kind: output, shape index: {}]  }
   0x1   :  { %12 = vsyncpa [#allocation6], 0 }
   0x2   :  { %13 = vsyncpa [#allocation9], 0 }
   0x3   :  { %14 = vsyncpa [#allocation4], 0  ;;  %s34_s23 = sshll.u32 %s12610_s2, 4  ;;  %s11886_s24 = smov [#allocation5]   ;;  %s35_s23 = int_to_ptr.hbm [resolvable:$true] %s34_s23 }
   0x4   :  { %s36_s25 = sshll.u32 %s11886_s24, 4  ;;  %s60_s28 = sshll.u32 %s12612_s4, 4  ;;  %s37_s25 = int_to_ptr.vmem [resolvable:$true] %s36_s25  ;;  %s61_s28 = int_to_ptr.hbm [resolvable:$true] %s60_s28 }
   0x5   :  { %s11887_s29 = smov 512   ;;  %s11888_s30 = smov 32  }
   0x6   :  { %42 = dma.hbm_to_vmem [thread:$0]  %s35_s23, 65536, %s37_s25, [#allocation6], %s11887_s29, %s11887_s29, %s11888_s30  }
   0x7   :  { %s11889_s7 = smov [#allocation8]   ;;  %s11890_s9 = smov 64  }
   0x8   :  { %s62_s8 = sshll.u32 %s11889_s7, 4  ;;  %s11891_s10 = smov 4   ;;  %s63_s8 = int_to_ptr.vmem [resolvable:$true] %s62_s8 }
   0x9   :  { %68 = dma.hbm_to_vmem [thread:$0]  %s61_s28, 4096, %s63_s8, [#allocation9], %s11890_s9, %s11890_s9, %s11891_s10  }
   0xa   :  { %s21_s12 = sshll.u32 %s12609_s1, 4  ;;  %s11892_s13 = smov [#allocation2]   ;;  %s22_s12 = int_to_ptr.hbm [resolvable:$true] %s21_s12 }
   0xb   :  { %s23_s14 = sshll.u32 %s11892_s13, 4  ;;  %s47_s16 = sshll.u32 %s12611_s3, 4  ;;  %s24_s14 = int_to_ptr.vmem [resolvable:$true] %s23_s14  ;;  %s48_s16 = int_to_ptr.hbm [resolvable:$true] %s47_s16 }
   0xc   :  { %29 = dma.hbm_to_vmem [thread:$0]  %s22_s12, 8192, %s24_s14, [#allocation3], %s11887_s29, %s11887_s29, %s11888_s30  }
   0xd   :  { %s11893_s17 = smov [#allocation7]   ;;  %s11894_s19 = smov 256  }
   0xe   :  { %s49_s18 = sshll.u32 %s11893_s17, 4  ;;  %s11895_s20 = smov 16   ;;  %s50_s18 = int_to_ptr.vmem [resolvable:$true] %s49_s18 }
   0xf   :  { %55 = dma.hbm_to_vmem [thread:$0]  %s48_s16, 32768, %s50_s18, [#allocation6], %s11894_s19, %s11894_s19, %s11895_s20  }
  0x10   :  { %s74_s1 = sshll.u32 %s12613_s5, 4  ;;  %s11896_s23 = smov [#allocation10]   ;;  %s75_s1 = int_to_ptr.hbm [resolvable:$true] %s74_s1 }
  0x11   :  { %s76_s24 = sshll.u32 %s11896_s23, 4  ;;  %s77_s24 = int_to_ptr.vmem [resolvable:$true] %s76_s24 }
  0x12   :  { %79 = dma.hbm_to_vmem [thread:$0]  %s75_s1, 1024, %s77_s24, [#allocation9]  }
  0x13   :  { %11878 = dma.done.wait [#allocation3], 8192  }
  0x14   :  { %11879 = vsyncadd [#allocation3], 4294959104 }
  0x15   :  { %11880 = dma.done.wait [#allocation6], 98304  }
  0x16   :  { %11881 = vsyncadd [#allocation6], 4294868992 }
  0x17   :  { %11882 = dma.done.wait [#allocation9], 5120  }
  0x18   :  { %11883 = vsyncadd [#allocation9], 4294962176  ;;  %v7583_v0 = vld [vmem:[#allocation2 + $0x1c0] sm:$0xf]  ;;  %v10869_v2 = vld [vmem:[#allocation2 + $0x1c4] sm:$0xf] }
  0x19   :  { %v10873_v1 = vld [vmem:[#allocation2 + $0x1dc] sm:$0xf0]  ;;  %v7585_v4 = vld [vmem:[#allocation2 + $0x1e0] sm:$0xf0]  ;;  %v7591_v5 = vld [vmem:[#allocation2 + $0x1c8] sm:$0xf] }
  0x1a   :  { %v7584_v3 = vor.u32 %v10873_v1, %v7583_v0  ;;  %v10874_v6 = vld [vmem:[#allocation2 + $0x1e4] sm:$0xf0]  ;;  %v7588_v7 = vor.u32 %v10869_v2, %v7585_v4  ;;  %v10870_v9 = vld [vmem:[#allocation2 + $0x1cc] sm:$0xf]  ;;  %v7551_v11 = vld [vmem:[#allocation2 + $0x180] sm:$0xf] }
  0x1b   :  { %v7592_v8 = vor.u32 %v10874_v6, %v7591_v5  ;;  %v7593_v10 = vld [vmem:[#allocation2 + $0x1e8] sm:$0xf0]  ;;  %v10865_v13 = vld [vmem:[#allocation2 + $0x19c] sm:$0xf0]  ;;  %v10861_v14 = vld [vmem:[#allocation2 + $0x184] sm:$0xf] }
  0x1c   :  { %501 = vmatpush.bf16.msra.mxu0 %v7584_v3  ;;  %v7596_v12 = vor.u32 %v10870_v9, %v7593_v10  ;;  %v7553_v15 = vld [vmem:[#allocation2 + $0x1a0] sm:$0xf0]  ;;  %514 = vmatpush.bf16.msra.mxu1 %v7588_v7  ;;  %v7552_v16 = vor.u32 %v10865_v13, %v7551_v11  ;;  %v7559_v18 = vld [vmem:[#allocation2 + $0x188] sm:$0xf]  ;;  %v10862_v20 = vld [vmem:[#allocation2 + $0x18c] sm:$0xf] }
  0x1d   :  { %527 = vmatpush.bf16.msra.mxu2 %v7592_v8  ;;  %v7556_v17 = vor.u32 %v10861_v14, %v7553_v15  ;;  %v10866_v19 = vld [vmem:[#allocation2 + $0x1a4] sm:$0xf0]  ;;  %v7561_v22 = vld [vmem:[#allocation2 + $0x1a8] sm:$0xf0]  ;;  %v7519_v23 = vld [vmem:[#allocation2 + $0x140] sm:$0xf] }
  0x1e   :  { %540 = vmatpush.bf16.msra.mxu3 %v7596_v12  ;;  %v7560_v21 = vor.u32 %v10866_v19, %v7559_v18  ;;  %v10857_v24 = vld [vmem:[#allocation2 + $0x15c] sm:$0xf0]  ;;  %v7564_v25 = vor.u32 %v10862_v20, %v7561_v22  ;;  %v10853_v26 = vld [vmem:[#allocation2 + $0x144] sm:$0xf]  ;;  %v7527_v28 = vld [vmem:[#allocation2 + $0x148] sm:$0xf] }
  0x1f   :  { %v7521_v27 = vld [vmem:[#allocation2 + $0x160] sm:$0xf0]  ;;  %v7520_v29 = vor.u32 %v10857_v24, %v7519_v23  ;;  %v10858_v30 = vld [vmem:[#allocation2 + $0x164] sm:$0xf0]  ;;  %v10854_v31 = vld [vmem:[#allocation2 + $0x14c] sm:$0xf] }
  0x20   :  { %502 = vmatpush.bf16.msra.mxu0 %v7552_v16  ;;  %v7529_v32 = vld [vmem:[#allocation2 + $0x168] sm:$0xf0]  ;;  %515 = vmatpush.bf16.msra.mxu1 %v7556_v17  ;;  %v7524_v33 = vor.u32 %v10853_v26, %v7521_v27  ;;  %v7528_v34 = vor.u32 %v10858_v30, %v7527_v28  ;;  %v7487_v35 = vld [vmem:[#allocation2 + $0x100] sm:$0xf]  ;;  %v10845_v37 = vld [vmem:[#allocation2 + $0x104] sm:$0xf] }
  0x21   :  { %528 = vmatpush.bf16.msra.mxu2 %v7560_v21  ;;  %v10849_v36 = vld [vmem:[#allocation2 + $0x11c] sm:$0xf0]  ;;  %v7532_v38 = vor.u32 %v10854_v31, %v7529_v32  ;;  %v7489_v39 = vld [vmem:[#allocation2 + $0x120] sm:$0xf0]  ;;  %v7495_v40 = vld [vmem:[#allocation2 + $0x108] sm:$0xf] }
  0x22   :  { %541 = vmatpush.bf16.msra.mxu3 %v7564_v25  ;;  %v10850_v41 = vld [vmem:[#allocation2 + $0x124] sm:$0xf0]  ;;  %v10846_v42 = vld [vmem:[#allocation2 + $0x10c] sm:$0xf]  ;;  %v7488_v44 = vor.u32 %v10849_v36, %v7487_v35  ;;  %v7492_v45 = vor.u32 %v10845_v37, %v7489_v39  ;;  %v7455_v47 = vld [vmem:[#allocation2 + $0xc0] sm:$0xf] }
  0x23   :  { %v7497_v43 = vld [vmem:[#allocation2 + $0x128] sm:$0xf0]  ;;  %v7496_v46 = vor.u32 %v10850_v41, %v7495_v40  ;;  %v10841_v48 = vld [vmem:[#allocation2 + $0xdc] sm:$0xf0]  ;;  %v10837_v49 = vld [vmem:[#allocation2 + $0xc4] sm:$0xf] }
  0x24   :  { %503 = vmatpush.bf16.msra.mxu0 %v7520_v29  ;;  %516 = vmatpush.bf16.msra.mxu1 %v7524_v33  ;;  %v7500_v50 = vor.u32 %v10846_v42, %v7497_v43  ;;  %v7457_v51 = vld [vmem:[#allocation2 + $0xe0] sm:$0xf0]  ;;  %v7463_v52 = vld [vmem:[#allocation2 + $0xc8] sm:$0xf]  ;;  %v10838_v54 = vld [vmem:[#allocation2 + $0xcc] sm:$0xf]  ;;  %v7456_v56 = vor.u32 %v10841_v48, %v7455_v47 }
  0x25   :  { %529 = vmatpush.bf16.msra.mxu2 %v7528_v34  ;;  %v10842_v53 = vld [vmem:[#allocation2 + $0xe4] sm:$0xf0]  ;;  %v7465_v55 = vld [vmem:[#allocation2 + $0xe8] sm:$0xf0]  ;;  %v7460_v57 = vor.u32 %v10837_v49, %v7457_v51  ;;  %v7423_v59 = vld [vmem:[#allocation2 + $0x80] sm:$0xf] }
  0x26   :  { %542 = vmatpush.bf16.msra.mxu3 %v7532_v38  ;;  %v7464_v58 = vor.u32 %v10842_v53, %v7463_v52  ;;  %v10833_v60 = vld [vmem:[#allocation2 + $0x9c] sm:$0xf0]  ;;  %v10829_v61 = vld [vmem:[#allocation2 + $0x84] sm:$0xf]  ;;  %v7468_v62 = vor.u32 %v10838_v54, %v7465_v55  ;;  %v7431_v0 = vld [vmem:[#allocation2 + $0x88] sm:$0xf] }
  0x27   :  { %v7425_v63 = vld [vmem:[#allocation2 + $0xa0] sm:$0xf0]  ;;  %v10834_v1 = vld [vmem:[#allocation2 + $0xa4] sm:$0xf0]  ;;  %v10830_v2 = vld [vmem:[#allocation2 + $0x8c] sm:$0xf]  ;;  %v7424_v4 = vor.u32 %v10833_v60, %v7423_v59 }
  0x28   :  { %504 = vmatpush.bf16.msra.mxu0 %v7488_v44  ;;  %517 = vmatpush.bf16.msra.mxu1 %v7492_v45  ;;  %v7433_v3 = vld [vmem:[#allocation2 + $0xa8] sm:$0xf0]  ;;  %v7428_v5 = vor.u32 %v10829_v61, %v7425_v63  ;;  %v7432_v6 = vor.u32 %v10834_v1, %v7431_v0  ;;  %v7391_v7 = vld [vmem:[#allocation2 + $0x40] sm:$0xf]  ;;  %v10821_v9 = vld [vmem:[#allocation2 + $0x44] sm:$0xf] }
  0x29   :  { %530 = vmatpush.bf16.msra.mxu2 %v7496_v46  ;;  %v10825_v8 = vld [vmem:[#allocation2 + $0x5c] sm:$0xf0]  ;;  %v7436_v10 = vor.u32 %v10830_v2, %v7433_v3  ;;  %v7393_v11 = vld [vmem:[#allocation2 + $0x60] sm:$0xf0]  ;;  %v7399_v12 = vld [vmem:[#allocation2 + $0x48] sm:$0xf] }
  0x2a   :  { %543 = vmatpush.bf16.msra.mxu3 %v7500_v50  ;;  %v10826_v13 = vld [vmem:[#allocation2 + $0x64] sm:$0xf0]  ;;  %v10822_v14 = vld [vmem:[#allocation2 + $0x4c] sm:$0xf]  ;;  %v7392_v16 = vor.u32 %v10825_v8, %v7391_v7  ;;  %v7359_v17 = vld [vmem:[#allocation2] sm:$0xf]  ;;  %v7396_v19 = vor.u32 %v10821_v9, %v7393_v11 }
  0x2b   :  { %v7401_v15 = vld [vmem:[#allocation2 + $0x68] sm:$0xf0]  ;;  %v10817_v18 = vld [vmem:[#allocation2 + $0x1c] sm:$0xf0]  ;;  %v7400_v20 = vor.u32 %v10826_v13, %v7399_v12  ;;  %v10813_v21 = vld [vmem:[#allocation2 + $0x4] sm:$0xf] }
  0x2c   :  { %505 = vmatpush.bf16.msra.mxu0 %v7456_v56  ;;  %518 = vmatpush.bf16.msra.mxu1 %v7460_v57  ;;  %v7361_v22 = vld [vmem:[#allocation2 + $0x20] sm:$0xf0]  ;;  %v7367_v23 = vld [vmem:[#allocation2 + $0x8] sm:$0xf]  ;;  %v7404_v24 = vor.u32 %v10822_v14, %v7401_v15  ;;  %v10814_v26 = vld [vmem:[#allocation2 + $0xc] sm:$0xf]  ;;  %v7360_v31 = vor.u32 %v10817_v18, %v7359_v17 }
  0x2d   :  { %531 = vmatpush.bf16.msra.mxu2 %v7464_v58  ;;  %v10818_v25 = vld [vmem:[#allocation2 + $0x24] sm:$0xf0]  ;;  %v7369_v27 = vld [vmem:[#allocation2 + $0x28] sm:$0xf0]  ;;  %v7599_v28 = vld [vmem:[#allocation2 + $0x1d0] sm:$0xf]  ;;  %v7364_v35 = vor.u32 %v10813_v21, %v7361_v22 }
  0x2e   :  { %544 = vmatpush.bf16.msra.mxu3 %v7468_v62  ;;  %v10875_v29 = vld [vmem:[#allocation2 + $0x1ec] sm:$0xf0]  ;;  %v10871_v30 = vld [vmem:[#allocation2 + $0x1d4] sm:$0xf]  ;;  %v7607_v33 = vld [vmem:[#allocation2 + $0x1d8] sm:$0xf]  ;;  %v7368_v36 = vor.u32 %v10818_v25, %v7367_v23  ;;  %v7372_v39 = vor.u32 %v10814_v26, %v7369_v27 }
  0x2f   :  { %v7601_v32 = vld [vmem:[#allocation2 + $0x1f0] sm:$0xf0]  ;;  %v10876_v34 = vld [vmem:[#allocation2 + $0x1f4] sm:$0xf0]  ;;  %v10872_v37 = vld [vmem:[#allocation2 + $0x1dc] sm:$0xf]  ;;  %v7600_v40 = vor.u32 %v10875_v29, %v7599_v28 }
  0x30   :  { %506 = vmatpush.bf16.msra.mxu0 %v7424_v4  ;;  %519 = vmatpush.bf16.msra.mxu1 %v7428_v5  ;;  %v7609_v38 = vld [vmem:[#allocation2 + $0x1f8] sm:$0xf0]  ;;  %v7604_v41 = vor.u32 %v10871_v30, %v7601_v32  ;;  %v7608_v42 = vor.u32 %v10876_v34, %v7607_v33  ;;  %v7567_v43 = vld [vmem:[#allocation2 + $0x190] sm:$0xf]  ;;  %v10863_v45 = vld [vmem:[#allocation2 + $0x194] sm:$0xf] }
  0x31   :  { %532 = vmatpush.bf16.msra.mxu2 %v7432_v6  ;;  %v10867_v44 = vld [vmem:[#allocation2 + $0x1ac] sm:$0xf0]  ;;  %v7612_v46 = vor.u32 %v10872_v37, %v7609_v38  ;;  %v7569_v47 = vld [vmem:[#allocation2 + $0x1b0] sm:$0xf0]  ;;  %v7575_v48 = vld [vmem:[#allocation2 + $0x198] sm:$0xf] }
  0x32   :  { %545 = vmatpush.bf16.msra.mxu3 %v7436_v10  ;;  %v10868_v49 = vld [vmem:[#allocation2 + $0x1b4] sm:$0xf0]  ;;  %v11952_v50 = vld [vmem:[%s12608_s0] sm:$0xf]  ;;  %v10864_v51 = vld [vmem:[#allocation2 + $0x19c] sm:$0xf]  ;;  %v7568_v53 = vor.u32 %v10867_v44, %v7567_v43  ;;  %v7572_v54 = vor.u32 %v10863_v45, %v7569_v47 }
  0x33   :  { %v7577_v52 = vld [vmem:[#allocation2 + $0x1b8] sm:$0xf0]  ;;  %v7576_v55 = vor.u32 %v10868_v49, %v7575_v48  ;;  %v7535_v56 = vld [vmem:[#allocation2 + $0x150] sm:$0xf]  ;;  %v10855_v58 = vld [vmem:[#allocation2 + $0x154] sm:$0xf] }
  0x34   :  { %507 = vmatpush.bf16.msra.mxu0 %v7392_v16  ;;  %520 = vmatpush.bf16.msra.mxu1 %v7396_v19  ;;  %v10859_v57 = vld [vmem:[#allocation2 + $0x16c] sm:$0xf0]  ;;  %v7580_v59 = vor.u32 %v10864_v51, %v7577_v52  ;;  %v7537_v60 = vld [vmem:[#allocation2 + $0x170] sm:$0xf0]  ;;  %v7543_v61 = vld [vmem:[#allocation2 + $0x158] sm:$0xf] }
  0x35   :  { %533 = vmatpush.bf16.msra.mxu2 %v7400_v20  ;;  %v10860_v62 = vld [vmem:[#allocation2 + $0x174] sm:$0xf0]  ;;  %v10856_v63 = vld [vmem:[#allocation2 + $0x15c] sm:$0xf]  ;;  %v7536_v1 = vor.u32 %v10859_v57, %v7535_v56  ;;  %v7540_v2 = vor.u32 %v10855_v58, %v7537_v60  ;;  %v7503_v4 = vld [vmem:[#allocation2 + $0x110] sm:$0xf] }
  0x36   :  { %546 = vmatpush.bf16.msra.mxu3 %v7404_v24  ;;  %v7545_v0 = vld [vmem:[#allocation2 + $0x178] sm:$0xf0]  ;;  %v7544_v3 = vor.u32 %v10860_v62, %v7543_v61  ;;  %v10851_v5 = vld [vmem:[#allocation2 + $0x12c] sm:$0xf0]  ;;  %v10847_v6 = vld [vmem:[#allocation2 + $0x114] sm:$0xf] }
  0x37   :  { %v7548_v7 = vor.u32 %v10856_v63, %v7545_v0  ;;  %v7505_v8 = vld [vmem:[#allocation2 + $0x130] sm:$0xf0]  ;;  %v7511_v9 = vld [vmem:[#allocation2 + $0x118] sm:$0xf]  ;;  %v10848_v11 = vld [vmem:[#allocation2 + $0x11c] sm:$0xf]  ;;  %v7504_v13 = vor.u32 %v10851_v5, %v7503_v4 }
  0x38   :  { %508 = vmatpush.bf16.msra.mxu0 %v7360_v31  ;;  %521 = vmatpush.bf16.msra.mxu1 %v7364_v35  ;;  %v10852_v10 = vld [vmem:[#allocation2 + $0x134] sm:$0xf0]  ;;  %v7513_v12 = vld [vmem:[#allocation2 + $0x138] sm:$0xf0]  ;;  %v7508_v14 = vor.u32 %v10847_v6, %v7505_v8  ;;  %v7471_v16 = vld [vmem:[#allocation2 + $0xd0] sm:$0xf] }
  0x39   :  { %534 = vmatpush.bf16.msra.mxu2 %v7368_v36  ;;  %v7512_v15 = vor.u32 %v10852_v10, %v7511_v9  ;;  %v10843_v17 = vld [vmem:[#allocation2 + $0xec] sm:$0xf0]  ;;  %v10839_v18 = vld [vmem:[#allocation2 + $0xd4] sm:$0xf]  ;;  %v7516_v19 = vor.u32 %v10848_v11, %v7513_v12  ;;  %v7479_v21 = vld [vmem:[#allocation2 + $0xd8] sm:$0xf] }
  0x3a   :  { %547 = vmatpush.bf16.msra.mxu3 %v7372_v39  ;;  %v7473_v20 = vld [vmem:[#allocation2 + $0xf0] sm:$0xf0]  ;;  %v10844_v22 = vld [vmem:[#allocation2 + $0xf4] sm:$0xf0]  ;;  %v10840_v23 = vld [vmem:[#allocation2 + $0xdc] sm:$0xf]  ;;  %v7472_v25 = vor.u32 %v10843_v17, %v7471_v16 }
  0x3b   :  { %509 = vmatmul.bf16.vlgmr.msra.gmra.mxu0 %v11952_v50  ;;  %522 = vmatmul.bf16.vlgmr.msra.gmra.mxu1 %v11952_v50  ;;  %v7481_v24 = vld [vmem:[#allocation2 + $0xf8] sm:$0xf0]  ;;  %v7476_v26 = vor.u32 %v10839_v18, %v7473_v20  ;;  %v7480_v27 = vor.u32 %v10844_v22, %v7479_v21  ;;  %v7439_v28 = vld [vmem:[#allocation2 + $0x90] sm:$0xf]  ;;  %v10831_v30 = vld [vmem:[#allocation2 + $0x94] sm:$0xf] }
  0x3c   :  { %553 = vmatpush.bf16.msrb.mxu0 %v7600_v40  ;;  %566 = vmatpush.bf16.msrb.mxu1 %v7604_v41  ;;  %v10835_v29 = vld [vmem:[#allocation2 + $0xac] sm:$0xf0]  ;;  %v7484_v31 = vor.u32 %v10840_v23, %v7481_v24  ;;  %v7441_v32 = vld [vmem:[#allocation2 + $0xb0] sm:$0xf0]  ;;  %v7447_v33 = vld [vmem:[#allocation2 + $0x98] sm:$0xf] }
  0x3d   :  { %579 = vmatpush.bf16.msrb.mxu2 %v7608_v42  ;;  %548 = vmatmul.bf16.vlgmr.msra.gmra.mxu3 %v11952_v50  ;;  %v10836_v34 = vld [vmem:[#allocation2 + $0xb4] sm:$0xf0]  ;;  %v10832_v35 = vld [vmem:[#allocation2 + $0x9c] sm:$0xf]  ;;  %v7440_v37 = vor.u32 %v10835_v29, %v7439_v28  ;;  %v7444_v38 = vor.u32 %v10831_v30, %v7441_v32  ;;  %v7407_v40 = vld [vmem:[#allocation2 + $0x50] sm:$0xf] }
  0x3e   :  { %592 = vmatpush.bf16.msrb.mxu3 %v7612_v46  ;;  %535 = vmatmul.bf16.vlgmr.msra.gmra.mxu2 %v11952_v50  ;;  %v7449_v36 = vld [vmem:[#allocation2 + $0xb8] sm:$0xf0]  ;;  %v7448_v39 = vor.u32 %v10836_v34, %v7447_v33  ;;  %v10827_v41 = vld [vmem:[#allocation2 + $0x6c] sm:$0xf0]  ;;  %v10823_v42 = vld [vmem:[#allocation2 + $0x54] sm:$0xf] }
  0x3f   :  { %v7452_v43 = vor.u32 %v10832_v35, %v7449_v36  ;;  %v7409_v44 = vld [vmem:[#allocation2 + $0x70] sm:$0xf0]  ;;  %v7415_v45 = vld [vmem:[#allocation2 + $0x58] sm:$0xf]  ;;  %v10824_v47 = vld [vmem:[#allocation2 + $0x5c] sm:$0xf]  ;;  %v7408_v49 = vor.u32 %v10827_v41, %v7407_v40 }
  0x40   :  { %554 = vmatpush.bf16.msrb.mxu0 %v7568_v53  ;;  %567 = vmatpush.bf16.msrb.mxu1 %v7572_v54  ;;  %v10828_v46 = vld [vmem:[#allocation2 + $0x74] sm:$0xf0]  ;;  %v7417_v48 = vld [vmem:[#allocation2 + $0x78] sm:$0xf0]  ;;  %v7375_v51 = vld [vmem:[#allocation2 + $0x10] sm:$0xf]  ;;  %v7412_v52 = vor.u32 %v10823_v42, %v7409_v44 }
  0x41   :  { %580 = vmatpush.bf16.msrb.mxu2 %v7576_v55  ;;  %v7416_v53 = vor.u32 %v10828_v46, %v7415_v45  ;;  %v10819_v54 = vld [vmem:[#allocation2 + $0x2c] sm:$0xf0]  ;;  %v10815_v55 = vld [vmem:[#allocation2 + $0x14] sm:$0xf]  ;;  %v7420_v57 = vor.u32 %v10824_v47, %v7417_v48  ;;  %v7383_v58 = vld [vmem:[#allocation2 + $0x18] sm:$0xf] }
  0x42   :  { %593 = vmatpush.bf16.msrb.mxu3 %v7580_v59  ;;  %v7377_v56 = vld [vmem:[#allocation2 + $0x30] sm:$0xf0]  ;;  %v10820_v59 = vld [vmem:[#allocation2 + $0x34] sm:$0xf0]  ;;  %v10816_v60 = vld [vmem:[#allocation2 + $0x1c] sm:$0xf]  ;;  %v7376_v0 = vor.u32 %v10819_v54, %v7375_v51 }
  0x43   :  { %v7385_v61 = vld [vmem:[#allocation2 + $0x38] sm:$0xf0]  ;;  %v7839_v62 = vld [vmem:[#allocation5 + $0x1c0] sm:$0xf]  ;;  %v7384_v4 = vor.u32 %v10820_v59, %v7383_v58  ;;  %s11898_s0 = smov [#allocation11]   ;;  %s7345_s28 = sshll.u32 %s12614_s6, 4  ;;  %s7346_s28 = int_to_ptr.hbm [resolvable:$true] %s7345_s28 }
  0x44   :  { %555 = vmatpush.bf16.msrb.mxu0 %v7536_v1  ;;  %568 = vmatpush.bf16.msrb.mxu1 %v7540_v2  ;;  %v10937_v63 = vld [vmem:[#allocation5 + $0x1dc] sm:$0xf0]  ;;  %v7388_v5 = vor.u32 %v10816_v60, %v7385_v61  ;;  %s7343_s25 = sshll.u32 %s11898_s0, 4  ;;  %s7344_s25 = int_to_ptr.vmem [resolvable:$true] %s7343_s25 }
  0x45   :  { %581 = vmatpush.bf16.msrb.mxu2 %v7544_v3  ;;  %v8095_v1 = vld [vmem:[#allocation5 + $0x3c0] sm:$0xf]  ;;  %v7380_v3 = vor.u32 %v10815_v55, %v7377_v56  ;;  %v7840_v6 = vor.u32 %v10937_v63, %v7839_v62 }
  0x46   :  { %594 = vmatpush.bf16.msrb.mxu3 %v7548_v7  ;;  %v11001_v2 = vld [vmem:[#allocation5 + $0x3dc] sm:$0xf0] }
  0x47   :  { %v7807_v7 = vld [vmem:[#allocation5 + $0x180] sm:$0xf]  ;;  %v8096_v10 = vor.u32 %v11001_v2, %v8095_v1 }
  0x48   :  { %556 = vmatpush.bf16.msrb.mxu0 %v7504_v13  ;;  %569 = vmatpush.bf16.msrb.mxu1 %v7508_v14  ;;  %v8351_v8 = vld [vmem:[#allocation5 + $0x5c0] sm:$0xf] }
  0x49   :  { %582 = vmatpush.bf16.msrb.mxu2 %v7512_v15  ;;  %v11065_v9 = vld [vmem:[#allocation5 + $0x5dc] sm:$0xf0] }
  0x4a   :  { %595 = vmatpush.bf16.msrb.mxu3 %v7516_v19  ;;  %v10929_v11 = vld [vmem:[#allocation5 + $0x19c] sm:$0xf0]  ;;  %v8352_v16 = vor.u32 %v11065_v9, %v8351_v8 }
  0x4b   :  { %v8607_v12 = vld [vmem:[#allocation5 + $0x7c0] sm:$0xf]  ;;  %v7808_v17 = vor.u32 %v10929_v11, %v7807_v7 }
  0x4c   :  { %557 = vmatpush.bf16.msrb.mxu0 %v7472_v25  ;;  %570 = vmatpush.bf16.msrb.mxu1 %v7476_v26  ;;  %v11129_v13 = vld [vmem:[#allocation5 + $0x7dc] sm:$0xf0] }
  0x4d   :  { %583 = vmatpush.bf16.msrb.mxu2 %v7480_v27  ;;  %v8063_v14 = vld [vmem:[#allocation5 + $0x380] sm:$0xf]  ;;  %v8608_v18 = vor.u32 %v11129_v13, %v8607_v12 }
  0x4e   :  { %596 = vmatpush.bf16.msrb.mxu3 %v7484_v31  ;;  %v10993_v15 = vld [vmem:[#allocation5 + $0x39c] sm:$0xf0] }
  0x4f   :  { %v7775_v19 = vld [vmem:[#allocation5 + $0x140] sm:$0xf]  ;;  %v8064_v22 = vor.u32 %v10993_v15, %v8063_v14 }
  0x50   :  { %558 = vmatpush.bf16.msrb.mxu0 %v7440_v37  ;;  %571 = vmatpush.bf16.msrb.mxu1 %v7444_v38  ;;  %v8319_v20 = vld [vmem:[#allocation5 + $0x580] sm:$0xf] }
  0x51   :  { %584 = vmatpush.bf16.msrb.mxu2 %v7448_v39  ;;  %v11057_v21 = vld [vmem:[#allocation5 + $0x59c] sm:$0xf0] }
  0x52   :  { %597 = vmatpush.bf16.msrb.mxu3 %v7452_v43  ;;  %v10921_v23 = vld [vmem:[#allocation5 + $0x15c] sm:$0xf0]  ;;  %v8320_v28 = vor.u32 %v11057_v21, %v8319_v20 }
  0x53   :  { %v8575_v24 = vld [vmem:[#allocation5 + $0x780] sm:$0xf]  ;;  %v7776_v29 = vor.u32 %v10921_v23, %v7775_v19 }
  0x54   :  { %559 = vmatpush.bf16.msrb.mxu0 %v7408_v49  ;;  %572 = vmatpush.bf16.msrb.mxu1 %v7412_v52  ;;  %v11121_v25 = vld [vmem:[#allocation5 + $0x79c] sm:$0xf0] }
  0x55   :  { %585 = vmatpush.bf16.msrb.mxu2 %v7416_v53  ;;  %v8031_v26 = vld [vmem:[#allocation5 + $0x340] sm:$0xf]  ;;  %v8576_v30 = vor.u32 %v11121_v25, %v8575_v24 }
  0x56   :  { %598 = vmatpush.bf16.msrb.mxu3 %v7420_v57  ;;  %v10985_v27 = vld [vmem:[#allocation5 + $0x35c] sm:$0xf0] }
  0x57   :  { %v7743_v31 = vld [vmem:[#allocation5 + $0x100] sm:$0xf]  ;;  %v8032_v34 = vor.u32 %v10985_v27, %v8031_v26 }
  0x58   :  { %560 = vmatpush.bf16.msrb.mxu0 %v7376_v0  ;;  %573 = vmatpush.bf16.msrb.mxu1 %v7380_v3  ;;  %v8287_v32 = vld [vmem:[#allocation5 + $0x540] sm:$0xf] }
  0x59   :  { %586 = vmatpush.bf16.msrb.mxu2 %v7384_v4  ;;  %v11049_v33 = vld [vmem:[#allocation5 + $0x55c] sm:$0xf0] }
  0x5a   :  { %599 = vmatpush.bf16.msrb.mxu3 %v7388_v5  ;;  %v10913_v35 = vld [vmem:[#allocation5 + $0x11c] sm:$0xf0]  ;;  %v8288_v40 = vor.u32 %v11049_v33, %v8287_v32 }
  0x5b   :  { %561 = vmatmul.bf16.vlgmr.msrb.gmra.mxu0 %v11952_v50  ;;  %574 = vmatmul.bf16.vlgmr.msrb.gmra.mxu1 %v11952_v50  ;;  %v8543_v36 = vld [vmem:[#allocation5 + $0x740] sm:$0xf] }
  0x5c   :  { %3717 = vmatpush.bf16.msra.mxu0 %v7840_v6  ;;  %3730 = vmatpush.bf16.msra.mxu1 %v8096_v10  ;;  %v11113_v37 = vld [vmem:[#allocation5 + $0x75c] sm:$0xf0] }
  0x5d   :  { %587 = vmatmul.bf16.vlgmr.msrb.gmra.mxu2 %v11952_v50  ;;  %600 = vmatmul.bf16.vlgmr.msrb.gmra.mxu3 %v11952_v50  ;;  %v7999_v38 = vld [vmem:[#allocation5 + $0x300] sm:$0xf]  ;;  %v7744_v50 = vor.u32 %v10913_v35, %v7743_v31  ;;  %v8544_v41 = vor.u32 %v11113_v37, %v8543_v36 }
  0x5e   :  { %3743 = vmatpush.bf16.msra.mxu2 %v8352_v16  ;;  %3756 = vmatpush.bf16.msra.mxu3 %v8608_v18  ;;  %v10977_v39 = vld [vmem:[#allocation5 + $0x31c] sm:$0xf0] }
  0x5f   :  { %v7711_v42 = vld [vmem:[#allocation5 + $0xc0] sm:$0xf]  ;;  %v8000_v45 = vor.u32 %v10977_v39, %v7999_v38 }
  0x60   :  { %3718 = vmatpush.bf16.msra.mxu0 %v7808_v17  ;;  %3731 = vmatpush.bf16.msra.mxu1 %v8064_v22  ;;  %v8255_v43 = vld [vmem:[#allocation5 + $0x500] sm:$0xf] }
  0x61   :  { %v11041_v44 = vld [vmem:[#allocation5 + $0x51c] sm:$0xf0] }
  0x62   :  { %3744 = vmatpush.bf16.msra.mxu2 %v8320_v28  ;;  %3757 = vmatpush.bf16.msra.mxu3 %v8576_v30  ;;  %v10905_v46 = vld [vmem:[#allocation5 + $0xdc] sm:$0xf0]  ;;  %v8256_v52 = vor.u32 %v11041_v44, %v8255_v43 }
  0x63   :  { %v8511_v47 = vld [vmem:[#allocation5 + $0x700] sm:$0xf]  ;;  %v7712_v53 = vor.u32 %v10905_v46, %v7711_v42 }
  0x64   :  { %3719 = vmatpush.bf16.msra.mxu0 %v7776_v29  ;;  %3732 = vmatpush.bf16.msra.mxu1 %v8032_v34  ;;  %v11105_v48 = vld [vmem:[#allocation5 + $0x71c] sm:$0xf0] }
  0x65   :  { %v7967_v49 = vld [vmem:[#allocation5 + $0x2c0] sm:$0xf]  ;;  %v8512_v54 = vor.u32 %v11105_v48, %v8511_v47 }
  0x66   :  { %v10969_v51 = vld [vmem:[#allocation5 + $0x2dc] sm:$0xf0]  ;;  %3745 = vmatpush.bf16.msra.mxu2 %v8288_v40  ;;  %3758 = vmatpush.bf16.msra.mxu3 %v8544_v41 }
  0x67   :  { %v7679_v55 = vld [vmem:[#allocation5 + $0x80] sm:$0xf]  ;;  %v7968_v58 = vor.u32 %v10969_v51, %v7967_v49 }
  0x68   :  { %3720 = vmatpush.bf16.msra.mxu0 %v7744_v50  ;;  %v8223_v56 = vld [vmem:[#allocation5 + $0x4c0] sm:$0xf]  ;;  %3733 = vmatpush.bf16.msra.mxu1 %v8000_v45 }
  0x69   :  { %v11033_v57 = vld [vmem:[#allocation5 + $0x4dc] sm:$0xf0] }
  0x6a   :  { %v10897_v59 = vld [vmem:[#allocation5 + $0x9c] sm:$0xf0]  ;;  %3746 = vmatpush.bf16.msra.mxu2 %v8256_v52  ;;  %v8224_v0 = vor.u32 %v11033_v57, %v8223_v56  ;;  %3759 = vmatpush.bf16.msra.mxu3 %v8512_v54 }
  0x6b   :  { %v8479_v60 = vld [vmem:[#allocation5 + $0x6c0] sm:$0xf]  ;;  %v7680_v1 = vor.u32 %v10897_v59, %v7679_v55 }
  0x6c   :  { %v11097_v61 = vld [vmem:[#allocation5 + $0x6dc] sm:$0xf0]  ;;  %3721 = vmatpush.bf16.msra.mxu0 %v7712_v53  ;;  %3734 = vmatpush.bf16.msra.mxu1 %v7968_v58 }
  0x6d   :  { %v7935_v62 = vld [vmem:[#allocation5 + $0x280] sm:$0xf]  ;;  %v8480_v2 = vor.u32 %v11097_v61, %v8479_v60 }
  0x6e   :  { %v10961_v63 = vld [vmem:[#allocation5 + $0x29c] sm:$0xf0]  ;;  %3747 = vmatpush.bf16.msra.mxu2 %v8224_v0 }
  0x6f   :  { %v7647_v3 = vld [vmem:[#allocation5 + $0x40] sm:$0xf]  ;;  %v7936_v6 = vor.u32 %v10961_v63, %v7935_v62  ;;  %3760 = vmatpush.bf16.msra.mxu3 %v8480_v2 }
  0x70   :  { %v8191_v4 = vld [vmem:[#allocation5 + $0x480] sm:$0xf]  ;;  %3722 = vmatpush.bf16.msra.mxu0 %v7680_v1 }
  0x71   :  { %v11025_v5 = vld [vmem:[#allocation5 + $0x49c] sm:$0xf0]  ;;  %3735 = vmatpush.bf16.msra.mxu1 %v7936_v6 }
  0x72   :  { %v10889_v7 = vld [vmem:[#allocation5 + $0x5c] sm:$0xf0]  ;;  %v8192_v12 = vor.u32 %v11025_v5, %v8191_v4 }
  0x73   :  { %v8447_v8 = vld [vmem:[#allocation5 + $0x680] sm:$0xf]  ;;  %v7648_v14 = vor.u32 %v10889_v7, %v7647_v3 }
  0x74   :  { %v11089_v9 = vld [vmem:[#allocation5 + $0x69c] sm:$0xf0]  ;;  %3748 = vmatpush.bf16.msra.mxu2 %v8192_v12 }
  0x75   :  { %v7903_v10 = vld [vmem:[#allocation5 + $0x240] sm:$0xf]  ;;  %v8448_v15 = vor.u32 %v11089_v9, %v8447_v8  ;;  %3723 = vmatpush.bf16.msra.mxu0 %v7648_v14 }
  0x76   :  { %v10953_v11 = vld [vmem:[#allocation5 + $0x25c] sm:$0xf0] }
  0x77   :  { %v7615_v13 = vld [vmem:[#allocation5] sm:$0xf]  ;;  %v7904_v19 = vor.u32 %v10953_v11, %v7903_v10  ;;  %3761 = vmatpush.bf16.msra.mxu3 %v8448_v15 }
  0x78   :  { %v10881_v16 = vld [vmem:[#allocation5 + $0x1c] sm:$0xf0] }
  0x79   :  { %v8159_v17 = vld [vmem:[#allocation5 + $0x440] sm:$0xf]  ;;  %v7616_v29 = vor.u32 %v10881_v16, %v7615_v13  ;;  %3736 = vmatpush.bf16.msra.mxu1 %v7904_v19 }
  0x7a   :  { %v11017_v18 = vld [vmem:[#allocation5 + $0x45c] sm:$0xf0] }
  0x7b   :  { %v7871_v20 = vld [vmem:[#allocation5 + $0x200] sm:$0xf]  ;;  %v8160_v28 = vor.u32 %v11017_v18, %v8159_v17  ;;  %3724 = vmatpush.bf16.msra.mxu0 %v7616_v29 }
  0x7c   :  { %v8415_v21 = vld [vmem:[#allocation5 + $0x640] sm:$0xf] }
  0x7d   :  { %v11081_v22 = vld [vmem:[#allocation5 + $0x65c] sm:$0xf0]  ;;  %3749 = vmatpush.bf16.msra.mxu2 %v8160_v28 }
  0x7e   :  { %v10945_v23 = vld [vmem:[#allocation5 + $0x21c] sm:$0xf0]  ;;  %v8416_v30 = vor.u32 %v11081_v22, %v8415_v21 }
  0x7f   :  { %v8863_v24 = vld [vmem:[#allocation5 + $0x9c0] sm:$0xf]  ;;  %v7872_v35 = vor.u32 %v10945_v23, %v7871_v20 }
  0x80   :  { %v11193_v25 = vld [vmem:[#allocation5 + $0x9dc] sm:$0xf0]  ;;  %3762 = vmatpush.bf16.msra.mxu3 %v8416_v30 }
  0x81   :  { %v9119_v26 = vld [vmem:[#allocation5 + $0xbc0] sm:$0xf]  ;;  %v8864_v36 = vor.u32 %v11193_v25, %v8863_v24  ;;  %3737 = vmatpush.bf16.msra.mxu1 %v7872_v35 }
  0x82   :  { %v11257_v27 = vld [vmem:[#allocation5 + $0xbdc] sm:$0xf0] }
  0x83   :  { %v8831_v31 = vld [vmem:[#allocation5 + $0x980] sm:$0xf]  ;;  %v9120_v40 = vor.u32 %v11257_v27, %v9119_v26  ;;  %3769 = vmatpush.bf16.msrb.mxu0 %v8864_v36 }
  0x84   :  { %v8127_v32 = vld [vmem:[#allocation5 + $0x400] sm:$0xf] }
  0x85   :  { %v11009_v33 = vld [vmem:[#allocation5 + $0x41c] sm:$0xf0]  ;;  %3782 = vmatpush.bf16.msrb.mxu1 %v9120_v40 }
  0x86   :  { %v8383_v34 = vld [vmem:[#allocation5 + $0x600] sm:$0xf]  ;;  %v8128_v45 = vor.u32 %v11009_v33, %v8127_v32 }
  0x87   :  { %v11073_v37 = vld [vmem:[#allocation5 + $0x61c] sm:$0xf0] }
  0x88   :  { %v9375_v38 = vld [vmem:[#allocation5 + $0xdc0] sm:$0xf]  ;;  %v8384_v46 = vor.u32 %v11073_v37, %v8383_v34  ;;  %3750 = vmatpush.bf16.msra.mxu2 %v8128_v45 }
  0x89   :  { %v11321_v39 = vld [vmem:[#allocation5 + $0xddc] sm:$0xf0] }
  0x8a   :  { %v11185_v50 = vld [vmem:[#allocation5 + $0x99c] sm:$0xf0]  ;;  %v9376_v47 = vor.u32 %v11321_v39, %v9375_v38  ;;  %3763 = vmatpush.bf16.msra.mxu3 %v8384_v46 }
  0x8b   :  { %v9631_v41 = vld [vmem:[#allocation5 + $0xfc0] sm:$0xf]  ;;  %v8832_v48 = vor.u32 %v11185_v50, %v8831_v31 }
  0x8c   :  { %v11385_v42 = vld [vmem:[#allocation5 + $0xfdc] sm:$0xf0]  ;;  %3795 = vmatpush.bf16.msrb.mxu2 %v9376_v47 }
  0x8d   :  { %v9087_v43 = vld [vmem:[#allocation5 + $0xb80] sm:$0xf]  ;;  %v9632_v49 = vor.u32 %v11385_v42, %v9631_v41  ;;  %3770 = vmatpush.bf16.msrb.mxu0 %v8832_v48 }
  0x8e   :  { %v11249_v44 = vld [vmem:[#allocation5 + $0xb9c] sm:$0xf0] }
  0x8f   :  { %v8799_v51 = vld [vmem:[#allocation5 + $0x940] sm:$0xf]  ;;  %v9088_v54 = vor.u32 %v11249_v44, %v9087_v43  ;;  %3808 = vmatpush.bf16.msrb.mxu3 %v9632_v49 }
  0x90   :  { %v9343_v52 = vld [vmem:[#allocation5 + $0xd80] sm:$0xf] }
  0x91   :  { %v11313_v53 = vld [vmem:[#allocation5 + $0xd9c] sm:$0xf0]  ;;  %3783 = vmatpush.bf16.msrb.mxu1 %v9088_v54 }
  0x92   :  { %v11177_v55 = vld [vmem:[#allocation5 + $0x95c] sm:$0xf0]  ;;  %v9344_v60 = vor.u32 %v11313_v53, %v9343_v52 }
  0x93   :  { %v9599_v56 = vld [vmem:[#allocation5 + $0xf80] sm:$0xf]  ;;  %v8800_v61 = vor.u32 %v11177_v55, %v8799_v51 }
  0x94   :  { %v11377_v57 = vld [vmem:[#allocation5 + $0xf9c] sm:$0xf0]  ;;  %3796 = vmatpush.bf16.msrb.mxu2 %v9344_v60 }
  0x95   :  { %v9055_v58 = vld [vmem:[#allocation5 + $0xb40] sm:$0xf]  ;;  %v9600_v62 = vor.u32 %v11377_v57, %v9599_v56  ;;  %3771 = vmatpush.bf16.msrb.mxu0 %v8800_v61 }
  0x96   :  { %v11241_v59 = vld [vmem:[#allocation5 + $0xb5c] sm:$0xf0] }
  0x97   :  { %v8767_v63 = vld [vmem:[#allocation5 + $0x900] sm:$0xf]  ;;  %v9056_v2 = vor.u32 %v11241_v59, %v9055_v58  ;;  %3809 = vmatpush.bf16.msrb.mxu3 %v9600_v62 }
  0x98   :  { %v9311_v0 = vld [vmem:[#allocation5 + $0xd40] sm:$0xf] }
  0x99   :  { %v11305_v1 = vld [vmem:[#allocation5 + $0xd5c] sm:$0xf0]  ;;  %3784 = vmatpush.bf16.msrb.mxu1 %v9056_v2 }
  0x9a   :  { %v11169_v3 = vld [vmem:[#allocation5 + $0x91c] sm:$0xf0]  ;;  %v9312_v8 = vor.u32 %v11305_v1, %v9311_v0 }
  0x9b   :  { %v9567_v4 = vld [vmem:[#allocation5 + $0xf40] sm:$0xf]  ;;  %v8768_v9 = vor.u32 %v11169_v3, %v8767_v63  ;;  %v101_v3 = vld [vmem:[#allocation10 + $0x8] sm:$0xff] }
  0x9c   :  { %v11369_v5 = vld [vmem:[#allocation5 + $0xf5c] sm:$0xf0]  ;;  %3797 = vmatpush.bf16.msrb.mxu2 %v9312_v8 }
  0x9d   :  { %v9023_v6 = vld [vmem:[#allocation5 + $0xb00] sm:$0xf]  ;;  %v9568_v10 = vor.u32 %v11369_v5, %v9567_v4  ;;  %3772 = vmatpush.bf16.msrb.mxu0 %v8768_v9  ;;  %v174_v5 = vperm.slane %v101_v3, 0  ;;  %v102_v9 = vld [vmem:[#allocation10 + $0x10] sm:$0xff] }
  0x9e   :  { %v11233_v7 = vld [vmem:[#allocation5 + $0xb1c] sm:$0xf0] }
  0x9f   :  { %v8735_v11 = vld [vmem:[#allocation5 + $0x8c0] sm:$0xf]  ;;  %v9024_v14 = vor.u32 %v11233_v7, %v9023_v6  ;;  %3810 = vmatpush.bf16.msrb.mxu3 %v9568_v10  ;;  %v103_v10 = vld [vmem:[#allocation10 + $0x18] sm:$0xff] }
  0xa0   :  { %v9279_v12 = vld [vmem:[#allocation5 + $0xd00] sm:$0xf] }
  0xa1   :  { %v11297_v13 = vld [vmem:[#allocation5 + $0xd1c] sm:$0xf0]  ;;  %3785 = vmatpush.bf16.msrb.mxu1 %v9024_v14  ;;  %v10997_v14 = vld [vmem:[#allocation5 + $0x3c4] sm:$0xf] }
  0xa2   :  { %v11161_v15 = vld [vmem:[#allocation5 + $0x8dc] sm:$0xf0]  ;;  %v9280_v20 = vor.u32 %v11297_v13, %v9279_v12  ;;  %v10933_v12 = vld [vmem:[#allocation5 + $0x1c4] sm:$0xf] }
  0xa3   :  { %v9535_v16 = vld [vmem:[#allocation5 + $0xf00] sm:$0xf]  ;;  %v8736_v21 = vor.u32 %v11161_v15, %v8735_v11  ;;  %v7841_v13 = vld [vmem:[#allocation5 + $0x1e0] sm:$0xf0] }
  0xa4   :  { %v11361_v17 = vld [vmem:[#allocation5 + $0xf1c] sm:$0xf0]  ;;  %3798 = vmatpush.bf16.msrb.mxu2 %v9280_v20  ;;  %v176_v20 = vperm.slane %v103_v10, 0  ;;  %v10901_v10 = vld [vmem:[#allocation5 + $0xc4] sm:$0xf] }
  0xa5   :  { %v8991_v18 = vld [vmem:[#allocation5 + $0xac0] sm:$0xf]  ;;  %v9536_v22 = vor.u32 %v11361_v17, %v9535_v16  ;;  %3773 = vmatpush.bf16.msrb.mxu0 %v8736_v21  ;;  %v8097_v16 = vld [vmem:[#allocation5 + $0x3e0] sm:$0xf0]  ;;  %v7844_v21 = vor.u32 %v10933_v12, %v7841_v13 }
  0xa6   :  { %v11225_v19 = vld [vmem:[#allocation5 + $0xadc] sm:$0xf0]  ;;  %v10965_v12 = vld [vmem:[#allocation5 + $0x2c4] sm:$0xf] }
  0xa7   :  { %v8992_v23 = vor.u32 %v11225_v19, %v8991_v18  ;;  %v8703_v24 = vld [vmem:[#allocation5 + $0x880] sm:$0xf]  ;;  %3811 = vmatpush.bf16.msrb.mxu3 %v9536_v22  ;;  %v175_v18 = vperm.slane %v102_v9, 0  ;;  %v8545_v9 = vld [vmem:[#allocation5 + $0x760] sm:$0xf0] }
  0xa8   :  { %v11153_v25 = vld [vmem:[#allocation5 + $0x89c] sm:$0xf0]  ;;  %v7969_v13 = vld [vmem:[#allocation5 + $0x2e0] sm:$0xf0] }
  0xa9   :  { %v8959_v26 = vld [vmem:[#allocation5 + $0xa80] sm:$0xf]  ;;  %v8704_v28 = vor.u32 %v11153_v25, %v8703_v24  ;;  %3786 = vmatpush.bf16.msrb.mxu1 %v8992_v23  ;;  %v8100_v24 = vor.u32 %v10997_v14, %v8097_v16  ;;  %v10925_v25 = vld [vmem:[#allocation5 + $0x184] sm:$0xf] }
  0xaa   :  { %v11217_v27 = vld [vmem:[#allocation5 + $0xa9c] sm:$0xf0]  ;;  %v8257_v16 = vld [vmem:[#allocation5 + $0x520] sm:$0xf0] }
  0xab   :  { %v8960_v29 = vor.u32 %v11217_v27, %v8959_v26  ;;  %3774 = vmatpush.bf16.msrb.mxu0 %v8704_v28  ;;  %v9247_v30 = vld [vmem:[#allocation5 + $0xcc0] sm:$0xf]  ;;  %v7809_v26 = vld [vmem:[#allocation5 + $0x1a0] sm:$0xf0] }
  0xac   :  { %v11289_v31 = vld [vmem:[#allocation5 + $0xcdc] sm:$0xf0] }
  0xad   :  { %3787 = vmatpush.bf16.msrb.mxu1 %v8960_v29  ;;  %v9248_v32 = vor.u32 %v11289_v31, %v9247_v30  ;;  %v9503_v33 = vld [vmem:[#allocation5 + $0xec0] sm:$0xf]  ;;  %v10989_v29 = vld [vmem:[#allocation5 + $0x384] sm:$0xf] }
  0xae   :  { %v11353_v34 = vld [vmem:[#allocation5 + $0xedc] sm:$0xf0]  ;;  %v8065_v30 = vld [vmem:[#allocation5 + $0x3a0] sm:$0xf0] }
  0xaf   :  { %v9504_v35 = vor.u32 %v11353_v34, %v9503_v33  ;;  %v8671_v36 = vld [vmem:[#allocation5 + $0x840] sm:$0xf]  ;;  %3799 = vmatpush.bf16.msrb.mxu2 %v9248_v32  ;;  %v11061_v34 = vld [vmem:[#allocation5 + $0x5c4] sm:$0xf] }
  0xb0   :  { %v11145_v37 = vld [vmem:[#allocation5 + $0x85c] sm:$0xf0] }
  0xb1   :  { %v8927_v38 = vld [vmem:[#allocation5 + $0xa40] sm:$0xf]  ;;  %v8672_v39 = vor.u32 %v11145_v37, %v8671_v36  ;;  %3812 = vmatpush.bf16.msrb.mxu3 %v9504_v35  ;;  %v8353_v35 = vld [vmem:[#allocation5 + $0x5e0] sm:$0xf0] }
  0xb2   :  { %v11209_v40 = vld [vmem:[#allocation5 + $0xa5c] sm:$0xf0]  ;;  %v11125_v36 = vld [vmem:[#allocation5 + $0x7c4] sm:$0xf] }
  0xb3   :  { %v8928_v50 = vor.u32 %v11209_v40, %v8927_v38  ;;  %v9215_v41 = vld [vmem:[#allocation5 + $0xc80] sm:$0xf]  ;;  %3775 = vmatpush.bf16.msrb.mxu0 %v8672_v39  ;;  %v7812_v39 = vor.u32 %v10925_v25, %v7809_v26  ;;  %v8609_v40 = vld [vmem:[#allocation5 + $0x7e0] sm:$0xf0] }
  0xb4   :  { %v11281_v42 = vld [vmem:[#allocation5 + $0xc9c] sm:$0xf0]  ;;  %v10893_v25 = vld [vmem:[#allocation5 + $0x84] sm:$0xf] }
  0xb5   :  { %v9471_v43 = vld [vmem:[#allocation5 + $0xe80] sm:$0xf]  ;;  %v9216_v44 = vor.u32 %v11281_v42, %v9215_v41  ;;  %3788 = vmatpush.bf16.msrb.mxu1 %v8928_v50  ;;  %v10917_v50 = vld [vmem:[#allocation5 + $0x144] sm:$0xf] }
  0xb6   :  { %v11345_v45 = vld [vmem:[#allocation5 + $0xe9c] sm:$0xf0]  ;;  %v7777_v41 = vld [vmem:[#allocation5 + $0x160] sm:$0xf0] }
  0xb7   :  { %v9472_v46 = vor.u32 %v11345_v45, %v9471_v43  ;;  %v8639_v47 = vld [vmem:[#allocation5 + $0x800] sm:$0xf]  ;;  %3800 = vmatpush.bf16.msrb.mxu2 %v9216_v44  ;;  %v8068_v43 = vor.u32 %v10989_v29, %v8065_v30  ;;  %v10981_v44 = vld [vmem:[#allocation5 + $0x344] sm:$0xf] }
  0xb8   :  { %v11137_v48 = vld [vmem:[#allocation5 + $0x81c] sm:$0xf0]  ;;  %v510_v6 = vpop.f32.mrf.mxu0  ;;  %v523_v8 = vpop.f32.mrf.mxu1  ;;  %v7681_v26 = vld [vmem:[#allocation5 + $0xa0] sm:$0xf0] }
  0xb9   :  { %v8895_v49 = vld [vmem:[#allocation5 + $0xa00] sm:$0xf]  ;;  %3813 = vmatpush.bf16.msrb.mxu3 %v9472_v46  ;;  %v8640_v51 = vor.u32 %v11137_v48, %v8639_v47  ;;  %v524_v11 = vadd.f32 %v523_v8, %v174_v5  ;;  %v8033_v46 = vld [vmem:[#allocation5 + $0x360] sm:$0xf0]  ;;  %v8356_v48 = vor.u32 %v11061_v34, %v8353_v35  ;;  %v7684_v35 = vor.u32 %v10893_v25, %v7681_v26 }
  0xba   :  { %v11201_v52 = vld [vmem:[#allocation5 + $0xa1c] sm:$0xf0]  ;;  %v11045_v5 = vld [vmem:[#allocation5 + $0x544] sm:$0xf] }
  0xbb   :  { %v8896_v53 = vor.u32 %v11201_v52, %v8895_v49  ;;  %v9183_v54 = vld [vmem:[#allocation5 + $0xc40] sm:$0xf]  ;;  %3776 = vmatpush.bf16.msrb.mxu0 %v8640_v51  ;;  %vm606_vm1 = vcmp.gt.f32.partialorder %v524_v11, 0.0  ;;  %v614_v17 = vmul.f32 0.2, %v524_v11  ;;  %v8612_v52 = vor.u32 %v11125_v36, %v8609_v40 }
  0xbc   :  { %v11273_v55 = vld [vmem:[#allocation5 + $0xc5c] sm:$0xf0]  ;;  %v7937_v29 = vld [vmem:[#allocation5 + $0x2a0] sm:$0xf0] }
  0xbd   :  { %v9439_v56 = vld [vmem:[#allocation5 + $0xe40] sm:$0xf]  ;;  %3789 = vmatpush.bf16.msrb.mxu1 %v8896_v53  ;;  %v9184_v58 = vor.u32 %v11273_v55, %v9183_v54  ;;  %v622_v23 = vsel %vm606_vm1, %v524_v11, %v614_v17  ;;  %v7780_v53 = vor.u32 %v10917_v50, %v7777_v41  ;;  %v11053_v54 = vld [vmem:[#allocation5 + $0x584] sm:$0xf] }
  0xbe   :  { %v11337_v57 = vld [vmem:[#allocation5 + $0xe5c] sm:$0xf0]  ;;  %v11964_v27 = vpack.c.bf16 %v622_v23, %v622_v23  ;;  %v8321_v55 = vld [vmem:[#allocation5 + $0x5a0] sm:$0xf0]  ;;  %v7972_v23 = vor.u32 %v10965_v12, %v7969_v13 }
  0xbf   :  { %v9440_v59 = vor.u32 %v11337_v57, %v9439_v56  ;;  %v9151_v60 = vld [vmem:[#allocation5 + $0xc00] sm:$0xf]  ;;  %3801 = vmatpush.bf16.msrb.mxu2 %v9184_v58  ;;  %v11117_v56 = vld [vmem:[#allocation5 + $0x784] sm:$0xf]  ;;  %v8036_v58 = vor.u32 %v10981_v44, %v8033_v46 }
  0xc0   :  { %v11265_v61 = vld [vmem:[#allocation5 + $0xc1c] sm:$0xf0]  ;;  %v549_v32 = vpop.f32.mrf.mxu3  ;;  %v512_v33 = vpop.f32.mrf.mxu0  ;;  %3738 = vmatmul.bf16.vlgmr.msra.gmra.mxu1 %v11964_v27  ;;  %v7713_v11 = vld [vmem:[#allocation5 + $0xe0] sm:$0xf0] }
  0xc1   :  { %3814 = vmatpush.bf16.msrb.mxu3 %v9440_v59  ;;  %v9152_v62 = vor.u32 %v11265_v61, %v9151_v60  ;;  %v9407_v63 = vld [vmem:[#allocation5 + $0xe00] sm:$0xf]  ;;  %v536_v28 = vpop.f32.mrf.mxu2  ;;  %v550_v37 = vadd.f32 %v549_v32, %v176_v20  ;;  %v525_v38 = vpop.f32.mrf.mxu1  ;;  %3834 = vmatpush.bf16.msra.mxu1 %v8100_v24  ;;  %v8577_v59 = vld [vmem:[#allocation5 + $0x7a0] sm:$0xf0] }
  0xc2   :  { %v11329_v0 = vld [vmem:[#allocation5 + $0xe1c] sm:$0xf0]  ;;  %v537_v31 = vadd.f32 %v536_v28, %v175_v18  ;;  %v10909_v60 = vld [vmem:[#allocation5 + $0x104] sm:$0xf]  ;;  %v8580_v3 = vor.u32 %v11117_v56, %v8577_v59  ;;  %v7716_v18 = vor.u32 %v10901_v10, %v7713_v11 }
  0xc3   :  { %v9408_v1 = vor.u32 %v11329_v0, %v9407_v63  ;;  %3802 = vmatpush.bf16.msrb.mxu2 %v9152_v62  ;;  %v100_v2 = vld [vmem:[#allocation10] sm:$0xff]  ;;  %vm608_vm3 = vcmp.gt.f32.partialorder %v550_v37, 0.0  ;;  %v616_v45 = vmul.f32 0.2, %v550_v37 }
  0xc4   :  { %v173_v4 = vperm.slane %v100_v2, 0  ;;  %vm607_vm2 = vcmp.gt.f32.partialorder %v537_v31, 0.0  ;;  %v615_v42 = vmul.f32 0.2, %v537_v31  ;;  %v7745_v61 = vld [vmem:[#allocation5 + $0x120] sm:$0xf0]  ;;  %v8324_v2 = vor.u32 %v11053_v54, %v8321_v55 }
  0xc5   :  { %3815 = vmatpush.bf16.msrb.mxu3 %v9408_v1  ;;  %v624_v51 = vsel %vm608_vm3, %v550_v37, %v616_v45  ;;  %3835 = vmatpush.bf16.msra.mxu1 %v8068_v43  ;;  %v10973_v63 = vld [vmem:[#allocation5 + $0x304] sm:$0xf]  ;;  %v107_v54 = vld [vmem:[#allocation10 + $0x38] sm:$0xff] }
  0xc6   :  { %v511_v7 = vadd.f32 %v510_v6, %v173_v4  ;;  %v623_v47 = vsel %vm607_vm2, %v537_v31, %v615_v42  ;;  %v11970_v57 = vpack.c.bf16 %v624_v51, %v624_v51  ;;  %v8001_v0 = vld [vmem:[#allocation5 + $0x320] sm:$0xf0]  ;;  %v7748_v4 = vor.u32 %v10909_v60, %v7745_v61 }
  0xc7   :  { %v11968_v49 = vpack.c.bf16 %v623_v47, %v623_v47  ;;  %v8289_v6 = vld [vmem:[#allocation5 + $0x560] sm:$0xf0]  ;;  %v8004_v8 = vor.u32 %v10973_v63, %v8001_v0  ;;  %v180_v13 = vperm.slane %v107_v54, 0 }
  0xc8   :  { %vm605_vm0 = vcmp.gt.f32.partialorder %v511_v7, 0.0  ;;  %v613_v15 = vmul.f32 0.2, %v511_v7  ;;  %v551_v1 = vpop.f32.mrf.mxu3  ;;  %3764 = vmatmul.bf16.vlgmr.msra.gmra.mxu3 %v11970_v57  ;;  %v8292_v14 = vor.u32 %v11045_v5, %v8289_v6  ;;  %v104_v20 = vld [vmem:[#allocation10 + $0x20] sm:$0xff] }
  0xc9   :  { %v538_v62 = vpop.f32.mrf.mxu2  ;;  %3751 = vmatmul.bf16.vlgmr.msra.gmra.mxu2 %v11968_v49  ;;  %3860 = vmatpush.bf16.msra.mxu3 %v8612_v52  ;;  %v8513_v24 = vld [vmem:[#allocation5 + $0x720] sm:$0xf0]  ;;  %v177_v31 = vperm.slane %v104_v20, 0 }
  0xca   :  { %v621_v19 = vsel %vm605_vm0, %v511_v7, %v613_v15  ;;  %3847 = vmatpush.bf16.msra.mxu2 %v8356_v48  ;;  %v11109_v7 = vld [vmem:[#allocation5 + $0x744] sm:$0xf]  ;;  %3836 = vmatpush.bf16.msra.mxu1 %v8036_v58  ;;  %v106_v48 = vld [vmem:[#allocation10 + $0x30] sm:$0xff] }
  0xcb   :  { %v11962_v22 = vpack.c.bf16 %v621_v19, %v621_v19  ;;  %v11037_v15 = vld [vmem:[#allocation5 + $0x504] sm:$0xf]  ;;  %v8548_v17 = vor.u32 %v11109_v7, %v8545_v9  ;;  %v179_v9 = vperm.slane %v106_v48, 0 }
  0xcc   :  { %v11101_v19 = vld [vmem:[#allocation5 + $0x704] sm:$0xf]  ;;  %v8260_v30 = vor.u32 %v11037_v15, %v8257_v16 }
  0xcd   :  { %3725 = vmatmul.bf16.vlgmr.msra.gmra.mxu0 %v11962_v22  ;;  %3861 = vmatpush.bf16.msra.mxu3 %v8580_v3  ;;  %v10957_v28 = vld [vmem:[#allocation5 + $0x284] sm:$0xf]  ;;  %v8516_v34 = vor.u32 %v11101_v19, %v8513_v24 }
  0xce   :  { %3821 = vmatpush.bf16.msra.mxu0 %v7844_v21  ;;  %3848 = vmatpush.bf16.msra.mxu2 %v8324_v2  ;;  %v105_v21 = vld [vmem:[#allocation10 + $0x28] sm:$0xff]  ;;  %v11029_v33 = vld [vmem:[#allocation5 + $0x4c4] sm:$0xf] }
  0xcf   :  { %3837 = vmatpush.bf16.msra.mxu1 %v8004_v8  ;;  %v178_v32 = vperm.slane %v105_v21, 0  ;;  %v8225_v36 = vld [vmem:[#allocation5 + $0x4e0] sm:$0xf0] }
  0xd0   :  { %v11093_v37 = vld [vmem:[#allocation5 + $0x6c4] sm:$0xf]  ;;  %v8228_v45 = vor.u32 %v11029_v33, %v8225_v36 }
  0xd1   :  { %3862 = vmatpush.bf16.msra.mxu3 %v8548_v17  ;;  %v8481_v38 = vld [vmem:[#allocation5 + $0x6e0] sm:$0xf0] }
  0xd2   :  { %3822 = vmatpush.bf16.msra.mxu0 %v7812_v39  ;;  %3849 = vmatpush.bf16.msra.mxu2 %v8292_v14  ;;  %v7940_v39 = vor.u32 %v10957_v28, %v7937_v29  ;;  %v10885_v40 = vld [vmem:[#allocation5 + $0x44] sm:$0xf]  ;;  %v8484_v52 = vor.u32 %v11093_v37, %v8481_v38 }
  0xd3   :  { %3838 = vmatpush.bf16.msra.mxu1 %v7972_v23  ;;  %v7649_v50 = vld [vmem:[#allocation5 + $0x60] sm:$0xf0] }
  0xd4   :  { %v10949_v41 = vld [vmem:[#allocation5 + $0x244] sm:$0xf] }
  0xd5   :  { %v7905_v42 = vld [vmem:[#allocation5 + $0x260] sm:$0xf0]  ;;  %3863 = vmatpush.bf16.msra.mxu3 %v8516_v34 }
  0xd6   :  { %3823 = vmatpush.bf16.msra.mxu0 %v7780_v53  ;;  %v11021_v43 = vld [vmem:[#allocation5 + $0x484] sm:$0xf]  ;;  %3850 = vmatpush.bf16.msra.mxu2 %v8260_v30  ;;  %v7652_v53 = vor.u32 %v10885_v40, %v7649_v50  ;;  %v7908_v60 = vor.u32 %v10949_v41, %v7905_v42 }
  0xd7   :  { %v8193_v44 = vld [vmem:[#allocation5 + $0x4a0] sm:$0xf0]  ;;  %3839 = vmatpush.bf16.msra.mxu1 %v7940_v39 }
  0xd8   :  { %v11085_v46 = vld [vmem:[#allocation5 + $0x684] sm:$0xf]  ;;  %v562_v51 = vpop.f32.mrf.mxu0  ;;  %v575_v59 = vpop.f32.mrf.mxu1  ;;  %v8196_v5 = vor.u32 %v11021_v43, %v8193_v44 }
  0xd9   :  { %v8449_v47 = vld [vmem:[#allocation5 + $0x6a0] sm:$0xf0]  ;;  %v563_v58 = vadd.f32 %v562_v51, %v177_v31  ;;  %v576_v0 = vadd.f32 %v575_v59, %v178_v32  ;;  %3864 = vmatpush.bf16.msra.mxu3 %v8484_v52 }
  0xda   :  { %3824 = vmatpush.bf16.msra.mxu0 %v7748_v4  ;;  %v10877_v55 = vld [vmem:[#allocation5 + $0x4] sm:$0xf]  ;;  %3851 = vmatpush.bf16.msra.mxu2 %v8228_v45  ;;  %v8452_v6 = vor.u32 %v11085_v46, %v8449_v47 }
  0xdb   :  { %v7617_v56 = vld [vmem:[#allocation5 + $0x20] sm:$0xf0]  ;;  %vm609_vm4 = vcmp.gt.f32.partialorder %v563_v58, 0.0  ;;  %v617_v4 = vmul.f32 0.2, %v563_v58  ;;  %vm610_vm5 = vcmp.gt.f32.partialorder %v576_v0, 0.0  ;;  %3840 = vmatpush.bf16.msra.mxu1 %v7908_v60 }
  0xdc   :  { %v10941_v61 = vld [vmem:[#allocation5 + $0x204] sm:$0xf]  ;;  %v618_v8 = vmul.f32 0.2, %v576_v0  ;;  %v7620_v10 = vor.u32 %v10877_v55, %v7617_v56 }
  0xdd   :  { %v7873_v62 = vld [vmem:[#allocation5 + $0x220] sm:$0xf0]  ;;  %v625_v12 = vsel %vm609_vm4, %v563_v58, %v617_v4  ;;  %3865 = vmatpush.bf16.msra.mxu3 %v8452_v6 }
  0xde   :  { %3825 = vmatpush.bf16.msra.mxu0 %v7716_v18  ;;  %v11189_v63 = vld [vmem:[#allocation5 + $0x9c4] sm:$0xf]  ;;  %v7876_v14 = vor.u32 %v10941_v61, %v7873_v62  ;;  %v11974_v17 = vpack.c.bf16 %v625_v12, %v625_v12  ;;  %v626_v18 = vsel %vm610_vm5, %v576_v0, %v618_v8  ;;  %3852 = vmatpush.bf16.msra.mxu2 %v8196_v5 }
  0xdf   :  { %v8865_v1 = vld [vmem:[#allocation5 + $0x9e0] sm:$0xf0]  ;;  %v11976_v24 = vpack.c.bf16 %v626_v18, %v626_v18 }
  0xe0   :  { %v11253_v2 = vld [vmem:[#allocation5 + $0xbc4] sm:$0xf]  ;;  %v8868_v19 = vor.u32 %v11189_v63, %v8865_v1  ;;  %v588_v25 = vpop.f32.mrf.mxu2  ;;  %v601_v33 = vpop.f32.mrf.mxu3  ;;  %3841 = vmatpush.bf16.msra.mxu1 %v7876_v14  ;;  %3777 = vmatmul.bf16.vlgmr.msrb.gmra.mxu0 %v11974_v17 }
  0xe1   :  { %v9121_v3 = vld [vmem:[#allocation5 + $0xbe0] sm:$0xf0]  ;;  %v589_v32 = vadd.f32 %v588_v25, %v179_v9  ;;  %v564_v34 = vpop.f32.mrf.mxu0  ;;  %v602_v39 = vadd.f32 %v601_v33, %v180_v13  ;;  %v577_v40 = vpop.f32.mrf.mxu1  ;;  %3790 = vmatmul.bf16.vlgmr.msrb.gmra.mxu1 %v11976_v24 }
  0xe2   :  { %3826 = vmatpush.bf16.msra.mxu0 %v7684_v35  ;;  %v11013_v7 = vld [vmem:[#allocation5 + $0x444] sm:$0xf]  ;;  %v9124_v26 = vor.u32 %v11253_v2, %v9121_v3 }
  0xe3   :  { %v8161_v11 = vld [vmem:[#allocation5 + $0x460] sm:$0xf0]  ;;  %vm611_vm6 = vcmp.gt.f32.partialorder %v589_v32, 0.0  ;;  %v619_v43 = vmul.f32 0.2, %v589_v32  ;;  %vm612_vm7 = vcmp.gt.f32.partialorder %v602_v39, 0.0 }
  0xe4   :  { %v11077_v15 = vld [vmem:[#allocation5 + $0x644] sm:$0xf]  ;;  %v8164_v28 = vor.u32 %v11013_v7, %v8161_v11  ;;  %v620_v46 = vmul.f32 0.2, %v602_v39  ;;  %3886 = vmatpush.bf16.msrb.mxu1 %v9124_v26 }
  0xe5   :  { %v8417_v16 = vld [vmem:[#allocation5 + $0x660] sm:$0xf0]  ;;  %v627_v52 = vsel %vm611_vm6, %v589_v32, %v619_v43 }
  0xe6   :  { %3827 = vmatpush.bf16.msra.mxu0 %v7652_v53  ;;  %v11181_v20 = vld [vmem:[#allocation5 + $0x984] sm:$0xf]  ;;  %v8420_v35 = vor.u32 %v11077_v15, %v8417_v16  ;;  %3853 = vmatpush.bf16.msra.mxu2 %v8164_v28  ;;  %v11980_v56 = vpack.c.bf16 %v627_v52, %v627_v52  ;;  %v628_v58 = vsel %vm612_vm7, %v602_v39, %v620_v46 }
  0xe7   :  { %v8833_v21 = vld [vmem:[#allocation5 + $0x9a0] sm:$0xf0]  ;;  %v11982_v60 = vpack.c.bf16 %v628_v58, %v628_v58 }
  0xe8   :  { %v11245_v23 = vld [vmem:[#allocation5 + $0xb84] sm:$0xf]  ;;  %v8836_v44 = vor.u32 %v11181_v20, %v8833_v21  ;;  %3866 = vmatpush.bf16.msra.mxu3 %v8420_v35  ;;  %v590_v2 = vpop.f32.mrf.mxu2  ;;  %v603_v7 = vpop.f32.mrf.mxu3  ;;  %3803 = vmatmul.bf16.vlgmr.msrb.gmra.mxu2 %v11980_v56 }
  0xe9   :  { %v9089_v29 = vld [vmem:[#allocation5 + $0xba0] sm:$0xf0]  ;;  %3816 = vmatmul.bf16.vlgmr.msrb.gmra.mxu3 %v11982_v60  ;;  %v7847_v2 = vld [vmem:[#allocation5 + $0x1c8] sm:$0xf] }
  0xea   :  { %v11005_v30 = vld [vmem:[#allocation5 + $0x404] sm:$0xf]  ;;  %3828 = vmatpush.bf16.msra.mxu0 %v7620_v10  ;;  %v9092_v47 = vor.u32 %v11245_v23, %v9089_v29 }
  0xeb   :  { %v8129_v31 = vld [vmem:[#allocation5 + $0x420] sm:$0xf0] }
  0xec   :  { %v11069_v36 = vld [vmem:[#allocation5 + $0x604] sm:$0xf]  ;;  %v8132_v48 = vor.u32 %v11005_v30, %v8129_v31  ;;  %3887 = vmatpush.bf16.msrb.mxu1 %v9092_v47 }
  0xed   :  { %v8385_v37 = vld [vmem:[#allocation5 + $0x620] sm:$0xf0] }
  0xee   :  { %v11317_v38 = vld [vmem:[#allocation5 + $0xdc4] sm:$0xf]  ;;  %3873 = vmatpush.bf16.msrb.mxu0 %v8868_v19  ;;  %v8388_v53 = vor.u32 %v11069_v36, %v8385_v37  ;;  %3854 = vmatpush.bf16.msra.mxu2 %v8132_v48 }
  0xef   :  { %v9377_v50 = vld [vmem:[#allocation5 + $0xde0] sm:$0xf0] }
  0xf0   :  { %v11381_v41 = vld [vmem:[#allocation5 + $0xfc4] sm:$0xf]  ;;  %v9380_v59 = vor.u32 %v11317_v38, %v9377_v50  ;;  %3867 = vmatpush.bf16.msra.mxu3 %v8388_v53  ;;  %3829 = vmatmul.bf16.vlgmr.msra.gmra.mxu0 %v11962_v22 }
  0xf1   :  { %v9633_v42 = vld [vmem:[#allocation5 + $0xfe0] sm:$0xf0]  ;;  %3842 = vmatmul.bf16.vlgmr.msra.gmra.mxu1 %v11964_v27 }
  0xf2   :  { %v11173_v45 = vld [vmem:[#allocation5 + $0x944] sm:$0xf]  ;;  %3874 = vmatpush.bf16.msrb.mxu0 %v8836_v44  ;;  %v9636_v61 = vor.u32 %v11381_v41, %v9633_v42  ;;  %3899 = vmatpush.bf16.msrb.mxu2 %v9380_v59 }
  0xf3   :  { %v8801_v51 = vld [vmem:[#allocation5 + $0x960] sm:$0xf0] }
  0xf4   :  { %v11237_v54 = vld [vmem:[#allocation5 + $0xb44] sm:$0xf]  ;;  %v8804_v62 = vor.u32 %v11173_v45, %v8801_v51  ;;  %3912 = vmatpush.bf16.msrb.mxu3 %v9636_v61 }
  0xf5   :  { %v9057_v55 = vld [vmem:[#allocation5 + $0xb60] sm:$0xf0] }
  0xf6   :  { %v11309_v63 = vld [vmem:[#allocation5 + $0xd84] sm:$0xf]  ;;  %v9060_v3 = vor.u32 %v11237_v54, %v9057_v55  ;;  %3875 = vmatpush.bf16.msrb.mxu0 %v8804_v62 }
  0xf7   :  { %v9345_v0 = vld [vmem:[#allocation5 + $0xda0] sm:$0xf0] }
  0xf8   :  { %v11373_v1 = vld [vmem:[#allocation5 + $0xf84] sm:$0xf]  ;;  %v9348_v10 = vor.u32 %v11309_v63, %v9345_v0  ;;  %3888 = vmatpush.bf16.msrb.mxu1 %v9060_v3  ;;  %3855 = vmatmul.bf16.vlgmr.msra.gmra.mxu2 %v11968_v49 }
  0xf9   :  { %v9601_v4 = vld [vmem:[#allocation5 + $0xfa0] sm:$0xf0]  ;;  %3868 = vmatmul.bf16.vlgmr.msra.gmra.mxu3 %v11970_v57 }
  0xfa   :  { %v11165_v5 = vld [vmem:[#allocation5 + $0x904] sm:$0xf]  ;;  %v9604_v11 = vor.u32 %v11373_v1, %v9601_v4  ;;  %3900 = vmatpush.bf16.msrb.mxu2 %v9348_v10  ;;  %v10938_v4 = vld [vmem:[#allocation5 + $0x1e4] sm:$0xf0] }
  0xfb   :  { %v8769_v6 = vld [vmem:[#allocation5 + $0x920] sm:$0xf0] }
  0xfc   :  { %v11229_v8 = vld [vmem:[#allocation5 + $0xb04] sm:$0xf]  ;;  %v8772_v12 = vor.u32 %v11165_v5, %v8769_v6  ;;  %3913 = vmatpush.bf16.msrb.mxu3 %v9604_v11  ;;  %v8103_v5 = vld [vmem:[#allocation5 + $0x3c8] sm:$0xf] }
  0xfd   :  { %v9025_v9 = vld [vmem:[#allocation5 + $0xb20] sm:$0xf0]  ;;  %v11002_v6 = vld [vmem:[#allocation5 + $0x3e4] sm:$0xf0] }
  0xfe   :  { %v11301_v13 = vld [vmem:[#allocation5 + $0xd44] sm:$0xf]  ;;  %v9028_v15 = vor.u32 %v11229_v8, %v9025_v9  ;;  %3876 = vmatpush.bf16.msrb.mxu0 %v8772_v12 }
  0xff   :  { %v9313_v14 = vld [vmem:[#allocation5 + $0xd60] sm:$0xf0] }
 0x100   :  { %v11365_v16 = vld [vmem:[#allocation5 + $0xf44] sm:$0xf]  ;;  %v9316_v25 = vor.u32 %v11301_v13, %v9313_v14  ;;  %3889 = vmatpush.bf16.msrb.mxu1 %v9028_v15  ;;  %v7848_v14 = vor.u32 %v10938_v4, %v7847_v2  ;;  %v8104_v15 = vor.u32 %v11002_v6, %v8103_v5  ;;  %v7719_v2 = vld [vmem:[#allocation5 + $0xc8] sm:$0xf] }
 0x101   :  { %v9569_v18 = vld [vmem:[#allocation5 + $0xf60] sm:$0xf0]  ;;  %v7975_v4 = vld [vmem:[#allocation5 + $0x2c8] sm:$0xf] }
 0x102   :  { %v11157_v19 = vld [vmem:[#allocation5 + $0x8c4] sm:$0xf]  ;;  %v9572_v26 = vor.u32 %v11365_v16, %v9569_v18  ;;  %3901 = vmatpush.bf16.msrb.mxu2 %v9316_v25  ;;  %v7815_v16 = vld [vmem:[#allocation5 + $0x188] sm:$0xf] }
 0x103   :  { %v8737_v20 = vld [vmem:[#allocation5 + $0x8e0] sm:$0xf0]  ;;  %v10970_v5 = vld [vmem:[#allocation5 + $0x2e4] sm:$0xf0] }
 0x104   :  { %v11221_v21 = vld [vmem:[#allocation5 + $0xac4] sm:$0xf]  ;;  %v8740_v30 = vor.u32 %v11157_v19, %v8737_v20  ;;  %3914 = vmatpush.bf16.msrb.mxu3 %v9572_v26  ;;  %v10930_v19 = vld [vmem:[#allocation5 + $0x1a4] sm:$0xf0] }
 0x105   :  { %v8993_v23 = vld [vmem:[#allocation5 + $0xae0] sm:$0xf0]  ;;  %v8071_v20 = vld [vmem:[#allocation5 + $0x388] sm:$0xf] }
 0x106   :  { %v11293_v28 = vld [vmem:[#allocation5 + $0xd04] sm:$0xf]  ;;  %v8996_v31 = vor.u32 %v11221_v21, %v8993_v23  ;;  %3877 = vmatpush.bf16.msrb.mxu0 %v8740_v30  ;;  %v10994_v21 = vld [vmem:[#allocation5 + $0x3a4] sm:$0xf0] }
 0x107   :  { %v9281_v29 = vld [vmem:[#allocation5 + $0xd20] sm:$0xf0]  ;;  %v8359_v30 = vld [vmem:[#allocation5 + $0x5c8] sm:$0xf] }
 0x108   :  { %v11357_v32 = vld [vmem:[#allocation5 + $0xf04] sm:$0xf]  ;;  %v9284_v38 = vor.u32 %v11293_v28, %v9281_v29  ;;  %3890 = vmatpush.bf16.msrb.mxu1 %v8996_v31  ;;  %v11066_v31 = vld [vmem:[#allocation5 + $0x5e4] sm:$0xf0] }
 0x109   :  { %v9537_v33 = vld [vmem:[#allocation5 + $0xf20] sm:$0xf0] }
 0x10a   :  { %v11149_v34 = vld [vmem:[#allocation5 + $0x884] sm:$0xf]  ;;  %v9540_v39 = vor.u32 %v11357_v32, %v9537_v33  ;;  %3902 = vmatpush.bf16.msrb.mxu2 %v9284_v38  ;;  %v7816_v32 = vor.u32 %v10930_v19, %v7815_v16  ;;  %v8072_v33 = vor.u32 %v10994_v21, %v8071_v20  ;;  %v10922_v38 = vld [vmem:[#allocation5 + $0x164] sm:$0xf0] }
 0x10b   :  { %v8705_v35 = vld [vmem:[#allocation5 + $0x8a0] sm:$0xf0]  ;;  %v7943_v16 = vld [vmem:[#allocation5 + $0x288] sm:$0xf] }
 0x10c   :  { %v11213_v36 = vld [vmem:[#allocation5 + $0xa84] sm:$0xf]  ;;  %v8708_v41 = vor.u32 %v11149_v34, %v8705_v35  ;;  %3915 = vmatpush.bf16.msrb.mxu3 %v9540_v39  ;;  %v8615_v34 = vld [vmem:[#allocation5 + $0x7c8] sm:$0xf] }
 0x10d   :  { %v8961_v37 = vld [vmem:[#allocation5 + $0xaa0] sm:$0xf0]  ;;  %v11130_v35 = vld [vmem:[#allocation5 + $0x7e4] sm:$0xf0] }
 0x10e   :  { %v11285_v40 = vld [vmem:[#allocation5 + $0xcc4] sm:$0xf]  ;;  %v8964_v42 = vor.u32 %v11213_v36, %v8961_v37  ;;  %3878 = vmatpush.bf16.msrb.mxu0 %v8708_v41  ;;  %v7783_v36 = vld [vmem:[#allocation5 + $0x148] sm:$0xf]  ;;  %v8360_v41 = vor.u32 %v11066_v31, %v8359_v30 }
 0x10f   :  { %v9249_v50 = vld [vmem:[#allocation5 + $0xce0] sm:$0xf0]  ;;  %v8039_v39 = vld [vmem:[#allocation5 + $0x348] sm:$0xf] }
 0x110   :  { %v11349_v43 = vld [vmem:[#allocation5 + $0xec4] sm:$0xf]  ;;  %v9252_v51 = vor.u32 %v11285_v40, %v9249_v50  ;;  %3891 = vmatpush.bf16.msrb.mxu1 %v8964_v42  ;;  %v10986_v40 = vld [vmem:[#allocation5 + $0x364] sm:$0xf0]  ;;  %v8616_v42 = vor.u32 %v11130_v35, %v8615_v34 }
 0x111   :  { %v9505_v44 = vld [vmem:[#allocation5 + $0xee0] sm:$0xf0]  ;;  %v8231_v21 = vld [vmem:[#allocation5 + $0x4c8] sm:$0xf] }
 0x112   :  { %v11141_v45 = vld [vmem:[#allocation5 + $0x844] sm:$0xf]  ;;  %v9508_v52 = vor.u32 %v11349_v43, %v9505_v44  ;;  %3903 = vmatpush.bf16.msrb.mxu2 %v9252_v51  ;;  %v8327_v43 = vld [vmem:[#allocation5 + $0x588] sm:$0xf] }
 0x113   :  { %v8673_v46 = vld [vmem:[#allocation5 + $0x860] sm:$0xf0]  ;;  %v11058_v44 = vld [vmem:[#allocation5 + $0x5a4] sm:$0xf0] }
 0x114   :  { %v11205_v47 = vld [vmem:[#allocation5 + $0xa44] sm:$0xf]  ;;  %v8676_v58 = vor.u32 %v11141_v45, %v8673_v46  ;;  %3916 = vmatpush.bf16.msrb.mxu3 %v9508_v52  ;;  %v7784_v45 = vor.u32 %v10922_v38, %v7783_v36  ;;  %v8040_v46 = vor.u32 %v10986_v40, %v8039_v39  ;;  %v7751_v51 = vld [vmem:[#allocation5 + $0x108] sm:$0xf] }
 0x115   :  { %v8929_v48 = vld [vmem:[#allocation5 + $0xa60] sm:$0xf0]  ;;  %v10914_v52 = vld [vmem:[#allocation5 + $0x124] sm:$0xf0] }
 0x116   :  { %v11277_v53 = vld [vmem:[#allocation5 + $0xc84] sm:$0xf]  ;;  %v8932_v59 = vor.u32 %v11205_v47, %v8929_v48  ;;  %3879 = vmatpush.bf16.msrb.mxu0 %v8676_v58  ;;  %v8583_v47 = vld [vmem:[#allocation5 + $0x788] sm:$0xf] }
 0x117   :  { %v9217_v54 = vld [vmem:[#allocation5 + $0xca0] sm:$0xf0]  ;;  %v11122_v48 = vld [vmem:[#allocation5 + $0x7a4] sm:$0xf0] }
 0x118   :  { %v11341_v55 = vld [vmem:[#allocation5 + $0xe84] sm:$0xf]  ;;  %v9220_v3 = vor.u32 %v11277_v53, %v9217_v54  ;;  %3892 = vmatpush.bf16.msrb.mxu1 %v8932_v59  ;;  %v8007_v53 = vld [vmem:[#allocation5 + $0x308] sm:$0xf]  ;;  %v8584_v58 = vor.u32 %v11122_v48, %v8583_v47 }
 0x119   :  { %v9473_v61 = vld [vmem:[#allocation5 + $0xea0] sm:$0xf0]  ;;  %v10978_v54 = vld [vmem:[#allocation5 + $0x324] sm:$0xf0] }
 0x11a   :  { %v11133_v62 = vld [vmem:[#allocation5 + $0x804] sm:$0xf]  ;;  %v9476_v7 = vor.u32 %v11341_v55, %v9473_v61  ;;  %3904 = vmatpush.bf16.msrb.mxu2 %v9220_v3  ;;  %v8328_v55 = vor.u32 %v11058_v44, %v8327_v43  ;;  %v8295_v59 = vld [vmem:[#allocation5 + $0x548] sm:$0xf] }
 0x11b   :  { %v8641_v63 = vld [vmem:[#allocation5 + $0x820] sm:$0xf0]  ;;  %v11050_v61 = vld [vmem:[#allocation5 + $0x564] sm:$0xf0] }
 0x11c   :  { %v11197_v0 = vld [vmem:[#allocation5 + $0xa04] sm:$0xf]  ;;  %v8644_v10 = vor.u32 %v11133_v62, %v8641_v63  ;;  %3917 = vmatpush.bf16.msrb.mxu3 %v9476_v7  ;;  %v7752_v62 = vor.u32 %v10914_v52, %v7751_v51  ;;  %v8008_v63 = vor.u32 %v10978_v54, %v8007_v53  ;;  %v10906_v3 = vld [vmem:[#allocation5 + $0xe4] sm:$0xf0]  ;;  %v8296_v6 = vor.u32 %v11050_v61, %v8295_v59 }
 0x11d   :  { %v8897_v1 = vld [vmem:[#allocation5 + $0xa20] sm:$0xf0]  ;;  %v7655_v30 = vld [vmem:[#allocation5 + $0x48] sm:$0xf] }
 0x11e   :  { %v11269_v8 = vld [vmem:[#allocation5 + $0xc44] sm:$0xf]  ;;  %v8900_v11 = vor.u32 %v11197_v0, %v8897_v1  ;;  %3880 = vmatpush.bf16.msrb.mxu0 %v8644_v10  ;;  %v8551_v0 = vld [vmem:[#allocation5 + $0x748] sm:$0xf]  ;;  %v7720_v10 = vor.u32 %v10906_v3, %v7719_v2 }
 0x11f   :  { %v9185_v9 = vld [vmem:[#allocation5 + $0xc60] sm:$0xf0]  ;;  %v11114_v1 = vld [vmem:[#allocation5 + $0x764] sm:$0xf0] }
 0x120   :  { %v11333_v12 = vld [vmem:[#allocation5 + $0xe44] sm:$0xf]  ;;  %v9188_v18 = vor.u32 %v11269_v8, %v9185_v9  ;;  %3893 = vmatpush.bf16.msrb.mxu1 %v8900_v11  ;;  %v8552_v7 = vor.u32 %v11114_v1, %v8551_v0  ;;  %v8263_v8 = vld [vmem:[#allocation5 + $0x508] sm:$0xf]  ;;  %v7976_v11 = vor.u32 %v10970_v5, %v7975_v4 }
 0x121   :  { %v9441_v13 = vld [vmem:[#allocation5 + $0xe60] sm:$0xf0]  ;;  %3881 = vmatmul.bf16.vlgmr.msrb.gmra.mxu0 %v11974_v17  ;;  %v11042_v9 = vld [vmem:[#allocation5 + $0x524] sm:$0xf0] }
 0x122   :  { %v9444_v23 = vor.u32 %v11333_v12, %v9441_v13  ;;  %v11261_v25 = vld [vmem:[#allocation5 + $0xc04] sm:$0xf]  ;;  %3925 = vmatpush.bf16.msra.mxu0 %v7848_v14  ;;  %3905 = vmatpush.bf16.msrb.mxu2 %v9188_v18  ;;  %v8519_v12 = vld [vmem:[#allocation5 + $0x708] sm:$0xf]  ;;  %v8264_v19 = vor.u32 %v11042_v9, %v8263_v8 }
 0x123   :  { %v9153_v26 = vld [vmem:[#allocation5 + $0xc20] sm:$0xf0]  ;;  %3894 = vmatmul.bf16.vlgmr.msrb.gmra.mxu1 %v11976_v24  ;;  %v11106_v13 = vld [vmem:[#allocation5 + $0x724] sm:$0xf0] }
 0x124   :  { %v11325_v28 = vld [vmem:[#allocation5 + $0xe04] sm:$0xf]  ;;  %3938 = vmatpush.bf16.msra.mxu1 %v8104_v15  ;;  %v9156_v37 = vor.u32 %v11261_v25, %v9153_v26  ;;  %3918 = vmatpush.bf16.msrb.mxu3 %v9444_v23  ;;  %v7687_v14 = vld [vmem:[#allocation5 + $0x88] sm:$0xf]  ;;  %v8520_v20 = vor.u32 %v11106_v13, %v8519_v12 }
 0x125   :  { %v9409_v29 = vld [vmem:[#allocation5 + $0xe20] sm:$0xf0]  ;;  %v10898_v15 = vld [vmem:[#allocation5 + $0xa4] sm:$0xf0] }
 0x126   :  { %v9412_v50 = vor.u32 %v11325_v28, %v9409_v29  ;;  %3926 = vmatpush.bf16.msra.mxu0 %v7816_v32  ;;  %3906 = vmatpush.bf16.msrb.mxu2 %v9156_v37  ;;  %v10962_v18 = vld [vmem:[#allocation5 + $0x2a4] sm:$0xf0]  ;;  %v7688_v25 = vor.u32 %v10898_v15, %v7687_v14 }
 0x127   :  { %v11034_v23 = vld [vmem:[#allocation5 + $0x4e4] sm:$0xf0]  ;;  %v7944_v26 = vor.u32 %v10962_v18, %v7943_v16 }
 0x128   :  { %3939 = vmatpush.bf16.msra.mxu1 %v8072_v33  ;;  %3919 = vmatpush.bf16.msrb.mxu3 %v9412_v50  ;;  %v8487_v28 = vld [vmem:[#allocation5 + $0x6c8] sm:$0xf]  ;;  %v8232_v34 = vor.u32 %v11034_v23, %v8231_v21 }
 0x129   :  { %3907 = vmatmul.bf16.vlgmr.msrb.gmra.mxu2 %v11980_v56  ;;  %v11098_v29 = vld [vmem:[#allocation5 + $0x6e4] sm:$0xf0] }
 0x12a   :  { %3951 = vmatpush.bf16.msra.mxu2 %v8360_v41  ;;  %3927 = vmatpush.bf16.msra.mxu0 %v7784_v45  ;;  %v10890_v31 = vld [vmem:[#allocation5 + $0x64] sm:$0xf0]  ;;  %v8488_v35 = vor.u32 %v11098_v29, %v8487_v28 }
 0x12b   :  { %3920 = vmatmul.bf16.vlgmr.msrb.gmra.mxu3 %v11982_v60  ;;  %v7911_v32 = vld [vmem:[#allocation5 + $0x248] sm:$0xf]  ;;  %v7656_v39 = vor.u32 %v10890_v31, %v7655_v30 }
 0x12c   :  { %3964 = vmatpush.bf16.msra.mxu3 %v8616_v42  ;;  %3940 = vmatpush.bf16.msra.mxu1 %v8040_v46  ;;  %v10954_v33 = vld [vmem:[#allocation5 + $0x264] sm:$0xf0] }
 0x12d   :  { %v8199_v36 = vld [vmem:[#allocation5 + $0x488] sm:$0xf]  ;;  %v7912_v40 = vor.u32 %v10954_v33, %v7911_v32 }
 0x12e   :  { %3952 = vmatpush.bf16.msra.mxu2 %v8328_v55  ;;  %3928 = vmatpush.bf16.msra.mxu0 %v7752_v62  ;;  %v11026_v37 = vld [vmem:[#allocation5 + $0x4a4] sm:$0xf0] }
 0x12f   :  { %v8455_v38 = vld [vmem:[#allocation5 + $0x688] sm:$0xf]  ;;  %v8200_v46 = vor.u32 %v11026_v37, %v8199_v36 }
 0x130   :  { %3965 = vmatpush.bf16.msra.mxu3 %v8584_v58  ;;  %3941 = vmatpush.bf16.msra.mxu1 %v8008_v63  ;;  %v11090_v50 = vld [vmem:[#allocation5 + $0x6a4] sm:$0xf0] }
 0x131   :  { %v7623_v41 = vld [vmem:[#allocation5 + $0x8] sm:$0xf]  ;;  %v8456_v52 = vor.u32 %v11090_v50, %v8455_v38 }
 0x132   :  { %3953 = vmatpush.bf16.msra.mxu2 %v8296_v6  ;;  %3929 = vmatpush.bf16.msra.mxu0 %v7720_v10  ;;  %v10882_v42 = vld [vmem:[#allocation5 + $0x24] sm:$0xf0] }
 0x133   :  { %v7879_v43 = vld [vmem:[#allocation5 + $0x208] sm:$0xf]  ;;  %v7624_v55 = vor.u32 %v10882_v42, %v7623_v41 }
 0x134   :  { %3966 = vmatpush.bf16.msra.mxu3 %v8552_v7  ;;  %3942 = vmatpush.bf16.msra.mxu1 %v7976_v11  ;;  %v10946_v44 = vld [vmem:[#allocation5 + $0x224] sm:$0xf0] }
 0x135   :  { %v8871_v45 = vld [vmem:[#allocation5 + $0x9c8] sm:$0xf]  ;;  %v7880_v58 = vor.u32 %v10946_v44, %v7879_v43 }
 0x136   :  { %3954 = vmatpush.bf16.msra.mxu2 %v8264_v19  ;;  %3930 = vmatpush.bf16.msra.mxu0 %v7688_v25  ;;  %v11194_v47 = vld [vmem:[#allocation5 + $0x9e4] sm:$0xf0] }
 0x137   :  { %v9127_v48 = vld [vmem:[#allocation5 + $0xbc8] sm:$0xf]  ;;  %v8872_v62 = vor.u32 %v11194_v47, %v8871_v45 }
 0x138   :  { %3967 = vmatpush.bf16.msra.mxu3 %v8520_v20  ;;  %3943 = vmatpush.bf16.msra.mxu1 %v7944_v26  ;;  %v11258_v51 = vld [vmem:[#allocation5 + $0xbe4] sm:$0xf0] }
 0x139   :  { %v8167_v53 = vld [vmem:[#allocation5 + $0x448] sm:$0xf]  ;;  %v9128_v63 = vor.u32 %v11258_v51, %v9127_v48 }
 0x13a   :  { %3955 = vmatpush.bf16.msra.mxu2 %v8232_v34  ;;  %v11018_v54 = vld [vmem:[#allocation5 + $0x464] sm:$0xf0]  ;;  %3931 = vmatpush.bf16.msra.mxu0 %v7656_v39 }
 0x13b   :  { %v8423_v59 = vld [vmem:[#allocation5 + $0x648] sm:$0xf]  ;;  %v8168_v1 = vor.u32 %v11018_v54, %v8167_v53 }
 0x13c   :  { %3968 = vmatpush.bf16.msra.mxu3 %v8488_v35  ;;  %3944 = vmatpush.bf16.msra.mxu1 %v7912_v40  ;;  %v11082_v61 = vld [vmem:[#allocation5 + $0x664] sm:$0xf0] }
 0x13d   :  { %v8839_v0 = vld [vmem:[#allocation5 + $0x988] sm:$0xf]  ;;  %v8424_v5 = vor.u32 %v11082_v61, %v8423_v59 }
 0x13e   :  { %3956 = vmatpush.bf16.msra.mxu2 %v8200_v46  ;;  %v11186_v2 = vld [vmem:[#allocation5 + $0x9a4] sm:$0xf0]  ;;  %3932 = vmatpush.bf16.msra.mxu0 %v7624_v55 }
 0x13f   :  { %v9095_v3 = vld [vmem:[#allocation5 + $0xb88] sm:$0xf]  ;;  %v8840_v12 = vor.u32 %v11186_v2, %v8839_v0 }
 0x140   :  { %v11250_v4 = vld [vmem:[#allocation5 + $0xba4] sm:$0xf0]  ;;  %3969 = vmatpush.bf16.msra.mxu3 %v8456_v52  ;;  %3945 = vmatpush.bf16.msra.mxu1 %v7880_v58 }
 0x141   :  { %v8135_v6 = vld [vmem:[#allocation5 + $0x408] sm:$0xf]  ;;  %v9096_v13 = vor.u32 %v11250_v4, %v9095_v3  ;;  %3933 = vmatmul.bf16.vlgmr.msra.gmra.mxu0 %v11962_v22 }
 0x142   :  { %v11010_v7 = vld [vmem:[#allocation5 + $0x424] sm:$0xf0]  ;;  %3977 = vmatpush.bf16.msrb.mxu0 %v8872_v62  ;;  %3957 = vmatpush.bf16.msra.mxu2 %v8168_v1 }
 0x143   :  { %v8391_v8 = vld [vmem:[#allocation5 + $0x608] sm:$0xf]  ;;  %v8136_v16 = vor.u32 %v11010_v7, %v8135_v6  ;;  %3946 = vmatmul.bf16.vlgmr.msra.gmra.mxu1 %v11964_v27 }
 0x144   :  { %v11074_v9 = vld [vmem:[#allocation5 + $0x624] sm:$0xf0]  ;;  %3990 = vmatpush.bf16.msrb.mxu1 %v9128_v63  ;;  %3970 = vmatpush.bf16.msra.mxu3 %v8424_v5 }
 0x145   :  { %v9383_v10 = vld [vmem:[#allocation5 + $0xdc8] sm:$0xf]  ;;  %v8392_v20 = vor.u32 %v11074_v9, %v8391_v8 }
 0x146   :  { %v11322_v11 = vld [vmem:[#allocation5 + $0xde4] sm:$0xf0]  ;;  %3978 = vmatpush.bf16.msrb.mxu0 %v8840_v12  ;;  %3958 = vmatpush.bf16.msra.mxu2 %v8136_v16 }
 0x147   :  { %v9639_v14 = vld [vmem:[#allocation5 + $0xfc8] sm:$0xf]  ;;  %v9384_v21 = vor.u32 %v11322_v11, %v9383_v10 }
 0x148   :  { %v11386_v15 = vld [vmem:[#allocation5 + $0xfe4] sm:$0xf0]  ;;  %3991 = vmatpush.bf16.msrb.mxu1 %v9096_v13  ;;  %3971 = vmatpush.bf16.msra.mxu3 %v8392_v20 }
 0x149   :  { %v8807_v18 = vld [vmem:[#allocation5 + $0x948] sm:$0xf]  ;;  %v9640_v26 = vor.u32 %v11386_v15, %v9639_v14  ;;  %3959 = vmatmul.bf16.vlgmr.msra.gmra.mxu2 %v11968_v49 }
 0x14a   :  { %v11178_v19 = vld [vmem:[#allocation5 + $0x964] sm:$0xf0]  ;;  %4003 = vmatpush.bf16.msrb.mxu2 %v9384_v21 }
 0x14b   :  { %v9063_v23 = vld [vmem:[#allocation5 + $0xb48] sm:$0xf]  ;;  %v8808_v30 = vor.u32 %v11178_v19, %v8807_v18  ;;  %3972 = vmatmul.bf16.vlgmr.msra.gmra.mxu3 %v11970_v57 }
 0x14c   :  { %v11242_v25 = vld [vmem:[#allocation5 + $0xb64] sm:$0xf0]  ;;  %4016 = vmatpush.bf16.msrb.mxu3 %v9640_v26 }
 0x14d   :  { %v9351_v28 = vld [vmem:[#allocation5 + $0xd88] sm:$0xf]  ;;  %v9064_v33 = vor.u32 %v11242_v25, %v9063_v23  ;;  %3979 = vmatpush.bf16.msrb.mxu0 %v8808_v30 }
 0x14e   :  { %v11314_v29 = vld [vmem:[#allocation5 + $0xda4] sm:$0xf0] }
 0x14f   :  { %v9607_v31 = vld [vmem:[#allocation5 + $0xf88] sm:$0xf]  ;;  %v9352_v36 = vor.u32 %v11314_v29, %v9351_v28  ;;  %3992 = vmatpush.bf16.msrb.mxu1 %v9064_v33  ;;  %v10998_v33 = vld [vmem:[#allocation5 + $0x3cc] sm:$0xf] }
 0x150   :  { %v11378_v32 = vld [vmem:[#allocation5 + $0xfa4] sm:$0xf0] }
 0x151   :  { %v8775_v34 = vld [vmem:[#allocation5 + $0x908] sm:$0xf]  ;;  %v9608_v39 = vor.u32 %v11378_v32, %v9607_v31  ;;  %4004 = vmatpush.bf16.msrb.mxu2 %v9352_v36  ;;  %v10934_v31 = vld [vmem:[#allocation5 + $0x1cc] sm:$0xf] }
 0x152   :  { %v11170_v35 = vld [vmem:[#allocation5 + $0x924] sm:$0xf0]  ;;  %v7849_v32 = vld [vmem:[#allocation5 + $0x1e8] sm:$0xf0] }
 0x153   :  { %v9031_v37 = vld [vmem:[#allocation5 + $0xb08] sm:$0xf]  ;;  %v8776_v41 = vor.u32 %v11170_v35, %v8775_v34  ;;  %4017 = vmatpush.bf16.msrb.mxu3 %v9608_v39  ;;  %v8105_v35 = vld [vmem:[#allocation5 + $0x3e8] sm:$0xf0] }
 0x154   :  { %v11234_v38 = vld [vmem:[#allocation5 + $0xb24] sm:$0xf0] }
 0x155   :  { %v9319_v40 = vld [vmem:[#allocation5 + $0xd48] sm:$0xf]  ;;  %v9032_v44 = vor.u32 %v11234_v38, %v9031_v37  ;;  %3980 = vmatpush.bf16.msrb.mxu0 %v8776_v41  ;;  %v7852_v41 = vor.u32 %v10934_v31, %v7849_v32  ;;  %v11110_v32 = vld [vmem:[#allocation5 + $0x74c] sm:$0xf] }
 0x156   :  { %v11306_v50 = vld [vmem:[#allocation5 + $0xd64] sm:$0xf0] }
 0x157   :  { %v9575_v42 = vld [vmem:[#allocation5 + $0xf48] sm:$0xf]  ;;  %v9320_v47 = vor.u32 %v11306_v50, %v9319_v40  ;;  %3993 = vmatpush.bf16.msrb.mxu1 %v9032_v44 }
 0x158   :  { %v11370_v43 = vld [vmem:[#allocation5 + $0xf64] sm:$0xf0] }
 0x159   :  { %v8743_v45 = vld [vmem:[#allocation5 + $0x8c8] sm:$0xf]  ;;  %v9576_v52 = vor.u32 %v11370_v43, %v9575_v42  ;;  %4005 = vmatpush.bf16.msrb.mxu2 %v9320_v47  ;;  %v10926_v42 = vld [vmem:[#allocation5 + $0x18c] sm:$0xf]  ;;  %v8108_v43 = vor.u32 %v10998_v33, %v8105_v35 }
 0x15a   :  { %v11162_v46 = vld [vmem:[#allocation5 + $0x8e4] sm:$0xf0]  ;;  %v8073_v47 = vld [vmem:[#allocation5 + $0x3a8] sm:$0xf0] }
 0x15b   :  { %v8999_v48 = vld [vmem:[#allocation5 + $0xac8] sm:$0xf]  ;;  %v8744_v55 = vor.u32 %v11162_v46, %v8743_v45  ;;  %4018 = vmatpush.bf16.msrb.mxu3 %v9576_v52  ;;  %v7817_v45 = vld [vmem:[#allocation5 + $0x1a8] sm:$0xf0] }
 0x15c   :  { %v11226_v51 = vld [vmem:[#allocation5 + $0xae4] sm:$0xf0]  ;;  %v10990_v46 = vld [vmem:[#allocation5 + $0x38c] sm:$0xf] }
 0x15d   :  { %v9287_v53 = vld [vmem:[#allocation5 + $0xd08] sm:$0xf]  ;;  %v9000_v61 = vor.u32 %v11226_v51, %v8999_v48  ;;  %3981 = vmatpush.bf16.msrb.mxu0 %v8744_v55  ;;  %v11062_v55 = vld [vmem:[#allocation5 + $0x5cc] sm:$0xf] }
 0x15e   :  { %v11298_v54 = vld [vmem:[#allocation5 + $0xd24] sm:$0xf0]  ;;  %v8553_v33 = vld [vmem:[#allocation5 + $0x768] sm:$0xf0] }
 0x15f   :  { %v9543_v58 = vld [vmem:[#allocation5 + $0xf08] sm:$0xf]  ;;  %v9288_v0 = vor.u32 %v11298_v54, %v9287_v53  ;;  %3994 = vmatpush.bf16.msrb.mxu1 %v9000_v61  ;;  %v11126_v61 = vld [vmem:[#allocation5 + $0x7cc] sm:$0xf] }
 0x160   :  { %v11362_v59 = vld [vmem:[#allocation5 + $0xf24] sm:$0xf0] }
 0x161   :  { %v8711_v62 = vld [vmem:[#allocation5 + $0x888] sm:$0xf]  ;;  %v9544_v3 = vor.u32 %v11362_v59, %v9543_v58  ;;  %4006 = vmatpush.bf16.msrb.mxu2 %v9288_v0  ;;  %v8361_v58 = vld [vmem:[#allocation5 + $0x5e8] sm:$0xf0]  ;;  %v7820_v59 = vor.u32 %v10926_v42, %v7817_v45 }
 0x162   :  { %v11154_v63 = vld [vmem:[#allocation5 + $0x8a4] sm:$0xf0]  ;;  %v8265_v42 = vld [vmem:[#allocation5 + $0x528] sm:$0xf0] }
 0x163   :  { %v8967_v1 = vld [vmem:[#allocation5 + $0xa88] sm:$0xf]  ;;  %v8712_v6 = vor.u32 %v11154_v63, %v8711_v62  ;;  %4019 = vmatpush.bf16.msrb.mxu3 %v9544_v3  ;;  %v8617_v62 = vld [vmem:[#allocation5 + $0x7e8] sm:$0xf0]  ;;  %v8076_v63 = vor.u32 %v10990_v46, %v8073_v47 }
 0x164   :  { %v11218_v2 = vld [vmem:[#allocation5 + $0xaa4] sm:$0xf0]  ;;  %v8521_v45 = vld [vmem:[#allocation5 + $0x728] sm:$0xf0] }
 0x165   :  { %v9255_v4 = vld [vmem:[#allocation5 + $0xcc8] sm:$0xf]  ;;  %v8968_v9 = vor.u32 %v11218_v2, %v8967_v1  ;;  %3982 = vmatpush.bf16.msrb.mxu0 %v8712_v6  ;;  %v10918_v1 = vld [vmem:[#allocation5 + $0x14c] sm:$0xf] }
 0x166   :  { %v11290_v5 = vld [vmem:[#allocation5 + $0xce4] sm:$0xf0]  ;;  %v7785_v2 = vld [vmem:[#allocation5 + $0x168] sm:$0xf0] }
 0x167   :  { %v9511_v7 = vld [vmem:[#allocation5 + $0xec8] sm:$0xf]  ;;  %v9256_v12 = vor.u32 %v11290_v5, %v9255_v4  ;;  %3995 = vmatpush.bf16.msrb.mxu1 %v8968_v9  ;;  %v8364_v4 = vor.u32 %v11062_v55, %v8361_v58  ;;  %v10982_v5 = vld [vmem:[#allocation5 + $0x34c] sm:$0xf] }
 0x168   :  { %v11354_v8 = vld [vmem:[#allocation5 + $0xee4] sm:$0xf0]  ;;  %v8041_v6 = vld [vmem:[#allocation5 + $0x368] sm:$0xf0] }
 0x169   :  { %v8679_v10 = vld [vmem:[#allocation5 + $0x848] sm:$0xf]  ;;  %v9512_v15 = vor.u32 %v11354_v8, %v9511_v7  ;;  %4007 = vmatpush.bf16.msrb.mxu2 %v9256_v12  ;;  %v8620_v7 = vor.u32 %v11126_v61, %v8617_v62  ;;  %v11716_v8 = vld [vmem:[#allocation10] sm:$0xff]  ;;  %v7788_v12 = vor.u32 %v10918_v1, %v7785_v2  ;;  %v10894_v47 = vld [vmem:[#allocation5 + $0x8c] sm:$0xf] }
 0x16a   :  { %v11146_v11 = vld [vmem:[#allocation5 + $0x864] sm:$0xf0]  ;;  %v1149_v9 = vperm.slane %v11716_v8, 1  ;;  %v8233_v61 = vld [vmem:[#allocation5 + $0x4e8] sm:$0xf0] }
 0x16b   :  { %v8935_v13 = vld [vmem:[#allocation5 + $0xa48] sm:$0xf]  ;;  %v8680_v19 = vor.u32 %v11146_v11, %v8679_v10  ;;  %4020 = vmatpush.bf16.msrb.mxu3 %v9512_v15  ;;  %v11054_v10 = vld [vmem:[#allocation5 + $0x58c] sm:$0xf]  ;;  %v8044_v15 = vor.u32 %v10982_v5, %v8041_v6 }
 0x16c   :  { %v11210_v14 = vld [vmem:[#allocation5 + $0xa64] sm:$0xf0]  ;;  %v8329_v11 = vld [vmem:[#allocation5 + $0x5a8] sm:$0xf0] }
 0x16d   :  { %v9223_v16 = vld [vmem:[#allocation5 + $0xc88] sm:$0xf]  ;;  %v8936_v25 = vor.u32 %v11210_v14, %v8935_v13  ;;  %3983 = vmatpush.bf16.msrb.mxu0 %v8680_v19  ;;  %v11118_v13 = vld [vmem:[#allocation5 + $0x78c] sm:$0xf]  ;;  %v3726_v19 = vpop.f32.mrf.mxu0 }
 0x16e   :  { %v11282_v18 = vld [vmem:[#allocation5 + $0xca4] sm:$0xf0]  ;;  %v8585_v14 = vld [vmem:[#allocation5 + $0x7a8] sm:$0xf0] }
 0x16f   :  { %v9479_v20 = vld [vmem:[#allocation5 + $0xe88] sm:$0xf]  ;;  %v9224_v30 = vor.u32 %v11282_v18, %v9223_v16  ;;  %3996 = vmatpush.bf16.msrb.mxu1 %v8936_v25  ;;  %v10910_v16 = vld [vmem:[#allocation5 + $0x10c] sm:$0xf]  ;;  %v3727_v25 = vadd.f32 %v3726_v19, %v1149_v9 }
 0x170   :  { %v11346_v21 = vld [vmem:[#allocation5 + $0xea4] sm:$0xf0]  ;;  %v7753_v18 = vld [vmem:[#allocation5 + $0x128] sm:$0xf0] }
 0x171   :  { %v8647_v23 = vld [vmem:[#allocation5 + $0x808] sm:$0xf]  ;;  %v9480_v34 = vor.u32 %v11346_v21, %v9479_v20  ;;  %4008 = vmatpush.bf16.msrb.mxu2 %v9224_v30  ;;  %v8332_v20 = vor.u32 %v11054_v10, %v8329_v11  ;;  %v10974_v21 = vld [vmem:[#allocation5 + $0x30c] sm:$0xf]  ;;  %v7756_v31 = vor.u32 %v10910_v16, %v7753_v18 }
 0x172   :  { %v11138_v26 = vld [vmem:[#allocation5 + $0x824] sm:$0xf0]  ;;  %v8297_v30 = vld [vmem:[#allocation5 + $0x568] sm:$0xf0] }
 0x173   :  { %v8903_v28 = vld [vmem:[#allocation5 + $0xa08] sm:$0xf]  ;;  %v8648_v38 = vor.u32 %v11138_v26, %v8647_v23  ;;  %4021 = vmatpush.bf16.msrb.mxu3 %v9480_v34  ;;  %v8009_v23 = vld [vmem:[#allocation5 + $0x328] sm:$0xf0]  ;;  %v3739_v26 = vpop.f32.mrf.mxu1 }
 0x174   :  { %v11202_v29 = vld [vmem:[#allocation5 + $0xa24] sm:$0xf0]  ;;  %v3740_v34 = vadd.f32 %v3739_v26, %v3727_v25  ;;  %v8012_v35 = vor.u32 %v10974_v21, %v8009_v23  ;;  %v10886_v2 = vld [vmem:[#allocation5 + $0x4c] sm:$0xf] }
 0x175   :  { %v9191_v36 = vld [vmem:[#allocation5 + $0xc48] sm:$0xf]  ;;  %v8904_v50 = vor.u32 %v11202_v29, %v8903_v28  ;;  %3984 = vmatpush.bf16.msrb.mxu0 %v8648_v38  ;;  %v8588_v28 = vor.u32 %v11118_v13, %v8585_v14  ;;  %v11046_v29 = vld [vmem:[#allocation5 + $0x54c] sm:$0xf] }
 0x176   :  { %v11274_v37 = vld [vmem:[#allocation5 + $0xc64] sm:$0xf0]  ;;  %v8300_v38 = vor.u32 %v11046_v29, %v8297_v30  ;;  %v10950_v5 = vld [vmem:[#allocation5 + $0x24c] sm:$0xf] }
 0x177   :  { %v9447_v39 = vld [vmem:[#allocation5 + $0xe48] sm:$0xf]  ;;  %v9192_v44 = vor.u32 %v11274_v37, %v9191_v36  ;;  %3997 = vmatpush.bf16.msrb.mxu1 %v8904_v50  ;;  %v10902_v36 = vld [vmem:[#allocation5 + $0xcc] sm:$0xf]  ;;  %v8556_v50 = vor.u32 %v11110_v32, %v8553_v33 }
 0x178   :  { %v11338_v40 = vld [vmem:[#allocation5 + $0xe64] sm:$0xf0]  ;;  %3985 = vmatmul.bf16.vlgmr.msrb.gmra.mxu0 %v11974_v17  ;;  %v7721_v37 = vld [vmem:[#allocation5 + $0xe8] sm:$0xf0] }
 0x179   :  { %v9448_v48 = vor.u32 %v11338_v40, %v9447_v39  ;;  %v9159_v51 = vld [vmem:[#allocation5 + $0xc08] sm:$0xf]  ;;  %4029 = vmatpush.bf16.msra.mxu0 %v7852_v41  ;;  %4009 = vmatpush.bf16.msrb.mxu2 %v9192_v44  ;;  %v10966_v39 = vld [vmem:[#allocation5 + $0x2cc] sm:$0xf] }
 0x17a   :  { %v11266_v52 = vld [vmem:[#allocation5 + $0xc24] sm:$0xf0]  ;;  %3998 = vmatmul.bf16.vlgmr.msrb.gmra.mxu1 %v11976_v24  ;;  %v7977_v40 = vld [vmem:[#allocation5 + $0x2e8] sm:$0xf0] }
 0x17b   :  { %v9415_v53 = vld [vmem:[#allocation5 + $0xe08] sm:$0xf]  ;;  %4042 = vmatpush.bf16.msra.mxu1 %v8108_v43  ;;  %v9160_v0 = vor.u32 %v11266_v52, %v9159_v51  ;;  %4022 = vmatpush.bf16.msrb.mxu3 %v9448_v48  ;;  %v11038_v41 = vld [vmem:[#allocation5 + $0x50c] sm:$0xf]  ;;  %v7724_v43 = vor.u32 %v10902_v36, %v7721_v37  ;;  %v7980_v46 = vor.u32 %v10966_v39, %v7977_v40  ;;  %v3728_v51 = vpop.f32.mrf.mxu0  ;;  %v3741_v55 = vpop.f32.mrf.mxu1 }
 0x17c   :  { %v11330_v54 = vld [vmem:[#allocation5 + $0xe24] sm:$0xf0]  ;;  %v11102_v44 = vld [vmem:[#allocation5 + $0x70c] sm:$0xf]  ;;  %v8268_v52 = vor.u32 %v11038_v41, %v8265_v42 }
 0x17d   :  { %v9416_v3 = vor.u32 %v11330_v54, %v9415_v53  ;;  %4030 = vmatpush.bf16.msra.mxu0 %v7820_v59  ;;  %4010 = vmatpush.bf16.msrb.mxu2 %v9160_v0  ;;  %v7689_v48 = vld [vmem:[#allocation5 + $0xa8] sm:$0xf0]  ;;  %v8524_v58 = vor.u32 %v11102_v44, %v8521_v45 }
 0x17e   :  { %v10958_v53 = vld [vmem:[#allocation5 + $0x28c] sm:$0xf]  ;;  %v7692_v62 = vor.u32 %v10894_v47, %v7689_v48 }
 0x17f   :  { %4043 = vmatpush.bf16.msra.mxu1 %v8076_v63  ;;  %4023 = vmatpush.bf16.msrb.mxu3 %v9416_v3  ;;  %v7945_v54 = vld [vmem:[#allocation5 + $0x2a8] sm:$0xf0] }
 0x180   :  { %4011 = vmatmul.bf16.vlgmr.msrb.gmra.mxu2 %v11980_v56  ;;  %v11030_v59 = vld [vmem:[#allocation5 + $0x4cc] sm:$0xf]  ;;  %v7948_v1 = vor.u32 %v10958_v53, %v7945_v54 }
 0x181   :  { %4055 = vmatpush.bf16.msra.mxu2 %v8364_v4  ;;  %4031 = vmatpush.bf16.msra.mxu0 %v7788_v12  ;;  %v11094_v63 = vld [vmem:[#allocation5 + $0x6cc] sm:$0xf]  ;;  %v8236_v4 = vor.u32 %v11030_v59, %v8233_v61  ;;  %v3765_v12 = vpop.f32.mrf.mxu3 }
 0x182   :  { %4024 = vmatmul.bf16.vlgmr.msrb.gmra.mxu3 %v11982_v60  ;;  %v8489_v0 = vld [vmem:[#allocation5 + $0x6e8] sm:$0xf0] }
 0x183   :  { %4068 = vmatpush.bf16.msra.mxu3 %v8620_v7  ;;  %4044 = vmatpush.bf16.msra.mxu1 %v8044_v15  ;;  %v7657_v3 = vld [vmem:[#allocation5 + $0x68] sm:$0xf0]  ;;  %v3752_v7 = vpop.f32.mrf.mxu2  ;;  %v8492_v8 = vor.u32 %v11094_v63, %v8489_v0 }
 0x184   :  { %v7913_v6 = vld [vmem:[#allocation5 + $0x268] sm:$0xf0]  ;;  %v3753_v11 = vadd.f32 %v3752_v7, %v3740_v34  ;;  %v7660_v13 = vor.u32 %v10886_v2, %v7657_v3 }
 0x185   :  { %4056 = vmatpush.bf16.msra.mxu2 %v8332_v20  ;;  %4032 = vmatpush.bf16.msra.mxu0 %v7756_v31  ;;  %v11022_v9 = vld [vmem:[#allocation5 + $0x48c] sm:$0xf]  ;;  %v7916_v18 = vor.u32 %v10950_v5, %v7913_v6 }
 0x186   :  { %v8201_v10 = vld [vmem:[#allocation5 + $0x4a8] sm:$0xf0]  ;;  %v12002_v23 = vadd.f32 %v3765_v12, %v3753_v11 }
 0x187   :  { %4069 = vmatpush.bf16.msra.mxu3 %v8588_v28  ;;  %4045 = vmatpush.bf16.msra.mxu1 %v8012_v35  ;;  %v11086_v14 = vld [vmem:[#allocation5 + $0x68c] sm:$0xf]  ;;  %v8204_v25 = vor.u32 %v11022_v9, %v8201_v10 }
 0x188   :  { %v8457_v15 = vld [vmem:[#allocation5 + $0x6a8] sm:$0xf0] }
 0x189   :  { %4057 = vmatpush.bf16.msra.mxu2 %v8300_v38  ;;  %4033 = vmatpush.bf16.msra.mxu0 %v7724_v43  ;;  %v10878_v16 = vld [vmem:[#allocation5 + $0xc] sm:$0xf]  ;;  %v8460_v30 = vor.u32 %v11086_v14, %v8457_v15  ;;  %v3767_v51 = vpop.f32.mrf.mxu3 }
 0x18a   :  { %v7625_v19 = vld [vmem:[#allocation5 + $0x28] sm:$0xf0] }
 0x18b   :  { %4070 = vmatpush.bf16.msra.mxu3 %v8556_v50  ;;  %4046 = vmatpush.bf16.msra.mxu1 %v7980_v46  ;;  %v10942_v20 = vld [vmem:[#allocation5 + $0x20c] sm:$0xf]  ;;  %v7628_v34 = vor.u32 %v10878_v16, %v7625_v19  ;;  %v3754_v44 = vpop.f32.mrf.mxu2 }
 0x18c   :  { %v7881_v21 = vld [vmem:[#allocation5 + $0x228] sm:$0xf0] }
 0x18d   :  { %4058 = vmatpush.bf16.msra.mxu2 %v8268_v52  ;;  %4034 = vmatpush.bf16.msra.mxu0 %v7692_v62  ;;  %v11190_v26 = vld [vmem:[#allocation5 + $0x9cc] sm:$0xf]  ;;  %v7884_v37 = vor.u32 %v10942_v20, %v7881_v21 }
 0x18e   :  { %v8873_v28 = vld [vmem:[#allocation5 + $0x9e8] sm:$0xf0] }
 0x18f   :  { %4071 = vmatpush.bf16.msra.mxu3 %v8524_v58  ;;  %4047 = vmatpush.bf16.msra.mxu1 %v7948_v1  ;;  %v11254_v29 = vld [vmem:[#allocation5 + $0xbcc] sm:$0xf]  ;;  %v8876_v38 = vor.u32 %v11190_v26, %v8873_v28  ;;  %v3791_v26 = vpop.f32.mrf.mxu1 }
 0x190   :  { %v9129_v31 = vld [vmem:[#allocation5 + $0xbe8] sm:$0xf0] }
 0x191   :  { %4059 = vmatpush.bf16.msra.mxu2 %v8236_v4  ;;  %v11014_v32 = vld [vmem:[#allocation5 + $0x44c] sm:$0xf]  ;;  %4035 = vmatpush.bf16.msra.mxu0 %v7660_v13  ;;  %v9132_v40 = vor.u32 %v11254_v29, %v9129_v31 }
 0x192   :  { %v8169_v33 = vld [vmem:[#allocation5 + $0x468] sm:$0xf0] }
 0x193   :  { %4072 = vmatpush.bf16.msra.mxu3 %v8492_v8  ;;  %v11078_v35 = vld [vmem:[#allocation5 + $0x64c] sm:$0xf]  ;;  %4048 = vmatpush.bf16.msra.mxu1 %v7916_v18  ;;  %v8172_v50 = vor.u32 %v11014_v32, %v8169_v33  ;;  %v3778_v18 = vpop.f32.mrf.mxu0 }
 0x194   :  { %v8425_v36 = vld [vmem:[#allocation5 + $0x668] sm:$0xf0] }
 0x195   :  { %v11182_v39 = vld [vmem:[#allocation5 + $0x98c] sm:$0xf]  ;;  %4060 = vmatpush.bf16.msra.mxu2 %v8204_v25  ;;  %v8428_v45 = vor.u32 %v11078_v35, %v8425_v36  ;;  %4036 = vmatpush.bf16.msra.mxu0 %v7628_v34  ;;  %v3779_v25 = vadd.f32 %v3778_v18, %v12002_v23 }
 0x196   :  { %v8841_v41 = vld [vmem:[#allocation5 + $0x9a8] sm:$0xf0] }
 0x197   :  { %v11246_v42 = vld [vmem:[#allocation5 + $0xb8c] sm:$0xf]  ;;  %4073 = vmatpush.bf16.msra.mxu3 %v8460_v30  ;;  %4049 = vmatpush.bf16.msra.mxu1 %v7884_v37  ;;  %v8844_v55 = vor.u32 %v11182_v39, %v8841_v41  ;;  %v3792_v34 = vadd.f32 %v3791_v26, %v3779_v25  ;;  %v10939_v25 = vld [vmem:[#allocation5 + $0x1ec] sm:$0xf0] }
 0x198   :  { %v9097_v43 = vld [vmem:[#allocation5 + $0xba8] sm:$0xf0]  ;;  %4037 = vmatmul.bf16.vlgmr.msra.gmra.mxu0 %v11962_v22  ;;  %v8111_v26 = vld [vmem:[#allocation5 + $0x3d0] sm:$0xf] }
 0x199   :  { %v11006_v46 = vld [vmem:[#allocation5 + $0x40c] sm:$0xf]  ;;  %4081 = vmatpush.bf16.msrb.mxu0 %v8876_v38  ;;  %4061 = vmatpush.bf16.msra.mxu2 %v8172_v50  ;;  %v9100_v61 = vor.u32 %v11246_v42, %v9097_v43 }
 0x19a   :  { %v8137_v47 = vld [vmem:[#allocation5 + $0x428] sm:$0xf0]  ;;  %4050 = vmatmul.bf16.vlgmr.msra.gmra.mxu1 %v11964_v27 }
 0x19b   :  { %v11070_v48 = vld [vmem:[#allocation5 + $0x60c] sm:$0xf]  ;;  %4094 = vmatpush.bf16.msrb.mxu1 %v9132_v40  ;;  %v8140_v62 = vor.u32 %v11006_v46, %v8137_v47  ;;  %4074 = vmatpush.bf16.msra.mxu3 %v8428_v45 }
 0x19c   :  { %v8393_v52 = vld [vmem:[#allocation5 + $0x628] sm:$0xf0] }
 0x19d   :  { %v11318_v53 = vld [vmem:[#allocation5 + $0xdcc] sm:$0xf]  ;;  %v8396_v1 = vor.u32 %v11070_v48, %v8393_v52  ;;  %4082 = vmatpush.bf16.msrb.mxu0 %v8844_v55  ;;  %4062 = vmatpush.bf16.msra.mxu2 %v8140_v62  ;;  %v3780_v48 = vpop.f32.mrf.mxu0 }
 0x19e   :  { %v9385_v54 = vld [vmem:[#allocation5 + $0xde8] sm:$0xf0] }
 0x19f   :  { %v11382_v58 = vld [vmem:[#allocation5 + $0xfcc] sm:$0xf]  ;;  %v9388_v2 = vor.u32 %v11318_v53, %v9385_v54  ;;  %4095 = vmatpush.bf16.msrb.mxu1 %v9100_v61  ;;  %4075 = vmatpush.bf16.msra.mxu3 %v8396_v1  ;;  %v3793_v54 = vpop.f32.mrf.mxu1 }
 0x1a0   :  { %v9641_v59 = vld [vmem:[#allocation5 + $0xfe8] sm:$0xf0]  ;;  %4063 = vmatmul.bf16.vlgmr.msra.gmra.mxu2 %v11968_v49  ;;  %v8367_v54 = vld [vmem:[#allocation5 + $0x5d0] sm:$0xf] }
 0x1a1   :  { %v11174_v63 = vld [vmem:[#allocation5 + $0x94c] sm:$0xf]  ;;  %v9644_v5 = vor.u32 %v11382_v58, %v9641_v59  ;;  %4107 = vmatpush.bf16.msrb.mxu2 %v9388_v2 }
 0x1a2   :  { %v8809_v0 = vld [vmem:[#allocation5 + $0x968] sm:$0xf0]  ;;  %4076 = vmatmul.bf16.vlgmr.msra.gmra.mxu3 %v11970_v57 }
 0x1a3   :  { %v11238_v3 = vld [vmem:[#allocation5 + $0xb4c] sm:$0xf]  ;;  %v8812_v8 = vor.u32 %v11174_v63, %v8809_v0  ;;  %4120 = vmatpush.bf16.msrb.mxu3 %v9644_v5 }
 0x1a4   :  { %v9065_v4 = vld [vmem:[#allocation5 + $0xb68] sm:$0xf0] }
 0x1a5   :  { %v11310_v6 = vld [vmem:[#allocation5 + $0xd8c] sm:$0xf]  ;;  %v9068_v11 = vor.u32 %v11238_v3, %v9065_v4  ;;  %4083 = vmatpush.bf16.msrb.mxu0 %v8812_v8 }
 0x1a6   :  { %v9353_v7 = vld [vmem:[#allocation5 + $0xda8] sm:$0xf0] }
 0x1a7   :  { %v11374_v9 = vld [vmem:[#allocation5 + $0xf8c] sm:$0xf]  ;;  %v9356_v14 = vor.u32 %v11310_v6, %v9353_v7  ;;  %4096 = vmatpush.bf16.msrb.mxu1 %v9068_v11  ;;  %v3804_v7 = vpop.f32.mrf.mxu2 }
 0x1a8   :  { %v9609_v10 = vld [vmem:[#allocation5 + $0xfa8] sm:$0xf0] }
 0x1a9   :  { %v11166_v12 = vld [vmem:[#allocation5 + $0x90c] sm:$0xf]  ;;  %v9612_v19 = vor.u32 %v11374_v9, %v9609_v10  ;;  %4108 = vmatpush.bf16.msrb.mxu2 %v9356_v14  ;;  %v3817_v14 = vpop.f32.mrf.mxu3 }
 0x1aa   :  { %v8777_v13 = vld [vmem:[#allocation5 + $0x928] sm:$0xf0] }
 0x1ab   :  { %v11230_v15 = vld [vmem:[#allocation5 + $0xb0c] sm:$0xf]  ;;  %v8780_v28 = vor.u32 %v11166_v12, %v8777_v13  ;;  %4121 = vmatpush.bf16.msrb.mxu3 %v9612_v19  ;;  %v3805_v13 = vadd.f32 %v3804_v7, %v3792_v34  ;;  %v10987_v7 = vld [vmem:[#allocation5 + $0x36c] sm:$0xf0] }
 0x1ac   :  { %v9033_v16 = vld [vmem:[#allocation5 + $0xb28] sm:$0xf0] }
 0x1ad   :  { %v11302_v20 = vld [vmem:[#allocation5 + $0xd4c] sm:$0xf]  ;;  %v9036_v31 = vor.u32 %v11230_v15, %v9033_v16  ;;  %4084 = vmatpush.bf16.msrb.mxu0 %v8780_v28  ;;  %v12009_v28 = vadd.f32 %v3817_v14, %v3805_v13  ;;  %v8591_v13 = vld [vmem:[#allocation5 + $0x790] sm:$0xf] }
 0x1ae   :  { %v9321_v21 = vld [vmem:[#allocation5 + $0xd68] sm:$0xf0]  ;;  %v11123_v14 = vld [vmem:[#allocation5 + $0x7ac] sm:$0xf0] }
 0x1af   :  { %v11366_v29 = vld [vmem:[#allocation5 + $0xf4c] sm:$0xf]  ;;  %v9324_v35 = vor.u32 %v11302_v20, %v9321_v21  ;;  %4097 = vmatpush.bf16.msrb.mxu1 %v9036_v31  ;;  %v7855_v21 = vld [vmem:[#allocation5 + $0x1d0] sm:$0xf] }
 0x1b0   :  { %v9577_v30 = vld [vmem:[#allocation5 + $0xf68] sm:$0xf0]  ;;  %v11003_v31 = vld [vmem:[#allocation5 + $0x3ec] sm:$0xf0] }
 0x1b1   :  { %v11158_v32 = vld [vmem:[#allocation5 + $0x8cc] sm:$0xf]  ;;  %v9580_v38 = vor.u32 %v11366_v29, %v9577_v30  ;;  %4109 = vmatpush.bf16.msrb.mxu2 %v9324_v35  ;;  %v3830_v29 = vpop.f32.mrf.mxu0  ;;  %v3843_v35 = vpop.f32.mrf.mxu1 }
 0x1b2   :  { %v8745_v33 = vld [vmem:[#allocation5 + $0x8e8] sm:$0xf0] }
 0x1b3   :  { %v11222_v36 = vld [vmem:[#allocation5 + $0xacc] sm:$0xf]  ;;  %v8748_v23 = vor.u32 %v11158_v32, %v8745_v33  ;;  %4122 = vmatpush.bf16.msrb.mxu3 %v9580_v38 }
 0x1b4   :  { %v9001_v37 = vld [vmem:[#allocation5 + $0xae8] sm:$0xf0] }
 0x1b5   :  { %v11294_v39 = vld [vmem:[#allocation5 + $0xd0c] sm:$0xf]  ;;  %v9004_v42 = vor.u32 %v11222_v36, %v9001_v37  ;;  %4085 = vmatpush.bf16.msrb.mxu0 %v8748_v23  ;;  %v7823_v23 = vld [vmem:[#allocation5 + $0x190] sm:$0xf] }
 0x1b6   :  { %v9289_v40 = vld [vmem:[#allocation5 + $0xd28] sm:$0xf0] }
 0x1b7   :  { %v11358_v50 = vld [vmem:[#allocation5 + $0xf0c] sm:$0xf]  ;;  %v9292_v45 = vor.u32 %v11294_v39, %v9289_v40  ;;  %4098 = vmatpush.bf16.msrb.mxu1 %v9004_v42  ;;  %v7856_v40 = vor.u32 %v10939_v25, %v7855_v21  ;;  %v10979_v21 = vld [vmem:[#allocation5 + $0x32c] sm:$0xf0] }
 0x1b8   :  { %v9545_v41 = vld [vmem:[#allocation5 + $0xf28] sm:$0xf0] }
 0x1b9   :  { %v11150_v43 = vld [vmem:[#allocation5 + $0x88c] sm:$0xf]  ;;  %v9548_v51 = vor.u32 %v11358_v50, %v9545_v41  ;;  %4110 = vmatpush.bf16.msrb.mxu2 %v9292_v45  ;;  %v8112_v41 = vor.u32 %v11003_v31, %v8111_v26  ;;  %v10995_v45 = vld [vmem:[#allocation5 + $0x3ac] sm:$0xf0]  ;;  %v8592_v26 = vor.u32 %v11123_v14, %v8591_v13 }
 0x1ba   :  { %v8713_v44 = vld [vmem:[#allocation5 + $0x8a8] sm:$0xf0]  ;;  %v8207_v14 = vld [vmem:[#allocation5 + $0x490] sm:$0xf] }
 0x1bb   :  { %v11214_v46 = vld [vmem:[#allocation5 + $0xa8c] sm:$0xf]  ;;  %v8716_v55 = vor.u32 %v11150_v43, %v8713_v44  ;;  %4123 = vmatpush.bf16.msrb.mxu3 %v9548_v51  ;;  %v10931_v43 = vld [vmem:[#allocation5 + $0x1ac] sm:$0xf0] }
 0x1bc   :  { %v8969_v47 = vld [vmem:[#allocation5 + $0xaa8] sm:$0xf0]  ;;  %v8079_v44 = vld [vmem:[#allocation5 + $0x390] sm:$0xf] }
 0x1bd   :  { %v11286_v52 = vld [vmem:[#allocation5 + $0xccc] sm:$0xf]  ;;  %v8972_v61 = vor.u32 %v11214_v46, %v8969_v47  ;;  %4086 = vmatpush.bf16.msrb.mxu0 %v8716_v55  ;;  %v11067_v55 = vld [vmem:[#allocation5 + $0x5ec] sm:$0xf0] }
 0x1be   :  { %v9257_v53 = vld [vmem:[#allocation5 + $0xce8] sm:$0xf0] }
 0x1bf   :  { %v11350_v58 = vld [vmem:[#allocation5 + $0xecc] sm:$0xf]  ;;  %v9260_v0 = vor.u32 %v11286_v52, %v9257_v53  ;;  %4099 = vmatpush.bf16.msrb.mxu1 %v8972_v61  ;;  %v3806_v52 = vpop.f32.mrf.mxu2  ;;  %v8623_v61 = vld [vmem:[#allocation5 + $0x7d0] sm:$0xf] }
 0x1c0   :  { %v9513_v59 = vld [vmem:[#allocation5 + $0xee8] sm:$0xf0] }
 0x1c1   :  { %v11142_v62 = vld [vmem:[#allocation5 + $0x84c] sm:$0xf]  ;;  %v9516_v3 = vor.u32 %v11350_v58, %v9513_v59  ;;  %4111 = vmatpush.bf16.msrb.mxu2 %v9260_v0  ;;  %v3819_v58 = vpop.f32.mrf.mxu3  ;;  %v7824_v59 = vor.u32 %v10931_v43, %v7823_v23  ;;  %v7983_v23 = vld [vmem:[#allocation5 + $0x2d0] sm:$0xf] }
 0x1c2   :  { %v8681_v63 = vld [vmem:[#allocation5 + $0x868] sm:$0xf0]  ;;  %v8271_v43 = vld [vmem:[#allocation5 + $0x510] sm:$0xf] }
 0x1c3   :  { %v11206_v1 = vld [vmem:[#allocation5 + $0xa4c] sm:$0xf]  ;;  %v8684_v8 = vor.u32 %v11142_v62, %v8681_v63  ;;  %4124 = vmatpush.bf16.msrb.mxu3 %v9516_v3  ;;  %v11131_v62 = vld [vmem:[#allocation5 + $0x7ec] sm:$0xf0]  ;;  %v8080_v63 = vor.u32 %v10995_v45, %v8079_v44  ;;  %v3832_v3 = vpop.f32.mrf.mxu0 }
 0x1c4   :  { %v8937_v2 = vld [vmem:[#allocation5 + $0xa68] sm:$0xf0]  ;;  %v11043_v44 = vld [vmem:[#allocation5 + $0x52c] sm:$0xf0] }
 0x1c5   :  { %v11278_v4 = vld [vmem:[#allocation5 + $0xc8c] sm:$0xf]  ;;  %v8940_v15 = vor.u32 %v11206_v1, %v8937_v2  ;;  %4087 = vmatpush.bf16.msrb.mxu0 %v8684_v8  ;;  %v7791_v1 = vld [vmem:[#allocation5 + $0x150] sm:$0xf]  ;;  %v3845_v8 = vpop.f32.mrf.mxu1  ;;  %v8272_v58 = vor.u32 %v11043_v44, %v8271_v43 }
 0x1c6   :  { %v9225_v5 = vld [vmem:[#allocation5 + $0xca8] sm:$0xf0]  ;;  %v10923_v2 = vld [vmem:[#allocation5 + $0x16c] sm:$0xf0] }
 0x1c7   :  { %v11342_v6 = vld [vmem:[#allocation5 + $0xe8c] sm:$0xf]  ;;  %v9228_v20 = vor.u32 %v11278_v4, %v9225_v5  ;;  %4100 = vmatpush.bf16.msrb.mxu1 %v8940_v15  ;;  %v8368_v5 = vor.u32 %v11067_v55, %v8367_v54  ;;  %v3856_v25 = vpop.f32.mrf.mxu2  ;;  %v10899_v54 = vld [vmem:[#allocation5 + $0xac] sm:$0xf0] }
 0x1c8   :  { %v11717_v9 = vld [vmem:[#allocation10 + $0x8] sm:$0xff]  ;;  %v10891_v8 = vld [vmem:[#allocation5 + $0x6c] sm:$0xf0] }
 0x1c9   :  { %v1150_v10 = vperm.slane %v11717_v9, 1  ;;  %v9481_v11 = vld [vmem:[#allocation5 + $0xea8] sm:$0xf0]  ;;  %4112 = vmatpush.bf16.msrb.mxu2 %v9228_v20  ;;  %v8624_v9 = vor.u32 %v11131_v62, %v8623_v61  ;;  %v8015_v20 = vld [vmem:[#allocation5 + $0x310] sm:$0xf] }
 0x1ca   :  { %v11134_v12 = vld [vmem:[#allocation5 + $0x80c] sm:$0xf]  ;;  %v9484_v30 = vor.u32 %v11342_v6, %v9481_v11  ;;  %v8047_v6 = vld [vmem:[#allocation5 + $0x350] sm:$0xf] }
 0x1cb   :  { %v8649_v16 = vld [vmem:[#allocation5 + $0x828] sm:$0xf0]  ;;  %v3831_v34 = vadd.f32 %v3830_v29, %v1150_v10  ;;  %v8335_v10 = vld [vmem:[#allocation5 + $0x590] sm:$0xf]  ;;  %v8048_v15 = vor.u32 %v10987_v7, %v8047_v6 }
 0x1cc   :  { %v11198_v18 = vld [vmem:[#allocation5 + $0xa0c] sm:$0xf]  ;;  %v8652_v36 = vor.u32 %v11134_v12, %v8649_v16  ;;  %4125 = vmatpush.bf16.msrb.mxu3 %v9484_v30  ;;  %v11059_v11 = vld [vmem:[#allocation5 + $0x5ac] sm:$0xf0]  ;;  %v7792_v12 = vor.u32 %v10923_v2, %v7791_v1 }
 0x1cd   :  { %v8905_v19 = vld [vmem:[#allocation5 + $0xa28] sm:$0xf0]  ;;  %v3844_v50 = vadd.f32 %v3843_v35, %v3831_v34  ;;  %v7759_v16 = vld [vmem:[#allocation5 + $0x110] sm:$0xf] }
 0x1ce   :  { %v11270_v32 = vld [vmem:[#allocation5 + $0xc4c] sm:$0xf]  ;;  %v8908_v39 = vor.u32 %v11198_v18, %v8905_v19  ;;  %4088 = vmatpush.bf16.msrb.mxu0 %v8652_v36  ;;  %v10915_v18 = vld [vmem:[#allocation5 + $0x12c] sm:$0xf0]  ;;  %v8336_v19 = vor.u32 %v11059_v11, %v8335_v10  ;;  %v8016_v36 = vor.u32 %v10979_v21, %v8015_v20 }
 0x1cf   :  { %v9193_v33 = vld [vmem:[#allocation5 + $0xc68] sm:$0xf0]  ;;  %v8303_v29 = vld [vmem:[#allocation5 + $0x550] sm:$0xf]  ;;  %v3857_v31 = vadd.f32 %v3856_v25, %v3844_v50  ;;  %v3882_v50 = vpop.f32.mrf.mxu0  ;;  %v3858_v62 = vpop.f32.mrf.mxu2 }
 0x1d0   :  { %v11334_v37 = vld [vmem:[#allocation5 + $0xe4c] sm:$0xf]  ;;  %v9196_v42 = vor.u32 %v11270_v32, %v9193_v33  ;;  %4101 = vmatpush.bf16.msrb.mxu1 %v8908_v39  ;;  %v11051_v30 = vld [vmem:[#allocation5 + $0x56c] sm:$0xf0]  ;;  %v3869_v32 = vpop.f32.mrf.mxu3  ;;  %v7760_v33 = vor.u32 %v10915_v18, %v7759_v16 }
 0x1d1   :  { %v9449_v38 = vld [vmem:[#allocation5 + $0xe68] sm:$0xf0]  ;;  %4089 = vmatmul.bf16.vlgmr.msrb.gmra.mxu0 %v11974_v17  ;;  %v8559_v34 = vld [vmem:[#allocation5 + $0x750] sm:$0xf]  ;;  %v3870_v39 = vadd.f32 %v3869_v32, %v3857_v31 }
 0x1d2   :  { %v9452_v46 = vor.u32 %v11334_v37, %v9449_v38  ;;  %v11262_v47 = vld [vmem:[#allocation5 + $0xc0c] sm:$0xf]  ;;  %4133 = vmatpush.bf16.msra.mxu0 %v7856_v40  ;;  %4113 = vmatpush.bf16.msrb.mxu2 %v9196_v42  ;;  %v11115_v35 = vld [vmem:[#allocation5 + $0x76c] sm:$0xf0]  ;;  %v8304_v40 = vor.u32 %v11051_v30, %v8303_v29 }
 0x1d3   :  { %v9161_v48 = vld [vmem:[#allocation5 + $0xc28] sm:$0xf0]  ;;  %4102 = vmatmul.bf16.vlgmr.msrb.gmra.mxu1 %v11976_v24  ;;  %v7727_v37 = vld [vmem:[#allocation5 + $0xd0] sm:$0xf]  ;;  %v8560_v42 = vor.u32 %v11115_v35, %v8559_v34  ;;  %v3883_v45 = vadd.f32 %v3882_v50, %v3870_v39 }
 0x1d4   :  { %v11326_v51 = vld [vmem:[#allocation5 + $0xe0c] sm:$0xf]  ;;  %4146 = vmatpush.bf16.msra.mxu1 %v8112_v41  ;;  %v9164_v0 = vor.u32 %v11262_v47, %v9161_v48  ;;  %4126 = vmatpush.bf16.msrb.mxu3 %v9452_v46  ;;  %v10907_v38 = vld [vmem:[#allocation5 + $0xec] sm:$0xf0]  ;;  %v3895_v46 = vpop.f32.mrf.mxu1 }
 0x1d5   :  { %v9417_v53 = vld [vmem:[#allocation5 + $0xe28] sm:$0xf0]  ;;  %v10971_v41 = vld [vmem:[#allocation5 + $0x2ec] sm:$0xf0]  ;;  %v7728_v47 = vor.u32 %v10907_v38, %v7727_v37  ;;  %v3896_v55 = vadd.f32 %v3895_v46, %v3883_v45 }
 0x1d6   :  { %v9420_v4 = vor.u32 %v11326_v51, %v9417_v53  ;;  %4134 = vmatpush.bf16.msra.mxu0 %v7824_v59  ;;  %4114 = vmatpush.bf16.msrb.mxu2 %v9164_v0  ;;  %v8527_v48 = vld [vmem:[#allocation5 + $0x710] sm:$0xf]  ;;  %v7984_v52 = vor.u32 %v10971_v41, %v7983_v23 }
 0x1d7   :  { %v11107_v51 = vld [vmem:[#allocation5 + $0x72c] sm:$0xf0]  ;;  %v3908_v39 = vpop.f32.mrf.mxu2 }
 0x1d8   :  { %4147 = vmatpush.bf16.msra.mxu1 %v8080_v63  ;;  %4127 = vmatpush.bf16.msrb.mxu3 %v9420_v4  ;;  %v7695_v53 = vld [vmem:[#allocation5 + $0x90] sm:$0xf]  ;;  %v8528_v63 = vor.u32 %v11107_v51, %v8527_v48  ;;  %v3871_v2 = vpop.f32.mrf.mxu3 }
 0x1d9   :  { %4115 = vmatmul.bf16.vlgmr.msrb.gmra.mxu2 %v11980_v56  ;;  %v7951_v59 = vld [vmem:[#allocation5 + $0x290] sm:$0xf]  ;;  %v7696_v3 = vor.u32 %v10899_v54, %v7695_v53 }
 0x1da   :  { %4159 = vmatpush.bf16.msra.mxu2 %v8368_v5  ;;  %4135 = vmatpush.bf16.msra.mxu0 %v7792_v12  ;;  %v10963_v61 = vld [vmem:[#allocation5 + $0x2ac] sm:$0xf0]  ;;  %v3884_v12 = vpop.f32.mrf.mxu0 }
 0x1db   :  { %4128 = vmatmul.bf16.vlgmr.msrb.gmra.mxu3 %v11982_v60  ;;  %v8239_v0 = vld [vmem:[#allocation5 + $0x4d0] sm:$0xf]  ;;  %v7952_v6 = vor.u32 %v10963_v61, %v7951_v59 }
 0x1dc   :  { %4172 = vmatpush.bf16.msra.mxu3 %v8624_v9  ;;  %4148 = vmatpush.bf16.msra.mxu1 %v8048_v15  ;;  %v11035_v1 = vld [vmem:[#allocation5 + $0x4ec] sm:$0xf0]  ;;  %v3897_v16 = vpop.f32.mrf.mxu1 }
 0x1dd   :  { %v8495_v4 = vld [vmem:[#allocation5 + $0x6d0] sm:$0xf]  ;;  %v8240_v9 = vor.u32 %v11035_v1, %v8239_v0 }
 0x1de   :  { %4160 = vmatpush.bf16.msra.mxu2 %v8336_v19  ;;  %4136 = vmatpush.bf16.msra.mxu0 %v7760_v33  ;;  %v11099_v5 = vld [vmem:[#allocation5 + $0x6ec] sm:$0xf0] }
 0x1df   :  { %v7663_v7 = vld [vmem:[#allocation5 + $0x50] sm:$0xf]  ;;  %v8496_v13 = vor.u32 %v11099_v5, %v8495_v4 }
 0x1e0   :  { %4173 = vmatpush.bf16.msra.mxu3 %v8592_v26  ;;  %4149 = vmatpush.bf16.msra.mxu1 %v8016_v36  ;;  %v7919_v10 = vld [vmem:[#allocation5 + $0x250] sm:$0xf]  ;;  %v7664_v18 = vor.u32 %v10891_v8, %v7663_v7 }
 0x1e1   :  { %v10955_v11 = vld [vmem:[#allocation5 + $0x26c] sm:$0xf0] }
 0x1e2   :  { %4161 = vmatpush.bf16.msra.mxu2 %v8304_v40  ;;  %4137 = vmatpush.bf16.msra.mxu0 %v7728_v47  ;;  %v11027_v15 = vld [vmem:[#allocation5 + $0x4ac] sm:$0xf0]  ;;  %v7920_v25 = vor.u32 %v10955_v11, %v7919_v10  ;;  %v3921_v40 = vpop.f32.mrf.mxu3  ;;  %v3910_v11 = vpop.f32.mrf.mxu2 }
 0x1e3   :  { %v8463_v19 = vld [vmem:[#allocation5 + $0x690] sm:$0xf]  ;;  %v8208_v31 = vor.u32 %v11027_v15, %v8207_v14 }
 0x1e4   :  { %4174 = vmatpush.bf16.msra.mxu3 %v8560_v42  ;;  %4150 = vmatpush.bf16.msra.mxu1 %v7984_v52  ;;  %v11091_v20 = vld [vmem:[#allocation5 + $0x6ac] sm:$0xf0]  ;;  %v3909_v42 = vadd.f32 %v3908_v39, %v3896_v55 }
 0x1e5   :  { %v7631_v21 = vld [vmem:[#allocation5 + $0x10] sm:$0xf]  ;;  %v8464_v35 = vor.u32 %v11091_v20, %v8463_v19 }
 0x1e6   :  { %4162 = vmatpush.bf16.msra.mxu2 %v8272_v58  ;;  %4138 = vmatpush.bf16.msra.mxu0 %v7696_v3  ;;  %v10883_v26 = vld [vmem:[#allocation5 + $0x2c] sm:$0xf0]  ;;  %v12015_v53 = vadd.f32 %v3921_v40, %v3909_v42 }
 0x1e7   :  { %v7887_v29 = vld [vmem:[#allocation5 + $0x210] sm:$0xf]  ;;  %v7632_v23 = vor.u32 %v10883_v26, %v7631_v21 }
 0x1e8   :  { %4175 = vmatpush.bf16.msra.mxu3 %v8528_v63  ;;  %4151 = vmatpush.bf16.msra.mxu1 %v7952_v6  ;;  %v10947_v30 = vld [vmem:[#allocation5 + $0x22c] sm:$0xf0] }
 0x1e9   :  { %v8879_v32 = vld [vmem:[#allocation5 + $0x9d0] sm:$0xf]  ;;  %v7888_v43 = vor.u32 %v10947_v30, %v7887_v29 }
 0x1ea   :  { %4163 = vmatpush.bf16.msra.mxu2 %v8240_v9  ;;  %v11195_v33 = vld [vmem:[#allocation5 + $0x9ec] sm:$0xf0]  ;;  %4139 = vmatpush.bf16.msra.mxu0 %v7664_v18  ;;  %v3923_v12 = vpop.f32.mrf.mxu3 }
 0x1eb   :  { %v9135_v34 = vld [vmem:[#allocation5 + $0xbd0] sm:$0xf]  ;;  %v8880_v44 = vor.u32 %v11195_v33, %v8879_v32 }
 0x1ec   :  { %4176 = vmatpush.bf16.msra.mxu3 %v8496_v13  ;;  %v11259_v36 = vld [vmem:[#allocation5 + $0xbec] sm:$0xf0]  ;;  %4152 = vmatpush.bf16.msra.mxu1 %v7920_v25 }
 0x1ed   :  { %v8175_v37 = vld [vmem:[#allocation5 + $0x450] sm:$0xf]  ;;  %v9136_v46 = vor.u32 %v11259_v36, %v9135_v34 }
 0x1ee   :  { %v11019_v38 = vld [vmem:[#allocation5 + $0x46c] sm:$0xf0]  ;;  %4164 = vmatpush.bf16.msra.mxu2 %v8208_v31  ;;  %4140 = vmatpush.bf16.msra.mxu0 %v7632_v23 }
 0x1ef   :  { %v8431_v41 = vld [vmem:[#allocation5 + $0x650] sm:$0xf]  ;;  %v8176_v47 = vor.u32 %v11019_v38, %v8175_v37 }
 0x1f0   :  { %v11083_v50 = vld [vmem:[#allocation5 + $0x66c] sm:$0xf0]  ;;  %4177 = vmatpush.bf16.msra.mxu3 %v8464_v35  ;;  %4153 = vmatpush.bf16.msra.mxu1 %v7888_v43  ;;  %v3934_v43 = vpop.f32.mrf.mxu0 }
 0x1f1   :  { %v8847_v45 = vld [vmem:[#allocation5 + $0x990] sm:$0xf]  ;;  %v8432_v54 = vor.u32 %v11083_v50, %v8431_v41  ;;  %4141 = vmatmul.bf16.vlgmr.msra.gmra.mxu0 %v11962_v22 }
 0x1f2   :  { %v11187_v48 = vld [vmem:[#allocation5 + $0x9ac] sm:$0xf0]  ;;  %4185 = vmatpush.bf16.msrb.mxu0 %v8880_v44  ;;  %4165 = vmatpush.bf16.msra.mxu2 %v8176_v47 }
 0x1f3   :  { %v9103_v51 = vld [vmem:[#allocation5 + $0xb90] sm:$0xf]  ;;  %v8848_v0 = vor.u32 %v11187_v48, %v8847_v45  ;;  %4154 = vmatmul.bf16.vlgmr.msra.gmra.mxu1 %v11964_v27  ;;  %v3947_v48 = vpop.f32.mrf.mxu1 }
 0x1f4   :  { %v11251_v52 = vld [vmem:[#allocation5 + $0xbac] sm:$0xf0]  ;;  %4198 = vmatpush.bf16.msrb.mxu1 %v9136_v46  ;;  %4178 = vmatpush.bf16.msra.mxu3 %v8432_v54 }
 0x1f5   :  { %v8143_v58 = vld [vmem:[#allocation5 + $0x410] sm:$0xf]  ;;  %v9104_v3 = vor.u32 %v11251_v52, %v9103_v51 }
 0x1f6   :  { %v11011_v59 = vld [vmem:[#allocation5 + $0x42c] sm:$0xf0]  ;;  %4186 = vmatpush.bf16.msrb.mxu0 %v8848_v0 }
 0x1f7   :  { %v8399_v61 = vld [vmem:[#allocation5 + $0x610] sm:$0xf]  ;;  %v8144_v4 = vor.u32 %v11011_v59, %v8143_v58 }
 0x1f8   :  { %v11075_v62 = vld [vmem:[#allocation5 + $0x62c] sm:$0xf0]  ;;  %4199 = vmatpush.bf16.msrb.mxu1 %v9104_v3 }
 0x1f9   :  { %v9391_v55 = vld [vmem:[#allocation5 + $0xdd0] sm:$0xf]  ;;  %v8400_v7 = vor.u32 %v11075_v62, %v8399_v61  ;;  %4166 = vmatpush.bf16.msra.mxu2 %v8144_v4 }
 0x1fa   :  { %v11323_v63 = vld [vmem:[#allocation5 + $0xdec] sm:$0xf0] }
 0x1fb   :  { %v9647_v1 = vld [vmem:[#allocation5 + $0xfd0] sm:$0xf]  ;;  %v9392_v8 = vor.u32 %v11323_v63, %v9391_v55  ;;  %4179 = vmatpush.bf16.msra.mxu3 %v8400_v7 }
 0x1fc   :  { %v11387_v2 = vld [vmem:[#allocation5 + $0xfec] sm:$0xf0]  ;;  %4167 = vmatmul.bf16.vlgmr.msra.gmra.mxu2 %v11968_v49 }
 0x1fd   :  { %v8815_v5 = vld [vmem:[#allocation5 + $0x950] sm:$0xf]  ;;  %v9648_v13 = vor.u32 %v11387_v2, %v9647_v1  ;;  %4211 = vmatpush.bf16.msrb.mxu2 %v9392_v8 }
 0x1fe   :  { %v11179_v6 = vld [vmem:[#allocation5 + $0x96c] sm:$0xf0]  ;;  %4180 = vmatmul.bf16.vlgmr.msra.gmra.mxu3 %v11970_v57 }
 0x1ff   :  { %v9071_v9 = vld [vmem:[#allocation5 + $0xb50] sm:$0xf]  ;;  %v8816_v16 = vor.u32 %v11179_v6, %v8815_v5  ;;  %4224 = vmatpush.bf16.msrb.mxu3 %v9648_v13  ;;  %v3936_v13 = vpop.f32.mrf.mxu0 }
 0x200   :  { %v11243_v10 = vld [vmem:[#allocation5 + $0xb6c] sm:$0xf0]  ;;  %v8049_v13 = vld [vmem:[#allocation5 + $0x370] sm:$0xf0] }
 0x201   :  { %v9359_v14 = vld [vmem:[#allocation5 + $0xd90] sm:$0xf]  ;;  %v9072_v20 = vor.u32 %v11243_v10, %v9071_v9  ;;  %4187 = vmatpush.bf16.msrb.mxu0 %v8816_v16 }
 0x202   :  { %v11315_v15 = vld [vmem:[#allocation5 + $0xdac] sm:$0xf0] }
 0x203   :  { %v9615_v18 = vld [vmem:[#allocation5 + $0xf90] sm:$0xf]  ;;  %v9360_v26 = vor.u32 %v11315_v15, %v9359_v14  ;;  %4200 = vmatpush.bf16.msrb.mxu1 %v9072_v20 }
 0x204   :  { %v11379_v19 = vld [vmem:[#allocation5 + $0xfac] sm:$0xf0] }
 0x205   :  { %v8783_v21 = vld [vmem:[#allocation5 + $0x910] sm:$0xf]  ;;  %v9616_v31 = vor.u32 %v11379_v19, %v9615_v18  ;;  %4212 = vmatpush.bf16.msrb.mxu2 %v9360_v26  ;;  %v3949_v18 = vpop.f32.mrf.mxu1 }
 0x206   :  { %v11171_v25 = vld [vmem:[#allocation5 + $0x92c] sm:$0xf0]  ;;  %v8337_v18 = vld [vmem:[#allocation5 + $0x5b0] sm:$0xf0] }
 0x207   :  { %v9039_v29 = vld [vmem:[#allocation5 + $0xb10] sm:$0xf]  ;;  %v8784_v36 = vor.u32 %v11171_v25, %v8783_v21  ;;  %4225 = vmatpush.bf16.msrb.mxu3 %v9616_v31 }
 0x208   :  { %v11235_v30 = vld [vmem:[#allocation5 + $0xb2c] sm:$0xf0] }
 0x209   :  { %v9327_v32 = vld [vmem:[#allocation5 + $0xd50] sm:$0xf]  ;;  %v9040_v39 = vor.u32 %v11235_v30, %v9039_v29  ;;  %4188 = vmatpush.bf16.msrb.mxu0 %v8784_v36  ;;  %v3960_v36 = vpop.f32.mrf.mxu2 }
 0x20a   :  { %v11307_v33 = vld [vmem:[#allocation5 + $0xd6c] sm:$0xf0] }
 0x20b   :  { %v11718_v34 = vld [vmem:[#allocation10 + $0x10] sm:$0xff]  ;;  %v9328_v41 = vor.u32 %v11307_v33, %v9327_v32  ;;  %4201 = vmatpush.bf16.msrb.mxu1 %v9040_v39 }
 0x20c   :  { %v1151_v35 = vperm.slane %v11718_v34, 1  ;;  %v9583_v37 = vld [vmem:[#allocation5 + $0xf50] sm:$0xf]  ;;  %v10935_v33 = vld [vmem:[#allocation5 + $0x1d4] sm:$0xf] }
 0x20d   :  { %v11371_v38 = vld [vmem:[#allocation5 + $0xf6c] sm:$0xf0]  ;;  %4213 = vmatpush.bf16.msrb.mxu2 %v9328_v41  ;;  %v7857_v34 = vld [vmem:[#allocation5 + $0x1f0] sm:$0xf0]  ;;  %v3973_v41 = vpop.f32.mrf.mxu3 }
 0x20e   :  { %v8751_v40 = vld [vmem:[#allocation5 + $0x8d0] sm:$0xf]  ;;  %v9584_v44 = vor.u32 %v11371_v38, %v9583_v37  ;;  %v3935_v47 = vadd.f32 %v3934_v43, %v1151_v35  ;;  %v10999_v35 = vld [vmem:[#allocation5 + $0x3d4] sm:$0xf] }
 0x20f   :  { %v11163_v23 = vld [vmem:[#allocation5 + $0x8ec] sm:$0xf0]  ;;  %v8113_v38 = vld [vmem:[#allocation5 + $0x3f0] sm:$0xf0] }
 0x210   :  { %v9007_v50 = vld [vmem:[#allocation5 + $0xad0] sm:$0xf]  ;;  %v8752_v51 = vor.u32 %v11163_v23, %v8751_v40  ;;  %v3948_v62 = vadd.f32 %v3947_v48, %v3935_v47  ;;  %4226 = vmatpush.bf16.msrb.mxu3 %v9584_v44  ;;  %v8116_v48 = vor.u32 %v10999_v35, %v8113_v38  ;;  %v8305_v35 = vld [vmem:[#allocation5 + $0x570] sm:$0xf0] }
 0x211   :  { %v11227_v42 = vld [vmem:[#allocation5 + $0xaec] sm:$0xf0]  ;;  %v8561_v38 = vld [vmem:[#allocation5 + $0x770] sm:$0xf0] }
 0x212   :  { %v9295_v45 = vld [vmem:[#allocation5 + $0xd10] sm:$0xf]  ;;  %v9008_v58 = vor.u32 %v11227_v42, %v9007_v50  ;;  %4189 = vmatpush.bf16.msrb.mxu0 %v8752_v51  ;;  %v3961_v23 = vadd.f32 %v3960_v36, %v3948_v62 }
 0x213   :  { %v11299_v46 = vld [vmem:[#allocation5 + $0xd2c] sm:$0xf0] }
 0x214   :  { %v9551_v52 = vld [vmem:[#allocation5 + $0xf10] sm:$0xf]  ;;  %v9296_v55 = vor.u32 %v11299_v46, %v9295_v45  ;;  %4202 = vmatpush.bf16.msrb.mxu1 %v9008_v58  ;;  %v7860_v45 = vor.u32 %v10935_v33, %v7857_v34  ;;  %v10927_v46 = vld [vmem:[#allocation5 + $0x194] sm:$0xf]  ;;  %v12021_v47 = vadd.f32 %v3973_v41, %v3961_v23 }
 0x215   :  { %v11363_v54 = vld [vmem:[#allocation5 + $0xf2c] sm:$0xf0]  ;;  %v8081_v58 = vld [vmem:[#allocation5 + $0x3b0] sm:$0xf0] }
 0x216   :  { %v8719_v59 = vld [vmem:[#allocation5 + $0x890] sm:$0xf]  ;;  %v9552_v1 = vor.u32 %v11363_v54, %v9551_v52  ;;  %4214 = vmatpush.bf16.msrb.mxu2 %v9296_v55  ;;  %v7825_v52 = vld [vmem:[#allocation5 + $0x1b0] sm:$0xf0] }
 0x217   :  { %v11155_v61 = vld [vmem:[#allocation5 + $0x8ac] sm:$0xf0]  ;;  %v10991_v54 = vld [vmem:[#allocation5 + $0x394] sm:$0xf] }
 0x218   :  { %v8975_v63 = vld [vmem:[#allocation5 + $0xa90] sm:$0xf]  ;;  %v8720_v4 = vor.u32 %v11155_v61, %v8719_v59  ;;  %4227 = vmatpush.bf16.msrb.mxu3 %v9552_v1  ;;  %v8369_v1 = vld [vmem:[#allocation5 + $0x5f0] sm:$0xf0] }
 0x219   :  { %v11219_v0 = vld [vmem:[#allocation5 + $0xaac] sm:$0xf0]  ;;  %v11047_v34 = vld [vmem:[#allocation5 + $0x554] sm:$0xf] }
 0x21a   :  { %v9263_v2 = vld [vmem:[#allocation5 + $0xcd0] sm:$0xf]  ;;  %v8976_v7 = vor.u32 %v11219_v0, %v8975_v63  ;;  %4190 = vmatpush.bf16.msrb.mxu0 %v8720_v4  ;;  %v11063_v0 = vld [vmem:[#allocation5 + $0x5d4] sm:$0xf]  ;;  %v8308_v41 = vor.u32 %v11047_v34, %v8305_v35 }
 0x21b   :  { %v11291_v3 = vld [vmem:[#allocation5 + $0xcec] sm:$0xf0]  ;;  %v8625_v4 = vld [vmem:[#allocation5 + $0x7f0] sm:$0xf0] }
 0x21c   :  { %v9519_v5 = vld [vmem:[#allocation5 + $0xed0] sm:$0xf]  ;;  %v9264_v10 = vor.u32 %v11291_v3, %v9263_v2  ;;  %4203 = vmatpush.bf16.msrb.mxu1 %v8976_v7  ;;  %v7828_v2 = vor.u32 %v10927_v46, %v7825_v52  ;;  %v11127_v3 = vld [vmem:[#allocation5 + $0x7d4] sm:$0xf] }
 0x21d   :  { %v11355_v6 = vld [vmem:[#allocation5 + $0xeec] sm:$0xf0]  ;;  %v10919_v7 = vld [vmem:[#allocation5 + $0x154] sm:$0xf] }
 0x21e   :  { %v8687_v8 = vld [vmem:[#allocation5 + $0x850] sm:$0xf]  ;;  %v9520_v14 = vor.u32 %v11355_v6, %v9519_v5  ;;  %4215 = vmatpush.bf16.msrb.mxu2 %v9264_v10  ;;  %v8084_v5 = vor.u32 %v10991_v54, %v8081_v58  ;;  %v7729_v23 = vld [vmem:[#allocation5 + $0xf0] sm:$0xf0] }
 0x21f   :  { %v11147_v9 = vld [vmem:[#allocation5 + $0x86c] sm:$0xf0]  ;;  %v8273_v46 = vld [vmem:[#allocation5 + $0x530] sm:$0xf0] }
 0x220   :  { %v8943_v11 = vld [vmem:[#allocation5 + $0xa50] sm:$0xf]  ;;  %v8688_v19 = vor.u32 %v11147_v9, %v8687_v8  ;;  %4228 = vmatpush.bf16.msrb.mxu3 %v9520_v14  ;;  %v7793_v8 = vld [vmem:[#allocation5 + $0x170] sm:$0xf0]  ;;  %v3962_v9 = vpop.f32.mrf.mxu2  ;;  %v3975_v14 = vpop.f32.mrf.mxu3 }
 0x221   :  { %v11211_v12 = vld [vmem:[#allocation5 + $0xa6c] sm:$0xf0]  ;;  %v11103_v54 = vld [vmem:[#allocation5 + $0x714] sm:$0xf] }
 0x222   :  { %v9231_v15 = vld [vmem:[#allocation5 + $0xc90] sm:$0xf]  ;;  %v8944_v26 = vor.u32 %v11211_v12, %v8943_v11  ;;  %4191 = vmatpush.bf16.msrb.mxu0 %v8688_v19  ;;  %v8372_v11 = vor.u32 %v11063_v0, %v8369_v1  ;;  %v10983_v12 = vld [vmem:[#allocation5 + $0x354] sm:$0xf]  ;;  %v7796_v19 = vor.u32 %v10919_v7, %v7793_v8 }
 0x223   :  { %v11283_v16 = vld [vmem:[#allocation5 + $0xcac] sm:$0xf0]  ;;  %v8529_v58 = vld [vmem:[#allocation5 + $0x730] sm:$0xf0] }
 0x224   :  { %v9487_v20 = vld [vmem:[#allocation5 + $0xe90] sm:$0xf]  ;;  %v9232_v32 = vor.u32 %v11283_v16, %v9231_v15  ;;  %4204 = vmatpush.bf16.msrb.mxu1 %v8944_v26  ;;  %v8628_v15 = vor.u32 %v11127_v3, %v8625_v4  ;;  %v11055_v16 = vld [vmem:[#allocation5 + $0x594] sm:$0xf] }
 0x225   :  { %v11347_v21 = vld [vmem:[#allocation5 + $0xeac] sm:$0xf0]  ;;  %v10911_v26 = vld [vmem:[#allocation5 + $0x114] sm:$0xf] }
 0x226   :  { %v8655_v25 = vld [vmem:[#allocation5 + $0x810] sm:$0xf]  ;;  %v9488_v37 = vor.u32 %v11347_v21, %v9487_v20  ;;  %4216 = vmatpush.bf16.msrb.mxu2 %v9232_v32  ;;  %v11119_v20 = vld [vmem:[#allocation5 + $0x794] sm:$0xf] }
 0x227   :  { %v11139_v29 = vld [vmem:[#allocation5 + $0x82c] sm:$0xf0]  ;;  %v8593_v21 = vld [vmem:[#allocation5 + $0x7b0] sm:$0xf0] }
 0x228   :  { %v8911_v30 = vld [vmem:[#allocation5 + $0xa10] sm:$0xf]  ;;  %v8656_v50 = vor.u32 %v11139_v29, %v8655_v25  ;;  %4229 = vmatpush.bf16.msrb.mxu3 %v9488_v37  ;;  %v8052_v25 = vor.u32 %v10983_v12, %v8049_v13  ;;  %v7761_v29 = vld [vmem:[#allocation5 + $0x130] sm:$0xf0]  ;;  %v8596_v33 = vor.u32 %v11119_v20, %v8593_v21 }
 0x229   :  { %v11203_v31 = vld [vmem:[#allocation5 + $0xa2c] sm:$0xf0]  ;;  %v8017_v32 = vld [vmem:[#allocation5 + $0x330] sm:$0xf0]  ;;  %v7764_v36 = vor.u32 %v10911_v26, %v7761_v29 }
 0x22a   :  { %v9199_v39 = vld [vmem:[#allocation5 + $0xc50] sm:$0xf]  ;;  %v8912_v44 = vor.u32 %v11203_v31, %v8911_v30  ;;  %4192 = vmatpush.bf16.msrb.mxu0 %v8656_v50  ;;  %v8340_v30 = vor.u32 %v11055_v16, %v8337_v18  ;;  %v10975_v31 = vld [vmem:[#allocation5 + $0x314] sm:$0xf] }
 0x22b   :  { %v11275_v40 = vld [vmem:[#allocation5 + $0xc6c] sm:$0xf0]  ;;  %v11111_v37 = vld [vmem:[#allocation5 + $0x754] sm:$0xf] }
 0x22c   :  { %v9455_v42 = vld [vmem:[#allocation5 + $0xe50] sm:$0xf]  ;;  %v9200_v51 = vor.u32 %v11275_v40, %v9199_v39  ;;  %4205 = vmatpush.bf16.msrb.mxu1 %v8912_v44  ;;  %v8020_v39 = vor.u32 %v10975_v31, %v8017_v32  ;;  %v10903_v40 = vld [vmem:[#allocation5 + $0xd4] sm:$0xf]  ;;  %v8564_v44 = vor.u32 %v11111_v37, %v8561_v38 }
 0x22d   :  { %v11339_v43 = vld [vmem:[#allocation5 + $0xe6c] sm:$0xf0]  ;;  %4193 = vmatmul.bf16.vlgmr.msrb.gmra.mxu0 %v11974_v17  ;;  %v10967_v50 = vld [vmem:[#allocation5 + $0x2d4] sm:$0xf]  ;;  %v7732_v52 = vor.u32 %v10903_v40, %v7729_v23 }
 0x22e   :  { %v9456_v59 = vor.u32 %v11339_v43, %v9455_v42  ;;  %v9167_v61 = vld [vmem:[#allocation5 + $0xc10] sm:$0xf]  ;;  %4237 = vmatpush.bf16.msra.mxu0 %v7860_v45  ;;  %4217 = vmatpush.bf16.msrb.mxu2 %v9200_v51  ;;  %v7985_v42 = vld [vmem:[#allocation5 + $0x2f0] sm:$0xf0]  ;;  %v3986_v43 = vpop.f32.mrf.mxu0  ;;  %v3999_v51 = vpop.f32.mrf.mxu1 }
 0x22f   :  { %v11267_v62 = vld [vmem:[#allocation5 + $0xc2c] sm:$0xf0]  ;;  %4206 = vmatmul.bf16.vlgmr.msrb.gmra.mxu1 %v11976_v24  ;;  %v11039_v45 = vld [vmem:[#allocation5 + $0x514] sm:$0xf] }
 0x230   :  { %v9423_v55 = vld [vmem:[#allocation5 + $0xe10] sm:$0xf]  ;;  %4250 = vmatpush.bf16.msra.mxu1 %v8116_v48  ;;  %v9168_v6 = vor.u32 %v11267_v62, %v9167_v61  ;;  %4230 = vmatpush.bf16.msrb.mxu3 %v9456_v59  ;;  %v3987_v48 = vadd.f32 %v3986_v43, %v12021_v47  ;;  %v7988_v59 = vor.u32 %v10967_v50, %v7985_v42  ;;  %v10895_v61 = vld [vmem:[#allocation5 + $0x94] sm:$0xf] }
 0x231   :  { %v11331_v63 = vld [vmem:[#allocation5 + $0xe2c] sm:$0xf0]  ;;  %v7697_v62 = vld [vmem:[#allocation5 + $0xb0] sm:$0xf0] }
 0x232   :  { %v9424_v10 = vor.u32 %v11331_v63, %v9423_v55  ;;  %4238 = vmatpush.bf16.msra.mxu0 %v7828_v2  ;;  %4218 = vmatpush.bf16.msrb.mxu2 %v9168_v6  ;;  %v4000_v55 = vadd.f32 %v3999_v51, %v3987_v48  ;;  %v8276_v63 = vor.u32 %v11039_v45, %v8273_v46  ;;  %v10959_v0 = vld [vmem:[#allocation5 + $0x294] sm:$0xf] }
 0x233   :  { %v7953_v1 = vld [vmem:[#allocation5 + $0x2b0] sm:$0xf0]  ;;  %v8532_v2 = vor.u32 %v11103_v54, %v8529_v58  ;;  %v7700_v47 = vor.u32 %v10895_v61, %v7697_v62 }
 0x234   :  { %4251 = vmatpush.bf16.msra.mxu1 %v8084_v5  ;;  %4231 = vmatpush.bf16.msrb.mxu3 %v9424_v10  ;;  %v11031_v3 = vld [vmem:[#allocation5 + $0x4d4] sm:$0xf]  ;;  %v7956_v7 = vor.u32 %v10959_v0, %v7953_v1 }
 0x235   :  { %4219 = vmatmul.bf16.vlgmr.msrb.gmra.mxu2 %v11980_v56  ;;  %v8241_v4 = vld [vmem:[#allocation5 + $0x4f0] sm:$0xf0] }
 0x236   :  { %4263 = vmatpush.bf16.msra.mxu2 %v8372_v11  ;;  %4239 = vmatpush.bf16.msra.mxu0 %v7796_v19  ;;  %v11095_v5 = vld [vmem:[#allocation5 + $0x6d4] sm:$0xf]  ;;  %v8244_v10 = vor.u32 %v11031_v3, %v8241_v4  ;;  %v3988_v13 = vpop.f32.mrf.mxu0  ;;  %v4001_v18 = vpop.f32.mrf.mxu1 }
 0x237   :  { %4232 = vmatmul.bf16.vlgmr.msrb.gmra.mxu3 %v11982_v60  ;;  %v8497_v6 = vld [vmem:[#allocation5 + $0x6f0] sm:$0xf0] }
 0x238   :  { %4276 = vmatpush.bf16.msra.mxu3 %v8628_v15  ;;  %4252 = vmatpush.bf16.msra.mxu1 %v8052_v25  ;;  %v10887_v8 = vld [vmem:[#allocation5 + $0x54] sm:$0xf]  ;;  %v8500_v14 = vor.u32 %v11095_v5, %v8497_v6 }
 0x239   :  { %v7665_v9 = vld [vmem:[#allocation5 + $0x70] sm:$0xf0] }
 0x23a   :  { %4264 = vmatpush.bf16.msra.mxu2 %v8340_v30  ;;  %4240 = vmatpush.bf16.msra.mxu0 %v7764_v36  ;;  %v10951_v11 = vld [vmem:[#allocation5 + $0x254] sm:$0xf]  ;;  %v7668_v19 = vor.u32 %v10887_v8, %v7665_v9  ;;  %v4012_v36 = vpop.f32.mrf.mxu2 }
 0x23b   :  { %v7921_v12 = vld [vmem:[#allocation5 + $0x270] sm:$0xf0]  ;;  %v4013_v23 = vadd.f32 %v4012_v36, %v4000_v55  ;;  %v11719_v36 = vld [vmem:[#allocation10 + $0x18] sm:$0xff] }
 0x23c   :  { %4277 = vmatpush.bf16.msra.mxu3 %v8596_v33  ;;  %4253 = vmatpush.bf16.msra.mxu1 %v8020_v39  ;;  %v11023_v15 = vld [vmem:[#allocation5 + $0x494] sm:$0xf]  ;;  %v7924_v26 = vor.u32 %v10951_v11, %v7921_v12 }
 0x23d   :  { %v8209_v16 = vld [vmem:[#allocation5 + $0x4b0] sm:$0xf0] }
 0x23e   :  { %4265 = vmatpush.bf16.msra.mxu2 %v8308_v41  ;;  %4241 = vmatpush.bf16.msra.mxu0 %v7732_v52  ;;  %v11087_v20 = vld [vmem:[#allocation5 + $0x694] sm:$0xf]  ;;  %v8212_v32 = vor.u32 %v11023_v15, %v8209_v16  ;;  %v4025_v41 = vpop.f32.mrf.mxu3 }
 0x23f   :  { %v8465_v21 = vld [vmem:[#allocation5 + $0x6b0] sm:$0xf0]  ;;  %v12028_v48 = vadd.f32 %v4025_v41, %v4013_v23 }
 0x240   :  { %4278 = vmatpush.bf16.msra.mxu3 %v8564_v44  ;;  %4254 = vmatpush.bf16.msra.mxu1 %v7988_v59  ;;  %v10879_v25 = vld [vmem:[#allocation5 + $0x14] sm:$0xf]  ;;  %v8468_v37 = vor.u32 %v11087_v20, %v8465_v21 }
 0x241   :  { %v7633_v29 = vld [vmem:[#allocation5 + $0x30] sm:$0xf0] }
 0x242   :  { %4266 = vmatpush.bf16.msra.mxu2 %v8276_v63  ;;  %4242 = vmatpush.bf16.msra.mxu0 %v7700_v47  ;;  %v10943_v30 = vld [vmem:[#allocation5 + $0x214] sm:$0xf]  ;;  %v7636_v50 = vor.u32 %v10879_v25, %v7633_v29  ;;  %v4014_v9 = vpop.f32.mrf.mxu2 }
 0x243   :  { %v7889_v31 = vld [vmem:[#allocation5 + $0x230] sm:$0xf0] }
 0x244   :  { %4279 = vmatpush.bf16.msra.mxu3 %v8532_v2  ;;  %4255 = vmatpush.bf16.msra.mxu1 %v7956_v7  ;;  %v11191_v33 = vld [vmem:[#allocation5 + $0x9d4] sm:$0xf]  ;;  %v7892_v44 = vor.u32 %v10943_v30, %v7889_v31 }
 0x245   :  { %v8881_v34 = vld [vmem:[#allocation5 + $0x9f0] sm:$0xf0] }
 0x246   :  { %4267 = vmatpush.bf16.msra.mxu2 %v8244_v10  ;;  %v11255_v35 = vld [vmem:[#allocation5 + $0xbd4] sm:$0xf]  ;;  %4243 = vmatpush.bf16.msra.mxu0 %v7668_v19  ;;  %v8884_v45 = vor.u32 %v11191_v33, %v8881_v34 }
 0x247   :  { %v9137_v38 = vld [vmem:[#allocation5 + $0xbf0] sm:$0xf0] }
 0x248   :  { %4280 = vmatpush.bf16.msra.mxu3 %v8500_v14  ;;  %v11015_v39 = vld [vmem:[#allocation5 + $0x454] sm:$0xf]  ;;  %4256 = vmatpush.bf16.msra.mxu1 %v7924_v26  ;;  %v9140_v51 = vor.u32 %v11255_v35, %v9137_v38  ;;  %v4027_v14 = vpop.f32.mrf.mxu3 }
 0x249   :  { %v8177_v40 = vld [vmem:[#allocation5 + $0x470] sm:$0xf0] }
 0x24a   :  { %v11079_v42 = vld [vmem:[#allocation5 + $0x654] sm:$0xf]  ;;  %4268 = vmatpush.bf16.msra.mxu2 %v8212_v32  ;;  %v8180_v52 = vor.u32 %v11015_v39, %v8177_v40  ;;  %4244 = vmatpush.bf16.msra.mxu0 %v7636_v50 }
 0x24b   :  { %v8433_v43 = vld [vmem:[#allocation5 + $0x670] sm:$0xf0] }
 0x24c   :  { %v11183_v46 = vld [vmem:[#allocation5 + $0x994] sm:$0xf]  ;;  %4281 = vmatpush.bf16.msra.mxu3 %v8468_v37  ;;  %v8436_v61 = vor.u32 %v11079_v42, %v8433_v43  ;;  %4257 = vmatpush.bf16.msra.mxu1 %v7892_v44  ;;  %v1152_v37 = vperm.slane %v11719_v36, 1  ;;  %v7863_v36 = vld [vmem:[#allocation5 + $0x1d8] sm:$0xf] }
 0x24d   :  { %v8849_v54 = vld [vmem:[#allocation5 + $0x9b0] sm:$0xf0]  ;;  %4245 = vmatmul.bf16.vlgmr.msra.gmra.mxu0 %v11962_v22 }
 0x24e   :  { %v11247_v58 = vld [vmem:[#allocation5 + $0xb94] sm:$0xf]  ;;  %4289 = vmatpush.bf16.msrb.mxu0 %v8884_v45  ;;  %v8852_v3 = vor.u32 %v11183_v46, %v8849_v54  ;;  %4269 = vmatpush.bf16.msra.mxu2 %v8180_v52  ;;  %v4038_v45 = vpop.f32.mrf.mxu0 }
 0x24f   :  { %v9105_v59 = vld [vmem:[#allocation5 + $0xbb0] sm:$0xf0]  ;;  %4258 = vmatmul.bf16.vlgmr.msra.gmra.mxu1 %v11964_v27  ;;  %v4039_v54 = vadd.f32 %v4038_v45, %v1152_v37  ;;  %v10940_v37 = vld [vmem:[#allocation5 + $0x1f4] sm:$0xf0] }
 0x250   :  { %v11007_v62 = vld [vmem:[#allocation5 + $0x414] sm:$0xf]  ;;  %4302 = vmatpush.bf16.msrb.mxu1 %v9140_v51  ;;  %v9108_v5 = vor.u32 %v11247_v58, %v9105_v59  ;;  %4282 = vmatpush.bf16.msra.mxu3 %v8436_v61  ;;  %v4051_v58 = vpop.f32.mrf.mxu1 }
 0x251   :  { %v8145_v55 = vld [vmem:[#allocation5 + $0x430] sm:$0xf0] }
 0x252   :  { %v11071_v63 = vld [vmem:[#allocation5 + $0x614] sm:$0xf]  ;;  %v8148_v6 = vor.u32 %v11007_v62, %v8145_v55  ;;  %4290 = vmatpush.bf16.msrb.mxu0 %v8852_v3 }
 0x253   :  { %v8401_v0 = vld [vmem:[#allocation5 + $0x630] sm:$0xf0] }
 0x254   :  { %v11319_v1 = vld [vmem:[#allocation5 + $0xdd4] sm:$0xf]  ;;  %v8404_v10 = vor.u32 %v11071_v63, %v8401_v0  ;;  %4303 = vmatpush.bf16.msrb.mxu1 %v9108_v5  ;;  %4270 = vmatpush.bf16.msra.mxu2 %v8148_v6 }
 0x255   :  { %v9393_v2 = vld [vmem:[#allocation5 + $0xdf0] sm:$0xf0] }
 0x256   :  { %v11383_v4 = vld [vmem:[#allocation5 + $0xfd4] sm:$0xf]  ;;  %v9396_v11 = vor.u32 %v11319_v1, %v9393_v2  ;;  %4283 = vmatpush.bf16.msra.mxu3 %v8404_v10  ;;  %v4052_v1 = vadd.f32 %v4051_v58, %v4039_v54  ;;  %v7831_v54 = vld [vmem:[#allocation5 + $0x198] sm:$0xf] }
 0x257   :  { %v9649_v47 = vld [vmem:[#allocation5 + $0xff0] sm:$0xf0]  ;;  %4271 = vmatmul.bf16.vlgmr.msra.gmra.mxu2 %v11968_v49 }
 0x258   :  { %v11175_v7 = vld [vmem:[#allocation5 + $0x954] sm:$0xf]  ;;  %v9652_v15 = vor.u32 %v11383_v4, %v9649_v47  ;;  %4315 = vmatpush.bf16.msrb.mxu2 %v9396_v11 }
 0x259   :  { %v8817_v8 = vld [vmem:[#allocation5 + $0x970] sm:$0xf0]  ;;  %4284 = vmatmul.bf16.vlgmr.msra.gmra.mxu3 %v11970_v57 }
 0x25a   :  { %v11239_v12 = vld [vmem:[#allocation5 + $0xb54] sm:$0xf]  ;;  %v8820_v19 = vor.u32 %v11175_v7, %v8817_v8  ;;  %4328 = vmatpush.bf16.msrb.mxu3 %v9652_v15 }
 0x25b   :  { %v9073_v13 = vld [vmem:[#allocation5 + $0xb70] sm:$0xf0] }
 0x25c   :  { %v11311_v16 = vld [vmem:[#allocation5 + $0xd94] sm:$0xf]  ;;  %v9076_v25 = vor.u32 %v11239_v12, %v9073_v13  ;;  %4291 = vmatpush.bf16.msrb.mxu0 %v8820_v19 }
 0x25d   :  { %v9361_v18 = vld [vmem:[#allocation5 + $0xdb0] sm:$0xf0] }
 0x25e   :  { %v11375_v20 = vld [vmem:[#allocation5 + $0xf94] sm:$0xf]  ;;  %v9364_v30 = vor.u32 %v11311_v16, %v9361_v18  ;;  %4304 = vmatpush.bf16.msrb.mxu1 %v9076_v25  ;;  %v4040_v16 = vpop.f32.mrf.mxu0 }
 0x25f   :  { %v9617_v21 = vld [vmem:[#allocation5 + $0xfb0] sm:$0xf0]  ;;  %v8055_v16 = vld [vmem:[#allocation5 + $0x358] sm:$0xf] }
 0x260   :  { %v11167_v26 = vld [vmem:[#allocation5 + $0x914] sm:$0xf]  ;;  %v9620_v33 = vor.u32 %v11375_v20, %v9617_v21  ;;  %4316 = vmatpush.bf16.msrb.mxu2 %v9364_v30  ;;  %v4053_v21 = vpop.f32.mrf.mxu1 }
 0x261   :  { %v8785_v29 = vld [vmem:[#allocation5 + $0x930] sm:$0xf0]  ;;  %v8343_v21 = vld [vmem:[#allocation5 + $0x598] sm:$0xf] }
 0x262   :  { %v11231_v31 = vld [vmem:[#allocation5 + $0xb14] sm:$0xf]  ;;  %v8788_v38 = vor.u32 %v11167_v26, %v8785_v29  ;;  %4329 = vmatpush.bf16.msrb.mxu3 %v9620_v33 }
 0x263   :  { %v9041_v32 = vld [vmem:[#allocation5 + $0xb30] sm:$0xf0] }
 0x264   :  { %v11303_v34 = vld [vmem:[#allocation5 + $0xd54] sm:$0xf]  ;;  %v9044_v23 = vor.u32 %v11231_v31, %v9041_v32  ;;  %4292 = vmatpush.bf16.msrb.mxu0 %v8788_v38  ;;  %v8119_v38 = vld [vmem:[#allocation5 + $0x3d8] sm:$0xf] }
 0x265   :  { %v9329_v35 = vld [vmem:[#allocation5 + $0xd70] sm:$0xf0] }
 0x266   :  { %v11367_v39 = vld [vmem:[#allocation5 + $0xf54] sm:$0xf]  ;;  %v9332_v42 = vor.u32 %v11303_v34, %v9329_v35  ;;  %4305 = vmatpush.bf16.msrb.mxu1 %v9044_v23  ;;  %v11004_v23 = vld [vmem:[#allocation5 + $0x3f4] sm:$0xf0] }
 0x267   :  { %v9585_v40 = vld [vmem:[#allocation5 + $0xf70] sm:$0xf0] }
 0x268   :  { %v11159_v41 = vld [vmem:[#allocation5 + $0x8d4] sm:$0xf]  ;;  %v9588_v46 = vor.u32 %v11367_v39, %v9585_v40  ;;  %4317 = vmatpush.bf16.msrb.mxu2 %v9332_v42  ;;  %v4064_v39 = vpop.f32.mrf.mxu2 }
 0x269   :  { %v8753_v50 = vld [vmem:[#allocation5 + $0x8f0] sm:$0xf0]  ;;  %v4065_v42 = vadd.f32 %v4064_v39, %v4052_v1  ;;  %v11052_v39 = vld [vmem:[#allocation5 + $0x574] sm:$0xf0] }
 0x26a   :  { %v11223_v43 = vld [vmem:[#allocation5 + $0xad4] sm:$0xf]  ;;  %v8756_v59 = vor.u32 %v11159_v41, %v8753_v50  ;;  %4330 = vmatpush.bf16.msrb.mxu3 %v9588_v46 }
 0x26b   :  { %v9009_v44 = vld [vmem:[#allocation5 + $0xaf0] sm:$0xf0] }
 0x26c   :  { %v11295_v51 = vld [vmem:[#allocation5 + $0xd14] sm:$0xf]  ;;  %v9012_v55 = vor.u32 %v11223_v43, %v9009_v44  ;;  %4293 = vmatpush.bf16.msrb.mxu0 %v8756_v59  ;;  %v4077_v43 = vpop.f32.mrf.mxu3  ;;  %v8120_v59 = vor.u32 %v11004_v23, %v8119_v38  ;;  %v8311_v38 = vld [vmem:[#allocation5 + $0x558] sm:$0xf] }
 0x26d   :  { %v9297_v52 = vld [vmem:[#allocation5 + $0xd30] sm:$0xf0]  ;;  %v12034_v58 = vadd.f32 %v4077_v43, %v4065_v42  ;;  %v8567_v23 = vld [vmem:[#allocation5 + $0x758] sm:$0xf] }
 0x26e   :  { %v11359_v61 = vld [vmem:[#allocation5 + $0xf14] sm:$0xf]  ;;  %v9300_v2 = vor.u32 %v11295_v51, %v9297_v52  ;;  %4306 = vmatpush.bf16.msrb.mxu1 %v9012_v55  ;;  %v7864_v52 = vor.u32 %v10940_v37, %v7863_v36  ;;  %v8087_v55 = vld [vmem:[#allocation5 + $0x398] sm:$0xf] }
 0x26f   :  { %v9553_v62 = vld [vmem:[#allocation5 + $0xf30] sm:$0xf0]  ;;  %v10980_v36 = vld [vmem:[#allocation5 + $0x334] sm:$0xf0] }
 0x270   :  { %v11151_v63 = vld [vmem:[#allocation5 + $0x894] sm:$0xf]  ;;  %v9556_v47 = vor.u32 %v11359_v61, %v9553_v62  ;;  %4318 = vmatpush.bf16.msrb.mxu2 %v9300_v2  ;;  %v10932_v62 = vld [vmem:[#allocation5 + $0x1b4] sm:$0xf0] }
 0x271   :  { %v8721_v0 = vld [vmem:[#allocation5 + $0x8b0] sm:$0xf0]  ;;  %v7735_v42 = vld [vmem:[#allocation5 + $0xd8] sm:$0xf] }
 0x272   :  { %v11215_v3 = vld [vmem:[#allocation5 + $0xa94] sm:$0xf]  ;;  %v8724_v7 = vor.u32 %v11151_v63, %v8721_v0  ;;  %4331 = vmatpush.bf16.msrb.mxu3 %v9556_v47  ;;  %v10996_v63 = vld [vmem:[#allocation5 + $0x3b4] sm:$0xf0] }
 0x273   :  { %v8977_v4 = vld [vmem:[#allocation5 + $0xab0] sm:$0xf0]  ;;  %v8375_v47 = vld [vmem:[#allocation5 + $0x5d8] sm:$0xf] }
 0x274   :  { %v11287_v5 = vld [vmem:[#allocation5 + $0xcd4] sm:$0xf]  ;;  %v8980_v10 = vor.u32 %v11215_v3, %v8977_v4  ;;  %4294 = vmatpush.bf16.msrb.mxu0 %v8724_v7  ;;  %v8631_v7 = vld [vmem:[#allocation5 + $0x7d8] sm:$0xf] }
 0x275   :  { %v9265_v6 = vld [vmem:[#allocation5 + $0xcf0] sm:$0xf0]  ;;  %v10908_v43 = vld [vmem:[#allocation5 + $0xf4] sm:$0xf0] }
 0x276   :  { %v11351_v8 = vld [vmem:[#allocation5 + $0xed4] sm:$0xf]  ;;  %v9268_v13 = vor.u32 %v11287_v5, %v9265_v6  ;;  %4307 = vmatpush.bf16.msrb.mxu1 %v8980_v10  ;;  %v11068_v5 = vld [vmem:[#allocation5 + $0x5f4] sm:$0xf0]  ;;  %v7832_v6 = vor.u32 %v10932_v62, %v7831_v54 }
 0x277   :  { %v9521_v9 = vld [vmem:[#allocation5 + $0xef0] sm:$0xf0] }
 0x278   :  { %v11143_v11 = vld [vmem:[#allocation5 + $0x854] sm:$0xf]  ;;  %v9524_v18 = vor.u32 %v11351_v8, %v9521_v9  ;;  %4319 = vmatpush.bf16.msrb.mxu2 %v9268_v13  ;;  %v11132_v8 = vld [vmem:[#allocation5 + $0x7f4] sm:$0xf0]  ;;  %v8088_v9 = vor.u32 %v10996_v63, %v8087_v55  ;;  %v4066_v13 = vpop.f32.mrf.mxu2  ;;  %v4103_v55 = vpop.f32.mrf.mxu1  ;;  %v7736_v63 = vor.u32 %v10908_v43, %v7735_v42 }
 0x279   :  { %v8689_v12 = vld [vmem:[#allocation5 + $0x870] sm:$0xf0]  ;;  %v11100_v13 = vld [vmem:[#allocation5 + $0x6f4] sm:$0xf0] }
 0x27a   :  { %v11207_v14 = vld [vmem:[#allocation5 + $0xa54] sm:$0xf]  ;;  %v8692_v25 = vor.u32 %v11143_v11, %v8689_v12  ;;  %4332 = vmatpush.bf16.msrb.mxu3 %v9524_v18  ;;  %v7799_v11 = vld [vmem:[#allocation5 + $0x158] sm:$0xf] }
 0x27b   :  { %v8945_v15 = vld [vmem:[#allocation5 + $0xa70] sm:$0xf0]  ;;  %v10924_v12 = vld [vmem:[#allocation5 + $0x174] sm:$0xf0] }
 0x27c   :  { %v11279_v19 = vld [vmem:[#allocation5 + $0xc94] sm:$0xf]  ;;  %v8948_v31 = vor.u32 %v11207_v14, %v8945_v15  ;;  %4295 = vmatpush.bf16.msrb.mxu0 %v8692_v25  ;;  %v8376_v15 = vor.u32 %v11068_v5, %v8375_v47  ;;  %v10988_v18 = vld [vmem:[#allocation5 + $0x374] sm:$0xf0] }
 0x27d   :  { %v9233_v20 = vld [vmem:[#allocation5 + $0xcb0] sm:$0xf0]  ;;  %v11060_v25 = vld [vmem:[#allocation5 + $0x5b4] sm:$0xf0] }
 0x27e   :  { %v11343_v26 = vld [vmem:[#allocation5 + $0xe94] sm:$0xf]  ;;  %v9236_v35 = vor.u32 %v11279_v19, %v9233_v20  ;;  %4308 = vmatpush.bf16.msrb.mxu1 %v8948_v31  ;;  %v4079_v19 = vpop.f32.mrf.mxu3  ;;  %v8632_v20 = vor.u32 %v11132_v8, %v8631_v7  ;;  %v8056_v31 = vor.u32 %v10988_v18, %v8055_v16  ;;  %v10964_v7 = vld [vmem:[#allocation5 + $0x2b4] sm:$0xf0] }
 0x27f   :  { %v9489_v29 = vld [vmem:[#allocation5 + $0xeb0] sm:$0xf0]  ;;  %v10892_v16 = vld [vmem:[#allocation5 + $0x74] sm:$0xf0] }
 0x280   :  { %v11135_v30 = vld [vmem:[#allocation5 + $0x814] sm:$0xf]  ;;  %v9492_v40 = vor.u32 %v11343_v26, %v9489_v29  ;;  %4320 = vmatpush.bf16.msrb.mxu2 %v9236_v35  ;;  %v7800_v26 = vor.u32 %v10924_v12, %v7799_v11  ;;  %v8599_v29 = vld [vmem:[#allocation5 + $0x798] sm:$0xf] }
 0x281   :  { %v8657_v32 = vld [vmem:[#allocation5 + $0x830] sm:$0xf0]  ;;  %v8023_v35 = vld [vmem:[#allocation5 + $0x318] sm:$0xf] }
 0x282   :  { %v11199_v33 = vld [vmem:[#allocation5 + $0xa14] sm:$0xf]  ;;  %v8660_v44 = vor.u32 %v11135_v30, %v8657_v32  ;;  %4333 = vmatpush.bf16.msrb.mxu3 %v9492_v40  ;;  %v11124_v30 = vld [vmem:[#allocation5 + $0x7b4] sm:$0xf0] }
 0x283   :  { %v8913_v34 = vld [vmem:[#allocation5 + $0xa30] sm:$0xf0]  ;;  %v7767_v32 = vld [vmem:[#allocation5 + $0x118] sm:$0xf]  ;;  %v8600_v37 = vor.u32 %v11124_v30, %v8599_v29 }
 0x284   :  { %v11271_v41 = vld [vmem:[#allocation5 + $0xc54] sm:$0xf]  ;;  %v8916_v51 = vor.u32 %v11199_v33, %v8913_v34  ;;  %4296 = vmatpush.bf16.msrb.mxu0 %v8660_v44  ;;  %v10916_v33 = vld [vmem:[#allocation5 + $0x134] sm:$0xf0]  ;;  %v8344_v34 = vor.u32 %v11060_v25, %v8343_v21  ;;  %v11897_v44 = vmov 8.0  }
 0x285   :  { %v9201_v50 = vld [vmem:[#allocation5 + $0xc70] sm:$0xf0]  ;;  %v7768_v40 = vor.u32 %v10916_v33, %v7767_v32  ;;  %11690 = vrcp.f32 %v11897_v44  ;;  %v8503_v12 = vld [vmem:[#allocation5 + $0x6d8] sm:$0xf]  ;;  %v4105_v32 = vpop.f32.mrf.mxu1  ;;  %v4116_v44 = vpop.f32.mrf.mxu2 }
 0x286   :  { %v11335_v45 = vld [vmem:[#allocation5 + $0xe54] sm:$0xf]  ;;  %v9204_v61 = vor.u32 %v11271_v41, %v9201_v50  ;;  %4309 = vmatpush.bf16.msrb.mxu1 %v8916_v51  ;;  %v11116_v41 = vld [vmem:[#allocation5 + $0x774] sm:$0xf0]  ;;  %v8024_v50 = vor.u32 %v10980_v36, %v8023_v35 }
 0x287   :  { %v9457_v46 = vld [vmem:[#allocation5 + $0xe70] sm:$0xf0]  ;;  %4297 = vmatmul.bf16.vlgmr.msrb.gmra.mxu0 %v11974_v17  ;;  %v10972_v51 = vld [vmem:[#allocation5 + $0x2f4] sm:$0xf0]  ;;  %v8568_v54 = vor.u32 %v11116_v41, %v8567_v23 }
 0x288   :  { %v9460_v0 = vor.u32 %v11335_v45, %v9457_v46  ;;  %v11263_v1 = vld [vmem:[#allocation5 + $0xc14] sm:$0xf]  ;;  %4341 = vmatpush.bf16.msra.mxu0 %v7864_v52  ;;  %4321 = vmatpush.bf16.msrb.mxu2 %v9204_v61  ;;  %v8312_v45 = vor.u32 %v11052_v39, %v8311_v38  ;;  %v7991_v46 = vld [vmem:[#allocation5 + $0x2d8] sm:$0xf]  ;;  %v4090_v52 = vpop.f32.mrf.mxu0 }
 0x289   :  { %v9169_v2 = vld [vmem:[#allocation5 + $0xc30] sm:$0xf0]  ;;  %4310 = vmatmul.bf16.vlgmr.msrb.gmra.mxu1 %v11976_v24  ;;  %v11044_v61 = vld [vmem:[#allocation5 + $0x534] sm:$0xf0]  ;;  %v4091_v62 = vadd.f32 %v4090_v52, %v12034_v58 }
 0x28a   :  { %v11327_v3 = vld [vmem:[#allocation5 + $0xe14] sm:$0xf]  ;;  %4354 = vmatpush.bf16.msra.mxu1 %v8120_v59  ;;  %v9172_v10 = vor.u32 %v11263_v1, %v9169_v2  ;;  %4334 = vmatpush.bf16.msrb.mxu3 %v9460_v0  ;;  %v8279_v59 = vld [vmem:[#allocation5 + $0x518] sm:$0xf]  ;;  %v7992_v2 = vor.u32 %v10972_v51, %v7991_v46 }
 0x28b   :  { %v9425_v4 = vld [vmem:[#allocation5 + $0xe30] sm:$0xf0]  ;;  %v8535_v0 = vld [vmem:[#allocation5 + $0x718] sm:$0xf]  ;;  %v4104_v47 = vadd.f32 %v4103_v55, %v4091_v62  ;;  %v8280_v5 = vor.u32 %v11044_v61, %v8279_v59  ;;  %v12041_v11 = vpop.eup %11690  ;;  %v4129_v62 = vpop.f32.mrf.mxu3 }
 0x28c   :  { %v9428_v14 = vor.u32 %v11327_v3, %v9425_v4  ;;  %4342 = vmatpush.bf16.msra.mxu0 %v7832_v6  ;;  %4322 = vmatpush.bf16.msrb.mxu2 %v9172_v10  ;;  %v11108_v1 = vld [vmem:[#allocation5 + $0x734] sm:$0xf0]  ;;  %v12044_v21 = vmul.f32 8.0, %v12041_v11  ;;  %vm4602_vm8 = vweird.f32 %v12041_v11 }
 0x28d   :  { %v7703_v3 = vld [vmem:[#allocation5 + $0x98] sm:$0xf]  ;;  %v8536_v8 = vor.u32 %v11108_v1, %v8535_v0  ;;  %v4117_v61 = vadd.f32 %v4116_v44, %v4104_v47  ;;  %v4555_v1 = vrot.slane %v12015_v53, 4 }
 0x28e   :  { %4355 = vmatpush.bf16.msra.mxu1 %v8088_v9  ;;  %4335 = vmatpush.bf16.msrb.mxu3 %v9428_v14  ;;  %v10900_v4 = vld [vmem:[#allocation5 + $0xb4] sm:$0xf0] }
 0x28f   :  { %4323 = vmatmul.bf16.vlgmr.msrb.gmra.mxu2 %v11980_v56  ;;  %v7959_v6 = vld [vmem:[#allocation5 + $0x298] sm:$0xf]  ;;  %v7704_v58 = vor.u32 %v10900_v4, %v7703_v3 }
 0x290   :  { %4367 = vmatpush.bf16.msra.mxu2 %v8376_v15  ;;  %4343 = vmatpush.bf16.msra.mxu0 %v7800_v26  ;;  %v8247_v9 = vld [vmem:[#allocation5 + $0x4d8] sm:$0xf]  ;;  %v7960_v14 = vor.u32 %v10964_v7, %v7959_v6  ;;  %v4092_v25 = vpop.f32.mrf.mxu0  ;;  %v8504_v26 = vor.u32 %v11100_v13, %v8503_v12  ;;  %v12058_v6 = vadd.f32 %v4129_v62, %v4117_v61 }
 0x291   :  { %4336 = vmatmul.bf16.vlgmr.msrb.gmra.mxu3 %v11982_v60  ;;  %v11036_v10 = vld [vmem:[#allocation5 + $0x4f4] sm:$0xf0]  ;;  %v4614_v62 = vmul.f32 %v12028_v48, %v12028_v48 }
 0x292   :  { %4380 = vmatpush.bf16.msra.mxu3 %v8632_v20  ;;  %4356 = vmatpush.bf16.msra.mxu1 %v8056_v31  ;;  %v7671_v15 = vld [vmem:[#allocation5 + $0x58] sm:$0xf]  ;;  %v8248_v18 = vor.u32 %v11036_v10, %v8247_v9  ;;  %v12048_v31 = vmul.f32 %v12009_v28, %v12009_v28 }
 0x293   :  { %v7927_v19 = vld [vmem:[#allocation5 + $0x258] sm:$0xf]  ;;  %v7672_v33 = vor.u32 %v10892_v16, %v7671_v15 }
 0x294   :  { %4368 = vmatpush.bf16.msra.mxu2 %v8344_v34  ;;  %4344 = vmatpush.bf16.msra.mxu0 %v7768_v40  ;;  %v10956_v20 = vld [vmem:[#allocation5 + $0x274] sm:$0xf0]  ;;  %v4620_v59 = vrot.slane %v12048_v31, 4 }
 0x295   :  { %v8215_v29 = vld [vmem:[#allocation5 + $0x498] sm:$0xf]  ;;  %v7928_v38 = vor.u32 %v10956_v20, %v7927_v19 }
 0x296   :  { %4381 = vmatpush.bf16.msra.mxu3 %v8600_v37  ;;  %4357 = vmatpush.bf16.msra.mxu1 %v8024_v50  ;;  %v11028_v30 = vld [vmem:[#allocation5 + $0x4b4] sm:$0xf0]  ;;  %v12052_v37 = vmul.f32 %v12015_v53, %v12015_v53 }
 0x297   :  { %v8471_v34 = vld [vmem:[#allocation5 + $0x698] sm:$0xf]  ;;  %v8216_v41 = vor.u32 %v11028_v30, %v8215_v29  ;;  %v4556_v29 = vadd.f32 %v4555_v1, %v12015_v53 }
 0x298   :  { %4369 = vmatpush.bf16.msra.mxu2 %v8312_v45  ;;  %4345 = vmatpush.bf16.msra.mxu0 %v7736_v63  ;;  %v11092_v35 = vld [vmem:[#allocation5 + $0x6b4] sm:$0xf0] }
 0x299   :  { %v7639_v36 = vld [vmem:[#allocation5 + $0x18] sm:$0xf]  ;;  %v8472_v45 = vor.u32 %v11092_v35, %v8471_v34  ;;  %v4599_v35 = vsub.f32 1.0, %v12044_v21  ;;  %v4561_v21 = vrot.slane %v12028_v48, 4  ;;  %v4557_v61 = vrot.slane %v4556_v29, 2 }
 0x29a   :  { %4382 = vmatpush.bf16.msra.mxu3 %v8568_v54  ;;  %4358 = vmatpush.bf16.msra.mxu1 %v7992_v2  ;;  %v10884_v39 = vld [vmem:[#allocation5 + $0x34] sm:$0xf0]  ;;  %v4549_v54 = vrot.slane %v12009_v28, 4  ;;  %v4626_v2 = vrot.slane %v12052_v37, 4 }
 0x29b   :  { %v7895_v40 = vld [vmem:[#allocation5 + $0x218] sm:$0xf]  ;;  %v7640_v55 = vor.u32 %v10884_v39, %v7639_v36  ;;  %v4118_v36 = vpop.f32.mrf.mxu2 }
 0x29c   :  { %4370 = vmatpush.bf16.msra.mxu2 %v8280_v5  ;;  %4346 = vmatpush.bf16.msra.mxu0 %v7704_v58  ;;  %v10948_v23 = vld [vmem:[#allocation5 + $0x234] sm:$0xf0]  ;;  %v4550_v15 = vadd.f32 %v4549_v54, %v12009_v28 }
 0x29d   :  { %v8887_v50 = vld [vmem:[#allocation5 + $0x9d8] sm:$0xf]  ;;  %v7896_v3 = vor.u32 %v10948_v23, %v7895_v40 }
 0x29e   :  { %4383 = vmatpush.bf16.msra.mxu3 %v8536_v8  ;;  %4359 = vmatpush.bf16.msra.mxu1 %v7960_v14  ;;  %v11196_v42 = vld [vmem:[#allocation5 + $0x9f4] sm:$0xf0] }
 0x29f   :  { %v9143_v43 = vld [vmem:[#allocation5 + $0xbd8] sm:$0xf]  ;;  %v8888_v4 = vor.u32 %v11196_v42, %v8887_v50  ;;  %v4621_v50 = vadd.f32 %v4620_v59, %v12048_v31  ;;  %v4627_v42 = vadd.f32 %v4626_v2, %v12052_v37 }
 0x2a0   :  { %4371 = vmatpush.bf16.msra.mxu2 %v8248_v18  ;;  %v11260_v46 = vld [vmem:[#allocation5 + $0xbf4] sm:$0xf0]  ;;  %4347 = vmatpush.bf16.msra.mxu0 %v7672_v33 }
 0x2a1   :  { %v8183_v51 = vld [vmem:[#allocation5 + $0x458] sm:$0xf]  ;;  %v9144_v7 = vor.u32 %v11260_v46, %v9143_v43  ;;  %v4131_v43 = vpop.f32.mrf.mxu3 }
 0x2a2   :  { %4384 = vmatpush.bf16.msra.mxu3 %v8504_v26  ;;  %v11020_v52 = vld [vmem:[#allocation5 + $0x474] sm:$0xf0]  ;;  %4360 = vmatpush.bf16.msra.mxu1 %v7928_v38 }
 0x2a3   :  { %v8439_v63 = vld [vmem:[#allocation5 + $0x658] sm:$0xf]  ;;  %v8184_v8 = vor.u32 %v11020_v52, %v8183_v51 }
 0x2a4   :  { %v11084_v0 = vld [vmem:[#allocation5 + $0x674] sm:$0xf0]  ;;  %4372 = vmatpush.bf16.msra.mxu2 %v8216_v41  ;;  %4348 = vmatpush.bf16.msra.mxu0 %v7640_v55  ;;  %v4551_v41 = vrot.slane %v4550_v15, 2  ;;  %v4600_v55 = vmul.f32 %v12041_v11, %v4599_v35 }
 0x2a5   :  { %v8855_v5 = vld [vmem:[#allocation5 + $0x998] sm:$0xf]  ;;  %v8440_v58 = vor.u32 %v11084_v0, %v8439_v63 }
 0x2a6   :  { %v11188_v9 = vld [vmem:[#allocation5 + $0x9b4] sm:$0xf0]  ;;  %4385 = vmatpush.bf16.msra.mxu3 %v8472_v45  ;;  %4361 = vmatpush.bf16.msra.mxu1 %v7896_v3  ;;  %v4552_v2 = vadd.f32 %v4551_v41, %v4550_v15  ;;  %v4622_v3 = vrot.slane %v4621_v50, 2  ;;  %v4632_v15 = vrot.slane %v4614_v62, 4  ;;  %v12082_v41 = vpop.f32.mrf.mxu1 }
 0x2a7   :  { %v9111_v47 = vld [vmem:[#allocation5 + $0xb98] sm:$0xf]  ;;  %v8856_v20 = vor.u32 %v11188_v9, %v8855_v5  ;;  %4349 = vmatmul.bf16.vlgmr.msra.gmra.mxu0 %v11962_v22  ;;  %v4562_v9 = vadd.f32 %v4561_v21, %v12028_v48 }
 0x2a8   :  { %v11252_v10 = vld [vmem:[#allocation5 + $0xbb4] sm:$0xf0]  ;;  %4393 = vmatpush.bf16.msrb.mxu0 %v8888_v4  ;;  %4373 = vmatpush.bf16.msra.mxu2 %v8184_v8  ;;  %v4628_v4 = vrot.slane %v4627_v42, 2  ;;  %v4633_v21 = vadd.f32 %v4632_v15, %v4614_v62 }
 0x2a9   :  { %v8151_v12 = vld [vmem:[#allocation5 + $0x418] sm:$0xf]  ;;  %v9112_v30 = vor.u32 %v11252_v10, %v9111_v47  ;;  %4362 = vmatmul.bf16.vlgmr.msra.gmra.mxu1 %v11964_v27  ;;  %v4567_v47 = vrot.slane %v12058_v6, 4  ;;  %v4615_v10 = vmul.f32 %v12058_v6, %v12058_v6 }
 0x2aa   :  { %v11012_v13 = vld [vmem:[#allocation5 + $0x434] sm:$0xf0]  ;;  %4406 = vmatpush.bf16.msrb.mxu1 %v9144_v7  ;;  %4386 = vmatpush.bf16.msra.mxu3 %v8440_v58 }
 0x2ab   :  { %v8407_v14 = vld [vmem:[#allocation5 + $0x618] sm:$0xf]  ;;  %v8152_v32 = vor.u32 %v11012_v13, %v8151_v12 }
 0x2ac   :  { %v11076_v16 = vld [vmem:[#allocation5 + $0x634] sm:$0xf0]  ;;  %4394 = vmatpush.bf16.msrb.mxu0 %v8856_v20  ;;  %v4601_v20 = vadd.f32 %v12041_v11, %v4600_v55 }
 0x2ad   :  { %v9399_v18 = vld [vmem:[#allocation5 + $0xdd8] sm:$0xf]  ;;  %v8408_v38 = vor.u32 %v11076_v16, %v8407_v14  ;;  %4374 = vmatpush.bf16.msra.mxu2 %v8152_v32  ;;  %v4558_v14 = vadd.f32 %v4557_v61, %v4556_v29  ;;  %v4553_v32 = vrot.slane %v4552_v2, 1  ;;  %v12079_v29 = vpop.f32.mrf.mxu0 }
 0x2ae   :  { %v11324_v19 = vld [vmem:[#allocation5 + $0xdf4] sm:$0xf0]  ;;  %4407 = vmatpush.bf16.msrb.mxu1 %v9112_v30 }
 0x2af   :  { %v9655_v25 = vld [vmem:[#allocation5 + $0xfd8] sm:$0xf]  ;;  %v9400_v39 = vor.u32 %v11324_v19, %v9399_v18  ;;  %4387 = vmatpush.bf16.msra.mxu3 %v8408_v38 }
 0x2b0   :  { %v11388_v26 = vld [vmem:[#allocation5 + $0xff4] sm:$0xf0]  ;;  %4375 = vmatmul.bf16.vlgmr.msra.gmra.mxu2 %v11968_v49 }
 0x2b1   :  { %v8823_v33 = vld [vmem:[#allocation5 + $0x958] sm:$0xf]  ;;  %v9656_v44 = vor.u32 %v11388_v26, %v9655_v25  ;;  %4419 = vmatpush.bf16.msrb.mxu2 %v9400_v39  ;;  %v4563_v39 = vrot.slane %v4562_v9, 2 }
 0x2b2   :  { %v11180_v34 = vld [vmem:[#allocation5 + $0x974] sm:$0xf0]  ;;  %4388 = vmatmul.bf16.vlgmr.msra.gmra.mxu3 %v11970_v57 }
 0x2b3   :  { %v9079_v40 = vld [vmem:[#allocation5 + $0xb58] sm:$0xf]  ;;  %v8824_v51 = vor.u32 %v11180_v34, %v8823_v33  ;;  %4432 = vmatpush.bf16.msrb.mxu3 %v9656_v44  ;;  %v4623_v33 = vadd.f32 %v4622_v3, %v4621_v50  ;;  %v4629_v34 = vadd.f32 %v4628_v4, %v4627_v42 }
 0x2b4   :  { %v11244_v23 = vld [vmem:[#allocation5 + $0xb74] sm:$0xf0] }
 0x2b5   :  { %v9367_v45 = vld [vmem:[#allocation5 + $0xd98] sm:$0xf]  ;;  %v9080_v31 = vor.u32 %v11244_v23, %v9079_v40  ;;  %4395 = vmatpush.bf16.msrb.mxu0 %v8824_v51  ;;  %v4568_v40 = vadd.f32 %v4567_v47, %v12058_v6  ;;  %v4638_v23 = vrot.slane %v4615_v10, 4  ;;  %v4630_v55 = vrot.slane %v4629_v34, 1 }
 0x2b6   :  { %v11316_v46 = vld [vmem:[#allocation5 + $0xdb4] sm:$0xf0]  ;;  %v4634_v47 = vrot.slane %v4633_v21, 2 }
 0x2b7   :  { %v9623_v52 = vld [vmem:[#allocation5 + $0xf98] sm:$0xf]  ;;  %v9368_v63 = vor.u32 %v11316_v46, %v9367_v45  ;;  %4408 = vmatpush.bf16.msrb.mxu1 %v9080_v31  ;;  %v4559_v46 = vrot.slane %v4558_v14, 1  ;;  %v4569_v3 = vrot.slane %v4568_v40, 2  ;;  %v4639_v4 = vadd.f32 %v4638_v23, %v4615_v10  ;;  %v4144_v10 = vpop.f32.mrf.mxu0 }
 0x2b8   :  { %v11380_v54 = vld [vmem:[#allocation5 + $0xfb4] sm:$0xf0] }
 0x2b9   :  { %v8791_v37 = vld [vmem:[#allocation5 + $0x918] sm:$0xf]  ;;  %v9624_v5 = vor.u32 %v11380_v54, %v9623_v52  ;;  %4420 = vmatpush.bf16.msrb.mxu2 %v9368_v63  ;;  %v12087_v52 = vsel %vm4602_vm8, %v12041_v11, %v4601_v20 }
 0x2ba   :  { %v11172_v59 = vld [vmem:[#allocation5 + $0x934] sm:$0xf0] }
 0x2bb   :  { %v9047_v0 = vld [vmem:[#allocation5 + $0xb18] sm:$0xf]  ;;  %v8792_v58 = vor.u32 %v11172_v59, %v8791_v37  ;;  %4433 = vmatpush.bf16.msrb.mxu3 %v9624_v5  ;;  %v4554_v37 = vadd.f32 %v4553_v32, %v4552_v2  ;;  %v4624_v59 = vrot.slane %v4623_v33, 1  ;;  %v4570_v32 = vadd.f32 %v4569_v3, %v4568_v40  ;;  %v11000_v40 = vld [vmem:[#allocation5 + $0x3dc] sm:$0xf]  ;;  %v12110_v3 = vpop.f32.mrf.mxu3 }
 0x2bc   :  { %v11236_v1 = vld [vmem:[#allocation5 + $0xb34] sm:$0xf0] }
 0x2bd   :  { %v9335_v7 = vld [vmem:[#allocation5 + $0xd58] sm:$0xf]  ;;  %v9048_v16 = vor.u32 %v11236_v1, %v9047_v0  ;;  %4396 = vmatpush.bf16.msrb.mxu0 %v8792_v58  ;;  %v12089_v1 = vadd.f32 %v4563_v39, %v4562_v9  ;;  %v4625_v9 = vadd.f32 %v4624_v59, %v4623_v33  ;;  %v4635_v33 = vadd.f32 %v4634_v47, %v4633_v21 }
 0x2be   :  { %v11308_v8 = vld [vmem:[#allocation5 + $0xd74] sm:$0xf0] }
 0x2bf   :  { %v9591_v12 = vld [vmem:[#allocation5 + $0xf58] sm:$0xf]  ;;  %v9336_v25 = vor.u32 %v11308_v8, %v9335_v7  ;;  %4409 = vmatpush.bf16.msrb.mxu1 %v9048_v16  ;;  %v4560_v8 = vadd.f32 %v4559_v46, %v4558_v14  ;;  %v4636_v47 = vrot.slane %v4635_v33, 1 }
 0x2c0   :  { %v11372_v13 = vld [vmem:[#allocation5 + $0xf74] sm:$0xf0] }
 0x2c1   :  { %v8759_v18 = vld [vmem:[#allocation5 + $0x8d8] sm:$0xf]  ;;  %v9592_v35 = vor.u32 %v11372_v13, %v9591_v12  ;;  %4421 = vmatpush.bf16.msrb.mxu2 %v9336_v25 }
 0x2c2   :  { %v11164_v19 = vld [vmem:[#allocation5 + $0x8f4] sm:$0xf0] }
 0x2c3   :  { %v9015_v26 = vld [vmem:[#allocation5 + $0xad8] sm:$0xf]  ;;  %v8760_v43 = vor.u32 %v11164_v19, %v8759_v18  ;;  %4434 = vmatpush.bf16.msrb.mxu3 %v9592_v35  ;;  %v12092_v18 = vmul.f32 %v12087_v52, %v4554_v37  ;;  %v4631_v19 = vadd.f32 %v4630_v55, %v4629_v34  ;;  %v4640_v35 = vrot.slane %v4639_v4, 2  ;;  %v8121_v37 = vld [vmem:[#allocation5 + $0x3f8] sm:$0xf0] }
 0x2c4   :  { %v11228_v30 = vld [vmem:[#allocation5 + $0xaf4] sm:$0xf0] }
 0x2c5   :  { %v9303_v36 = vld [vmem:[#allocation5 + $0xd18] sm:$0xf]  ;;  %v9016_v50 = vor.u32 %v11228_v30, %v9015_v26  ;;  %4397 = vmatpush.bf16.msrb.mxu0 %v8760_v43  ;;  %v4565_v30 = vrot.slane %v12089_v1, 1  ;;  %v12096_v43 = vmul.f32 %v12087_v52, %v4560_v8 }
 0x2c6   :  { %v11300_v38 = vld [vmem:[#allocation5 + $0xd34] sm:$0xf0] }
 0x2c7   :  { %v9559_v44 = vld [vmem:[#allocation5 + $0xf18] sm:$0xf]  ;;  %v9304_v54 = vor.u32 %v11300_v38, %v9303_v36  ;;  %4410 = vmatpush.bf16.msrb.mxu1 %v9016_v50  ;;  %v4157_v36 = vpop.f32.mrf.mxu1  ;;  %v12114_v8 = vmul.f32 %v12096_v43, %v12096_v43  ;;  %v4566_v10 = vadd.f32 %v4565_v30, %v12089_v1  ;;  %v11128_v1 = vld [vmem:[#allocation5 + $0x7dc] sm:$0xf] }
 0x2c8   :  { %v11364_v45 = vld [vmem:[#allocation5 + $0xf34] sm:$0xf0]  ;;  %v8633_v30 = vld [vmem:[#allocation5 + $0x7f8] sm:$0xf0] }
 0x2c9   :  { %v8727_v42 = vld [vmem:[#allocation5 + $0x898] sm:$0xf]  ;;  %v9560_v63 = vor.u32 %v11364_v45, %v9559_v44  ;;  %4422 = vmatpush.bf16.msrb.mxu2 %v9304_v54  ;;  %v12099_v54 = vmul.f32 %v4625_v9, %v12087_v52  ;;  %v8089_v9 = vld [vmem:[#allocation5 + $0x3b8] sm:$0xf0] }
 0x2ca   :  { %v11156_v51 = vld [vmem:[#allocation5 + $0x8b4] sm:$0xf0] }
 0x2cb   :  { %v8983_v61 = vld [vmem:[#allocation5 + $0xa98] sm:$0xf]  ;;  %v8728_v5 = vor.u32 %v11156_v51, %v8727_v42  ;;  %4435 = vmatpush.bf16.msrb.mxu3 %v9560_v63  ;;  %v10936_v42 = vld [vmem:[#allocation5 + $0x1dc] sm:$0xf]  ;;  %v12108_v63 = vmul.f32 %v4631_v19, %v12087_v52 }
 0x2cc   :  { %v11220_v31 = vld [vmem:[#allocation5 + $0xab4] sm:$0xf0]  ;;  %v7865_v51 = vld [vmem:[#allocation5 + $0x1f8] sm:$0xf0] }
 0x2cd   :  { %v9271_v0 = vld [vmem:[#allocation5 + $0xcd8] sm:$0xf]  ;;  %v8984_v58 = vor.u32 %v11220_v31, %v8983_v61  ;;  %4398 = vmatpush.bf16.msrb.mxu0 %v8728_v5  ;;  %v12103_v61 = vmul.f32 %v12092_v18, %v12092_v18  ;;  %v12105_v31 = vpop.f32.mrf.mxu2 }
 0x2ce   :  { %v11292_v62 = vld [vmem:[#allocation5 + $0xcf4] sm:$0xf0] }
 0x2cf   :  { %v9527_v7 = vld [vmem:[#allocation5 + $0xed8] sm:$0xf]  ;;  %v9272_v13 = vor.u32 %v11292_v62, %v9271_v0  ;;  %4411 = vmatpush.bf16.msrb.mxu1 %v8984_v58  ;;  %v4571_v0 = vrot.slane %v4570_v32, 1  ;;  %v4641_v62 = vadd.f32 %v4640_v35, %v4639_v4  ;;  %v10992_v4 = vld [vmem:[#allocation5 + $0x39c] sm:$0xf] }
 0x2d0   :  { %v11356_v11 = vld [vmem:[#allocation5 + $0xef4] sm:$0xf0] }
 0x2d1   :  { %v8695_v12 = vld [vmem:[#allocation5 + $0x858] sm:$0xf]  ;;  %v9528_v20 = vor.u32 %v11356_v11, %v9527_v7  ;;  %4423 = vmatpush.bf16.msrb.mxu2 %v9272_v13  ;;  %v7833_v13 = vld [vmem:[#allocation5 + $0x1b8] sm:$0xf0]  ;;  %v4572_v35 = vadd.f32 %v4571_v0, %v4570_v32  ;;  %v4642_v36 = vrot.slane %v4641_v62, 1  ;;  %v4183_v0 = vpop.f32.mrf.mxu3 }
 0x2d2   :  { %v11148_v2 = vld [vmem:[#allocation5 + $0x874] sm:$0xf0]  ;;  %v11104_v0 = vld [vmem:[#allocation5 + $0x71c] sm:$0xf] }
 0x2d3   :  { %v8951_v15 = vld [vmem:[#allocation5 + $0xa58] sm:$0xf]  ;;  %v8696_v38 = vor.u32 %v11148_v2, %v8695_v12  ;;  %4436 = vmatpush.bf16.msrb.mxu3 %v9528_v20  ;;  %v7868_v12 = vor.u32 %v10936_v42, %v7865_v51  ;;  %v10928_v2 = vld [vmem:[#allocation5 + $0x19c] sm:$0xf]  ;;  %v12122_v51 = vmul.f32 %v12087_v52, %v4566_v10 }
 0x2d4   :  { %v11212_v16 = vld [vmem:[#allocation5 + $0xa74] sm:$0xf0]  ;;  %v7801_v42 = vld [vmem:[#allocation5 + $0x178] sm:$0xf0] }
 0x2d5   :  { %v9239_v25 = vld [vmem:[#allocation5 + $0xc98] sm:$0xf]  ;;  %v8952_v34 = vor.u32 %v11212_v16, %v8951_v15  ;;  %4399 = vmatpush.bf16.msrb.mxu0 %v8696_v38  ;;  %v8124_v15 = vor.u32 %v11000_v40, %v8121_v37  ;;  %v11064_v38 = vld [vmem:[#allocation5 + $0x5dc] sm:$0xf]  ;;  %v11720_v40 = vld [vmem:[#allocation10 + $0x20] sm:$0xff] }
 0x2d6   :  { %v11284_v26 = vld [vmem:[#allocation5 + $0xcb4] sm:$0xf0]  ;;  %v10976_v10 = vld [vmem:[#allocation5 + $0x31c] sm:$0xf] }
 0x2d7   :  { %v9495_v14 = vld [vmem:[#allocation5 + $0xe98] sm:$0xf]  ;;  %v9240_v50 = vor.u32 %v11284_v26, %v9239_v25  ;;  %4412 = vmatpush.bf16.msrb.mxu1 %v8952_v34  ;;  %v4685_v34 = vsub.f32 %v12108_v63, %v12114_v8  ;;  %v4643_v63 = vadd.f32 %v4642_v36, %v4641_v62  ;;  %v4678_v62 = vmul.f32 %v12122_v51, %v12122_v51  ;;  %v8313_v36 = vld [vmem:[#allocation5 + $0x578] sm:$0xf0] }
 0x2d8   :  { %v11348_v39 = vld [vmem:[#allocation5 + $0xeb4] sm:$0xf0] }
 0x2d9   :  { %v8663_v23 = vld [vmem:[#allocation5 + $0x818] sm:$0xf]  ;;  %v9496_v21 = vor.u32 %v11348_v39, %v9495_v14  ;;  %4424 = vmatpush.bf16.msrb.mxu2 %v9240_v50  ;;  %v8377_v39 = vld [vmem:[#allocation5 + $0x5f8] sm:$0xf0] }
 0x2da   :  { %v11140_v44 = vld [vmem:[#allocation5 + $0x834] sm:$0xf0]  ;;  %v10920_v50 = vld [vmem:[#allocation5 + $0x15c] sm:$0xf]  ;;  %v8380_v37 = vor.u32 %v11064_v38, %v8377_v39 }
 0x2db   :  { %v8919_v45 = vld [vmem:[#allocation5 + $0xa18] sm:$0xf]  ;;  %v8664_v5 = vor.u32 %v11140_v44, %v8663_v23  ;;  %4437 = vmatpush.bf16.msrb.mxu3 %v9496_v21  ;;  %v4684_v23 = vsub.f32 %v12099_v54, %v12103_v61  ;;  %v7836_v44 = vor.u32 %v10928_v2, %v7833_v13  ;;  %v1153_v54 = vperm.slane %v11720_v40, 1  ;;  %v4170_v61 = vpop.f32.mrf.mxu2  ;;  %v11112_v39 = vld [vmem:[#allocation5 + $0x75c] sm:$0xf] }
 0x2dc   :  { %v11204_v46 = vld [vmem:[#allocation5 + $0xa34] sm:$0xf0] }
 0x2dd   :  { %v9207_v59 = vld [vmem:[#allocation5 + $0xc58] sm:$0xf]  ;;  %v8920_v58 = vor.u32 %v11204_v46, %v8919_v45  ;;  %4400 = vmatpush.bf16.msrb.mxu0 %v8664_v5  ;;  %v4637_v45 = vadd.f32 %v4636_v47, %v4635_v33  ;;  %v8092_v46 = vor.u32 %v10992_v4, %v8089_v9  ;;  %v12126_v33 = vmul.f32 %v12087_v52, %v4572_v35  ;;  %v11048_v35 = vld [vmem:[#allocation5 + $0x55c] sm:$0xf] }
 0x2de   :  { %v11276_v55 = vld [vmem:[#allocation5 + $0xc74] sm:$0xf0]  ;;  %v8636_v5 = vor.u32 %v11128_v1, %v8633_v30  ;;  %v4692_v8 = vmax.f32 %v4684_v23, 0.0  ;;  %v7804_v47 = vor.u32 %v10920_v50, %v7801_v42  ;;  %v4693_v4 = vmax.f32 %v4685_v34, 0.0  ;;  %v8569_v23 = vld [vmem:[#allocation5 + $0x778] sm:$0xf0] }
 0x2df   :  { %v9463_v7 = vld [vmem:[#allocation5 + $0xe58] sm:$0xf]  ;;  %v9208_v16 = vor.u32 %v11276_v55, %v9207_v59  ;;  %4413 = vmatpush.bf16.msrb.mxu1 %v8920_v58  ;;  %v10984_v59 = vld [vmem:[#allocation5 + $0x35c] sm:$0xf]  ;;  %v4670_v2 = vmul.f32 %v4637_v45, %v12087_v52  ;;  %v4143_v9 = vadd.f32 %v12079_v29, %v1153_v54  ;;  %v4194_v54 = vpop.f32.mrf.mxu0  ;;  %v8572_v61 = vor.u32 %v11112_v39, %v8569_v23 }
 0x2e0   :  { %v11340_v11 = vld [vmem:[#allocation5 + $0xe74] sm:$0xf0]  ;;  %4401 = vmatmul.bf16.vlgmr.msrb.gmra.mxu0 %v11974_v17  ;;  %v8057_v55 = vld [vmem:[#allocation5 + $0x378] sm:$0xf0]  ;;  %v12136_v38 = vadd.f32 1e-05, %v4692_v8 }
 0x2e1   :  { %v9175_v19 = vld [vmem:[#allocation5 + $0xc18] sm:$0xf]  ;;  %v9464_v20 = vor.u32 %v11340_v11, %v9463_v7  ;;  %4445 = vmatpush.bf16.msra.mxu0 %v7868_v12  ;;  %4425 = vmatpush.bf16.msrb.mxu2 %v9208_v16  ;;  %v11056_v7 = vld [vmem:[#allocation5 + $0x59c] sm:$0xf]  ;;  %v8060_v13 = vor.u32 %v10984_v59, %v8057_v55  ;;  %v12140_v30 = vadd.f32 1e-05, %v4693_v4  ;;  %v4686_v45 = vsub.f32 %v4670_v2, %v4678_v62  ;;  %v4207_v55 = vpop.f32.mrf.mxu1 }
 0x2e2   :  { %v11268_v25 = vld [vmem:[#allocation5 + $0xc34] sm:$0xf0]  ;;  %4414 = vmatmul.bf16.vlgmr.msrb.gmra.mxu1 %v11976_v24  ;;  %v8345_v11 = vld [vmem:[#allocation5 + $0x5b8] sm:$0xf0]  ;;  %11692 = vrsqrt.f32 %v12136_v38  ;;  %vm4714_vm9 = vweird.f32 %v12136_v38 }
 0x2e3   :  { %v9431_v26 = vld [vmem:[#allocation5 + $0xe18] sm:$0xf]  ;;  %4458 = vmatpush.bf16.msra.mxu1 %v8124_v15  ;;  %v9176_v32 = vor.u32 %v11268_v25, %v9175_v19  ;;  %4438 = vmatpush.bf16.msrb.mxu3 %v9464_v20  ;;  %v11120_v58 = vld [vmem:[#allocation5 + $0x79c] sm:$0xf]  ;;  %v8348_v19 = vor.u32 %v11056_v7, %v8345_v11  ;;  %v4671_v25 = vmul.f32 %v4643_v63, %v12087_v52  ;;  %11694 = vrsqrt.f32 %v12140_v30 }
 0x2e4   :  { %v11332_v14 = vld [vmem:[#allocation5 + $0xe34] sm:$0xf0]  ;;  %v8601_v12 = vld [vmem:[#allocation5 + $0x7b8] sm:$0xf0]  ;;  %v4694_v8 = vmax.f32 %v4686_v45, 0.0  ;;  %vm4724_vm13 = vweird.f32 %v12140_v30 }
 0x2e5   :  { %v9432_v21 = vor.u32 %v11332_v14, %v9431_v26  ;;  %4446 = vmatpush.bf16.msra.mxu0 %v7836_v44  ;;  %4426 = vmatpush.bf16.msrb.mxu2 %v9176_v32  ;;  %v10912_v15 = vld [vmem:[#allocation5 + $0x11c] sm:$0xf]  ;;  %v4679_v26 = vmul.f32 %v12126_v33, %v12126_v33  ;;  %v8604_v14 = vor.u32 %v11120_v58, %v8601_v12 }
 0x2e6   :  { %v7769_v16 = vld [vmem:[#allocation5 + $0x138] sm:$0xf0]  ;;  %v8316_v32 = vor.u32 %v11048_v35, %v8313_v36 }
 0x2e7   :  { %4459 = vmatpush.bf16.msra.mxu1 %v8092_v46  ;;  %4439 = vmatpush.bf16.msrb.mxu3 %v9432_v21  ;;  %v8025_v20 = vld [vmem:[#allocation5 + $0x338] sm:$0xf0]  ;;  %v7772_v29 = vor.u32 %v10912_v15, %v7769_v16  ;;  %v4156_v46 = vadd.f32 %v12082_v41, %v4143_v9  ;;  %v4687_v40 = vsub.f32 %v4671_v25, %v4679_v26  ;;  %v12149_v26 = vadd.f32 1e-05, %v4694_v8 }
 0x2e8   :  { %4427 = vmatmul.bf16.vlgmr.msrb.gmra.mxu2 %v11980_v56  ;;  %v8028_v34 = vor.u32 %v10976_v10, %v8025_v20  ;;  %v10904_v44 = vld [vmem:[#allocation5 + $0xdc] sm:$0xf]  ;;  %v12147_v25 = vpop.eup %11692 }
 0x2e9   :  { %4471 = vmatpush.bf16.msra.mxu2 %v8380_v37  ;;  %4447 = vmatpush.bf16.msra.mxu0 %v7804_v47  ;;  %v7737_v1 = vld [vmem:[#allocation5 + $0xf8] sm:$0xf0]  ;;  %v4169_v59 = vadd.f32 %v12105_v31, %v4156_v46  ;;  %v4695_v2 = vmax.f32 %v4687_v40, 0.0  ;;  %v4209_v45 = vpop.f32.mrf.mxu1  ;;  %v4709_v40 = vmul.f32 %v12147_v25, %v12136_v38  ;;  %11696 = vrsqrt.f32 %v12149_v26 }
 0x2ea   :  { %4440 = vmatmul.bf16.vlgmr.msrb.gmra.mxu3 %v11982_v60  ;;  %v10968_v50 = vld [vmem:[#allocation5 + $0x2dc] sm:$0xf]  ;;  %v7740_v63 = vor.u32 %v10904_v44, %v7737_v1  ;;  %v12153_v1 = vpop.eup %11694  ;;  %vm4715_vm10 = vweird.f32 %v12147_v25  ;;  %vm4734_vm0 = vweird.f32 %v12149_v26 }
 0x2eb   :  { %4484 = vmatpush.bf16.msra.mxu3 %v8636_v5  ;;  %4460 = vmatpush.bf16.msra.mxu1 %v8060_v13  ;;  %v7993_v42 = vld [vmem:[#allocation5 + $0x2f8] sm:$0xf0]  ;;  %v4182_v16 = vadd.f32 %v12110_v3, %v4169_v59  ;;  %v12151_v39 = vadd.f32 1e-05, %v4695_v2  ;;  %v4196_v3 = vpop.f32.mrf.mxu0  ;;  %vm4725_vm11 = vweird.f32 %v12153_v1  ;;  %vm12192_vm12 = vmor %vm4714_vm9, %vm4715_vm10 }
 0x2ec   :  { %v11040_v21 = vld [vmem:[#allocation5 + $0x51c] sm:$0xf]  ;;  %v7996_v41 = vor.u32 %v10968_v50, %v7993_v42  ;;  %vm12209_vm14 = vmor %vm4724_vm13, %vm4725_vm11 }
 0x2ed   :  { %4472 = vmatpush.bf16.msra.mxu2 %v8348_v19  ;;  %v8281_v37 = vld [vmem:[#allocation5 + $0x538] sm:$0xf0]  ;;  %4448 = vmatpush.bf16.msra.mxu0 %v7772_v29  ;;  %11698 = vrsqrt.f32 %v12151_v39  ;;  %vm4744_vm3 = vweird.f32 %v12151_v39 }
 0x2ee   :  { %v8537_v5 = vld [vmem:[#allocation5 + $0x738] sm:$0xf0]  ;;  %v8284_v47 = vor.u32 %v11040_v21, %v8281_v37 }
 0x2ef   :  { %4485 = vmatpush.bf16.msra.mxu3 %v8604_v14  ;;  %4461 = vmatpush.bf16.msra.mxu1 %v8028_v34  ;;  %v10896_v7 = vld [vmem:[#allocation5 + $0x9c] sm:$0xf]  ;;  %v8540_v13 = vor.u32 %v11104_v0, %v8537_v5  ;;  %v4195_v14 = vadd.f32 %v4194_v54, %v4182_v16  ;;  %v4710_v16 = vmul.f32 %v12147_v25, %v4709_v40 }
 0x2f0   :  { %v7705_v11 = vld [vmem:[#allocation5 + $0xb8] sm:$0xf0] }
 0x2f1   :  { %4473 = vmatpush.bf16.msra.mxu2 %v8316_v32  ;;  %v10960_v58 = vld [vmem:[#allocation5 + $0x29c] sm:$0xf]  ;;  %4449 = vmatpush.bf16.msra.mxu0 %v7740_v63  ;;  %v7708_v4 = vor.u32 %v10896_v7, %v7705_v11  ;;  %v4208_v59 = vadd.f32 %v4207_v55, %v4195_v14  ;;  %v4719_v7 = vmul.f32 %v12153_v1, %v12140_v30  ;;  %v4220_v11 = vpop.f32.mrf.mxu2  ;;  %v4711_v40 = vmul.f32 0.5, %v4710_v16  ;;  %v12205_v38 = vpop.f32.mrf.mxu1 }
 0x2f2   :  { %v7961_v12 = vld [vmem:[#allocation5 + $0x2b8] sm:$0xf0] }
 0x2f3   :  { %4486 = vmatpush.bf16.msra.mxu3 %v8572_v61  ;;  %v11032_v31 = vld [vmem:[#allocation5 + $0x4dc] sm:$0xf]  ;;  %4462 = vmatpush.bf16.msra.mxu1 %v7996_v41  ;;  %v7964_v19 = vor.u32 %v10960_v58, %v7961_v12  ;;  %v4221_v2 = vadd.f32 %v4220_v11, %v4208_v59  ;;  %v4720_v3 = vmul.f32 %v12153_v1, %v4719_v7  ;;  %v12169_v7 = vpop.eup %11696 }
 0x2f4   :  { %v8249_v15 = vld [vmem:[#allocation5 + $0x4f8] sm:$0xf0]  ;;  %vm4735_vm15 = vweird.f32 %v12169_v7 }
 0x2f5   :  { %v11096_v62 = vld [vmem:[#allocation5 + $0x6dc] sm:$0xf]  ;;  %4474 = vmatpush.bf16.msra.mxu2 %v8284_v47  ;;  %v8252_v35 = vor.u32 %v11032_v31, %v8249_v15  ;;  %4450 = vmatpush.bf16.msra.mxu0 %v7708_v4  ;;  %v4721_v11 = vmul.f32 0.5, %v4720_v3  ;;  %vm12248_vm1 = vmor %vm4734_vm0, %vm4735_vm15 }
 0x2f6   :  { %v8505_v9 = vld [vmem:[#allocation5 + $0x6f8] sm:$0xf0] }
 0x2f7   :  { %v10888_v10 = vld [vmem:[#allocation5 + $0x5c] sm:$0xf]  ;;  %4487 = vmatpush.bf16.msra.mxu3 %v8540_v13  ;;  %v8508_v23 = vor.u32 %v11096_v62, %v8505_v9  ;;  %4463 = vmatpush.bf16.msra.mxu1 %v7964_v19  ;;  %v4233_v13 = vpop.f32.mrf.mxu3 }
 0x2f8   :  { %v7673_v20 = vld [vmem:[#allocation5 + $0x78] sm:$0xf0] }
 0x2f9   :  { %v10952_v36 = vld [vmem:[#allocation5 + $0x25c] sm:$0xf]  ;;  %v7676_v46 = vor.u32 %v10888_v10, %v7673_v20  ;;  %4475 = vmatpush.bf16.msra.mxu2 %v8252_v35  ;;  %v12162_v10 = vadd.f32 %v4233_v13, %v4221_v2  ;;  %v12172_v13 = vpop.eup %11698 }
 0x2fa   :  { %v7929_v29 = vld [vmem:[#allocation5 + $0x278] sm:$0xf0]  ;;  %vm4745_vm2 = vweird.f32 %v12172_v13 }
 0x2fb   :  { %v11024_v34 = vld [vmem:[#allocation5 + $0x49c] sm:$0xf]  ;;  %v7932_v54 = vor.u32 %v10952_v36, %v7929_v29  ;;  %4488 = vmatpush.bf16.msra.mxu3 %v8508_v23  ;;  %4451 = vmatpush.bf16.msra.mxu0 %v7676_v46  ;;  %v4573_v46 = vrot.slane %v12162_v10, 4  ;;  %vm12271_vm4 = vmor %vm4744_vm3, %vm4745_vm2 }
 0x2fc   :  { %v8217_v44 = vld [vmem:[#allocation5 + $0x4b8] sm:$0xf0] }
 0x2fd   :  { %v11088_v32 = vld [vmem:[#allocation5 + $0x69c] sm:$0xf]  ;;  %v8220_v63 = vor.u32 %v11024_v34, %v8217_v44  ;;  %4464 = vmatpush.bf16.msra.mxu1 %v7932_v54 }
 0x2fe   :  { %v8473_v50 = vld [vmem:[#allocation5 + $0x6b8] sm:$0xf0] }
 0x2ff   :  { %v10880_v42 = vld [vmem:[#allocation5 + $0x1c] sm:$0xf]  ;;  %v8476_v8 = vor.u32 %v11088_v32, %v8473_v50  ;;  %4476 = vmatpush.bf16.msra.mxu2 %v8220_v63  ;;  %v4616_v32 = vmul.f32 %v12162_v10, %v12162_v10 }
 0x300   :  { %v7641_v61 = vld [vmem:[#allocation5 + $0x38] sm:$0xf0] }
 0x301   :  { %v10944_v21 = vld [vmem:[#allocation5 + $0x21c] sm:$0xf]  ;;  %v7644_v31 = vor.u32 %v10880_v42, %v7641_v61  ;;  %4489 = vmatpush.bf16.msra.mxu3 %v8476_v8  ;;  %v4644_v59 = vrot.slane %v4616_v32, 4  ;;  %v4222_v8 = vpop.f32.mrf.mxu2 }
 0x302   :  { %v7897_v37 = vld [vmem:[#allocation5 + $0x238] sm:$0xf0] }
 0x303   :  { %v11192_v0 = vld [vmem:[#allocation5 + $0x9dc] sm:$0xf]  ;;  %v7900_v4 = vor.u32 %v10944_v21, %v7897_v37  ;;  %4452 = vmatpush.bf16.msra.mxu0 %v7644_v31  ;;  %v4574_v37 = vadd.f32 %v4573_v46, %v12162_v10 }
 0x304   :  { %v8889_v5 = vld [vmem:[#allocation5 + $0x9f8] sm:$0xf0] }
 0x305   :  { %v11256_v41 = vld [vmem:[#allocation5 + $0xbdc] sm:$0xf]  ;;  %v8892_v62 = vor.u32 %v11192_v0, %v8889_v5  ;;  %4465 = vmatpush.bf16.msra.mxu1 %v7900_v4  ;;  %v4575_v31 = vrot.slane %v4574_v37, 2 }
 0x306   :  { %v9145_v47 = vld [vmem:[#allocation5 + $0xbf8] sm:$0xf0]  ;;  %4453 = vmatmul.bf16.vlgmr.msra.gmra.mxu0 %v11962_v22  ;;  %v4729_v22 = vmul.f32 %v12169_v7, %v12149_v26 }
 0x307   :  { %v11016_v58 = vld [vmem:[#allocation5 + $0x45c] sm:$0xf]  ;;  %v9148_v20 = vor.u32 %v11256_v41, %v9145_v47  ;;  %4497 = vmatpush.bf16.msrb.mxu0 %v8892_v62 }
 0x308   :  { %v8185_v12 = vld [vmem:[#allocation5 + $0x478] sm:$0xf0]  ;;  %4466 = vmatmul.bf16.vlgmr.msra.gmra.mxu1 %v11964_v27  ;;  %v4739_v27 = vmul.f32 %v12172_v13, %v12151_v39 }
 0x309   :  { %v11080_v15 = vld [vmem:[#allocation5 + $0x65c] sm:$0xf]  ;;  %v8188_v14 = vor.u32 %v11016_v58, %v8185_v12  ;;  %4510 = vmatpush.bf16.msrb.mxu1 %v9148_v20 }
 0x30a   :  { %v8441_v55 = vld [vmem:[#allocation5 + $0x678] sm:$0xf0] }
 0x30b   :  { %v11184_v9 = vld [vmem:[#allocation5 + $0x99c] sm:$0xf]  ;;  %v8444_v23 = vor.u32 %v11080_v15, %v8441_v55  ;;  %4477 = vmatpush.bf16.msra.mxu2 %v8188_v14  ;;  %v4645_v15 = vadd.f32 %v4644_v59, %v4616_v32  ;;  %v4235_v55 = vpop.f32.mrf.mxu3 }
 0x30c   :  { %v8857_v19 = vld [vmem:[#allocation5 + $0x9b8] sm:$0xf0]  ;;  %v12199_v55 = vpop.f32.mrf.mxu0 }
 0x30d   :  { %v11248_v35 = vld [vmem:[#allocation5 + $0xb9c] sm:$0xf]  ;;  %v8860_v54 = vor.u32 %v11184_v9, %v8857_v19  ;;  %4490 = vmatpush.bf16.msra.mxu3 %v8444_v23  ;;  %v4712_v9 = vsub.f32 1.5, %v4711_v40 }
 0x30e   :  { %v9113_v36 = vld [vmem:[#allocation5 + $0xbb8] sm:$0xf0] }
 0x30f   :  { %v11008_v29 = vld [vmem:[#allocation5 + $0x41c] sm:$0xf]  ;;  %v9116_v63 = vor.u32 %v11248_v35, %v9113_v36  ;;  %4498 = vmatpush.bf16.msrb.mxu0 %v8860_v54  ;;  %v4576_v35 = vadd.f32 %v4575_v31, %v4574_v37  ;;  %v4646_v36 = vrot.slane %v4645_v15, 2 }
 0x310   :  { %v8153_v34 = vld [vmem:[#allocation5 + $0x438] sm:$0xf0] }
 0x311   :  { %v11072_v44 = vld [vmem:[#allocation5 + $0x61c] sm:$0xf]  ;;  %v8156_v0 = vor.u32 %v11008_v29, %v8153_v34  ;;  %4511 = vmatpush.bf16.msrb.mxu1 %v9116_v63  ;;  %v4722_v34 = vsub.f32 1.5, %v4721_v11  ;;  %v4577_v32 = vrot.slane %v4576_v35, 1  ;;  %v4730_v63 = vmul.f32 %v12169_v7, %v4729_v22 }
 0x312   :  { %v8409_v45 = vld [vmem:[#allocation5 + $0x638] sm:$0xf0] }
 0x313   :  { %v11320_v50 = vld [vmem:[#allocation5 + $0xddc] sm:$0xf]  ;;  %v8412_v47 = vor.u32 %v11072_v44, %v8409_v45  ;;  %4478 = vmatpush.bf16.msra.mxu2 %v8156_v0  ;;  %v4578_v0 = vadd.f32 %v4577_v32, %v4576_v35  ;;  %v4731_v35 = vmul.f32 0.5, %v4730_v63 }
 0x314   :  { %v9401_v42 = vld [vmem:[#allocation5 + $0xdf8] sm:$0xf0] }
 0x315   :  { %v11384_v61 = vld [vmem:[#allocation5 + $0xfdc] sm:$0xf]  ;;  %v9404_v58 = vor.u32 %v11320_v50, %v9401_v42  ;;  %4491 = vmatpush.bf16.msra.mxu3 %v8412_v47  ;;  %v4647_v50 = vadd.f32 %v4646_v36, %v4645_v15  ;;  %v4723_v47 = vmul.f32 %v12153_v1, %v4722_v34  ;;  %v12197_v31 = vmul.f32 %v12087_v52, %v4578_v0 }
 0x316   :  { %v9657_v21 = vld [vmem:[#allocation5 + $0xff8] sm:$0xf0]  ;;  %4479 = vmatmul.bf16.vlgmr.msra.gmra.mxu2 %v11968_v49  ;;  %v4740_v49 = vmul.f32 %v12172_v13, %v4739_v27  ;;  %v4732_v63 = vsub.f32 1.5, %v4731_v35 }
 0x317   :  { %v11176_v5 = vld [vmem:[#allocation5 + $0x95c] sm:$0xf]  ;;  %v9660_v16 = vor.u32 %v11384_v61, %v9657_v21  ;;  %4523 = vmatpush.bf16.msrb.mxu2 %v9404_v58  ;;  %v4713_v61 = vmul.f32 %v12147_v25, %v4712_v9 }
 0x318   :  { %v8825_v41 = vld [vmem:[#allocation5 + $0x978] sm:$0xf0]  ;;  %4492 = vmatmul.bf16.vlgmr.msra.gmra.mxu3 %v11970_v57  ;;  %v12219_v34 = vmul.f32 0.5, %v4740_v49  ;;  %v4733_v35 = vmul.f32 %v12169_v7, %v4732_v63 }
 0x319   :  { %v11240_v12 = vld [vmem:[#allocation5 + $0xb5c] sm:$0xf]  ;;  %v8828_v19 = vor.u32 %v11176_v5, %v8825_v41  ;;  %4536 = vmatpush.bf16.msrb.mxu3 %v9660_v16  ;;  %v4648_v5 = vrot.slane %v4647_v50, 1  ;;  %v4717_v9 = vsel %vm12192_vm12, %v12147_v25, %v4713_v61  ;;  %v4680_v25 = vmul.f32 %v12197_v31, %v12197_v31 }
 0x31a   :  { %v9081_v2 = vld [vmem:[#allocation5 + $0xb78] sm:$0xf0]  ;;  %v4737_v63 = vsel %vm12248_vm1, %v12169_v7, %v4733_v35  ;;  %v10127_v35 = vld [vmem:[#allocation7 + $0x3a0] sm:$0xf] }
 0x31b   :  { %v11312_v4 = vld [vmem:[#allocation5 + $0xd9c] sm:$0xf]  ;;  %v9084_v29 = vor.u32 %v11240_v12, %v9081_v2  ;;  %4499 = vmatpush.bf16.msrb.mxu0 %v8828_v19  ;;  %v4649_v15 = vadd.f32 %v4648_v5, %v4647_v50 }
 0x31c   :  { %v9369_v62 = vld [vmem:[#allocation5 + $0xdb8] sm:$0xf0] }
 0x31d   :  { %v11376_v20 = vld [vmem:[#allocation5 + $0xf9c] sm:$0xf]  ;;  %v9372_v44 = vor.u32 %v11312_v4, %v9369_v62  ;;  %4512 = vmatpush.bf16.msrb.mxu1 %v9084_v29  ;;  %v4672_v36 = vmul.f32 %v4649_v15, %v12087_v52 }
 0x31e   :  { %v9625_v14 = vld [vmem:[#allocation5 + $0xfb8] sm:$0xf0] }
 0x31f   :  { %v11168_v3 = vld [vmem:[#allocation5 + $0x91c] sm:$0xf]  ;;  %v9628_v42 = vor.u32 %v11376_v20, %v9625_v14  ;;  %4524 = vmatpush.bf16.msrb.mxu2 %v9372_v44 }
 0x320   :  { %v8793_v23 = vld [vmem:[#allocation5 + $0x938] sm:$0xf0] }
 0x321   :  { %v11232_v45 = vld [vmem:[#allocation5 + $0xb1c] sm:$0xf]  ;;  %v8796_v21 = vor.u32 %v11168_v3, %v8793_v23  ;;  %4537 = vmatpush.bf16.msrb.mxu3 %v9628_v42  ;;  %v4727_v23 = vsel %vm12209_vm14, %v12153_v1, %v4723_v47 }
 0x322   :  { %v9049_v46 = vld [vmem:[#allocation5 + $0xb38] sm:$0xf0] }
 0x323   :  { %v11304_v40 = vld [vmem:[#allocation5 + $0xd5c] sm:$0xf]  ;;  %v9052_v41 = vor.u32 %v11232_v45, %v9049_v46  ;;  %4500 = vmatpush.bf16.msrb.mxu0 %v8796_v21  ;;  %v4688_v46 = vsub.f32 %v4672_v36, %v4680_v25 }
 0x324   :  { %v9337_v54 = vld [vmem:[#allocation5 + $0xd78] sm:$0xf0] }
 0x325   :  { %v11368_v37 = vld [vmem:[#allocation5 + $0xf5c] sm:$0xf]  ;;  %v9340_v58 = vor.u32 %v11304_v40, %v9337_v54  ;;  %4513 = vmatpush.bf16.msrb.mxu1 %v9052_v41  ;;  %v12221_v40 = vld [vmem:[#allocation10] sm:$0xff]  ;;  %v4696_v0 = vmax.f32 %v4688_v46, 0.0 }
 0x326   :  { %v9593_v59 = vld [vmem:[#allocation5 + $0xf78] sm:$0xf0]  ;;  %v12224_v54 = vmul.f32 %v12221_v40, %v4717_v9 }
 0x327   :  { %v11160_v11 = vld [vmem:[#allocation5 + $0x8dc] sm:$0xf]  ;;  %v9596_v16 = vor.u32 %v11368_v37, %v9593_v59  ;;  %4525 = vmatpush.bf16.msrb.mxu2 %v9340_v58  ;;  %v12226_v37 = vld [vmem:[#allocation10 + $0x8] sm:$0xff] }
 0x328   :  { %v8761_v8 = vld [vmem:[#allocation5 + $0x8f8] sm:$0xf0]  ;;  %v12229_v59 = vmul.f32 %v12226_v37, %v4727_v23  ;;  %v11419_v23 = vld [vmem:[#allocation7 + $0xec] sm:$0xf0] }
 0x329   :  { %v11224_v12 = vld [vmem:[#allocation5 + $0xadc] sm:$0xf]  ;;  %v8764_v19 = vor.u32 %v11160_v11, %v8761_v8  ;;  %4538 = vmatpush.bf16.msrb.mxu3 %v9596_v16  ;;  %v4742_v8 = vsub.f32 1.5, %v12219_v34  ;;  %v9903_v34 = vld [vmem:[#allocation7 + $0x1e0] sm:$0xf] }
 0x32a   :  { %v9017_v2 = vld [vmem:[#allocation5 + $0xaf8] sm:$0xf0]  ;;  %v12238_v22 = vmul.f32 %v12229_v59, %v12096_v43  ;;  %v12244_v43 = vpop.f32.mrf.mxu2 }
 0x32b   :  { %v11296_v4 = vld [vmem:[#allocation5 + $0xd1c] sm:$0xf]  ;;  %v9020_v30 = vor.u32 %v11224_v12, %v9017_v2  ;;  %4501 = vmatpush.bf16.msrb.mxu0 %v8764_v19  ;;  %v12232_v12 = vadd.f32 1e-05, %v4696_v0  ;;  %v4248_v2 = vpop.f32.mrf.mxu0 }
 0x32c   :  { %v9305_v62 = vld [vmem:[#allocation5 + $0xd38] sm:$0xf0]  ;;  %v9887_v2 = vld [vmem:[#allocation7 + $0x1c0] sm:$0xf] }
 0x32d   :  { %v11360_v20 = vld [vmem:[#allocation5 + $0xf1c] sm:$0xf]  ;;  %v9308_v27 = vor.u32 %v11296_v4, %v9305_v62  ;;  %4514 = vmatpush.bf16.msrb.mxu1 %v9020_v30  ;;  %v4796_v4 = vmul.f32 %v12224_v54, %v12092_v18  ;;  %v4261_v62 = vpop.f32.mrf.mxu1  ;;  %11700 = vrsqrt.f32 %v12232_v12  ;;  %vm4754_vm7 = vweird.f32 %v12232_v12 }
 0x32e   :  { %v9561_v14 = vld [vmem:[#allocation5 + $0xf38] sm:$0xf0] }
 0x32f   :  { %v11152_v29 = vld [vmem:[#allocation5 + $0x89c] sm:$0xf]  ;;  %v9564_v32 = vor.u32 %v11360_v20, %v9561_v14  ;;  %4526 = vmatpush.bf16.msrb.mxu2 %v9308_v27 }
 0x330   :  { %v8729_v3 = vld [vmem:[#allocation5 + $0x8b8] sm:$0xf0] }
 0x331   :  { %v11216_v44 = vld [vmem:[#allocation5 + $0xa9c] sm:$0xf]  ;;  %v8732_v61 = vor.u32 %v11152_v29, %v8729_v3  ;;  %4539 = vmatpush.bf16.msrb.mxu3 %v9564_v32  ;;  %v9775_v3 = vld [vmem:[#allocation7 + $0xe0] sm:$0xf]  ;;  %v4812_v32 = vrot.slane %v4796_v4, 7 }
 0x332   :  { %v8985_v45 = vld [vmem:[#allocation5 + $0xab8] sm:$0xf0] }
 0x333   :  { %v11288_v50 = vld [vmem:[#allocation5 + $0xcdc] sm:$0xf]  ;;  %v8988_v5 = vor.u32 %v11216_v44, %v8985_v45  ;;  %4502 = vmatpush.bf16.msrb.mxu0 %v8732_v61  ;;  %v11451_v44 = vld [vmem:[#allocation7 + $0x1ec] sm:$0xf0]  ;;  %v12260_v7 = vpop.eup %11700 }
 0x334   :  { %v9273_v42 = vld [vmem:[#allocation5 + $0xcf8] sm:$0xf0]  ;;  %vm4755_vm6 = vweird.f32 %v12260_v7 }
 0x335   :  { %v11352_v21 = vld [vmem:[#allocation5 + $0xedc] sm:$0xf]  ;;  %v9276_v47 = vor.u32 %v11288_v50, %v9273_v42  ;;  %4515 = vmatpush.bf16.msrb.mxu1 %v8988_v5  ;;  %v12252_v42 = vpop.f32.mrf.mxu3  ;;  %v9776_v5 = vor.u32 %v11419_v23, %v9775_v3  ;;  %v9743_v3 = vld [vmem:[#allocation7 + $0xa0] sm:$0xf]  ;;  %v11411_v23 = vld [vmem:[#allocation7 + $0xac] sm:$0xf0] }
 0x336   :  { %v9529_v1 = vld [vmem:[#allocation5 + $0xef8] sm:$0xf0]  ;;  %vm12331_vm8 = vmor %vm4754_vm7, %vm4755_vm6 }
 0x337   :  { %v11144_v41 = vld [vmem:[#allocation5 + $0x85c] sm:$0xf]  ;;  %v9532_v57 = vor.u32 %v11352_v21, %v9529_v1  ;;  %4527 = vmatpush.bf16.msrb.mxu2 %v9276_v47  ;;  %v4813_v1 = vrot.slane %v12238_v22, 7  ;;  %v9904_v47 = vor.u32 %v11451_v44, %v9903_v34  ;;  %v4749_v34 = vmul.f32 %v12260_v7, %v12232_v12 }
 0x338   :  { %v8697_v11 = vld [vmem:[#allocation5 + $0x878] sm:$0xf0] }
 0x339   :  { %v11208_v49 = vld [vmem:[#allocation5 + $0xa5c] sm:$0xf]  ;;  %v8700_v9 = vor.u32 %v11144_v41, %v8697_v11  ;;  %4540 = vmatpush.bf16.msrb.mxu3 %v9532_v57  ;;  %v9759_v41 = vld [vmem:[#allocation7 + $0xc0] sm:$0xf]  ;;  %v4743_v11 = vmul.f32 %v12172_v13, %v4742_v8  ;;  %v11447_v57 = vld [vmem:[#allocation7 + $0x1cc] sm:$0xf0]  ;;  %v4829_v50 = vsub.f32 %v12226_v37, %v4813_v1 }
 0x33a   :  { %v8953_v58 = vld [vmem:[#allocation5 + $0xa78] sm:$0xf0]  ;;  %v10031_v8 = vld [vmem:[#allocation7 + $0x2e0] sm:$0xf] }
 0x33b   :  { %v11280_v15 = vld [vmem:[#allocation5 + $0xc9c] sm:$0xf]  ;;  %v8956_v36 = vor.u32 %v11208_v49, %v8953_v58  ;;  %4503 = vmatpush.bf16.msrb.mxu0 %v8700_v9  ;;  %v11415_v58 = vld [vmem:[#allocation7 + $0xcc] sm:$0xf0]  ;;  %v9727_v1 = vld [vmem:[#allocation7 + $0x80] sm:$0xf] }
 0x33c   :  { %v9241_v16 = vld [vmem:[#allocation5 + $0xcb8] sm:$0xf0]  ;;  %v9760_v39 = vor.u32 %v11415_v58, %v9759_v41  ;;  %v9744_v41 = vor.u32 %v11411_v23, %v9743_v3  ;;  %v9839_v3 = vld [vmem:[#allocation7 + $0x160] sm:$0xf]  ;;  %v11435_v23 = vld [vmem:[#allocation7 + $0x16c] sm:$0xf0] }
 0x33d   :  { %v11344_v19 = vld [vmem:[#allocation5 + $0xe9c] sm:$0xf]  ;;  %v9244_v18 = vor.u32 %v11280_v15, %v9241_v16  ;;  %4516 = vmatpush.bf16.msrb.mxu1 %v8956_v36  ;;  %v10159_v36 = vld [vmem:[#allocation7 + $0x3e0] sm:$0xf] }
 0x33e   :  { %v9497_v20 = vld [vmem:[#allocation5 + $0xeb8] sm:$0xf0] }
 0x33f   :  { %v11136_v14 = vld [vmem:[#allocation5 + $0x81c] sm:$0xf]  ;;  %v9500_v27 = vor.u32 %v11344_v19, %v9497_v20  ;;  %4528 = vmatpush.bf16.msrb.mxu2 %v9244_v18  ;;  %v11483_v19 = vld [vmem:[#allocation7 + $0x2ec] sm:$0xf0]  ;;  %v4828_v20 = vsub.f32 %v12221_v40, %v4812_v32  ;;  %v4747_v40 = vsel %vm12271_vm4, %v12172_v13, %v4743_v11  ;;  %v9871_v13 = vld [vmem:[#allocation7 + $0x1a0] sm:$0xf] }
 0x340   :  { %v8665_v25 = vld [vmem:[#allocation5 + $0x838] sm:$0xf0]  ;;  %v11443_v32 = vld [vmem:[#allocation7 + $0x1ac] sm:$0xf0]  ;;  %v10143_v11 = vld [vmem:[#allocation7 + $0x3c0] sm:$0xf] }
 0x341   :  { %v11200_v30 = vld [vmem:[#allocation5 + $0xa1c] sm:$0xf]  ;;  %v8668_v61 = vor.u32 %v11136_v14, %v8665_v25  ;;  %4541 = vmatpush.bf16.msrb.mxu3 %v9500_v27  ;;  %v12264_v14 = vld [vmem:[#allocation10 + $0x10] sm:$0xff]  ;;  %v12281_v27 = vld [vmem:[#allocation10 + $0x28] sm:$0xff] }
 0x342   :  { %v8921_v29 = vld [vmem:[#allocation5 + $0xa38] sm:$0xf0]  ;;  %v12267_v22 = vmul.f32 %v12264_v14, %v4737_v63  ;;  %v11515_v25 = vld [vmem:[#allocation7 + $0x3ec] sm:$0xf0]  ;;  %v1154_v44 = vperm.slane %v12281_v27, 1 }
 0x343   :  { %v11272_v45 = vld [vmem:[#allocation5 + $0xc5c] sm:$0xf]  ;;  %v8924_v0 = vor.u32 %v11200_v30, %v8921_v29  ;;  %4504 = vmatpush.bf16.msrb.mxu0 %v8668_v61  ;;  %v4836_v30 = vperm.slane %v12224_v54, 2  ;;  %v9888_v29 = vor.u32 %v11447_v57, %v9887_v2  ;;  %v4287_v61 = vpop.f32.mrf.mxu3  ;;  %v11479_v63 = vld [vmem:[#allocation7 + $0x2cc] sm:$0xf0] }
 0x344   :  { %v9209_v46 = vld [vmem:[#allocation5 + $0xc78] sm:$0xf0]  ;;  %v11407_v2 = vld [vmem:[#allocation7 + $0x8c] sm:$0xf0]  ;;  %v4247_v57 = vadd.f32 %v12199_v55, %v1154_v44  ;;  %v4838_v61 = vperm.slane %v12267_v22, 2 }
 0x345   :  { %v11336_v21 = vld [vmem:[#allocation5 + $0xe5c] sm:$0xf]  ;;  %v9212_v49 = vor.u32 %v11272_v45, %v9209_v46  ;;  %4517 = vmatpush.bf16.msrb.mxu1 %v8924_v0  ;;  %v4274_v45 = vpop.f32.mrf.mxu2  ;;  %v10032_v46 = vor.u32 %v11483_v19, %v10031_v8  ;;  %v4852_v0 = vperm.slane %v4828_v20, 3  ;;  %v9728_v20 = vor.u32 %v11407_v2, %v9727_v1  ;;  %v10095_v2 = vld [vmem:[#allocation7 + $0x360] sm:$0xf] }
 0x346   :  { %v9465_v26 = vld [vmem:[#allocation5 + $0xe78] sm:$0xf0]  ;;  %4505 = vmatmul.bf16.vlgmr.msrb.gmra.mxu0 %v11974_v17  ;;  %v11511_v17 = vld [vmem:[#allocation7 + $0x3cc] sm:$0xf0]  ;;  %v9983_v45 = vld [vmem:[#allocation7 + $0x280] sm:$0xf] }
 0x347   :  { %v9468_v15 = vor.u32 %v11336_v21, %v9465_v26  ;;  %v11264_v16 = vld [vmem:[#allocation5 + $0xc1c] sm:$0xf]  ;;  %6440 = vmatpush.bf16.msra.mxu0 %v9776_v5  ;;  %4529 = vmatpush.bf16.msrb.mxu2 %v9212_v49  ;;  %v10160_v21 = vor.u32 %v11515_v25, %v10159_v36  ;;  %v10015_v26 = vld [vmem:[#allocation7 + $0x2c0] sm:$0xf]  ;;  %v4798_v5 = vmul.f32 %v12267_v22, %v12122_v51  ;;  %v4837_v49 = vperm.slane %v12229_v59, 2 }
 0x348   :  { %v9177_v4 = vld [vmem:[#allocation5 + $0xc38] sm:$0xf0]  ;;  %4518 = vmatmul.bf16.vlgmr.msrb.gmra.mxu1 %v11976_v24  ;;  %v9872_v24 = vor.u32 %v11443_v32, %v9871_v13  ;;  %v4750_v51 = vmul.f32 %v12260_v7, %v4749_v34  ;;  %v4853_v59 = vperm.slane %v4829_v50, 3  ;;  %v12313_v13 = vpop.f32.mrf.mxu1  ;;  %v10111_v32 = vld [vmem:[#allocation7 + $0x380] sm:$0xf] }
 0x349   :  { %v11328_v62 = vld [vmem:[#allocation5 + $0xe1c] sm:$0xf]  ;;  %6453 = vmatpush.bf16.msra.mxu1 %v9904_v47  ;;  %v9180_v18 = vor.u32 %v11264_v16, %v9177_v4  ;;  %4542 = vmatpush.bf16.msrb.mxu3 %v9468_v15  ;;  %v4844_v47 = vmul.f32 %v4836_v30, %v12009_v28  ;;  %v10016_v15 = vor.u32 %v11479_v63, %v10015_v26  ;;  %v9855_v28 = vld [vmem:[#allocation7 + $0x180] sm:$0xf]  ;;  %v11439_v16 = vld [vmem:[#allocation7 + $0x18c] sm:$0xf0] }
 0x34a   :  { %v9433_v9 = vld [vmem:[#allocation5 + $0xe38] sm:$0xf0]  ;;  %v10144_v4 = vor.u32 %v11511_v17, %v10143_v11  ;;  %v4814_v19 = vrot.slane %v4798_v5, 7  ;;  %v4845_v55 = vmul.f32 %v4837_v49, %v12015_v53  ;;  %v9856_v25 = vor.u32 %v11439_v16, %v9855_v28  ;;  %v9711_v30 = vld [vmem:[#allocation7 + $0x60] sm:$0xf]  ;;  %v4298_v53 = vpop.f32.mrf.mxu0 }
 0x34b   :  { %v9436_v54 = vor.u32 %v11328_v62, %v9433_v9  ;;  %6441 = vmatpush.bf16.msra.mxu0 %v9760_v39  ;;  %v12291_v58 = vld [vmem:[#allocation10 + $0x18] sm:$0xff]  ;;  %4530 = vmatpush.bf16.msrb.mxu2 %v9180_v18  ;;  %v9999_v62 = vld [vmem:[#allocation7 + $0x2a0] sm:$0xf]  ;;  %v11475_v9 = vld [vmem:[#allocation7 + $0x2ac] sm:$0xf0]  ;;  %v12298_v8 = vadd.f32 %v4852_v0, %v4844_v47  ;;  %v4260_v18 = vadd.f32 %v12205_v38, %v4247_v57 }
 0x34c   :  { %v12294_v37 = vmul.f32 %v12291_v58, %v4747_v40  ;;  %v11507_v39 = vld [vmem:[#allocation7 + $0x3ac] sm:$0xf0]  ;;  %v12306_v34 = vadd.f32 %v4853_v59, %v4845_v55  ;;  %v9840_v26 = vor.u32 %v11435_v23, %v9839_v3  ;;  %v9695_v63 = vld [vmem:[#allocation7 + $0x40] sm:$0xf]  ;;  %v4846_v57 = vmul.f32 %v4838_v61, %v12028_v48 }
 0x34d   :  { %6454 = vmatpush.bf16.msra.mxu1 %v9888_v29  ;;  %4543 = vmatpush.bf16.msrb.mxu3 %v9436_v54  ;;  %v11403_v40 = vld [vmem:[#allocation7 + $0x6c] sm:$0xf0]  ;;  %v4751_v29 = vmul.f32 0.5, %v4750_v51  ;;  %v10128_v44 = vor.u32 %v11507_v39, %v10127_v35  ;;  %v4830_v54 = vsub.f32 %v12264_v14, %v4814_v19  ;;  %v9823_v11 = vld [vmem:[#allocation7 + $0x140] sm:$0xf]  ;;  %vm4868_vm5 = vcmp.gt.f32.partialorder %v12298_v8, 0.0 }
 0x34e   :  { %4531 = vmatmul.bf16.vlgmr.msrb.gmra.mxu2 %v11980_v56  ;;  %v4799_v36 = vmul.f32 %v12294_v37, %v12126_v33  ;;  %v10000_v56 = vor.u32 %v11475_v9, %v9999_v62  ;;  %v11471_v33 = vld [vmem:[#allocation7 + $0x28c] sm:$0xf0]  ;;  %v9712_v38 = vor.u32 %v11403_v40, %v9711_v30  ;;  %v9967_v47 = vld [vmem:[#allocation7 + $0x260] sm:$0xf]  ;;  %v4839_v28 = vperm.slane %v12294_v37, 2 }
 0x34f   :  { %6466 = vmatpush.bf16.msra.mxu2 %v10032_v46  ;;  %6442 = vmatpush.bf16.msra.mxu0 %v9744_v41  ;;  %v4273_v46 = vadd.f32 %v12244_v43, %v4260_v18  ;;  %v11503_v50 = vld [vmem:[#allocation7 + $0x38c] sm:$0xf0]  ;;  %v4752_v5 = vsub.f32 1.5, %v4751_v29  ;;  %v9984_v41 = vor.u32 %v11471_v33, %v9983_v45  ;;  %v12317_v43 = vmul.f32 0.2, %v12306_v34 }
 0x350   :  { %4544 = vmatmul.bf16.vlgmr.msrb.gmra.mxu3 %v11982_v60  ;;  %v12309_v60 = vmul.f32 0.2, %v12298_v8  ;;  %v11399_v0 = vld [vmem:[#allocation7 + $0x4c] sm:$0xf0]  ;;  %v10112_v17 = vor.u32 %v11503_v50, %v10111_v32  ;;  %v9679_v59 = vld [vmem:[#allocation7 + $0x20] sm:$0xf]  ;;  %v4324_v32 = vpop.f32.mrf.mxu2 }
 0x351   :  { %6479 = vmatpush.bf16.msra.mxu3 %v10160_v21  ;;  %6455 = vmatpush.bf16.msra.mxu1 %v9872_v24  ;;  %v4815_v21 = vrot.slane %v4799_v36, 7  ;;  %v11431_v14 = vld [vmem:[#allocation7 + $0x14c] sm:$0xf0]  ;;  %v4854_v24 = vperm.slane %v4830_v54, 3  ;;  %v4286_v22 = vadd.f32 %v12252_v42, %v4273_v46  ;;  %v9696_v1 = vor.u32 %v11399_v0, %v9695_v63  ;;  %v9807_v19 = vld [vmem:[#allocation7 + $0x120] sm:$0xf]  ;;  %v4313_v36 = vpop.f32.mrf.mxu1  ;;  %v4337_v0 = vpop.f32.mrf.mxu3 }
 0x352   :  { %v11467_v49 = vld [vmem:[#allocation7 + $0x26c] sm:$0xf0]  ;;  %v9824_v16 = vor.u32 %v11431_v14, %v9823_v11  ;;  %v4753_v62 = vmul.f32 %v12260_v7, %v4752_v5  ;;  %v4300_v35 = vpop.f32.mrf.mxu0  ;;  %v9951_v39 = vld [vmem:[#allocation7 + $0x240] sm:$0xf]  ;;  %vm4869_vm9 = vcmp.gt.f32.partialorder %v12306_v34, 0.0 }
 0x353   :  { %6467 = vmatpush.bf16.msra.mxu2 %v10016_v15  ;;  %6443 = vmatpush.bf16.msra.mxu0 %v9728_v20  ;;  %v11499_v51 = vld [vmem:[#allocation7 + $0x36c] sm:$0xf0]  ;;  %v4831_v15 = vsub.f32 %v12291_v58, %v4815_v21  ;;  %v4299_v42 = vadd.f32 %v4298_v53, %v4286_v22  ;;  %v9968_v9 = vor.u32 %v11467_v49, %v9967_v47  ;;  %v10079_v55 = vld [vmem:[#allocation7 + $0x340] sm:$0xf] }
 0x354   :  { %v11427_v20 = vld [vmem:[#allocation7 + $0x12c] sm:$0xf0]  ;;  %v10096_v48 = vor.u32 %v11499_v51, %v10095_v2  ;;  %v12326_v37 = vadd.f32 %v4854_v24, %v4846_v57  ;;  %v9663_v40 = vld [vmem:[#allocation7] sm:$0xf]  ;;  %v4757_v12 = vsel %vm12331_vm8, %v12260_v7, %v4753_v62  ;;  %v4884_v7 = vsel %vm4868_vm5, %v12298_v8, %v12309_v60 }
 0x355   :  { %6480 = vmatpush.bf16.msra.mxu3 %v10144_v4  ;;  %6456 = vmatpush.bf16.msra.mxu1 %v9856_v25  ;;  %v11395_v4 = vld [vmem:[#allocation7 + $0x2c] sm:$0xf0]  ;;  %v4855_v18 = vperm.slane %v4831_v15, 3  ;;  %v9808_v3 = vor.u32 %v11427_v20, %v9807_v19  ;;  %v9791_v23 = vld [vmem:[#allocation7 + $0x100] sm:$0xf] }
 0x356   :  { %v11463_v58 = vld [vmem:[#allocation7 + $0x24c] sm:$0xf0]  ;;  %v9680_v25 = vor.u32 %v11395_v4, %v9679_v59  ;;  %v10287_v33 = vld [vmem:[#allocation7 + $0x4e0] sm:$0xf]  ;;  %vm4870_vm10 = vcmp.gt.f32.partialorder %v12326_v37, 0.0 }
 0x357   :  { %6468 = vmatpush.bf16.msra.mxu2 %v10000_v56  ;;  %6444 = vmatpush.bf16.msra.mxu0 %v9712_v38  ;;  %v11495_v30 = vld [vmem:[#allocation7 + $0x34c] sm:$0xf0]  ;;  %v9952_v45 = vor.u32 %v11463_v58, %v9951_v39  ;;  %v10415_v46 = vld [vmem:[#allocation7 + $0x5e0] sm:$0xf]  ;;  %v4847_v38 = vmul.f32 %v4839_v28, %v12058_v6  ;;  %v4885_v6 = vsel %vm4869_vm9, %v12306_v34, %v12317_v43 }
 0x358   :  { %v11391_v29 = vld [vmem:[#allocation7 + $0xc] sm:$0xf0]  ;;  %v10080_v50 = vor.u32 %v11495_v30, %v10079_v55  ;;  %v9935_v21 = vld [vmem:[#allocation7 + $0x220] sm:$0xf]  ;;  %v12357_v34 = vpack.c.bf16 %v4884_v7, %v4884_v7  ;;  %v12362_v4 = vpack.c.bf16 %v4885_v6, %v4885_v6 }
 0x359   :  { %6481 = vmatpush.bf16.msra.mxu3 %v10128_v44  ;;  %6457 = vmatpush.bf16.msra.mxu1 %v9840_v26  ;;  %v11423_v53 = vld [vmem:[#allocation7 + $0x10c] sm:$0xf0]  ;;  %v4312_v44 = vadd.f32 %v12313_v13, %v4299_v42  ;;  %v4878_v13 = vmul.f32 0.2, %v12326_v37  ;;  %v9664_v5 = vor.u32 %v11391_v29, %v9663_v40  ;;  %v4863_v14 = vadd.f32 %v4855_v18, %v4847_v38  ;;  %v10399_v51 = vld [vmem:[#allocation7 + $0x5c0] sm:$0xf]  ;;  %v4339_v56 = vpop.f32.mrf.mxu3 }
 0x35a   :  { %v11547_v54 = vld [vmem:[#allocation7 + $0x4ec] sm:$0xf0]  ;;  %v9792_v8 = vor.u32 %v11423_v53, %v9791_v23  ;;  %v9919_v15 = vld [vmem:[#allocation7 + $0x200] sm:$0xf]  ;;  %v11417_v56 = vld [vmem:[#allocation7 + $0xe4] sm:$0xf] }
 0x35b   :  { %6469 = vmatpush.bf16.msra.mxu2 %v9984_v41  ;;  %6445 = vmatpush.bf16.msra.mxu0 %v9696_v1  ;;  %v11579_v61 = vld [vmem:[#allocation7 + $0x5ec] sm:$0xf0]  ;;  %v4325_v63 = vadd.f32 %v4324_v32, %v4312_v44  ;;  %v10063_v41 = vld [vmem:[#allocation7 + $0x320] sm:$0xf]  ;;  %v10288_v60 = vor.u32 %v11547_v54, %v10287_v33  ;;  %vm4871_vm11 = vcmp.gt.f32.partialorder %v4863_v14, 0.0 }
 0x35c   :  { %v11459_v26 = vld [vmem:[#allocation7 + $0x22c] sm:$0xf0]  ;;  %v10416_v24 = vor.u32 %v11579_v61, %v10415_v46  ;;  %v10271_v1 = vld [vmem:[#allocation7 + $0x4c0] sm:$0xf] }
 0x35d   :  { %6482 = vmatpush.bf16.msra.mxu3 %v10112_v17  ;;  %6458 = vmatpush.bf16.msra.mxu1 %v9824_v16  ;;  %v11491_v11 = vld [vmem:[#allocation7 + $0x32c] sm:$0xf0]  ;;  %v12350_v17 = vld [vmem:[#allocation10 + $0x20] sm:$0xff]  ;;  %v12355_v49 = vadd.f32 %v4337_v0, %v4325_v63  ;;  %v9936_v22 = vor.u32 %v11459_v26, %v9935_v21 }
 0x35e   :  { %v12353_v47 = vmul.f32 %v12350_v17, %v4757_v12  ;;  %v11543_v2 = vld [vmem:[#allocation7 + $0x4cc] sm:$0xf0]  ;;  %v10064_v57 = vor.u32 %v11491_v11, %v10063_v41  ;;  %v10047_v62 = vld [vmem:[#allocation7 + $0x300] sm:$0xf] }
 0x35f   :  { %6470 = vmatpush.bf16.msra.mxu2 %v9968_v9  ;;  %6446 = vmatpush.bf16.msra.mxu0 %v9680_v25  ;;  %v11575_v43 = vld [vmem:[#allocation7 + $0x5cc] sm:$0xf0]  ;;  %v4579_v16 = vrot.slane %v12355_v49, 4  ;;  %v4617_v59 = vmul.f32 %v12355_v49, %v12355_v49  ;;  %v4879_v9 = vmul.f32 0.2, %v4863_v14  ;;  %v10272_v20 = vor.u32 %v11543_v2, %v10271_v1  ;;  %v4326_v25 = vpop.f32.mrf.mxu2 }
 0x360   :  { %v11455_v28 = vld [vmem:[#allocation7 + $0x20c] sm:$0xf0]  ;;  %v4800_v19 = vmul.f32 %v12353_v47, %v12197_v31  ;;  %v10400_v39 = vor.u32 %v11575_v43, %v10399_v51  ;;  %v10255_v55 = vld [vmem:[#allocation7 + $0x4a0] sm:$0xf]  ;;  %v4840_v11 = vperm.slane %v12353_v47, 2 }
 0x361   :  { %6483 = vmatpush.bf16.msra.mxu3 %v10096_v48  ;;  %6459 = vmatpush.bf16.msra.mxu1 %v9808_v3  ;;  %v11487_v42 = vld [vmem:[#allocation7 + $0x30c] sm:$0xf0]  ;;  %v4580_v35 = vadd.f32 %v4579_v16, %v12355_v49  ;;  %v4650_v48 = vrot.slane %v4617_v59, 4  ;;  %v9920_v58 = vor.u32 %v11455_v28, %v9919_v15  ;;  %v10383_v40 = vld [vmem:[#allocation7 + $0x5a0] sm:$0xf]  ;;  %v4886_v3 = vsel %vm4870_vm10, %v12326_v37, %v4878_v13 }
 0x362   :  { %v11539_v36 = vld [vmem:[#allocation7 + $0x4ac] sm:$0xf0]  ;;  %v10048_v30 = vor.u32 %v11487_v42, %v10047_v62  ;;  %v4816_v23 = vrot.slane %v4800_v19, 7  ;;  %v4887_v53 = vsel %vm4871_vm11, %v4863_v14, %v4879_v9  ;;  %v10239_v54 = vld [vmem:[#allocation7 + $0x480] sm:$0xf]  ;;  %v12374_v38 = vpack.c.bf16 %v4886_v3, %v4886_v3 }
 0x363   :  { %6471 = vmatpush.bf16.msra.mxu2 %v9952_v45  ;;  %6447 = vmatpush.bf16.msra.mxu0 %v9664_v5  ;;  %v11571_v31 = vld [vmem:[#allocation7 + $0x5ac] sm:$0xf0]  ;;  %v4581_v29 = vrot.slane %v4580_v35, 2  ;;  %v4651_v18 = vadd.f32 %v4650_v48, %v4617_v59  ;;  %v10256_v12 = vor.u32 %v11539_v36, %v10255_v55  ;;  %v10367_v32 = vld [vmem:[#allocation7 + $0x580] sm:$0xf]  ;;  %v12376_v37 = vpack.c.bf16 %v4887_v53, %v4887_v53 }
 0x364   :  { %v10384_v33 = vor.u32 %v11571_v31, %v10383_v40  ;;  %v11535_v46 = vld [vmem:[#allocation7 + $0x48c] sm:$0xf0]  ;;  %v4832_v26 = vsub.f32 %v12350_v17, %v4816_v23  ;;  %v10223_v5 = vld [vmem:[#allocation7 + $0x460] sm:$0xf]  ;;  %v4848_v15 = vmul.f32 %v4840_v11, %v12162_v10  ;;  %v9777_v3 = vld [vmem:[#allocation7 + $0xf0] sm:$0xf0] }
 0x365   :  { %6484 = vmatpush.bf16.msra.mxu3 %v10080_v50  ;;  %6460 = vmatpush.bf16.msra.mxu1 %v9792_v8  ;;  %v4582_v44 = vadd.f32 %v4581_v29, %v4580_v35  ;;  %v4652_v45 = vrot.slane %v4651_v18, 2  ;;  %v11567_v50 = vld [vmem:[#allocation7 + $0x58c] sm:$0xf0]  ;;  %v10240_v7 = vor.u32 %v11535_v46, %v10239_v54  ;;  %v10351_v6 = vld [vmem:[#allocation7 + $0x560] sm:$0xf]  ;;  %v9780_v54 = vor.u32 %v11417_v56, %v9777_v3 }
 0x366   :  { %6448 = vmatmul.bf16.vlgmr.msra.gmra.mxu0 %v12357_v34  ;;  %v10368_v0 = vor.u32 %v11567_v50, %v10367_v32  ;;  %v11531_v41 = vld [vmem:[#allocation7 + $0x46c] sm:$0xf0]  ;;  %v10335_v28 = vld [vmem:[#allocation7 + $0x540] sm:$0xf]  ;;  %v11449_v53 = vld [vmem:[#allocation7 + $0x1e4] sm:$0xf] }
 0x367   :  { %6492 = vmatpush.bf16.msrb.mxu0 %v10288_v60  ;;  %6472 = vmatpush.bf16.msra.mxu2 %v9936_v22  ;;  %v4583_v61 = vrot.slane %v4582_v44, 1  ;;  %v4653_v21 = vadd.f32 %v4652_v45, %v4651_v18  ;;  %v11563_v14 = vld [vmem:[#allocation7 + $0x56c] sm:$0xf0]  ;;  %v12385_v60 = vpop.f32.mrf.mxu0  ;;  %v12387_v22 = vpop.f32.mrf.mxu1  ;;  %v10224_v1 = vor.u32 %v11531_v41, %v10223_v5  ;;  %v10319_v48 = vld [vmem:[#allocation7 + $0x520] sm:$0xf] }
 0x368   :  { %6461 = vmatmul.bf16.vlgmr.msra.gmra.mxu1 %v12362_v4  ;;  %v10352_v47 = vor.u32 %v11563_v14, %v10351_v6  ;;  %v11527_v43 = vld [vmem:[#allocation7 + $0x44c] sm:$0xf0]  ;;  %v10175_v40 = vld [vmem:[#allocation7 + $0x400] sm:$0xf]  ;;  %v12396_v23 = vpop.f32.mrf.mxu2  ;;  %v11401_v56 = vld [vmem:[#allocation7 + $0x64] sm:$0xf] }
 0x369   :  { %6505 = vmatpush.bf16.msrb.mxu1 %v10416_v24  ;;  %6485 = vmatpush.bf16.msra.mxu3 %v10064_v57  ;;  %v4584_v13 = vadd.f32 %v4583_v61, %v4582_v44  ;;  %v4654_v63 = vrot.slane %v4653_v21, 1  ;;  %v4856_v24 = vperm.slane %v4832_v26, 3  ;;  %v10207_v57 = vld [vmem:[#allocation7 + $0x440] sm:$0xf]  ;;  %v11559_v16 = vld [vmem:[#allocation7 + $0x54c] sm:$0xf0]  ;;  %v12398_v44 = vpop.f32.mrf.mxu3 }
 0x36a   :  { %v10208_v42 = vor.u32 %v11527_v43, %v10207_v57  ;;  %v10336_v19 = vor.u32 %v11559_v16, %v10335_v28  ;;  %v11523_v35 = vld [vmem:[#allocation7 + $0x42c] sm:$0xf0]  ;;  %v10303_v29 = vld [vmem:[#allocation7 + $0x500] sm:$0xf]  ;;  %v9761_v26 = vld [vmem:[#allocation7 + $0xd0] sm:$0xf0] }
 0x36b   :  { %6493 = vmatpush.bf16.msrb.mxu0 %v10272_v20  ;;  %6473 = vmatpush.bf16.msra.mxu2 %v9920_v58  ;;  %v12383_v8 = vmul.f32 %v12087_v52, %v4584_v13  ;;  %v4655_v17 = vadd.f32 %v4654_v63, %v4653_v21  ;;  %v4864_v62 = vadd.f32 %v4856_v24, %v4848_v15  ;;  %v10191_v20 = vld [vmem:[#allocation7 + $0x420] sm:$0xf]  ;;  %v11519_v31 = vld [vmem:[#allocation7 + $0x40c] sm:$0xf0]  ;;  %v11413_v21 = vld [vmem:[#allocation7 + $0xc4] sm:$0xf] }
 0x36c   :  { %v10192_v10 = vor.u32 %v11523_v35, %v10191_v20  ;;  %v11551_v18 = vld [vmem:[#allocation7 + $0x50c] sm:$0xf0]  ;;  %v10176_v45 = vor.u32 %v11519_v31, %v10175_v40  ;;  %v10543_v46 = vld [vmem:[#allocation7 + $0x6e0] sm:$0xf]  ;;  %v11445_v63 = vld [vmem:[#allocation7 + $0x1c4] sm:$0xf]  ;;  %v9764_v11 = vor.u32 %v11413_v21, %v9761_v26 }
 0x36d   :  { %6506 = vmatpush.bf16.msrb.mxu1 %v10400_v39  ;;  %6486 = vmatpush.bf16.msra.mxu3 %v10048_v30  ;;  %v4673_v2 = vmul.f32 %v4655_v17, %v12087_v52  ;;  %v4681_v51 = vmul.f32 %v12383_v8, %v12383_v8  ;;  %v11555_v39 = vld [vmem:[#allocation7 + $0x52c] sm:$0xf0]  ;;  %v4880_v36 = vmul.f32 0.2, %v4864_v62  ;;  %vm4872_vm12 = vcmp.gt.f32.partialorder %v4864_v62, 0.0 }
 0x36e   :  { %6474 = vmatmul.bf16.vlgmr.msra.gmra.mxu2 %v12374_v38  ;;  %v10320_v30 = vor.u32 %v11555_v39, %v10319_v48  ;;  %v11611_v32 = vld [vmem:[#allocation7 + $0x6ec] sm:$0xf0]  ;;  %v10527_v6 = vld [vmem:[#allocation7 + $0x6c0] sm:$0xf]  ;;  %v11441_v15 = vld [vmem:[#allocation7 + $0x1a4] sm:$0xf] }
 0x36f   :  { %6494 = vmatpush.bf16.msrb.mxu0 %v10256_v12  ;;  %v4689_v59 = vsub.f32 %v4673_v2, %v4681_v51  ;;  %v4352_v55 = vpop.f32.mrf.mxu0  ;;  %v4365_v25 = vpop.f32.mrf.mxu1  ;;  %v9905_v12 = vld [vmem:[#allocation7 + $0x1f0] sm:$0xf0]  ;;  %v4888_v61 = vsel %vm4872_vm12, %v4864_v62, %v4880_v36  ;;  %v11607_v14 = vld [vmem:[#allocation7 + $0x6cc] sm:$0xf0]  ;;  %v11405_v35 = vld [vmem:[#allocation7 + $0x84] sm:$0xf] }
 0x370   :  { %6487 = vmatmul.bf16.vlgmr.msra.gmra.mxu3 %v12376_v37  ;;  %v9908_v50 = vor.u32 %v11449_v53, %v9905_v12  ;;  %v12401_v41 = vpack.c.bf16 %v4888_v61, %v4888_v61  ;;  %v9745_v2 = vld [vmem:[#allocation7 + $0xb0] sm:$0xf0]  ;;  %v10528_v51 = vor.u32 %v11607_v14, %v10527_v6  ;;  %v4378_v43 = vpop.f32.mrf.mxu2  ;;  %v11437_v36 = vld [vmem:[#allocation7 + $0x184] sm:$0xf]  ;;  %v10495_v40 = vld [vmem:[#allocation7 + $0x680] sm:$0xf] }
 0x371   :  { %6507 = vmatpush.bf16.msrb.mxu1 %v10384_v33  ;;  %v4697_v9 = vmax.f32 %v4689_v59, 0.0  ;;  %v10304_v33 = vor.u32 %v11551_v18, %v10303_v29  ;;  %v9873_v28 = vld [vmem:[#allocation7 + $0x1b0] sm:$0xf0]  ;;  %v4391_v59 = vpop.f32.mrf.mxu3  ;;  %v11599_v31 = vld [vmem:[#allocation7 + $0x68c] sm:$0xf0] }
 0x372   :  { %v9876_v20 = vor.u32 %v11441_v15, %v9873_v28  ;;  %v9729_v48 = vld [vmem:[#allocation7 + $0x90] sm:$0xf0]  ;;  %v10496_v53 = vor.u32 %v11599_v31, %v10495_v40  ;;  %v10479_v61 = vld [vmem:[#allocation7 + $0x660] sm:$0xf]  ;;  %v11595_v21 = vld [vmem:[#allocation7 + $0x66c] sm:$0xf0] }
 0x373   :  { %6495 = vmatpush.bf16.msrb.mxu0 %v10240_v7  ;;  %v12393_v58 = vadd.f32 1e-05, %v4697_v9  ;;  %v10544_v7 = vor.u32 %v11611_v32, %v10543_v46  ;;  %v11603_v9 = vld [vmem:[#allocation7 + $0x6ac] sm:$0xf0]  ;;  %v9857_v25 = vld [vmem:[#allocation7 + $0x190] sm:$0xf0] }
 0x374   :  { %v9860_v18 = vor.u32 %v11437_v36, %v9857_v25  ;;  %v9713_v3 = vld [vmem:[#allocation7 + $0x70] sm:$0xf0]  ;;  %v10463_v14 = vld [vmem:[#allocation7 + $0x640] sm:$0xf]  ;;  %v11425_v28 = vld [vmem:[#allocation7 + $0x124] sm:$0xf] }
 0x375   :  { %6508 = vmatpush.bf16.msrb.mxu1 %v10368_v0  ;;  %11702 = vrsqrt.f32 %v12393_v58  ;;  %v9889_v0 = vld [vmem:[#allocation7 + $0x1d0] sm:$0xf0]  ;;  %6518 = vmatpush.bf16.msrb.mxu2 %v10544_v7  ;;  %vm4764_vm14 = vweird.f32 %v12393_v58  ;;  %v11397_v7 = vld [vmem:[#allocation7 + $0x44] sm:$0xf] }
 0x376   :  { %v9892_v24 = vor.u32 %v11445_v63, %v9889_v0  ;;  %v10480_v63 = vor.u32 %v11595_v21, %v10479_v61  ;;  %v11577_v40 = vld [vmem:[#allocation7 + $0x5e4] sm:$0xf]  ;;  %v10417_v31 = vld [vmem:[#allocation7 + $0x5f0] sm:$0xf0] }
 0x377   :  { %6496 = vmatpush.bf16.msrb.mxu0 %v10224_v1  ;;  %v11409_v1 = vld [vmem:[#allocation7 + $0xa4] sm:$0xf]  ;;  %v4415_v32 = vpop.f32.mrf.mxu1  ;;  %v10273_v21 = vld [vmem:[#allocation7 + $0x4d0] sm:$0xf0] }
 0x378   :  { %v9748_v62 = vor.u32 %v11409_v1, %v9745_v2  ;;  %v11393_v1 = vld [vmem:[#allocation7 + $0x24] sm:$0xf]  ;;  %v9681_v2 = vld [vmem:[#allocation7 + $0x30] sm:$0xf0] }
 0x379   :  { %6509 = vmatpush.bf16.msrb.mxu1 %v10352_v47  ;;  %v12403_v47 = vld [vmem:[#allocation10 + $0x30] sm:$0xff]  ;;  %6519 = vmatpush.bf16.msrb.mxu2 %v10528_v51  ;;  %v11541_v61 = vld [vmem:[#allocation7 + $0x4c4] sm:$0xf] }
 0x37a   :  { %v1155_v57 = vperm.slane %v12403_v47, 1 }
 0x37b   :  { %6497 = vmatpush.bf16.msrb.mxu0 %v10208_v42  ;;  %v11703_v13 = vpop.eup %11702  ;;  %v10511_v42 = vld [vmem:[#allocation7 + $0x6a0] sm:$0xf] }
 0x37c   :  { %v4759_v5 = vmul.f32 %v11703_v13, %v12393_v58  ;;  %vm4765_vm13 = vweird.f32 %v11703_v13  ;;  %v10512_v39 = vor.u32 %v11603_v9, %v10511_v42  ;;  %v4351_v55 = vadd.f32 %v12385_v60, %v1155_v57  ;;  %v9665_v9 = vld [vmem:[#allocation7 + $0x10] sm:$0xf0] }
 0x37d   :  { %6510 = vmatpush.bf16.msrb.mxu1 %v10336_v19  ;;  %vm4766_vm15 = vmor %vm4764_vm14, %vm4765_vm13  ;;  %v9684_v42 = vor.u32 %v11393_v1, %v9681_v2  ;;  %v11569_v2 = vld [vmem:[#allocation7 + $0x5a4] sm:$0xf] }
 0x37e   :  { %v4760_v17 = vmul.f32 %v11703_v13, %v4759_v5  ;;  %6520 = vmatpush.bf16.msrb.mxu2 %v10512_v39  ;;  %v4364_v60 = vadd.f32 %v12387_v22, %v4351_v55  ;;  %v11429_v5 = vld [vmem:[#allocation7 + $0x144] sm:$0xf]  ;;  %v9793_v39 = vld [vmem:[#allocation7 + $0x110] sm:$0xf0] }
 0x37f   :  { %6498 = vmatpush.bf16.msrb.mxu0 %v10192_v10  ;;  %v11545_v55 = vld [vmem:[#allocation7 + $0x4e4] sm:$0xf] }
 0x380   :  { %v4761_v16 = vmul.f32 0.5, %v4760_v17  ;;  %v4377_v46 = vadd.f32 %v12396_v23, %v4364_v60  ;;  %v11591_v17 = vld [vmem:[#allocation7 + $0x64c] sm:$0xf0] }
 0x381   :  { %6511 = vmatpush.bf16.msrb.mxu1 %v10320_v30  ;;  %v9732_v30 = vor.u32 %v11405_v35, %v9729_v48  ;;  %v10464_v51 = vor.u32 %v11591_v17, %v10463_v14  ;;  %v11421_v48 = vld [vmem:[#allocation7 + $0x104] sm:$0xf]  ;;  %v10257_v17 = vld [vmem:[#allocation7 + $0x4b0] sm:$0xf0] }
 0x382   :  { %v4762_v19 = vsub.f32 1.5, %v4761_v16  ;;  %6521 = vmatpush.bf16.msrb.mxu2 %v10496_v53  ;;  %v9809_v16 = vld [vmem:[#allocation7 + $0x130] sm:$0xf0]  ;;  %v10431_v53 = vld [vmem:[#allocation7 + $0x600] sm:$0xf] }
 0x383   :  { %6499 = vmatpush.bf16.msrb.mxu0 %v10176_v45  ;;  %v11433_v45 = vld [vmem:[#allocation7 + $0x164] sm:$0xf]  ;;  %v9812_v35 = vor.u32 %v11425_v28, %v9809_v16 }
 0x384   :  { %v4763_v10 = vmul.f32 %v11703_v13, %v4762_v19  ;;  %v10447_v19 = vld [vmem:[#allocation7 + $0x620] sm:$0xf]  ;;  %v11537_v14 = vld [vmem:[#allocation7 + $0x4a4] sm:$0xf] }
 0x385   :  { %6512 = vmatpush.bf16.msrb.mxu1 %v10304_v33  ;;  %v9841_v33 = vld [vmem:[#allocation7 + $0x170] sm:$0xf0]  ;;  %v10260_v28 = vor.u32 %v11537_v14, %v10257_v17  ;;  %v11473_v16 = vld [vmem:[#allocation7 + $0x2a4] sm:$0xf] }
 0x386   :  { %6500 = vmatmul.bf16.vlgmr.msrb.gmra.mxu0 %v12401_v41  ;;  %v4767_v29 = vsel %vm4766_vm15, %v11703_v13, %v4763_v10  ;;  %v9844_v26 = vor.u32 %v11433_v45, %v9841_v33  ;;  %v9697_v13 = vld [vmem:[#allocation7 + $0x50] sm:$0xf0]  ;;  %6522 = vmatpush.bf16.msrb.mxu2 %v10480_v63  ;;  %v9796_v45 = vor.u32 %v11421_v48, %v9793_v39 }
 0x387   :  { %6544 = vmatpush.bf16.msra.mxu0 %v9780_v54  ;;  %v4793_v12 = vmul.f32 %v12281_v27, %v4767_v29  ;;  %v4402_v54 = vpop.f32.mrf.mxu0  ;;  %v9700_v23 = vor.u32 %v11397_v7, %v9697_v13  ;;  %v10289_v10 = vld [vmem:[#allocation7 + $0x4f0] sm:$0xf0]  ;;  %v11573_v7 = vld [vmem:[#allocation7 + $0x5c4] sm:$0xf] }
 0x388   :  { %v10292_v33 = vor.u32 %v11545_v55, %v10289_v10  ;;  %v10401_v13 = vld [vmem:[#allocation7 + $0x5d0] sm:$0xf0] }
 0x389   :  { %6557 = vmatpush.bf16.msra.mxu1 %v9908_v50  ;;  %v4801_v58 = vmul.f32 %v4793_v12, %v12383_v8  ;;  %v9716_v50 = vor.u32 %v11401_v56, %v9713_v3  ;;  %v4841_v22 = vperm.slane %v4793_v12, 2  ;;  %v4390_v8 = vadd.f32 %v12398_v44, %v4377_v46  ;;  %v4417_v44 = vpop.f32.mrf.mxu1  ;;  %v11583_v12 = vld [vmem:[#allocation7 + $0x60c] sm:$0xf0]  ;;  %v10033_v46 = vld [vmem:[#allocation7 + $0x2f0] sm:$0xf0] }
 0x38a   :  { %6523 = vmatpush.bf16.msrb.mxu2 %v10464_v51  ;;  %v10385_v51 = vld [vmem:[#allocation7 + $0x5b0] sm:$0xf0] }
 0x38b   :  { %6545 = vmatpush.bf16.msra.mxu0 %v9764_v11  ;;  %v4817_v0 = vrot.slane %v4801_v58, 7  ;;  %v9825_v11 = vld [vmem:[#allocation7 + $0x150] sm:$0xf0]  ;;  %v4849_v57 = vmul.f32 %v4841_v22, %v12355_v49  ;;  %v4403_v15 = vadd.f32 %v4402_v54, %v4390_v8  ;;  %v10432_v54 = vor.u32 %v11583_v12, %v10431_v53  ;;  %v11481_v58 = vld [vmem:[#allocation7 + $0x2e4] sm:$0xf] }
 0x38c   :  { %v10276_v22 = vor.u32 %v11541_v61, %v10273_v21  ;;  %v10388_v44 = vor.u32 %v11569_v2, %v10385_v51  ;;  %v11525_v21 = vld [vmem:[#allocation7 + $0x444] sm:$0xf]  ;;  %v10193_v14 = vld [vmem:[#allocation7 + $0x430] sm:$0xf0] }
 0x38d   :  { %6558 = vmatpush.bf16.msra.mxu1 %v9892_v24  ;;  %v4833_v6 = vsub.f32 %v12281_v27, %v4817_v0  ;;  %v9828_v24 = vor.u32 %v11429_v5, %v9825_v11  ;;  %v4416_v25 = vadd.f32 %v4415_v32, %v4403_v15  ;;  %v11477_v5 = vld [vmem:[#allocation7 + $0x2c4] sm:$0xf]  ;;  %v10017_v11 = vld [vmem:[#allocation7 + $0x2d0] sm:$0xf0] }
 0x38f   :  { %6546 = vmatpush.bf16.msra.mxu0 %v9748_v62  ;;  %v4857_v43 = vperm.slane %v4833_v6, 3  ;;  %v4404_v59 = vpop.f32.mrf.mxu0  ;;  %v11389_v62 = vld [vmem:[#allocation7 + $0x4] sm:$0xf] }
 0x390   :  { %v9668_v3 = vor.u32 %v11389_v62, %v9665_v9  ;;  %v10001_v59 = vld [vmem:[#allocation7 + $0x2b0] sm:$0xf0] }
 0x391   :  { %6559 = vmatpush.bf16.msra.mxu1 %v9876_v20  ;;  %v4865_v27 = vadd.f32 %v4857_v43, %v4849_v57  ;;  %v11587_v20 = vld [vmem:[#allocation7 + $0x62c] sm:$0xf0]  ;;  %v10241_v9 = vld [vmem:[#allocation7 + $0x490] sm:$0xf0] }
 0x392   :  { %v10448_v49 = vor.u32 %v11587_v20, %v10447_v19  ;;  %v10004_v19 = vor.u32 %v11473_v16, %v10001_v59  ;;  %v11565_v20 = vld [vmem:[#allocation7 + $0x584] sm:$0xf] }
 0x393   :  { %6547 = vmatpush.bf16.msra.mxu0 %v9732_v30  ;;  %v4881_v36 = vmul.f32 0.2, %v4865_v27  ;;  %vm4873_vm0 = vcmp.gt.f32.partialorder %v4865_v27, 0.0  ;;  %v4428_v30 = vpop.f32.mrf.mxu2  ;;  %v11517_v59 = vld [vmem:[#allocation7 + $0x404] sm:$0xf] }
 0x394   :  { %6524 = vmatpush.bf16.msrb.mxu2 %v10448_v49  ;;  %v4429_v29 = vadd.f32 %v4428_v30, %v4416_v25  ;;  %v11469_v49 = vld [vmem:[#allocation7 + $0x284] sm:$0xf] }
 0x395   :  { %6560 = vmatpush.bf16.msra.mxu1 %v9860_v18  ;;  %v4441_v18 = vpop.f32.mrf.mxu3  ;;  %v4889_v56 = vsel %vm4873_vm0, %v4865_v27, %v4881_v36  ;;  %v9985_v36 = vld [vmem:[#allocation7 + $0x290] sm:$0xf0] }
 0x396   :  { %v12416_v60 = vpack.c.bf16 %v4889_v56, %v4889_v56  ;;  %v12418_v32 = vadd.f32 %v4441_v18, %v4429_v29  ;;  %v9988_v29 = vor.u32 %v11469_v49, %v9985_v36  ;;  %v11561_v18 = vld [vmem:[#allocation7 + $0x564] sm:$0xf]  ;;  %v10353_v56 = vld [vmem:[#allocation7 + $0x570] sm:$0xf0] }
 0x397   :  { %6548 = vmatpush.bf16.msra.mxu0 %v9716_v50  ;;  %v10420_v50 = vor.u32 %v11577_v40, %v10417_v31  ;;  %v11529_v40 = vld [vmem:[#allocation7 + $0x464] sm:$0xf]  ;;  %v10225_v31 = vld [vmem:[#allocation7 + $0x470] sm:$0xf0]  ;;  %v12429_v12 = vpop.f32.mrf.mxu0  ;;  %v10356_v61 = vor.u32 %v11561_v18, %v10353_v56  ;;  %v9767_v18 = vld [vmem:[#allocation7 + $0xc8] sm:$0xf] }
 0x398   :  { %6513 = vmatmul.bf16.vlgmr.msrb.gmra.mxu1 %v12416_v60  ;;  %6525 = vmatpush.bf16.msrb.mxu2 %v10432_v54  ;;  %v4585_v63 = vrot.slane %v12418_v32, 4  ;;  %v4618_v0 = vmul.f32 %v12418_v32, %v12418_v32  ;;  %v11465_v54 = vld [vmem:[#allocation7 + $0x264] sm:$0xf]  ;;  %v9921_v36 = vld [vmem:[#allocation7 + $0x210] sm:$0xf0] }
 0x399   :  { %6561 = vmatpush.bf16.msra.mxu1 %v9844_v26  ;;  %v10036_v26 = vor.u32 %v11481_v58, %v10033_v46  ;;  %v9969_v58 = vld [vmem:[#allocation7 + $0x270] sm:$0xf0]  ;;  %v11453_v49 = vld [vmem:[#allocation7 + $0x204] sm:$0xf]  ;;  %v11416_v56 = vld [vmem:[#allocation7 + $0xd4] sm:$0xf0] }
 0x39a   :  { %v4586_v6 = vadd.f32 %v4585_v63, %v12418_v32  ;;  %v4656_v8 = vrot.slane %v4618_v0, 4  ;;  %v10337_v63 = vld [vmem:[#allocation7 + $0x550] sm:$0xf0] }
 0x39b   :  { %6549 = vmatpush.bf16.msra.mxu0 %v9700_v23  ;;  %v10404_v23 = vor.u32 %v11573_v7, %v10401_v13  ;;  %v4430_v1 = vpop.f32.mrf.mxu2  ;;  %v9972_v7 = vor.u32 %v11465_v54, %v9969_v58  ;;  %v11557_v13 = vld [vmem:[#allocation7 + $0x544] sm:$0xf]  ;;  %v9895_v54 = vld [vmem:[#allocation7 + $0x1c8] sm:$0xf]  ;;  %v11448_v58 = vld [vmem:[#allocation7 + $0x1d4] sm:$0xf0] }
 0x39c   :  { %6570 = vmatpush.bf16.msra.mxu2 %v10036_v26  ;;  %v4587_v57 = vrot.slane %v4586_v6, 2  ;;  %v4657_v43 = vadd.f32 %v4656_v8, %v4618_v0  ;;  %v10209_v26 = vld [vmem:[#allocation7 + $0x450] sm:$0xf0]  ;;  %v10340_v8 = vor.u32 %v11557_v13, %v10337_v63  ;;  %v9751_v13 = vld [vmem:[#allocation7 + $0xa8] sm:$0xf] }
 0x39d   :  { %6562 = vmatpush.bf16.msra.mxu1 %v9828_v24  ;;  %v10020_v24 = vor.u32 %v11477_v5, %v10017_v11  ;;  %v4443_v15 = vpop.f32.mrf.mxu3  ;;  %v11461_v5 = vld [vmem:[#allocation7 + $0x244] sm:$0xf]  ;;  %v9953_v11 = vld [vmem:[#allocation7 + $0x250] sm:$0xf0]  ;;  %v11412_v63 = vld [vmem:[#allocation7 + $0xb4] sm:$0xf0] }
 0x39e   :  { %v4588_v62 = vadd.f32 %v4587_v57, %v4586_v6  ;;  %v4658_v27 = vrot.slane %v4657_v43, 2  ;;  %v9956_v17 = vor.u32 %v11461_v5, %v9953_v11  ;;  %v10321_v1 = vld [vmem:[#allocation7 + $0x530] sm:$0xf0]  ;;  %v11457_v57 = vld [vmem:[#allocation7 + $0x224] sm:$0xf] }
 0x39f   :  { %6550 = vmatpush.bf16.msra.mxu0 %v9684_v42  ;;  %v11533_v42 = vld [vmem:[#allocation7 + $0x484] sm:$0xf]  ;;  %v4456_v51 = vpop.f32.mrf.mxu0 }
 0x3a0   :  { %6571 = vmatpush.bf16.msra.mxu2 %v10020_v24  ;;  %v4589_v48 = vrot.slane %v4588_v62, 1  ;;  %v4659_v39 = vadd.f32 %v4658_v27, %v4657_v43  ;;  %v10244_v55 = vor.u32 %v11533_v42, %v10241_v9  ;;  %v11553_v24 = vld [vmem:[#allocation7 + $0x524] sm:$0xf]  ;;  %v10305_v42 = vld [vmem:[#allocation7 + $0x510] sm:$0xf0] }
 0x3a1   :  { %6563 = vmatpush.bf16.msra.mxu1 %v9812_v35  ;;  %v10369_v35 = vld [vmem:[#allocation7 + $0x590] sm:$0xf0]  ;;  %v10324_v16 = vor.u32 %v11553_v24, %v10321_v1  ;;  %v11549_v27 = vld [vmem:[#allocation7 + $0x504] sm:$0xf]  ;;  %v9783_v9 = vld [vmem:[#allocation7 + $0xe8] sm:$0xf] }
 0x3a2   :  { %v4590_v25 = vadd.f32 %v4589_v48, %v4588_v62  ;;  %v4660_v10 = vrot.slane %v4659_v39, 1  ;;  %v10372_v30 = vor.u32 %v11565_v20, %v10369_v35  ;;  %v10177_v62 = vld [vmem:[#allocation7 + $0x410] sm:$0xf0]  ;;  %v9911_v35 = vld [vmem:[#allocation7 + $0x1e8] sm:$0xf] }
 0x3a3   :  { %6551 = vmatpush.bf16.msra.mxu0 %v9668_v3  ;;  %v12440_v20 = vpop.f32.mrf.mxu2  ;;  %v11452_v48 = vld [vmem:[#allocation7 + $0x1f4] sm:$0xf0]  ;;  %v10639_v24 = vld [vmem:[#allocation7 + $0x7a0] sm:$0xf]  ;;  %v11635_v1 = vld [vmem:[#allocation7 + $0x7ac] sm:$0xf0] }
 0x3a4   :  { %6572 = vmatpush.bf16.msra.mxu2 %v10004_v19  ;;  %v12427_v3 = vmul.f32 %v12087_v52, %v4590_v25  ;;  %v4661_v53 = vadd.f32 %v4660_v10, %v4659_v39  ;;  %v11420_v19 = vld [vmem:[#allocation7 + $0xf4] sm:$0xf0]  ;;  %v10308_v25 = vor.u32 %v11549_v27, %v10305_v42  ;;  %v10623_v42 = vld [vmem:[#allocation7 + $0x780] sm:$0xf] }
 0x3a5   :  { %6564 = vmatpush.bf16.msra.mxu1 %v9796_v45  ;;  %v12431_v45 = vpop.f32.mrf.mxu1  ;;  %v12442_v39 = vpop.f32.mrf.mxu3  ;;  %v9784_v10 = vor.u32 %v11420_v19, %v9783_v9  ;;  %v11631_v9 = vld [vmem:[#allocation7 + $0x78c] sm:$0xf0] }
 0x3a6   :  { %6552 = vmatmul.bf16.vlgmr.msra.gmra.mxu0 %v12357_v34  ;;  %v4674_v46 = vmul.f32 %v4661_v53, %v12087_v52 }
 0x3a7   :  { %6596 = vmatpush.bf16.msrb.mxu0 %v10292_v33  ;;  %v10228_v33 = vor.u32 %v11529_v40, %v10225_v31  ;;  %v10671_v40 = vld [vmem:[#allocation7 + $0x7e0] sm:$0xf]  ;;  %v11643_v31 = vld [vmem:[#allocation7 + $0x7ec] sm:$0xf0] }
 0x3a8   :  { %6573 = vmatpush.bf16.msra.mxu2 %v9988_v29  ;;  %6565 = vmatmul.bf16.vlgmr.msra.gmra.mxu1 %v12362_v4  ;;  %v9912_v29 = vor.u32 %v11452_v48, %v9911_v35  ;;  %v10672_v53 = vor.u32 %v11643_v31, %v10671_v40  ;;  %v9719_v48 = vld [vmem:[#allocation7 + $0x68] sm:$0xf] }
 0x3a9   :  { %6609 = vmatpush.bf16.msrb.mxu1 %v10420_v50  ;;  %v4682_v50 = vmul.f32 %v12427_v3, %v12427_v3 }
 0x3aa   :  { %6531 = vmatpush.bf16.msrb.mxu3 %v10672_v53 }
 0x3ab   :  { %6597 = vmatpush.bf16.msrb.mxu0 %v10276_v22  ;;  %v4690_v0 = vsub.f32 %v4674_v46, %v4682_v50  ;;  %v10212_v22 = vor.u32 %v11525_v21, %v10209_v26  ;;  %v9768_v50 = vor.u32 %v11416_v56, %v9767_v18  ;;  %v11639_v21 = vld [vmem:[#allocation7 + $0x7cc] sm:$0xf0]  ;;  %v4482_v11 = vpop.f32.mrf.mxu2  ;;  %v10607_v18 = vld [vmem:[#allocation7 + $0x760] sm:$0xf] }
 0x3ac   :  { %6574 = vmatpush.bf16.msra.mxu2 %v9972_v7  ;;  %v9896_v7 = vor.u32 %v11448_v58, %v9895_v54  ;;  %v11627_v56 = vld [vmem:[#allocation7 + $0x76c] sm:$0xf0]  ;;  %v11400_v54 = vld [vmem:[#allocation7 + $0x54] sm:$0xf0] }
 0x3ad   :  { %6610 = vmatpush.bf16.msrb.mxu1 %v10404_v23  ;;  %v4698_v6 = vmax.f32 %v4690_v0, 0.0  ;;  %v11521_v23 = vld [vmem:[#allocation7 + $0x424] sm:$0xf]  ;;  %v4469_v43 = vpop.f32.mrf.mxu1  ;;  %v10608_v58 = vor.u32 %v11627_v56, %v10607_v18  ;;  %v10529_v18 = vld [vmem:[#allocation7 + $0x6d0] sm:$0xf0] }
 0x3ae   :  { %v10196_v15 = vor.u32 %v11521_v23, %v10193_v14  ;;  %v4495_v14 = vpop.f32.mrf.mxu3  ;;  %v9735_v43 = vld [vmem:[#allocation7 + $0x88] sm:$0xf] }
 0x3af   :  { %6598 = vmatpush.bf16.msrb.mxu0 %v10260_v28  ;;  %v12437_v2 = vadd.f32 1e-05, %v4698_v6  ;;  %v9937_v28 = vld [vmem:[#allocation7 + $0x230] sm:$0xf0]  ;;  %v9879_v6 = vld [vmem:[#allocation7 + $0x1a8] sm:$0xf] }
 0x3b0   :  { %6575 = vmatpush.bf16.msra.mxu2 %v9956_v17  ;;  %v9752_v17 = vor.u32 %v11412_v63, %v9751_v13  ;;  %v9687_v63 = vld [vmem:[#allocation7 + $0x28] sm:$0xf]  ;;  %v11428_v14 = vld [vmem:[#allocation7 + $0x134] sm:$0xf0] }
 0x3b1   :  { %6611 = vmatpush.bf16.msrb.mxu1 %v10388_v44  ;;  %11704 = vrsqrt.f32 %v12437_v2  ;;  %v9940_v44 = vor.u32 %v11457_v57, %v9937_v28  ;;  %v10640_v28 = vor.u32 %v11635_v1, %v10639_v24  ;;  %vm4774_vm2 = vweird.f32 %v12437_v2  ;;  %v11609_v24 = vld [vmem:[#allocation7 + $0x6e4] sm:$0xf]  ;;  %v9671_v1 = vld [vmem:[#allocation7 + $0x8] sm:$0xf] }
 0x3b3   :  { %6599 = vmatpush.bf16.msrb.mxu0 %v10244_v55  ;;  %v10180_v55 = vor.u32 %v11517_v59, %v10177_v62  ;;  %v9863_v59 = vld [vmem:[#allocation7 + $0x188] sm:$0xf]  ;;  %v11440_v62 = vld [vmem:[#allocation7 + $0x194] sm:$0xf0] }
 0x3b4   :  { %6576 = vmatpush.bf16.msra.mxu2 %v9940_v44  ;;  %v9864_v35 = vor.u32 %v11440_v62, %v9863_v59  ;;  %v9799_v59 = vld [vmem:[#allocation7 + $0x108] sm:$0xf] }
 0x3b5   :  { %6612 = vmatpush.bf16.msrb.mxu1 %v10372_v30  ;;  %v9924_v30 = vor.u32 %v11453_v49, %v9921_v36  ;;  %v10624_v49 = vor.u32 %v11631_v9, %v10623_v42  ;;  %v10295_v62 = vld [vmem:[#allocation7 + $0x4e8] sm:$0xf]  ;;  %v11548_v9 = vld [vmem:[#allocation7 + $0x4f4] sm:$0xf0] }
 0x3b7   :  { %6600 = vmatpush.bf16.msrb.mxu0 %v10228_v33  ;;  %v11705_v33 = vpop.eup %11704 }
 0x3b8   :  { %6577 = vmatpush.bf16.msra.mxu2 %v9924_v30  ;;  %v4769_v46 = vmul.f32 %v11705_v33, %v12437_v2  ;;  %vm4775_vm1 = vweird.f32 %v11705_v33 }
 0x3b9   :  { %6613 = vmatpush.bf16.msrb.mxu1 %v10356_v61  ;;  %v10655_v61 = vld [vmem:[#allocation7 + $0x7c0] sm:$0xf]  ;;  %vm4776_vm3 = vmor %vm4774_vm2, %vm4775_vm1 }
 0x3ba   :  { %v4770_v26 = vmul.f32 %v11705_v33, %v4769_v46  ;;  %v10656_v0 = vor.u32 %v11639_v21, %v10655_v61  ;;  %v11432_v61 = vld [vmem:[#allocation7 + $0x154] sm:$0xf0] }
 0x3bb   :  { %6601 = vmatpush.bf16.msrb.mxu0 %v10212_v22  ;;  %v12445_v22 = vld [vmem:[#allocation10 + $0x38] sm:$0xff] }
 0x3bc   :  { %v1156_v5 = vperm.slane %v12445_v22, 1  ;;  %v4771_v23 = vmul.f32 0.5, %v4770_v26  ;;  %6532 = vmatpush.bf16.msrb.mxu3 %v10656_v0  ;;  %v10591_v26 = vld [vmem:[#allocation7 + $0x740] sm:$0xf]  ;;  %v11396_v0 = vld [vmem:[#allocation7 + $0x34] sm:$0xf0] }
 0x3bd   :  { %6614 = vmatpush.bf16.msrb.mxu1 %v10340_v8  ;;  %v11444_v8 = vld [vmem:[#allocation7 + $0x1b4] sm:$0xf0] }
 0x3be   :  { %v4772_v51 = vsub.f32 1.5, %v4771_v23  ;;  %v9880_v57 = vor.u32 %v11444_v8, %v9879_v6  ;;  %v9815_v23 = vld [vmem:[#allocation7 + $0x128] sm:$0xf] }
 0x3bf   :  { %6602 = vmatpush.bf16.msrb.mxu0 %v10196_v15  ;;  %v11408_v15 = vld [vmem:[#allocation7 + $0x94] sm:$0xf0] }
 0x3c0   :  { %v4773_v27 = vmul.f32 %v11705_v33, %v4772_v51  ;;  %6533 = vmatpush.bf16.msrb.mxu3 %v10640_v28  ;;  %v9736_v44 = vor.u32 %v11408_v15, %v9735_v43  ;;  %v11392_v43 = vld [vmem:[#allocation7 + $0x14] sm:$0xf0]  ;;  %v10575_v15 = vld [vmem:[#allocation7 + $0x720] sm:$0xf]  ;;  %v11619_v28 = vld [vmem:[#allocation7 + $0x72c] sm:$0xf0] }
 0x3c1   :  { %6615 = vmatpush.bf16.msrb.mxu1 %v10324_v16  ;;  %v4455_v16 = vadd.f32 %v12429_v12, %v1156_v5 }
 0x3c2   :  { %v4777_v19 = vsel %vm4776_vm3, %v11705_v33, %v4773_v27  ;;  %v9703_v33 = vld [vmem:[#allocation7 + $0x48] sm:$0xf]  ;;  %v10576_v27 = vor.u32 %v11619_v28, %v10575_v15  ;;  %v11597_v15 = vld [vmem:[#allocation7 + $0x684] sm:$0xf] }
 0x3c3   :  { %6603 = vmatpush.bf16.msrb.mxu0 %v10180_v55  ;;  %v11404_v55 = vld [vmem:[#allocation7 + $0x74] sm:$0xf0]  ;;  %v4794_v36 = vmul.f32 %v12403_v47, %v4777_v19  ;;  %v4468_v12 = vadd.f32 %v12431_v45, %v4455_v16  ;;  %v4506_v30 = vpop.f32.mrf.mxu0  ;;  %v9816_v16 = vor.u32 %v11428_v14, %v9815_v23  ;;  %v10145_v14 = vld [vmem:[#allocation7 + $0x3d0] sm:$0xf0] }
 0x3c4   :  { %6534 = vmatpush.bf16.msrb.mxu3 %v10624_v49  ;;  %v11540_v23 = vld [vmem:[#allocation7 + $0x4b4] sm:$0xf0] }
 0x3c5   :  { %6616 = vmatpush.bf16.msrb.mxu1 %v10308_v25  ;;  %v9847_v25 = vld [vmem:[#allocation7 + $0x168] sm:$0xf]  ;;  %v4802_v2 = vmul.f32 %v4794_v36, %v12427_v3  ;;  %v4481_v40 = vadd.f32 %v12440_v20, %v4468_v12  ;;  %v4519_v31 = vpop.f32.mrf.mxu1  ;;  %v4842_v45 = vperm.slane %v4794_v36, 2  ;;  %v9704_v20 = vor.u32 %v11400_v54, %v9703_v33  ;;  %v10161_v33 = vld [vmem:[#allocation7 + $0x3f0] sm:$0xf0] }
 0x3c6   :  { %6604 = vmatmul.bf16.vlgmr.msrb.gmra.mxu0 %v12401_v41 }
 0x3c7   :  { %6648 = vmatpush.bf16.msra.mxu0 %v9784_v10  ;;  %v11436_v10 = vld [vmem:[#allocation7 + $0x174] sm:$0xf0]  ;;  %v4818_v46 = vrot.slane %v4802_v2, 7  ;;  %v4494_v3 = vadd.f32 %v12442_v39, %v4481_v40  ;;  %v4850_v11 = vmul.f32 %v4842_v45, %v12418_v32  ;;  %v11615_v2 = vld [vmem:[#allocation7 + $0x70c] sm:$0xf0] }
 0x3c8   :  { %6617 = vmatmul.bf16.vlgmr.msrb.gmra.mxu1 %v12416_v60  ;;  %v9848_v53 = vor.u32 %v11436_v10, %v9847_v25  ;;  %6535 = vmatpush.bf16.msrb.mxu3 %v10608_v58  ;;  %v11424_v32 = vld [vmem:[#allocation7 + $0x114] sm:$0xf0]  ;;  %v9672_v25 = vor.u32 %v11392_v43, %v9671_v1  ;;  %v11605_v10 = vld [vmem:[#allocation7 + $0x6c4] sm:$0xf] }
 0x3c9   :  { %6661 = vmatpush.bf16.msra.mxu1 %v9912_v29  ;;  %v9720_v29 = vor.u32 %v11404_v55, %v9719_v48  ;;  %v4834_v21 = vsub.f32 %v12403_v47, %v4818_v46  ;;  %v4507_v8 = vadd.f32 %v4506_v30, %v4494_v3  ;;  %v10545_v47 = vld [vmem:[#allocation7 + $0x6f0] sm:$0xf0]  ;;  %v11580_v48 = vld [vmem:[#allocation7 + $0x5f4] sm:$0xf0]  ;;  %v10559_v30 = vld [vmem:[#allocation7 + $0x700] sm:$0xf] }
 0x3ca   :  { %v10548_v12 = vor.u32 %v11609_v24, %v10545_v47  ;;  %v10560_v56 = vor.u32 %v11615_v2, %v10559_v30  ;;  %v10279_v46 = vld [vmem:[#allocation7 + $0x4c8] sm:$0xf]  ;;  %v11544_v45 = vld [vmem:[#allocation7 + $0x4d4] sm:$0xf0]  ;;  %v10481_v30 = vld [vmem:[#allocation7 + $0x670] sm:$0xf0] }
 0x3cb   :  { %6649 = vmatpush.bf16.msra.mxu0 %v9768_v50  ;;  %v9831_v50 = vld [vmem:[#allocation7 + $0x148] sm:$0xf]  ;;  %v4858_v6 = vperm.slane %v4834_v21, 3  ;;  %v4520_v42 = vadd.f32 %v4519_v31, %v4507_v8  ;;  %v10296_v31 = vor.u32 %v11548_v9, %v10295_v62  ;;  %v11576_v21 = vld [vmem:[#allocation7 + $0x5d4] sm:$0xf0] }
 0x3cc   :  { %v9832_v13 = vor.u32 %v11432_v61, %v9831_v50  ;;  %v10407_v61 = vld [vmem:[#allocation7 + $0x5c8] sm:$0xf]  ;;  %v11572_v47 = vld [vmem:[#allocation7 + $0x5b4] sm:$0xf0] }
 0x3cd   :  { %6662 = vmatpush.bf16.msra.mxu1 %v9896_v7  ;;  %v11623_v7 = vld [vmem:[#allocation7 + $0x74c] sm:$0xf0]  ;;  %v4866_v39 = vadd.f32 %v4858_v6, %v4850_v11  ;;  %v4521_v51 = vpop.f32.mrf.mxu1  ;;  %v10408_v8 = vor.u32 %v11576_v21, %v10407_v61  ;;  %v10391_v24 = vld [vmem:[#allocation7 + $0x5a8] sm:$0xf]  ;;  %v11536_v9 = vld [vmem:[#allocation7 + $0x494] sm:$0xf0] }
 0x3ce   :  { %v10592_v5 = vor.u32 %v11623_v7, %v10591_v26  ;;  %v10532_v26 = vor.u32 %v11605_v10, %v10529_v18  ;;  %v11601_v7 = vld [vmem:[#allocation7 + $0x6a4] sm:$0xf]  ;;  %v10231_v2 = vld [vmem:[#allocation7 + $0x468] sm:$0xf] }
 0x3cf   :  { %6650 = vmatpush.bf16.msra.mxu0 %v9752_v17  ;;  %v4508_v17 = vpop.f32.mrf.mxu0  ;;  %vm4874_vm4 = vcmp.gt.f32.partialorder %v4866_v39, 0.0  ;;  %v11501_v18 = vld [vmem:[#allocation7 + $0x384] sm:$0xf] }
 0x3d0   :  { %6536 = vmatpush.bf16.msrb.mxu3 %v10592_v5  ;;  %v11509_v5 = vld [vmem:[#allocation7 + $0x3c4] sm:$0xf] }
 0x3d1   :  { %6663 = vmatpush.bf16.msra.mxu1 %v9880_v57  ;;  %v9688_v57 = vor.u32 %v11396_v0, %v9687_v63  ;;  %v4532_v19 = vpop.f32.mrf.mxu2  ;;  %v10513_v63 = vld [vmem:[#allocation7 + $0x6b0] sm:$0xf0]  ;;  %v10263_v0 = vld [vmem:[#allocation7 + $0x4a8] sm:$0xf]  ;;  %v10148_v1 = vor.u32 %v11509_v5, %v10145_v14 }
 0x3d2   :  { %v4533_v55 = vadd.f32 %v4532_v19, %v4520_v42  ;;  %v10516_v43 = vor.u32 %v11601_v7, %v10513_v63  ;;  %v10264_v28 = vor.u32 %v11540_v23, %v10263_v0  ;;  %v10247_v42 = vld [vmem:[#allocation7 + $0x488] sm:$0xf]  ;;  %v10465_v5 = vld [vmem:[#allocation7 + $0x650] sm:$0xf0] }
 0x3d3   :  { %6651 = vmatpush.bf16.msra.mxu0 %v9736_v44  ;;  %v4882_v44 = vmul.f32 0.2, %v4866_v39  ;;  %v4545_v49 = vpop.f32.mrf.mxu3  ;;  %v10215_v14 = vld [vmem:[#allocation7 + $0x448] sm:$0xf] }
 0x3d4   :  { %6537 = vmatpush.bf16.msrb.mxu3 %v10576_v27  ;;  %v12461_v54 = vadd.f32 %v4545_v49, %v4533_v55  ;;  %v11593_v55 = vld [vmem:[#allocation7 + $0x664] sm:$0xf] }
 0x3d5   :  { %6664 = vmatpush.bf16.msra.mxu1 %v9864_v35  ;;  %v10423_v35 = vld [vmem:[#allocation7 + $0x5e8] sm:$0xf]  ;;  %v4890_v36 = vsel %vm4874_vm4, %v4866_v39, %v4882_v44  ;;  %v10392_v44 = vor.u32 %v11572_v47, %v10391_v24 }
 0x3d6   :  { %v12459_v40 = vpack.c.bf16 %v4890_v36, %v4890_v36  ;;  %v10424_v58 = vor.u32 %v11580_v48, %v10423_v35  ;;  %v4591_v3 = vrot.slane %v12461_v54, 4  ;;  %v10375_v35 = vld [vmem:[#allocation7 + $0x588] sm:$0xf]  ;;  %v11568_v48 = vld [vmem:[#allocation7 + $0x594] sm:$0xf0] }
 0x3d7   :  { %6652 = vmatpush.bf16.msra.mxu0 %v9720_v29  ;;  %v9800_v29 = vor.u32 %v11424_v32, %v9799_v59  ;;  %v11505_v59 = vld [vmem:[#allocation7 + $0x3a4] sm:$0xf]  ;;  %v10129_v32 = vld [vmem:[#allocation7 + $0x3b0] sm:$0xf0] }
 0x3d8   :  { %6526 = vmatmul.bf16.vlgmr.msrb.gmra.mxu2 %v12459_v40  ;;  %6538 = vmatpush.bf16.msrb.mxu3 %v10560_v56  ;;  %v4592_v11 = vadd.f32 %v4591_v3, %v12461_v54  ;;  %v10132_v19 = vor.u32 %v11505_v59, %v10129_v32  ;;  %v10113_v56 = vld [vmem:[#allocation7 + $0x390] sm:$0xf0] }
 0x3d9   :  { %6665 = vmatpush.bf16.msra.mxu1 %v9848_v53  ;;  %v11513_v53 = vld [vmem:[#allocation7 + $0x3e4] sm:$0xf]  ;;  %6622 = vmatpush.bf16.msrb.mxu2 %v10548_v12  ;;  %v4534_v17 = vpop.f32.mrf.mxu2  ;;  %v10081_v59 = vld [vmem:[#allocation7 + $0x350] sm:$0xf0] }
 0x3da   :  { %v10164_v50 = vor.u32 %v11513_v53, %v10161_v33  ;;  %v4593_v39 = vrot.slane %v4592_v11, 2  ;;  %v11528_v17 = vld [vmem:[#allocation7 + $0x454] sm:$0xf0] }
 0x3db   :  { %6653 = vmatpush.bf16.msra.mxu0 %v9704_v20  ;;  %v4619_v20 = vmul.f32 %v12461_v54, %v12461_v54 }
 0x3dc   :  { %6583 = vmatpush.bf16.msra.mxu3 %v10164_v50  ;;  %v4594_v62 = vadd.f32 %v4593_v39, %v4592_v11  ;;  %v10116_v50 = vor.u32 %v11501_v18, %v10113_v56  ;;  %v11497_v11 = vld [vmem:[#allocation7 + $0x364] sm:$0xf]  ;;  %v11560_v39 = vld [vmem:[#allocation7 + $0x554] sm:$0xf0]  ;;  %v10183_v18 = vld [vmem:[#allocation7 + $0x408] sm:$0xf] }
 0x3dd   :  { %6666 = vmatpush.bf16.msra.mxu1 %v9832_v13  ;;  %v10280_v13 = vor.u32 %v11544_v45, %v10279_v46  ;;  %v4662_v6 = vrot.slane %v4619_v20, 4  ;;  %6623 = vmatpush.bf16.msrb.mxu2 %v10532_v26  ;;  %v10359_v46 = vld [vmem:[#allocation7 + $0x568] sm:$0xf]  ;;  %v11564_v45 = vld [vmem:[#allocation7 + $0x574] sm:$0xf0] }
 0x3de   :  { %v4595_v49 = vrot.slane %v4594_v62, 1  ;;  %v11589_v26 = vld [vmem:[#allocation7 + $0x644] sm:$0xf]  ;;  %v10360_v0 = vor.u32 %v11564_v45, %v10359_v46  ;;  %v11520_v56 = vld [vmem:[#allocation7 + $0x414] sm:$0xf0] }
 0x3df   :  { %6654 = vmatpush.bf16.msra.mxu0 %v9688_v57  ;;  %v4663_v51 = vadd.f32 %v4662_v6, %v4619_v20  ;;  %v4547_v57 = vpop.f32.mrf.mxu3  ;;  %v10484_v20 = vor.u32 %v11593_v55, %v10481_v30  ;;  %v10097_v6 = vld [vmem:[#allocation7 + $0x370] sm:$0xf0]  ;;  %v10039_v30 = vld [vmem:[#allocation7 + $0x2e8] sm:$0xf]  ;;  %v11418_v46 = vld [vmem:[#allocation7 + $0xec] sm:$0xf] }
 0x3e0   :  { %6584 = vmatpush.bf16.msra.mxu3 %v10148_v1  ;;  %v4596_v53 = vadd.f32 %v4595_v49, %v4594_v62  ;;  %v10100_v24 = vor.u32 %v11497_v11, %v10097_v6  ;;  %v10343_v1 = vld [vmem:[#allocation7 + $0x548] sm:$0xf]  ;;  %v10468_v57 = vor.u32 %v11589_v26, %v10465_v5  ;;  %v9785_v45 = vld [vmem:[#allocation7 + $0xf8] sm:$0xf0]  ;;  %v10049_v5 = vld [vmem:[#allocation7 + $0x310] sm:$0xf0] }
 0x3e1   :  { %6667 = vmatpush.bf16.msra.mxu1 %v9816_v16  ;;  %v10497_v16 = vld [vmem:[#allocation7 + $0x690] sm:$0xf0]  ;;  %v4664_v27 = vrot.slane %v4663_v51, 2  ;;  %6624 = vmatpush.bf16.msrb.mxu2 %v10516_v43  ;;  %v11585_v43 = vld [vmem:[#allocation7 + $0x624] sm:$0xf]  ;;  %v10344_v62 = vor.u32 %v11560_v39, %v10343_v1  ;;  %v9788_v6 = vor.u32 %v11418_v46, %v9785_v45 }
 0x3e2   :  { %v10500_v12 = vor.u32 %v11597_v15, %v10497_v16  ;;  %v12471_v61 = vmul.f32 %v12087_v52, %v4596_v53  ;;  %v10216_v15 = vor.u32 %v11528_v17, %v10215_v14  ;;  %v11493_v16 = vld [vmem:[#allocation7 + $0x344] sm:$0xf]  ;;  %v10311_v53 = vld [vmem:[#allocation7 + $0x508] sm:$0xf]  ;;  %v9769_v1 = vld [vmem:[#allocation7 + $0xd8] sm:$0xf0] }
 0x3e3   :  { %6655 = vmatpush.bf16.msra.mxu0 %v9672_v25  ;;  %v4665_v36 = vadd.f32 %v4664_v27, %v4663_v51  ;;  %v11729_v25 = vld [vmem:[#allocation10] sm:$0xff]  ;;  %v6449_v3 = vpop.f32.mrf.mxu0  ;;  %v10199_v27 = vld [vmem:[#allocation7 + $0x428] sm:$0xf]  ;;  %v11468_v46 = vld [vmem:[#allocation7 + $0x274] sm:$0xf0] }
 0x3e4   :  { %v5156_v10 = vperm.slane %v11729_v25, 4  ;;  %6585 = vmatpush.bf16.msra.mxu3 %v10132_v19  ;;  %v4683_v23 = vmul.f32 %v12471_v61, %v12471_v61  ;;  %v11556_v19 = vld [vmem:[#allocation7 + $0x534] sm:$0xf0] }
 0x3e5   :  { %6668 = vmatpush.bf16.msra.mxu1 %v9800_v29  ;;  %v10248_v29 = vor.u32 %v11536_v9, %v10247_v42  ;;  %v4666_v33 = vrot.slane %v4665_v36, 1  ;;  %6625 = vmatpush.bf16.msrb.mxu2 %v10500_v12  ;;  %v10084_v42 = vor.u32 %v11493_v16, %v10081_v59  ;;  %v10327_v9 = vld [vmem:[#allocation7 + $0x528] sm:$0xf]  ;;  %v11489_v12 = vld [vmem:[#allocation7 + $0x324] sm:$0xf] }
 0x3e6   :  { %6656 = vmatmul.bf16.vlgmr.msra.gmra.mxu0 %v12357_v34  ;;  %v6450_v7 = vadd.f32 %v6449_v3, %v5156_v10  ;;  %v11450_v3 = vld [vmem:[#allocation7 + $0x1ec] sm:$0xf]  ;;  %v10007_v16 = vld [vmem:[#allocation7 + $0x2a8] sm:$0xf]  ;;  %v11476_v59 = vld [vmem:[#allocation7 + $0x2b4] sm:$0xf0] }
 0x3e7   :  { %6700 = vmatpush.bf16.msrb.mxu0 %v10296_v31  ;;  %v11532_v31 = vld [vmem:[#allocation7 + $0x474] sm:$0xf0]  ;;  %v4667_v21 = vadd.f32 %v4666_v33, %v4665_v36  ;;  %v10433_v36 = vld [vmem:[#allocation7 + $0x610] sm:$0xf0] }
 0x3e8   :  { %6669 = vmatmul.bf16.vlgmr.msra.gmra.mxu1 %v12362_v4  ;;  %v10232_v63 = vor.u32 %v11532_v31, %v10231_v2  ;;  %6586 = vmatpush.bf16.msra.mxu3 %v10116_v50  ;;  %v11484_v2 = vld [vmem:[#allocation7 + $0x2f4] sm:$0xf0]  ;;  %v10328_v31 = vor.u32 %v11556_v19, %v10327_v9  ;;  %v11442_v9 = vld [vmem:[#allocation7 + $0x1ac] sm:$0xf]  ;;  %v9881_v19 = vld [vmem:[#allocation7 + $0x1b8] sm:$0xf0] }
 0x3e9   :  { %6713 = vmatpush.bf16.msrb.mxu1 %v10424_v58  ;;  %v10376_v58 = vor.u32 %v11568_v48, %v10375_v35  ;;  %6578 = vmatmul.bf16.vlgmr.msra.gmra.mxu2 %v12374_v38  ;;  %v11581_v35 = vld [vmem:[#allocation7 + $0x604] sm:$0xf] }
 0x3ea   :  { %6626 = vmatpush.bf16.msrb.mxu2 %v10484_v20  ;;  %v9913_v20 = vld [vmem:[#allocation7 + $0x1f8] sm:$0xf0] }
 0x3eb   :  { %6701 = vmatpush.bf16.msrb.mxu0 %v10280_v13  ;;  %v6462_v13 = vpop.f32.mrf.mxu1  ;;  %v6451_v55 = vpop.f32.mrf.mxu0  ;;  %v9916_v17 = vor.u32 %v11450_v3, %v9913_v20  ;;  %v9721_v3 = vld [vmem:[#allocation7 + $0x78] sm:$0xf0] }
 0x3ec   :  { %v6463_v47 = vadd.f32 %v6462_v13, %v6450_v7  ;;  %6587 = vmatpush.bf16.msra.mxu3 %v10100_v24  ;;  %v10040_v13 = vor.u32 %v11484_v2, %v10039_v30  ;;  %v11414_v24 = vld [vmem:[#allocation7 + $0xcc] sm:$0xf]  ;;  %v9884_v30 = vor.u32 %v11442_v9, %v9881_v19  ;;  %v9927_v9 = vld [vmem:[#allocation7 + $0x208] sm:$0xf]  ;;  %v11456_v19 = vld [vmem:[#allocation7 + $0x214] sm:$0xf0] }
 0x3ed   :  { %6714 = vmatpush.bf16.msrb.mxu1 %v10408_v8  ;;  %v4675_v8 = vmul.f32 %v4667_v21, %v12087_v52  ;;  %v10436_v21 = vor.u32 %v11581_v35, %v10433_v36  ;;  %v11406_v2 = vld [vmem:[#allocation7 + $0x8c] sm:$0xf] }
 0x3ee   :  { %6627 = vmatpush.bf16.msrb.mxu2 %v10468_v57 }
 0x3ef   :  { %6702 = vmatpush.bf16.msrb.mxu0 %v10264_v28  ;;  %v4691_v51 = vsub.f32 %v4675_v8, %v4683_v23  ;;  %v10449_v28 = vld [vmem:[#allocation7 + $0x630] sm:$0xf0]  ;;  %v10023_v8 = vld [vmem:[#allocation7 + $0x2c8] sm:$0xf]  ;;  %v11480_v23 = vld [vmem:[#allocation7 + $0x2d4] sm:$0xf0] }
 0x3f0   :  { %v10452_v49 = vor.u32 %v11585_v43, %v10449_v28  ;;  %6588 = vmatpush.bf16.msra.mxu3 %v10084_v42  ;;  %v9772_v28 = vor.u32 %v11414_v24, %v9769_v1 }
 0x3f1   :  { %6715 = vmatpush.bf16.msrb.mxu1 %v10392_v44  ;;  %v4699_v32 = vmax.f32 %v4691_v51, 0.0  ;;  %v11524_v44 = vld [vmem:[#allocation7 + $0x434] sm:$0xf0]  ;;  %v6475_v50 = vpop.f32.mrf.mxu2  ;;  %v9897_v51 = vld [vmem:[#allocation7 + $0x1d8] sm:$0xf0] }
 0x3f2   :  { %v10200_v10 = vor.u32 %v11524_v44, %v10199_v27  ;;  %6628 = vmatpush.bf16.msrb.mxu2 %v10452_v49  ;;  %v6476_v26 = vadd.f32 %v6475_v50, %v6463_v47  ;;  %v11446_v47 = vld [vmem:[#allocation7 + $0x1cc] sm:$0xf]  ;;  %v9753_v44 = vld [vmem:[#allocation7 + $0xb8] sm:$0xf0]  ;;  %v10008_v49 = vor.u32 %v11476_v59, %v10007_v16 }
 0x3f3   :  { %6703 = vmatpush.bf16.msrb.mxu0 %v10248_v29  ;;  %v12477_v48 = vadd.f32 1e-05, %v4699_v32  ;;  %v6464_v25 = vpop.f32.mrf.mxu1  ;;  %v10065_v29 = vld [vmem:[#allocation7 + $0x330] sm:$0xf0]  ;;  %v6488_v7 = vpop.f32.mrf.mxu3  ;;  %v11410_v27 = vld [vmem:[#allocation7 + $0xac] sm:$0xf] }
 0x3f4   :  { %v10068_v33 = vor.u32 %v11489_v12, %v10065_v29  ;;  %v12480_v14 = vadd.f32 %v6488_v7, %v6476_v26  ;;  %v9756_v36 = vor.u32 %v11410_v27, %v9753_v44  ;;  %v9991_v12 = vld [vmem:[#allocation7 + $0x288] sm:$0xf]  ;;  %v11472_v25 = vld [vmem:[#allocation7 + $0x294] sm:$0xf0]  ;;  %v9737_v29 = vld [vmem:[#allocation7 + $0x98] sm:$0xf0] }
 0x3f5   :  { %6716 = vmatpush.bf16.msrb.mxu1 %v10376_v58  ;;  %11706 = vrsqrt.f32 %v12477_v48  ;;  %v11552_v58 = vld [vmem:[#allocation7 + $0x514] sm:$0xf0]  ;;  %vm4784_vm6 = vweird.f32 %v12477_v48  ;;  %v11434_v26 = vld [vmem:[#allocation7 + $0x16c] sm:$0xf]  ;;  %v9849_v7 = vld [vmem:[#allocation7 + $0x178] sm:$0xf0] }
 0x3f6   :  { %v10312_v11 = vor.u32 %v11552_v58, %v10311_v53  ;;  %6589 = vmatpush.bf16.msra.mxu3 %v10068_v33  ;;  %6629 = vmatpush.bf16.msrb.mxu2 %v10436_v21  ;;  %v9992_v53 = vor.u32 %v11472_v25, %v9991_v12  ;;  %v9740_v33 = vor.u32 %v11406_v2, %v9737_v29  ;;  %v9975_v58 = vld [vmem:[#allocation7 + $0x268] sm:$0xf]  ;;  %v11402_v21 = vld [vmem:[#allocation7 + $0x6c] sm:$0xf]  ;;  %v9689_v16 = vld [vmem:[#allocation7 + $0x38] sm:$0xf0] }
 0x3f7   :  { %6704 = vmatpush.bf16.msrb.mxu0 %v10232_v63  ;;  %v10184_v63 = vor.u32 %v11520_v56, %v10183_v18  ;;  %v9865_v18 = vld [vmem:[#allocation7 + $0x198] sm:$0xf0]  ;;  %v11612_v12 = vld [vmem:[#allocation7 + $0x6f4] sm:$0xf0] }
 0x3f8   :  { %v9817_v27 = vld [vmem:[#allocation7 + $0x138] sm:$0xf0] }
 0x3f9   :  { %6717 = vmatpush.bf16.msrb.mxu1 %v10360_v0  ;;  %v11485_v0 = vld [vmem:[#allocation7 + $0x304] sm:$0xf]  ;;  %6630 = vmatmul.bf16.vlgmr.msrb.gmra.mxu2 %v12459_v40  ;;  %v6477_v42 = vpop.f32.mrf.mxu2  ;;  %v9801_v29 = vld [vmem:[#allocation7 + $0x118] sm:$0xf0] }
 0x3fa   :  { %v10052_v57 = vor.u32 %v11485_v0, %v10049_v5  ;;  %6674 = vmatpush.bf16.msra.mxu2 %v10040_v13  ;;  %v9724_v5 = vor.u32 %v11402_v21, %v9721_v3 }
 0x3fb   :  { %6705 = vmatpush.bf16.msrb.mxu0 %v10216_v15  ;;  %v11707_v39 = vpop.eup %11706  ;;  %v10024_v15 = vor.u32 %v11480_v23, %v10023_v8  ;;  %v6490_v55 = vpop.f32.mrf.mxu3  ;;  %v9852_v8 = vor.u32 %v11434_v26, %v9849_v7  ;;  %v11398_v23 = vld [vmem:[#allocation7 + $0x4c] sm:$0xf]  ;;  %v10657_v26 = vld [vmem:[#allocation7 + $0x7d0] sm:$0xf0]  ;;  %v10535_v7 = vld [vmem:[#allocation7 + $0x6c8] sm:$0xf] }
 0x3fc   :  { %v4779_v43 = vmul.f32 %v11707_v39, %v12477_v48  ;;  %6590 = vmatpush.bf16.msra.mxu3 %v10052_v57  ;;  %vm4785_vm5 = vweird.f32 %v11707_v39 }
 0x3fd   :  { %6718 = vmatpush.bf16.msrb.mxu1 %v10344_v62  ;;  %v9900_v62 = vor.u32 %v11446_v47, %v9897_v51  ;;  %vm4786_vm7 = vmor %vm4784_vm6, %vm4785_vm5  ;;  %v9833_v47 = vld [vmem:[#allocation7 + $0x158] sm:$0xf0] }
 0x3fe   :  { %v4780_v32 = vmul.f32 %v11707_v39, %v4779_v43  ;;  %6675 = vmatpush.bf16.msra.mxu2 %v10024_v15  ;;  %v11460_v43 = vld [vmem:[#allocation7 + $0x234] sm:$0xf0] }
 0x3ff   :  { %6706 = vmatpush.bf16.msrb.mxu0 %v10200_v10 }
 0x400   :  { %v4781_v35 = vmul.f32 0.5, %v4780_v32 }
 0x401   :  { %6719 = vmatpush.bf16.msrb.mxu1 %v10328_v31  ;;  %v11438_v31 = vld [vmem:[#allocation7 + $0x18c] sm:$0xf] }
 0x402   :  { %v4782_v10 = vsub.f32 1.5, %v4781_v35  ;;  %6676 = vmatpush.bf16.msra.mxu2 %v10008_v49  ;;  %v9868_v50 = vor.u32 %v11438_v31, %v9865_v18  ;;  %v11641_v35 = vld [vmem:[#allocation7 + $0x7e4] sm:$0xf]  ;;  %v10673_v49 = vld [vmem:[#allocation7 + $0x7f0] sm:$0xf0]  ;;  %v9928_v31 = vor.u32 %v11456_v19, %v9927_v9 }
 0x403   :  { %6707 = vmatpush.bf16.msrb.mxu0 %v10184_v63  ;;  %v6501_v13 = vpop.f32.mrf.mxu0  ;;  %v9976_v63 = vor.u32 %v11468_v46, %v9975_v58  ;;  %v11546_v18 = vld [vmem:[#allocation7 + $0x4ec] sm:$0xf]  ;;  %v10249_v19 = vld [vmem:[#allocation7 + $0x498] sm:$0xf0] }
 0x404   :  { %v4783_v56 = vmul.f32 %v11707_v39, %v4782_v10  ;;  %v12490_v0 = vadd.f32 %v6501_v13, %v12480_v14  ;;  %v9943_v14 = vld [vmem:[#allocation7 + $0x228] sm:$0xf]  ;;  %v11390_v10 = vld [vmem:[#allocation7 + $0xc] sm:$0xf]  ;;  %v11608_v13 = vld [vmem:[#allocation7 + $0x6d4] sm:$0xf0] }
 0x405   :  { %6720 = vmatpush.bf16.msrb.mxu1 %v10312_v11  ;;  %v9959_v11 = vld [vmem:[#allocation7 + $0x248] sm:$0xf]  ;;  %v9944_v42 = vor.u32 %v11460_v43, %v9943_v14  ;;  %v11578_v46 = vld [vmem:[#allocation7 + $0x5ec] sm:$0xf]  ;;  %v10265_v14 = vld [vmem:[#allocation7 + $0x4b8] sm:$0xf0] }
 0x406   :  { %6708 = vmatmul.bf16.vlgmr.msrb.gmra.mxu0 %v12401_v41  ;;  %v4787_v45 = vsel %vm4786_vm7, %v11707_v39, %v4783_v56  ;;  %6677 = vmatpush.bf16.msra.mxu2 %v9992_v53  ;;  %v11430_v39 = vld [vmem:[#allocation7 + $0x14c] sm:$0xf]  ;;  %v10297_v56 = vld [vmem:[#allocation7 + $0x4f8] sm:$0xf0] }
 0x407   :  { %6752 = vmatpush.bf16.msra.mxu0 %v9788_v6  ;;  %v4795_v20 = vmul.f32 %v12445_v22, %v4787_v45  ;;  %v11464_v6 = vld [vmem:[#allocation7 + $0x254] sm:$0xf0]  ;;  %v9836_v15 = vor.u32 %v11430_v39, %v9833_v47  ;;  %v10425_v45 = vld [vmem:[#allocation7 + $0x5f8] sm:$0xf0]  ;;  %v10519_v39 = vld [vmem:[#allocation7 + $0x6a8] sm:$0xf] }
 0x408   :  { %6721 = vmatmul.bf16.vlgmr.msrb.gmra.mxu1 %v12416_v60  ;;  %v9960_v51 = vor.u32 %v11464_v6, %v9959_v11  ;;  %v10281_v11 = vld [vmem:[#allocation7 + $0x4d8] sm:$0xf0]  ;;  %v11604_v47 = vld [vmem:[#allocation7 + $0x6b4] sm:$0xf0]  ;;  %v11534_v9 = vld [vmem:[#allocation7 + $0x48c] sm:$0xf] }
 0x409   :  { %6765 = vmatpush.bf16.msra.mxu1 %v9916_v17  ;;  %v4803_v48 = vmul.f32 %v4795_v20, %v12471_v61  ;;  %v9705_v17 = vld [vmem:[#allocation7 + $0x58] sm:$0xf0]  ;;  %v4843_v1 = vperm.slane %v4795_v20, 2 }
 0x40a   :  { %6678 = vmatpush.bf16.msra.mxu2 %v9976_v63  ;;  %v9708_v61 = vor.u32 %v11398_v23, %v9705_v17  ;;  %v10300_v63 = vor.u32 %v11546_v18, %v10297_v56  ;;  %v11574_v23 = vld [vmem:[#allocation7 + $0x5cc] sm:$0xf]  ;;  %v10409_v17 = vld [vmem:[#allocation7 + $0x5d8] sm:$0xf0] }
 0x40b   :  { %6753 = vmatpush.bf16.msra.mxu0 %v9772_v28  ;;  %v4819_v24 = vrot.slane %v4803_v48, 7  ;;  %v11394_v28 = vld [vmem:[#allocation7 + $0x2c] sm:$0xf]  ;;  %v4851_v59 = vmul.f32 %v4843_v1, %v12461_v54  ;;  %v6503_v44 = vpop.f32.mrf.mxu0  ;;  %v10428_v48 = vor.u32 %v11578_v46, %v10425_v45  ;;  %v10641_v1 = vld [vmem:[#allocation7 + $0x7b0] sm:$0xf0] }
 0x40c   :  { %v9692_v55 = vor.u32 %v11394_v28, %v9689_v16  ;;  %v11422_v54 = vld [vmem:[#allocation7 + $0x10c] sm:$0xf]  ;;  %v10393_v16 = vld [vmem:[#allocation7 + $0x5b8] sm:$0xf0]  ;;  %v10593_v46 = vld [vmem:[#allocation7 + $0x750] sm:$0xf0] }
 0x40d   :  { %6766 = vmatpush.bf16.msra.mxu1 %v9900_v62  ;;  %v4835_v57 = vsub.f32 %v12445_v22, %v4819_v24  ;;  %v11426_v62 = vld [vmem:[#allocation7 + $0x12c] sm:$0xf]  ;;  %v9804_v20 = vor.u32 %v11422_v54, %v9801_v29  ;;  %v11633_v24 = vld [vmem:[#allocation7 + $0x7a4] sm:$0xf]  ;;  %v10233_v29 = vld [vmem:[#allocation7 + $0x478] sm:$0xf0] }
 0x40e   :  { %6679 = vmatpush.bf16.msra.mxu2 %v9960_v51  ;;  %v9820_v25 = vor.u32 %v11426_v62, %v9817_v27  ;;  %v10644_v43 = vor.u32 %v11633_v24, %v10641_v1  ;;  %v11570_v28 = vld [vmem:[#allocation7 + $0x5ac] sm:$0xf]  ;;  %v10503_v62 = vld [vmem:[#allocation7 + $0x688] sm:$0xf]  ;;  %v11600_v27 = vld [vmem:[#allocation7 + $0x694] sm:$0xf0] }
 0x40f   :  { %6754 = vmatpush.bf16.msra.mxu0 %v9756_v36  ;;  %v4859_v32 = vperm.slane %v4835_v57, 3  ;;  %v10551_v36 = vld [vmem:[#allocation7 + $0x6e8] sm:$0xf]  ;;  %v10412_v57 = vor.u32 %v11574_v23, %v10409_v17  ;;  %v11592_v45 = vld [vmem:[#allocation7 + $0x654] sm:$0xf0] }
 0x410   :  { %v10552_v58 = vor.u32 %v11612_v12, %v10551_v36  ;;  %v10377_v36 = vld [vmem:[#allocation7 + $0x598] sm:$0xf0]  ;;  %v11625_v12 = vld [vmem:[#allocation7 + $0x764] sm:$0xf]  ;;  %v11588_v23 = vld [vmem:[#allocation7 + $0x634] sm:$0xf0] }
 0x411   :  { %6767 = vmatpush.bf16.msra.mxu1 %v9884_v30  ;;  %v4867_v22 = vadd.f32 %v4859_v32, %v4851_v59  ;;  %v9673_v30 = vld [vmem:[#allocation7 + $0x18] sm:$0xf0]  ;;  %v11629_v59 = vld [vmem:[#allocation7 + $0x784] sm:$0xf]  ;;  %v10625_v32 = vld [vmem:[#allocation7 + $0x790] sm:$0xf0] }
 0x412   :  { %6680 = vmatpush.bf16.msra.mxu2 %v9944_v42  ;;  %v9676_v3 = vor.u32 %v11390_v10, %v9673_v30  ;;  %v10396_v42 = vor.u32 %v11570_v28, %v10393_v16  ;;  %v11596_v10 = vld [vmem:[#allocation7 + $0x674] sm:$0xf0]  ;;  %v10252_v30 = vor.u32 %v11534_v9, %v10249_v19  ;;  %v12504_v17 = vld [vmem:[#allocation10 + $0x8] sm:$0xff]  ;;  %v11613_v28 = vld [vmem:[#allocation7 + $0x704] sm:$0xf] }
 0x413   :  { %6755 = vmatpush.bf16.msra.mxu0 %v9740_v33  ;;  %v4883_v2 = vmul.f32 0.2, %v4867_v22  ;;  %vm4875_vm8 = vcmp.gt.f32.partialorder %v4867_v22, 0.0  ;;  %v10676_v33 = vor.u32 %v11641_v35, %v10673_v49  ;;  %v11566_v49 = vld [vmem:[#allocation7 + $0x58c] sm:$0xf]  ;;  %v5157_v24 = vperm.slane %v12504_v17, 4 }
 0x414   :  { %v10380_v54 = vor.u32 %v11566_v49, %v10377_v36  ;;  %v10561_v16 = vld [vmem:[#allocation7 + $0x710] sm:$0xf0]  ;;  %v10041_v9 = vld [vmem:[#allocation7 + $0x2f8] sm:$0xf0] }
 0x415   :  { %6768 = vmatpush.bf16.msra.mxu1 %v9868_v50  ;;  %v4891_v53 = vsel %vm4875_vm8, %v4867_v22, %v4883_v2  ;;  %v11637_v50 = vld [vmem:[#allocation7 + $0x7c4] sm:$0xf]  ;;  %v6514_v35 = vpop.f32.mrf.mxu1  ;;  %v10628_v22 = vor.u32 %v11629_v59, %v10625_v32  ;;  %v11530_v2 = vld [vmem:[#allocation7 + $0x46c] sm:$0xf]  ;;  %v10439_v59 = vld [vmem:[#allocation7 + $0x608] sm:$0xf]  ;;  %v10564_v36 = vor.u32 %v11613_v28, %v10561_v16 }
 0x416   :  { %v12494_v21 = vpack.c.bf16 %v4891_v53, %v4891_v53  ;;  %6681 = vmatpush.bf16.msra.mxu2 %v9928_v31  ;;  %v10660_v6 = vor.u32 %v11637_v50, %v10657_v26  ;;  %v11562_v53 = vld [vmem:[#allocation7 + $0x56c] sm:$0xf]  ;;  %v10236_v50 = vor.u32 %v11530_v2, %v10233_v29  ;;  %v10217_v26 = vld [vmem:[#allocation7 + $0x458] sm:$0xf0]  ;;  %v11584_v32 = vld [vmem:[#allocation7 + $0x614] sm:$0xf0] }
 0x417   :  { %6756 = vmatpush.bf16.msra.mxu0 %v9724_v5  ;;  %v11542_v5 = vld [vmem:[#allocation7 + $0x4cc] sm:$0xf]  ;;  %v10151_v2 = vld [vmem:[#allocation7 + $0x3c8] sm:$0xf]  ;;  %v11492_v28 = vld [vmem:[#allocation7 + $0x334] sm:$0xf0] }
 0x418   :  { %6539 = vmatmul.bf16.vlgmr.msrb.gmra.mxu3 %v12494_v21  ;;  %v10284_v51 = vor.u32 %v11542_v5, %v10281_v11  ;;  %v10345_v5 = vld [vmem:[#allocation7 + $0x558] sm:$0xf0]  ;;  %v11617_v11 = vld [vmem:[#allocation7 + $0x724] sm:$0xf]  ;;  %v11458_v16 = vld [vmem:[#allocation7 + $0x22c] sm:$0xf] }
 0x419   :  { %6769 = vmatpush.bf16.msra.mxu1 %v9852_v8  ;;  %6635 = vmatpush.bf16.msrb.mxu3 %v10676_v33  ;;  %v10536_v8 = vor.u32 %v11608_v13, %v10535_v7  ;;  %v10361_v33 = vld [vmem:[#allocation7 + $0x578] sm:$0xf0] }
 0x41a   :  { %6726 = vmatpush.bf16.msrb.mxu2 %v10552_v58  ;;  %v11621_v58 = vld [vmem:[#allocation7 + $0x744] sm:$0xf] }
 0x41b   :  { %6757 = vmatpush.bf16.msra.mxu0 %v9708_v61  ;;  %6682 = vmatmul.bf16.vlgmr.msra.gmra.mxu2 %v12374_v38  ;;  %v11538_v61 = vld [vmem:[#allocation7 + $0x4ac] sm:$0xf]  ;;  %v10596_v13 = vor.u32 %v11621_v58, %v10593_v46  ;;  %v10135_v46 = vld [vmem:[#allocation7 + $0x3a8] sm:$0xf] }
 0x41c   :  { %v10268_v44 = vor.u32 %v11538_v61, %v10265_v14 }
 0x41d   :  { %6770 = vmatpush.bf16.msra.mxu1 %v9836_v15  ;;  %6636 = vmatpush.bf16.msrb.mxu3 %v10660_v6  ;;  %v10520_v15 = vor.u32 %v11604_v47, %v10519_v39  ;;  %v6516_v7 = vpop.f32.mrf.mxu1  ;;  %v10577_v6 = vld [vmem:[#allocation7 + $0x730] sm:$0xf0]  ;;  %v11522_v47 = vld [vmem:[#allocation7 + $0x42c] sm:$0xf] }
 0x41e   :  { %6727 = vmatpush.bf16.msrb.mxu2 %v10536_v8  ;;  %v10455_v8 = vld [vmem:[#allocation7 + $0x628] sm:$0xf]  ;;  %v10580_v14 = vor.u32 %v11617_v11, %v10577_v6 }
 0x41f   :  { %6758 = vmatpush.bf16.msra.mxu0 %v9692_v55  ;;  %v10504_v55 = vor.u32 %v11600_v27, %v10503_v62  ;;  %v10167_v62 = vld [vmem:[#allocation7 + $0x3e8] sm:$0xf] }
 0x420   :  { %v10119_v7 = vld [vmem:[#allocation7 + $0x388] sm:$0xf] }
 0x421   :  { %6771 = vmatpush.bf16.msra.mxu1 %v9820_v25  ;;  %6637 = vmatpush.bf16.msrb.mxu3 %v10644_v43  ;;  %v10487_v25 = vld [vmem:[#allocation7 + $0x668] sm:$0xf]  ;;  %v10456_v43 = vor.u32 %v11588_v23, %v10455_v8  ;;  %v11500_v8 = vld [vmem:[#allocation7 + $0x374] sm:$0xf0]  ;;  %v11466_v23 = vld [vmem:[#allocation7 + $0x26c] sm:$0xf] }
 0x422   :  { %6728 = vmatpush.bf16.msrb.mxu2 %v10520_v15  ;;  %v10488_v56 = vor.u32 %v11596_v10, %v10487_v25  ;;  %v10329_v15 = vld [vmem:[#allocation7 + $0x538] sm:$0xf0]  ;;  %v10103_v6 = vld [vmem:[#allocation7 + $0x368] sm:$0xf] }
 0x423   :  { %6759 = vmatpush.bf16.msra.mxu0 %v9676_v3  ;;  %v6553_v31 = vpop.f32.mrf.mxu0  ;;  %v10364_v3 = vor.u32 %v11562_v53, %v10361_v33  ;;  %v10313_v25 = vld [vmem:[#allocation7 + $0x518] sm:$0xf0] }
 0x424   :  { %v6554_v19 = vadd.f32 %v6553_v31, %v5157_v24  ;;  %v11478_v31 = vld [vmem:[#allocation7 + $0x2cc] sm:$0xf]  ;;  %v9977_v24 = vld [vmem:[#allocation7 + $0x278] sm:$0xf0] }
 0x425   :  { %6772 = vmatpush.bf16.msra.mxu1 %v9804_v20  ;;  %6638 = vmatpush.bf16.msrb.mxu3 %v10628_v22  ;;  %v11526_v20 = vld [vmem:[#allocation7 + $0x44c] sm:$0xf]  ;;  %v6566_v49 = vpop.f32.mrf.mxu1 }
 0x426   :  { %6760 = vmatmul.bf16.vlgmr.msra.gmra.mxu0 %v12357_v34  ;;  %v12501_v34 = vadd.f32 %v6514_v35, %v12490_v0  ;;  %6729 = vmatpush.bf16.msrb.mxu2 %v10504_v55  ;;  %v10471_v0 = vld [vmem:[#allocation7 + $0x648] sm:$0xf]  ;;  %v10220_v1 = vor.u32 %v11526_v20, %v10217_v26  ;;  %v11518_v22 = vld [vmem:[#allocation7 + $0x40c] sm:$0xf]  ;;  %v10185_v55 = vld [vmem:[#allocation7 + $0x418] sm:$0xf0]  ;;  %v12507_v10 = vadd.f32 %v6566_v49, %v6554_v19 }
 0x427   :  { %6804 = vmatpush.bf16.msrb.mxu0 %v10300_v63  ;;  %v10472_v63 = vor.u32 %v11592_v45, %v10471_v0  ;;  %v10188_v29 = vor.u32 %v11518_v22, %v10185_v55  ;;  %v11508_v0 = vld [vmem:[#allocation7 + $0x3b4] sm:$0xf0]  ;;  %v11474_v45 = vld [vmem:[#allocation7 + $0x2ac] sm:$0xf]  ;;  %v10679_v22 = vld [vmem:[#allocation7 + $0x7e8] sm:$0xf] }
 0x428   :  { %6773 = vmatmul.bf16.vlgmr.msra.gmra.mxu1 %v12362_v4  ;;  %v10609_v4 = vld [vmem:[#allocation7 + $0x770] sm:$0xf0]  ;;  %6591 = vmatmul.bf16.vlgmr.msra.gmra.mxu3 %v12376_v37  ;;  %v10136_v20 = vor.u32 %v11508_v0, %v10135_v46  ;;  %v11454_v19 = vld [vmem:[#allocation7 + $0x20c] sm:$0xf]  ;;  %v11644_v55 = vld [vmem:[#allocation7 + $0x7f4] sm:$0xf0] }
 0x429   :  { %6817 = vmatpush.bf16.msrb.mxu1 %v10428_v48  ;;  %v10612_v18 = vor.u32 %v11625_v12, %v10609_v4  ;;  %v11558_v48 = vld [vmem:[#allocation7 + $0x54c] sm:$0xf]  ;;  %v10440_v12 = vor.u32 %v11584_v32, %v10439_v59  ;;  %v9945_v59 = vld [vmem:[#allocation7 + $0x238] sm:$0xf0] }
 0x42a   :  { %6730 = vmatpush.bf16.msrb.mxu2 %v10488_v56  ;;  %v10348_v39 = vor.u32 %v11558_v48, %v10345_v5  ;;  %v11550_v4 = vld [vmem:[#allocation7 + $0x50c] sm:$0xf]  ;;  %v10025_v56 = vld [vmem:[#allocation7 + $0x2d8] sm:$0xf0] }
 0x42b   :  { %6805 = vmatpush.bf16.msrb.mxu0 %v10284_v51  ;;  %6639 = vmatpush.bf16.msrb.mxu3 %v10612_v18  ;;  %v10201_v51 = vld [vmem:[#allocation7 + $0x438] sm:$0xf0]  ;;  %v6555_v61 = vpop.f32.mrf.mxu0  ;;  %v11512_v18 = vld [vmem:[#allocation7 + $0x3d4] sm:$0xf0]  ;;  %v10316_v53 = vor.u32 %v11550_v4, %v10313_v25  ;;  %v10028_v58 = vor.u32 %v11478_v31, %v10025_v56  ;;  %v11610_v49 = vld [vmem:[#allocation7 + $0x6ec] sm:$0xf]  ;;  %v10680_v25 = vor.u32 %v11644_v55, %v10679_v22 }
 0x42c   :  { %v10204_v27 = vor.u32 %v11522_v47, %v10201_v51  ;;  %v10152_v33 = vor.u32 %v11512_v18, %v10151_v2  ;;  %v9993_v48 = vld [vmem:[#allocation7 + $0x298] sm:$0xf0]  ;;  %v9980_v47 = vor.u32 %v11466_v23, %v9977_v24  ;;  %v11640_v2 = vld [vmem:[#allocation7 + $0x7d4] sm:$0xf0]  ;;  %v11582_v22 = vld [vmem:[#allocation7 + $0x60c] sm:$0xf] }
 0x42d   :  { %6818 = vmatpush.bf16.msrb.mxu1 %v10412_v57  ;;  %v11554_v57 = vld [vmem:[#allocation7 + $0x52c] sm:$0xf]  ;;  %v9961_v61 = vld [vmem:[#allocation7 + $0x258] sm:$0xf0] }
 0x42e   :  { %6731 = vmatpush.bf16.msrb.mxu2 %v10472_v63  ;;  %v10332_v35 = vor.u32 %v11554_v57, %v10329_v15  ;;  %v11470_v63 = vld [vmem:[#allocation7 + $0x28c] sm:$0xf]  ;;  %v10071_v15 = vld [vmem:[#allocation7 + $0x328] sm:$0xf]  ;;  %v10537_v18 = vld [vmem:[#allocation7 + $0x6d8] sm:$0xf0] }
 0x42f   :  { %6806 = vmatpush.bf16.msrb.mxu0 %v10268_v44  ;;  %6640 = vmatpush.bf16.msrb.mxu3 %v10596_v13  ;;  %v11516_v44 = vld [vmem:[#allocation7 + $0x3f4] sm:$0xf0]  ;;  %v9996_v11 = vor.u32 %v11470_v63, %v9993_v48  ;;  %v11462_v57 = vld [vmem:[#allocation7 + $0x24c] sm:$0xf]  ;;  %v10521_v46 = vld [vmem:[#allocation7 + $0x6b8] sm:$0xf0] }
 0x430   :  { %v11504_v13 = vld [vmem:[#allocation7 + $0x394] sm:$0xf0]  ;;  %v12519_v63 = vld [vmem:[#allocation10 + $0x10] sm:$0xff]  ;;  %v10441_v55 = vld [vmem:[#allocation7 + $0x618] sm:$0xf0] }
 0x431   :  { %6819 = vmatpush.bf16.msrb.mxu1 %v10396_v42  ;;  %v11482_v42 = vld [vmem:[#allocation7 + $0x2ec] sm:$0xf]  ;;  %v10120_v5 = vor.u32 %v11504_v13, %v10119_v7  ;;  %v5158_v48 = vperm.slane %v12519_v63, 4 }
 0x432   :  { %6732 = vmatpush.bf16.msrb.mxu2 %v10456_v43  ;;  %v9964_v43 = vor.u32 %v11462_v57, %v9961_v61  ;;  %v11590_v57 = vld [vmem:[#allocation7 + $0x64c] sm:$0xf]  ;;  %v10473_v61 = vld [vmem:[#allocation7 + $0x658] sm:$0xf0] }
 0x433   :  { %6807 = vmatpush.bf16.msrb.mxu0 %v10252_v30  ;;  %6641 = vmatpush.bf16.msrb.mxu3 %v10580_v14  ;;  %v10168_v30 = vor.u32 %v11516_v44, %v10167_v62  ;;  %v10072_v62 = vor.u32 %v11492_v28, %v10071_v15  ;;  %v10055_v44 = vld [vmem:[#allocation7 + $0x308] sm:$0xf]  ;;  %v10476_v28 = vor.u32 %v11590_v57, %v10473_v61  ;;  %v11638_v61 = vld [vmem:[#allocation7 + $0x7cc] sm:$0xf] }
 0x435   :  { %6820 = vmatpush.bf16.msrb.mxu1 %v10380_v54  ;;  %v10044_v54 = vor.u32 %v11482_v42, %v10041_v9  ;;  %v11488_v42 = vld [vmem:[#allocation7 + $0x314] sm:$0xf0] }
 0x436   :  { %6733 = vmatpush.bf16.msrb.mxu2 %v10440_v12  ;;  %v10056_v12 = vor.u32 %v11488_v42, %v10055_v44 }
 0x437   :  { %6808 = vmatpush.bf16.msrb.mxu0 %v10236_v50  ;;  %6642 = vmatpush.bf16.msrb.mxu3 %v10564_v36  ;;  %v10009_v50 = vld [vmem:[#allocation7 + $0x2b8] sm:$0xf0] }
 0x438   :  { %v10012_v26 = vor.u32 %v11474_v45, %v10009_v50  ;;  %v10553_v36 = vld [vmem:[#allocation7 + $0x6f8] sm:$0xf0]  ;;  %v10631_v50 = vld [vmem:[#allocation7 + $0x788] sm:$0xf] }
 0x439   :  { %6821 = vmatpush.bf16.msrb.mxu1 %v10364_v3  ;;  %6734 = vmatmul.bf16.vlgmr.msrb.gmra.mxu2 %v12459_v40  ;;  %v6568_v3 = vpop.f32.mrf.mxu1 }
 0x43a   :  { %6778 = vmatpush.bf16.msra.mxu2 %v10044_v54  ;;  %6643 = vmatmul.bf16.vlgmr.msrb.gmra.mxu3 %v12494_v21  ;;  %v10663_v54 = vld [vmem:[#allocation7 + $0x7c8] sm:$0xf]  ;;  %v11632_v3 = vld [vmem:[#allocation7 + $0x794] sm:$0xf0] }
 0x43b   :  { %6809 = vmatpush.bf16.msrb.mxu0 %v10220_v1  ;;  %6687 = vmatpush.bf16.msra.mxu3 %v10168_v30  ;;  %v10556_v30 = vor.u32 %v11610_v49, %v10553_v36  ;;  %v10664_v31 = vor.u32 %v11640_v2, %v10663_v54  ;;  %v10632_v7 = vor.u32 %v11632_v3, %v10631_v50  ;;  %v11514_v36 = vld [vmem:[#allocation7 + $0x3ec] sm:$0xf]  ;;  %v10153_v2 = vld [vmem:[#allocation7 + $0x3d8] sm:$0xf0] }
 0x43c   :  { %v11510_v54 = vld [vmem:[#allocation7 + $0x3cc] sm:$0xf]  ;;  %v10105_v3 = vld [vmem:[#allocation7 + $0x378] sm:$0xf0] }
 0x43d   :  { %6822 = vmatpush.bf16.msrb.mxu1 %v10348_v39  ;;  %v10104_v39 = vor.u32 %v11500_v8, %v10103_v6  ;;  %v11594_v6 = vld [vmem:[#allocation7 + $0x66c] sm:$0xf] }
 0x43e   :  { %6779 = vmatpush.bf16.msra.mxu2 %v10028_v58  ;;  %v11602_v58 = vld [vmem:[#allocation7 + $0x6ac] sm:$0xf] }
 0x43f   :  { %6810 = vmatpush.bf16.msrb.mxu0 %v10204_v27  ;;  %6688 = vmatpush.bf16.msra.mxu3 %v10152_v33  ;;  %v9948_v27 = vor.u32 %v11458_v16, %v9945_v59  ;;  %v11636_v33 = vld [vmem:[#allocation7 + $0x7b4] sm:$0xf0]  ;;  %v10524_v45 = vor.u32 %v11602_v58, %v10521_v46  ;;  %v10583_v16 = vld [vmem:[#allocation7 + $0x728] sm:$0xf]  ;;  %v11502_v58 = vld [vmem:[#allocation7 + $0x38c] sm:$0xf] }
 0x440   :  { %v11620_v59 = vld [vmem:[#allocation7 + $0x734] sm:$0xf0]  ;;  %v10121_v46 = vld [vmem:[#allocation7 + $0x398] sm:$0xf0]  ;;  %v11498_v50 = vld [vmem:[#allocation7 + $0x36c] sm:$0xf] }
 0x441   :  { %6823 = vmatpush.bf16.msrb.mxu1 %v10332_v35  ;;  %v9929_v35 = vld [vmem:[#allocation7 + $0x218] sm:$0xf0]  ;;  %v10584_v44 = vor.u32 %v11620_v59, %v10583_v16  ;;  %v11634_v16 = vld [vmem:[#allocation7 + $0x7ac] sm:$0xf] }
 0x442   :  { %6780 = vmatpush.bf16.msra.mxu2 %v10012_v26  ;;  %v9932_v4 = vor.u32 %v11454_v19, %v9929_v35  ;;  %v10505_v26 = vld [vmem:[#allocation7 + $0x698] sm:$0xf0]  ;;  %v11616_v35 = vld [vmem:[#allocation7 + $0x714] sm:$0xf0] }
 0x443   :  { %6811 = vmatpush.bf16.msrb.mxu0 %v10188_v29  ;;  %6689 = vmatpush.bf16.msra.mxu3 %v10136_v20  ;;  %v12513_v1 = vpop.f32.mrf.mxu0  ;;  %v11606_v29 = vld [vmem:[#allocation7 + $0x6cc] sm:$0xf]  ;;  %v10649_v59 = vld [vmem:[#allocation7 + $0x7b8] sm:$0xf0] }
 0x444   :  { %v10540_v56 = vor.u32 %v11606_v29, %v10537_v18  ;;  %v11598_v20 = vld [vmem:[#allocation7 + $0x68c] sm:$0xf]  ;;  %v10156_v29 = vor.u32 %v11510_v54, %v10153_v2 }
 0x445   :  { %6824 = vmatpush.bf16.msrb.mxu1 %v10316_v53  ;;  %v12515_v51 = vpop.f32.mrf.mxu1  ;;  %v10647_v53 = vld [vmem:[#allocation7 + $0x7a8] sm:$0xf]  ;;  %v10508_v13 = vor.u32 %v11598_v20, %v10505_v26  ;;  %v10108_v26 = vor.u32 %v11498_v50, %v10105_v3  ;;  %v11614_v50 = vld [vmem:[#allocation7 + $0x70c] sm:$0xf]  ;;  %v10569_v3 = vld [vmem:[#allocation7 + $0x718] sm:$0xf0] }
 0x446   :  { %6812 = vmatmul.bf16.vlgmr.msrb.gmra.mxu0 %v12401_v41  ;;  %6781 = vmatpush.bf16.msra.mxu2 %v9996_v11  ;;  %v10087_v41 = vld [vmem:[#allocation7 + $0x348] sm:$0xf]  ;;  %v10648_v0 = vor.u32 %v11636_v33, %v10647_v53  ;;  %v11628_v11 = vld [vmem:[#allocation7 + $0x774] sm:$0xf0] }
 0x447   :  { %6690 = vmatpush.bf16.msra.mxu3 %v10120_v5  ;;  %v10615_v5 = vld [vmem:[#allocation7 + $0x768] sm:$0xf] }
 0x448   :  { %6825 = vmatmul.bf16.vlgmr.msrb.gmra.mxu1 %v12416_v60  ;;  %v11496_v60 = vld [vmem:[#allocation7 + $0x354] sm:$0xf0]  ;;  %v10616_v23 = vor.u32 %v11628_v11, %v10615_v5  ;;  %v11490_v5 = vld [vmem:[#allocation7 + $0x32c] sm:$0xf]  ;;  %v10073_v11 = vld [vmem:[#allocation7 + $0x338] sm:$0xf0] }
 0x449   :  { %v10088_v14 = vor.u32 %v11496_v60, %v10087_v41  ;;  %v11624_v60 = vld [vmem:[#allocation7 + $0x754] sm:$0xf0] }
 0x44a   :  { %6782 = vmatpush.bf16.msra.mxu2 %v9980_v47 }
 0x44b   :  { %6691 = vmatpush.bf16.msra.mxu3 %v10104_v39  ;;  %v6607_v32 = vpop.f32.mrf.mxu0  ;;  %v10599_v39 = vld [vmem:[#allocation7 + $0x748] sm:$0xf] }
 0x44c   :  { %v10600_v15 = vor.u32 %v11624_v60, %v10599_v39  ;;  %v11586_v32 = vld [vmem:[#allocation7 + $0x62c] sm:$0xf] }
 0x44d   :  { %v6620_v9 = vpop.f32.mrf.mxu1  ;;  %v11642_v39 = vld [vmem:[#allocation7 + $0x7ec] sm:$0xf] }
 0x44e   :  { %6783 = vmatpush.bf16.msra.mxu2 %v9964_v43  ;;  %v10567_v9 = vld [vmem:[#allocation7 + $0x708] sm:$0xf] }
 0x44f   :  { %6692 = vmatpush.bf16.msra.mxu3 %v10088_v14 }
 0x452   :  { %6784 = vmatpush.bf16.msra.mxu2 %v9948_v27 }
 0x453   :  { %6693 = vmatpush.bf16.msra.mxu3 %v10072_v62  ;;  %v10457_v62 = vld [vmem:[#allocation7 + $0x638] sm:$0xf0] }
 0x454   :  { %v10460_v42 = vor.u32 %v11586_v32, %v10457_v62  ;;  %v10652_v32 = vor.u32 %v11634_v16, %v10649_v59  ;;  %v11630_v62 = vld [vmem:[#allocation7 + $0x78c] sm:$0xf]  ;;  %v11647_v59 = vld [vmem:[#allocation8 + $0x10] sm:$0xff] }
 0x456   :  { %6785 = vmatpush.bf16.msra.mxu2 %v9932_v4  ;;  %v10568_v4 = vor.u32 %v11616_v35, %v10567_v9  ;;  %v10617_v9 = vld [vmem:[#allocation7 + $0x778] sm:$0xf0] }
 0x457   :  { %6694 = vmatpush.bf16.msra.mxu3 %v10056_v12  ;;  %v10169_v12 = vld [vmem:[#allocation7 + $0x3f8] sm:$0xf0] }
 0x459   :  { %6786 = vmatmul.bf16.vlgmr.msra.gmra.mxu2 %v12374_v38  ;;  %v10489_v38 = vld [vmem:[#allocation7 + $0x678] sm:$0xf0] }
 0x45a   :  { %6830 = vmatpush.bf16.msrb.mxu2 %v10556_v30  ;;  %6695 = vmatmul.bf16.vlgmr.msra.gmra.mxu3 %v12376_v37  ;;  %v10492_v24 = vor.u32 %v11594_v6, %v10489_v38  ;;  %v10172_v30 = vor.u32 %v11514_v36, %v10169_v12  ;;  %v10076_v38 = vor.u32 %v11490_v5, %v10073_v11  ;;  %v11652_v36 = vld [vmem:[#allocation8 + $0x38] sm:$0xff] }
 0x45b   :  { %6739 = vmatpush.bf16.msrb.mxu3 %v10680_v25  ;;  %v12522_v14 = vpop.f32.mrf.mxu2  ;;  %v10444_v25 = vor.u32 %v11582_v22, %v10441_v55  ;;  %v11622_v55 = vld [vmem:[#allocation7 + $0x74c] sm:$0xf]  ;;  %7285 = vmatpush.bf16.msra.mxu0 %v11652_v36  ;;  %v11660_v36 = vld [vmem:[#allocation8 + $0x78] sm:$0xff] }
 0x45c   :  { %7298 = vmatpush.bf16.msra.mxu1 %v11660_v36  ;;  %v11653_v36 = vld [vmem:[#allocation8 + $0x40] sm:$0xff] }
 0x45e   :  { %6831 = vmatpush.bf16.msrb.mxu2 %v10540_v56  ;;  %v10137_v56 = vld [vmem:[#allocation7 + $0x3b8] sm:$0xf0] }
 0x45f   :  { %6740 = vmatpush.bf16.msrb.mxu3 %v10664_v31  ;;  %v11506_v31 = vld [vmem:[#allocation7 + $0x3ac] sm:$0xf] }
 0x460   :  { %v10140_v33 = vor.u32 %v11506_v31, %v10137_v56  ;;  %v11618_v31 = vld [vmem:[#allocation7 + $0x72c] sm:$0xf]  ;;  %v10585_v56 = vld [vmem:[#allocation7 + $0x738] sm:$0xf0] }
 0x462   :  { %6832 = vmatpush.bf16.msrb.mxu2 %v10524_v45 }
 0x463   :  { %6741 = vmatpush.bf16.msrb.mxu3 %v10648_v0  ;;  %v6657_v8 = vpop.f32.mrf.mxu0  ;;  %v6529_v49 = vpop.f32.mrf.mxu2  ;;  %v10124_v0 = vor.u32 %v11502_v58, %v10121_v46 }
 0x464   :  { %v6658_v47 = vadd.f32 %v6657_v8, %v5158_v48  ;;  %v10601_v49 = vld [vmem:[#allocation7 + $0x758] sm:$0xf0] }
 0x465   :  { %v6670_v41 = vpop.f32.mrf.mxu1  ;;  %v10604_v2 = vor.u32 %v11622_v55, %v10601_v49 }
 0x466   :  { %6833 = vmatpush.bf16.msrb.mxu2 %v10508_v13  ;;  %v12524_v43 = vadd.f32 %v6670_v41, %v6658_v47  ;;  %v10089_v13 = vld [vmem:[#allocation7 + $0x358] sm:$0xf0] }
 0x467   :  { %6742 = vmatpush.bf16.msrb.mxu3 %v10632_v7  ;;  %v10681_v47 = vld [vmem:[#allocation7 + $0x7f8] sm:$0xf0] }
 0x468   :  { %v10684_v57 = vor.u32 %v11642_v39, %v10681_v47 }
 0x46a   :  { %6834 = vmatpush.bf16.msrb.mxu2 %v10492_v24  ;;  %v10057_v24 = vld [vmem:[#allocation7 + $0x318] sm:$0xf0] }
 0x46b   :  { %6743 = vmatpush.bf16.msrb.mxu3 %v10616_v23  ;;  %v6659_v27 = vpop.f32.mrf.mxu0  ;;  %v11486_v23 = vld [vmem:[#allocation7 + $0x30c] sm:$0xf] }
 0x46c   :  { %v6579_v18 = vpop.f32.mrf.mxu2  ;;  %v10060_v41 = vor.u32 %v11486_v23, %v10057_v24  ;;  %v10633_v27 = vld [vmem:[#allocation7 + $0x798] sm:$0xf0]  ;;  %v11649_v23 = vld [vmem:[#allocation8 + $0x20] sm:$0xff] }
 0x46d   :  { %v6672_v19 = vpop.f32.mrf.mxu1  ;;  %v12527_v53 = vadd.f32 %v6579_v18, %v12507_v10  ;;  %v11494_v10 = vld [vmem:[#allocation7 + $0x34c] sm:$0xf] }
 0x46e   :  { %6835 = vmatpush.bf16.msrb.mxu2 %v10476_v28  ;;  %v10092_v48 = vor.u32 %v11494_v10, %v10089_v13  ;;  %v12538_v19 = vld [vmem:[#allocation10 + $0x18] sm:$0xff] }
 0x46f   :  { %6744 = vmatpush.bf16.msrb.mxu3 %v10600_v15  ;;  %v10665_v15 = vld [vmem:[#allocation7 + $0x7d8] sm:$0xf0]  ;;  %v5159_v35 = vperm.slane %v12538_v19, 4 }
 0x470   :  { %v10668_v28 = vor.u32 %v11638_v61, %v10665_v15 }
 0x472   :  { %6836 = vmatpush.bf16.msrb.mxu2 %v10460_v42  ;;  %v11626_v42 = vld [vmem:[#allocation7 + $0x76c] sm:$0xf] }
 0x473   :  { %6745 = vmatpush.bf16.msrb.mxu3 %v10584_v44  ;;  %v10636_v44 = vor.u32 %v11630_v62, %v10633_v27  ;;  %v10620_v22 = vor.u32 %v11626_v42, %v10617_v9 }
 0x474   :  { %v6581_v45 = vpop.f32.mrf.mxu2 }
 0x475   :  { %v10588_v45 = vor.u32 %v11618_v31, %v10585_v56 }
 0x476   :  { %6837 = vmatpush.bf16.msrb.mxu2 %v10444_v25 }
 0x477   :  { %6746 = vmatpush.bf16.msrb.mxu3 %v10568_v4 }
 0x479   :  { %6838 = vmatmul.bf16.vlgmr.msrb.gmra.mxu2 %v12459_v40 }
 0x47a   :  { %6747 = vmatmul.bf16.vlgmr.msrb.gmra.mxu3 %v12494_v21 }
 0x47b   :  { %6791 = vmatpush.bf16.msra.mxu3 %v10172_v30 }
 0x47c   :  { %v12535_v40 = vpop.f32.mrf.mxu2 }
 0x47f   :  { %6792 = vmatpush.bf16.msra.mxu3 %v10156_v29 }
 0x483   :  { %6793 = vmatpush.bf16.msra.mxu3 %v10140_v33  ;;  %v12531_v20 = vpop.f32.mrf.mxu0  ;;  %v11651_v33 = vld [vmem:[#allocation8 + $0x30] sm:$0xff] }
 0x484   :  { %v6633_v60 = vpop.f32.mrf.mxu2  ;;  %7286 = vmatpush.bf16.msra.mxu0 %v11651_v33 }
 0x485   :  { %v12533_v7 = vpop.f32.mrf.mxu1  ;;  %v11648_v60 = vld [vmem:[#allocation8 + $0x18] sm:$0xff] }
 0x487   :  { %6794 = vmatpush.bf16.msra.mxu3 %v10124_v0 }
 0x48b   :  { %6795 = vmatpush.bf16.msra.mxu3 %v10108_v26  ;;  %v6711_v6 = vpop.f32.mrf.mxu0  ;;  %v11650_v26 = vld [vmem:[#allocation8 + $0x28] sm:$0xff] }
 0x48c   :  { %7287 = vmatpush.bf16.msra.mxu0 %v11650_v26 }
 0x48d   :  { %v6724_v8 = vpop.f32.mrf.mxu1 }
 0x48f   :  { %6796 = vmatpush.bf16.msra.mxu3 %v10092_v48 }
 0x490   :  { %7288 = vmatpush.bf16.msra.mxu0 %v11649_v23 }
 0x493   :  { %6797 = vmatpush.bf16.msra.mxu3 %v10076_v38 }
 0x494   :  { %7289 = vmatpush.bf16.msra.mxu0 %v11648_v60 }
 0x497   :  { %6798 = vmatpush.bf16.msra.mxu3 %v10060_v41 }
 0x498   :  { %7290 = vmatpush.bf16.msra.mxu0 %v11647_v59  ;;  %v11655_v59 = vld [vmem:[#allocation8 + $0x50] sm:$0xff] }
 0x49a   :  { %6799 = vmatmul.bf16.vlgmr.msra.gmra.mxu3 %v12376_v37  ;;  %v6528_v37 = vadd.f32 %v12522_v14, %v12501_v34 }
 0x49b   :  { %6843 = vmatpush.bf16.msrb.mxu3 %v10684_v57  ;;  %v6540_v30 = vpop.f32.mrf.mxu3 }
 0x49c   :  { %v12543_v54 = vadd.f32 %v6540_v30, %v6528_v37 }
 0x49e   :  { %v6683_v18 = vpop.f32.mrf.mxu2  ;;  %v6856_v58 = vrot.slane %v12543_v54, 4  ;;  %v6884_v34 = vmul.f32 %v12543_v54, %v12543_v54 }
 0x49f   :  { %6844 = vmatpush.bf16.msrb.mxu3 %v10668_v28  ;;  %v12551_v14 = vadd.f32 %v6683_v18, %v12524_v43  ;;  %v10572_v43 = vor.u32 %v11614_v50, %v10569_v3 }
 0x4a0   :  { %v6857_v46 = vadd.f32 %v6856_v58, %v12543_v54  ;;  %v6888_v0 = vrot.slane %v6884_v34, 4 }
 0x4a2   :  { %v6858_v10 = vrot.slane %v6857_v46, 2  ;;  %v6889_v13 = vadd.f32 %v6888_v0, %v6884_v34 }
 0x4a3   :  { %6845 = vmatpush.bf16.msrb.mxu3 %v10652_v32  ;;  %v6761_v12 = vpop.f32.mrf.mxu0  ;;  %v6542_v11 = vpop.f32.mrf.mxu3 }
 0x4a4   :  { %v6762_v25 = vadd.f32 %v6761_v12, %v5159_v35  ;;  %v6859_v6 = vadd.f32 %v6858_v10, %v6857_v46  ;;  %v6890_v38 = vrot.slane %v6889_v13, 2  ;;  %v11658_v46 = vld [vmem:[#allocation8 + $0x68] sm:$0xff]  ;;  %v12573_v11 = vld [vmem:[#allocation10] sm:$0xff] }
 0x4a5   :  { %v6774_v4 = vpop.f32.mrf.mxu1 }
 0x4a6   :  { %v12545_v29 = vadd.f32 %v6774_v4, %v6762_v25  ;;  %v6685_v8 = vpop.f32.mrf.mxu2  ;;  %v6860_v24 = vrot.slane %v6859_v6, 1  ;;  %v6891_v39 = vadd.f32 %v6890_v38, %v6889_v13 }
 0x4a7   :  { %6846 = vmatpush.bf16.msrb.mxu3 %v10636_v44  ;;  %v11646_v44 = vld [vmem:[#allocation8 + $0x8] sm:$0xff] }
 0x4a8   :  { %v6861_v47 = vadd.f32 %v6860_v24, %v6859_v6  ;;  %v6892_v41 = vrot.slane %v6891_v39, 1  ;;  %7291 = vmatpush.bf16.msra.mxu0 %v11646_v44 }
 0x4aa   :  { %v6880_v57 = vmul.f32 %v6861_v47, %v12087_v52  ;;  %v6893_v61 = vadd.f32 %v6892_v41, %v6891_v39  ;;  %v11656_v39 = vld [vmem:[#allocation8 + $0x58] sm:$0xff] }
 0x4ab   :  { %6847 = vmatpush.bf16.msrb.mxu3 %v10620_v22  ;;  %v6763_v48 = vpop.f32.mrf.mxu0  ;;  %v6592_v15 = vpop.f32.mrf.mxu3  ;;  %v11645_v22 = vld [vmem:[#allocation8] sm:$0xff] }
 0x4ac   :  { %v6912_v28 = vmul.f32 %v6893_v61, %v12087_v52  ;;  %v6916_v16 = vmul.f32 %v6880_v57, %v6880_v57  ;;  %v6593_v62 = vadd.f32 %v6592_v15, %v12527_v53  ;;  %7292 = vmatpush.bf16.msra.mxu0 %v11645_v22 }
 0x4ad   :  { %v6776_v5 = vpop.f32.mrf.mxu1 }
 0x4ae   :  { %v6920_v32 = vsub.f32 %v6912_v28, %v6916_v16  ;;  %v6606_v9 = vadd.f32 %v12513_v1, %v6593_v62  ;;  %v11657_v5 = vld [vmem:[#allocation8 + $0x60] sm:$0xff] }
 0x4af   :  { %6848 = vmatpush.bf16.msrb.mxu3 %v10604_v2  ;;  %v11659_v2 = vld [vmem:[#allocation8 + $0x70] sm:$0xff] }
 0x4b0   :  { %v6924_v27 = vmax.f32 %v6920_v32, 0.0  ;;  %7299 = vmatpush.bf16.msra.mxu1 %v11659_v2 }
 0x4b2   :  { %v6928_v42 = vadd.f32 1e-05, %v6924_v27 }
 0x4b3   :  { %6849 = vmatpush.bf16.msrb.mxu3 %v10588_v45  ;;  %v6594_v35 = vpop.f32.mrf.mxu3 }
 0x4b4   :  { %11708 = vrsqrt.f32 %v6928_v42  ;;  %vm6938_vm10 = vweird.f32 %v6928_v42  ;;  %7300 = vmatpush.bf16.msra.mxu1 %v11658_v46 }
 0x4b7   :  { %6850 = vmatpush.bf16.msrb.mxu3 %v10572_v43 }
 0x4b8   :  { %7301 = vmatpush.bf16.msra.mxu1 %v11657_v5 }
 0x4ba   :  { %6851 = vmatmul.bf16.vlgmr.msrb.gmra.mxu3 %v12494_v21  ;;  %v6619_v21 = vadd.f32 %v12515_v51, %v6606_v9  ;;  %v11709_v37 = vpop.eup %11708 }
 0x4bb   :  { %v6933_v4 = vmul.f32 %v11709_v37, %v6928_v42  ;;  %vm6939_vm9 = vweird.f32 %v11709_v37  ;;  %v11654_v42 = vld [vmem:[#allocation8 + $0x48] sm:$0xff] }
 0x4bc   :  { %v12564_v53 = vpop.f32.mrf.mxu2  ;;  %v6632_v12 = vadd.f32 %v12535_v40, %v6619_v21  ;;  %vm6940_vm11 = vmor %vm6938_vm10, %vm6939_vm9  ;;  %7302 = vmatpush.bf16.msra.mxu1 %v11656_v39 }
 0x4bd   :  { %v6644_v25 = vpop.f32.mrf.mxu3  ;;  %v6934_v30 = vmul.f32 %v11709_v37, %v6933_v4 }
 0x4be   :  { %v12567_v1 = vadd.f32 %v6644_v25, %v6632_v12 }
 0x4bf   :  { %v6935_v31 = vmul.f32 0.5, %v6934_v30 }
 0x4c0   :  { %v6862_v51 = vrot.slane %v12567_v1, 4  ;;  %v6885_v18 = vmul.f32 %v12567_v1, %v12567_v1  ;;  %7303 = vmatpush.bf16.msra.mxu1 %v11655_v59 }
 0x4c1   :  { %v6936_v40 = vsub.f32 1.5, %v6935_v31 }
 0x4c2   :  { %v6863_v58 = vadd.f32 %v6862_v51, %v12567_v1  ;;  %v6894_v34 = vrot.slane %v6885_v18, 4 }
 0x4c3   :  { %v12560_v55 = vpop.f32.mrf.mxu0  ;;  %v6937_v3 = vmul.f32 %v11709_v37, %v6936_v40 }
 0x4c4   :  { %v6864_v0 = vrot.slane %v6863_v58, 2  ;;  %v6895_v45 = vadd.f32 %v6894_v34, %v6885_v18  ;;  %v6737_v50 = vpop.f32.mrf.mxu2  ;;  %7304 = vmatpush.bf16.msra.mxu1 %v11654_v42 }
 0x4c5   :  { %v12562_v49 = vpop.f32.mrf.mxu1  ;;  %v6646_v26 = vpop.f32.mrf.mxu3  ;;  %v6941_v48 = vsel %vm6940_vm11, %v11709_v37, %v6937_v3 }
 0x4c6   :  { %v6865_v10 = vadd.f32 %v6864_v0, %v6863_v58  ;;  %v6896_v13 = vrot.slane %v6895_v45, 2  ;;  %v6972_v6 = vmul.f32 %v12573_v11, %v6941_v48  ;;  %v11668_v48 = vld [vmem:[#allocation8 + $0xb8] sm:$0xff] }
 0x4c7   :  { %7311 = vmatpush.bf16.msra.mxu2 %v11668_v48 }
 0x4c8   :  { %v6866_v38 = vrot.slane %v6865_v10, 1  ;;  %v6897_v43 = vadd.f32 %v6896_v13, %v6895_v45  ;;  %v6976_v8 = vmul.f32 %v6972_v6, %v6880_v57  ;;  %v6996_v41 = vperm.slane %v6972_v6, 5  ;;  %7305 = vmatpush.bf16.msra.mxu1 %v11653_v36 }
 0x4ca   :  { %v6867_v23 = vadd.f32 %v6866_v38, %v6865_v10  ;;  %v6898_v24 = vrot.slane %v6897_v43, 1  ;;  %v6984_v47 = vrot.slane %v6976_v8, 7  ;;  %v7000_v32 = vmul.f32 %v6996_v41, %v12543_v54  ;;  %v11667_v8 = vld [vmem:[#allocation8 + $0xb0] sm:$0xff] }
 0x4cb   :  { %v6815_v56 = vpop.f32.mrf.mxu0  ;;  %7312 = vmatpush.bf16.msra.mxu2 %v11667_v8 }
 0x4cc   :  { %v6881_v60 = vmul.f32 %v6867_v23, %v12087_v52  ;;  %v6899_v61 = vadd.f32 %v6898_v24, %v6897_v43  ;;  %v6992_v15 = vsub.f32 %v12573_v11, %v6984_v47  ;;  %v11666_v24 = vld [vmem:[#allocation8 + $0xa8] sm:$0xff] }
 0x4cd   :  { %v6828_v33 = vpop.f32.mrf.mxu1 }
 0x4ce   :  { %v6913_v28 = vmul.f32 %v6899_v61, %v12087_v52  ;;  %v6917_v16 = vmul.f32 %v6881_v60, %v6881_v60  ;;  %v7004_v62 = vperm.slane %v6992_v15, 6  ;;  %v11665_v15 = vld [vmem:[#allocation8 + $0xa0] sm:$0xff] }
 0x4cf   :  { %7313 = vmatpush.bf16.msra.mxu2 %v11666_v24 }
 0x4d0   :  { %v6921_v27 = vsub.f32 %v6913_v28, %v6917_v16  ;;  %v7008_v57 = vadd.f32 %v7004_v62, %v7000_v32  ;;  %v11664_v62 = vld [vmem:[#allocation8 + $0x98] sm:$0xff] }
 0x4d2   :  { %v6925_v44 = vmax.f32 %v6921_v27, 0.0  ;;  %v7016_v9 = vmul.f32 0.2, %v7008_v57  ;;  %vm7012_vm12 = vcmp.gt.f32.partialorder %v7008_v57, 0.0 }
 0x4d3   :  { %7314 = vmatpush.bf16.msra.mxu2 %v11665_v15 }
 0x4d4   :  { %v6929_v35 = vadd.f32 1e-05, %v6925_v44  ;;  %v7020_v22 = vsel %vm7012_vm12, %v7008_v57, %v7016_v9  ;;  %v11663_v9 = vld [vmem:[#allocation8 + $0x90] sm:$0xff] }
 0x4d5   :  { %v7024_v21 = vpack.c.bf16 %v7020_v22, %v7020_v22 }
 0x4d6   :  { %11710 = vrsqrt.f32 %v6929_v35  ;;  %vm6948_vm14 = vweird.f32 %v6929_v35 }
 0x4d7   :  { %7293 = vmatmul.bf16.vlgmr.msra.gmra.mxu0 %v7024_v21  ;;  %7315 = vmatpush.bf16.msra.mxu2 %v11664_v62  ;;  %v11662_v21 = vld [vmem:[#allocation8 + $0x88] sm:$0xff] }
 0x4db   :  { %7316 = vmatpush.bf16.msra.mxu2 %v11663_v9 }
 0x4dc   :  { %v6787_v12 = vpop.f32.mrf.mxu2  ;;  %v11711_v4 = vpop.eup %11710 }
 0x4dd   :  { %v6696_v37 = vpop.f32.mrf.mxu3  ;;  %v12581_v54 = vadd.f32 %v6787_v12, %v12545_v29  ;;  %v6943_v25 = vmul.f32 %v11711_v4, %v6929_v35  ;;  %vm6949_vm13 = vweird.f32 %v11711_v4 }
 0x4de   :  { %vm6950_vm15 = vmor %vm6948_vm14, %vm6949_vm13  ;;  %v6697_v34 = vadd.f32 %v6696_v37, %v12551_v14  ;;  %v11661_v37 = vld [vmem:[#allocation8 + $0x80] sm:$0xff] }
 0x4df   :  { %v6944_v30 = vmul.f32 %v11711_v4, %v6943_v25  ;;  %7317 = vmatpush.bf16.msra.mxu2 %v11662_v21 }
 0x4e0   :  { %v6710_v0 = vadd.f32 %v12531_v20, %v6697_v34 }
 0x4e1   :  { %v6945_v2 = vmul.f32 0.5, %v6944_v30 }
 0x4e2   :  { %v6723_v26 = vadd.f32 %v12533_v7, %v6710_v0 }
 0x4e3   :  { %v6946_v31 = vsub.f32 1.5, %v6945_v2  ;;  %7318 = vmatpush.bf16.msra.mxu2 %v11661_v37 }
 0x4e4   :  { %v6789_v18 = vpop.f32.mrf.mxu2  ;;  %v6736_v5 = vadd.f32 %v12564_v53, %v6723_v26 }
 0x4e5   :  { %v6698_v51 = vpop.f32.mrf.mxu3  ;;  %v6947_v56 = vmul.f32 %v11711_v4, %v6946_v31 }
 0x4e7   :  { %v6951_v33 = vsel %vm6950_vm15, %v11711_v4, %v6947_v56 }
 0x4e8   :  { %v6973_v58 = vmul.f32 %v12504_v17, %v6951_v33 }
 0x4ea   :  { %v6977_v40 = vmul.f32 %v6973_v58, %v6881_v60  ;;  %v6997_v29 = vperm.slane %v6973_v58, 5 }
 0x4ec   :  { %v6985_v46 = vrot.slane %v6977_v40, 7  ;;  %v7001_v50 = vmul.f32 %v6997_v29, %v12567_v1 }
 0x4ee   :  { %v6993_v45 = vsub.f32 %v12504_v17, %v6985_v46 }
 0x4f0   :  { %v7005_v3 = vperm.slane %v6993_v45, 6 }
 0x4f2   :  { %v7009_v10 = vadd.f32 %v7005_v3, %v7001_v50 }
 0x4f4   :  { %v7017_v13 = vmul.f32 0.2, %v7009_v10  ;;  %vm7013_vm0 = vcmp.gt.f32.partialorder %v7009_v10, 0.0 }
 0x4f6   :  { %v7021_v38 = vsel %vm7013_vm0, %v7009_v10, %v7017_v13  ;;  %v11676_v13 = vld [vmem:[#allocation8 + $0xf8] sm:$0xff] }
 0x4f7   :  { %v7025_v20 = vpack.c.bf16 %v7021_v38, %v7021_v38  ;;  %7324 = vmatpush.bf16.msra.mxu3 %v11676_v13 }
 0x4f9   :  { %7306 = vmatmul.bf16.vlgmr.msra.gmra.mxu1 %v7025_v20  ;;  %v11675_v20 = vld [vmem:[#allocation8 + $0xf0] sm:$0xff] }
 0x4fb   :  { %7325 = vmatpush.bf16.msra.mxu3 %v11675_v20 }
 0x4fc   :  { %v12590_v14 = vpop.f32.mrf.mxu2 }
 0x4fd   :  { %v6748_v6 = vpop.f32.mrf.mxu3 }
 0x4fe   :  { %v6749_v43 = vadd.f32 %v6748_v6, %v6736_v5 }
 0x500   :  { %v6868_v17 = vrot.slane %v6749_v43, 4  ;;  %v6886_v23 = vmul.f32 %v6749_v43, %v6749_v43 }
 0x502   :  { %v6869_v1 = vadd.f32 %v6868_v17, %v6749_v43  ;;  %v6900_v7 = vrot.slane %v6886_v23, 4  ;;  %v11674_v17 = vld [vmem:[#allocation8 + $0xe8] sm:$0xff] }
 0x503   :  { %7326 = vmatpush.bf16.msra.mxu3 %v11674_v17 }
 0x504   :  { %v6870_v39 = vrot.slane %v6869_v1, 2  ;;  %v6901_v47 = vadd.f32 %v6900_v7, %v6886_v23  ;;  %v6841_v60 = vpop.f32.mrf.mxu2 }
 0x505   :  { %v6750_v41 = vpop.f32.mrf.mxu3 }
 0x506   :  { %v6871_v53 = vadd.f32 %v6870_v39, %v6869_v1  ;;  %v6902_v61 = vrot.slane %v6901_v47, 2 }
 0x508   :  { %v6872_v28 = vrot.slane %v6871_v53, 1  ;;  %v6903_v16 = vadd.f32 %v6902_v61, %v6901_v47 }
 0x50a   :  { %v6873_v59 = vadd.f32 %v6872_v28, %v6871_v53  ;;  %v6904_v32 = vrot.slane %v6903_v16, 1  ;;  %v11672_v53 = vld [vmem:[#allocation8 + $0xd8] sm:$0xff] }
 0x50c   :  { %v6882_v27 = vmul.f32 %v6873_v59, %v12087_v52  ;;  %v6905_v57 = vadd.f32 %v6904_v32, %v6903_v16  ;;  %v11671_v59 = vld [vmem:[#allocation8 + $0xd0] sm:$0xff] }
 0x50e   :  { %v6914_v44 = vmul.f32 %v6905_v57, %v12087_v52  ;;  %v6918_v42 = vmul.f32 %v6882_v27, %v6882_v27 }
 0x510   :  { %v6922_v35 = vsub.f32 %v6914_v44, %v6918_v42  ;;  %v11669_v44 = vld [vmem:[#allocation8 + $0xc0] sm:$0xff] }
 0x512   :  { %v6926_v22 = vmax.f32 %v6922_v35, 0.0 }
 0x514   :  { %v6930_v36 = vadd.f32 1e-05, %v6926_v22 }
 0x516   :  { %11712 = vrsqrt.f32 %v6930_v36  ;;  %vm6958_vm2 = vweird.f32 %v6930_v36 }
 0x51c   :  { %v11713_v4 = vpop.eup %11712 }
 0x51d   :  { %v6800_v12 = vpop.f32.mrf.mxu3  ;;  %v6953_v25 = vmul.f32 %v11713_v4, %v6930_v36  ;;  %vm6959_vm1 = vweird.f32 %v11713_v4 }
 0x51e   :  { %vm6960_vm3 = vmor %vm6958_vm2, %vm6959_vm1  ;;  %v6801_v34 = vadd.f32 %v6800_v12, %v12581_v54 }
 0x51f   :  { %v6954_v30 = vmul.f32 %v11713_v4, %v6953_v25 }
 0x520   :  { %v6814_v0 = vadd.f32 %v12560_v55, %v6801_v34 }
 0x521   :  { %v6955_v2 = vmul.f32 0.5, %v6954_v30 }
 0x522   :  { %v6827_v26 = vadd.f32 %v12562_v49, %v6814_v0 }
 0x523   :  { %v6956_v18 = vsub.f32 1.5, %v6955_v2 }
 0x524   :  { %v6840_v48 = vadd.f32 %v12590_v14, %v6827_v26  ;;  %v11673_v14 = vld [vmem:[#allocation8 + $0xe0] sm:$0xff] }
 0x525   :  { %v6802_v51 = vpop.f32.mrf.mxu3  ;;  %v6957_v31 = vmul.f32 %v11713_v4, %v6956_v18  ;;  %7327 = vmatpush.bf16.msra.mxu3 %v11673_v14 }
 0x527   :  { %v6961_v56 = vsel %vm6960_vm3, %v11713_v4, %v6957_v31 }
 0x528   :  { %v6974_v33 = vmul.f32 %v12519_v63, %v6961_v56 }
 0x529   :  { %7328 = vmatpush.bf16.msra.mxu3 %v11672_v53 }
 0x52a   :  { %v6978_v58 = vmul.f32 %v6974_v33, %v6882_v27  ;;  %v6998_v46 = vperm.slane %v6974_v33, 5  ;;  %v11670_v27 = vld [vmem:[#allocation8 + $0xc8] sm:$0xff] }
 0x52c   :  { %v6986_v40 = vrot.slane %v6978_v58, 7  ;;  %v7002_v45 = vmul.f32 %v6998_v46, %v6749_v43 }
 0x52d   :  { %7329 = vmatpush.bf16.msra.mxu3 %v11671_v59 }
 0x52e   :  { %v6994_v29 = vsub.f32 %v12519_v63, %v6986_v40  ;;  %v7092_v40 = vperm.slane %v12573_v11, 7 }
 0x530   :  { %v7006_v50 = vperm.slane %v6994_v29, 6 }
 0x531   :  { %7330 = vmatpush.bf16.msra.mxu3 %v11670_v27 }
 0x532   :  { %v7010_v3 = vadd.f32 %v7006_v50, %v7002_v45 }
 0x534   :  { %v7018_v10 = vmul.f32 0.2, %v7010_v3  ;;  %vm7014_vm4 = vcmp.gt.f32.partialorder %v7010_v3, 0.0 }
 0x535   :  { %7331 = vmatpush.bf16.msra.mxu3 %v11669_v44 }
 0x536   :  { %v7022_v5 = vsel %vm7014_vm4, %v7010_v3, %v7018_v10 }
 0x537   :  { %v7026_v38 = vpack.c.bf16 %v7022_v5, %v7022_v5 }
 0x539   :  { %7319 = vmatmul.bf16.vlgmr.msra.gmra.mxu2 %v7026_v38 }
 0x53d   :  { %v6852_v6 = vpop.f32.mrf.mxu3 }
 0x53e   :  { %v6853_v54 = vadd.f32 %v6852_v6, %v6840_v48 }
 0x540   :  { %v6874_v63 = vrot.slane %v6853_v54, 4  ;;  %v6887_v8 = vmul.f32 %v6853_v54, %v6853_v54 }
 0x542   :  { %v6875_v55 = vadd.f32 %v6874_v63, %v6853_v54  ;;  %v6906_v43 = vrot.slane %v6887_v8, 4 }
 0x544   :  { %v6876_v23 = vrot.slane %v6875_v55, 2  ;;  %v6907_v49 = vadd.f32 %v6906_v43, %v6887_v8 }
 0x545   :  { %v6854_v1 = vpop.f32.mrf.mxu3 }
 0x546   :  { %v6877_v7 = vadd.f32 %v6876_v23, %v6875_v55  ;;  %v6908_v24 = vrot.slane %v6907_v49, 2 }
 0x548   :  { %v6878_v39 = vrot.slane %v6877_v7, 1  ;;  %v6909_v47 = vadd.f32 %v6908_v24, %v6907_v49 }
 0x54a   :  { %v6879_v41 = vadd.f32 %v6878_v39, %v6877_v7  ;;  %v6910_v60 = vrot.slane %v6909_v47, 1 }
 0x54c   :  { %v6883_v61 = vmul.f32 %v6879_v41, %v12087_v52  ;;  %v6911_v15 = vadd.f32 %v6910_v60, %v6909_v47 }
 0x54e   :  { %v6915_v28 = vmul.f32 %v6911_v15, %v12087_v52  ;;  %v6919_v16 = vmul.f32 %v6883_v61, %v6883_v61 }
 0x550   :  { %v6923_v32 = vsub.f32 %v6915_v28, %v6919_v16 }
 0x552   :  { %v6927_v62 = vmax.f32 %v6923_v32, 0.0 }
 0x554   :  { %v6931_v57 = vadd.f32 1e-05, %v6927_v62  ;;  %v7294_v36 = vpop.f32.mrf.mxu0 }
 0x555   :  { %v7295_v46 = vadd.f32 %v7294_v36, %v7092_v40 }
 0x556   :  { %11714 = vrsqrt.f32 %v6931_v57  ;;  %vm6968_vm6 = vweird.f32 %v6931_v57 }
 0x55c   :  { %v11715_v42 = vpop.eup %11714  ;;  %v7296_v25 = vpop.f32.mrf.mxu0 }
 0x55d   :  { %v6963_v9 = vmul.f32 %v11715_v42, %v6931_v57  ;;  %vm6969_vm5 = vweird.f32 %v11715_v42 }
 0x55e   :  { %vm6970_vm7 = vmor %vm6968_vm6, %vm6969_vm5 }
 0x55f   :  { %v6964_v35 = vmul.f32 %v11715_v42, %v6963_v9 }
 0x561   :  { %v6965_v22 = vmul.f32 0.5, %v6964_v35 }
 0x563   :  { %v6966_v21 = vsub.f32 1.5, %v6965_v22 }
 0x565   :  { %v6967_v37 = vmul.f32 %v11715_v42, %v6966_v21 }
 0x567   :  { %v6971_v52 = vsel %vm6970_vm7, %v11715_v42, %v6967_v37 }
 0x568   :  { %v6975_v12 = vmul.f32 %v12538_v19, %v6971_v52 }
 0x56a   :  { %v6979_v4 = vmul.f32 %v6975_v12, %v6883_v61  ;;  %v6999_v2 = vperm.slane %v6975_v12, 5 }
 0x56c   :  { %v6987_v30 = vrot.slane %v6979_v4, 7  ;;  %v7003_v18 = vmul.f32 %v6999_v2, %v6853_v54 }
 0x56e   :  { %v6995_v51 = vsub.f32 %v12538_v19, %v6987_v30 }
 0x570   :  { %v7007_v31 = vperm.slane %v6995_v51, 6 }
 0x572   :  { %v7011_v56 = vadd.f32 %v7007_v31, %v7003_v18 }
 0x574   :  { %v7019_v33 = vmul.f32 0.2, %v7011_v56  ;;  %vm7015_vm8 = vcmp.gt.f32.partialorder %v7011_v56, 0.0 }
 0x576   :  { %v7023_v58 = vsel %vm7015_vm8, %v7011_v56, %v7019_v33  ;;  %v7307_v29 = vpop.f32.mrf.mxu1 }
 0x577   :  { %v7027_v34 = vpack.c.bf16 %v7023_v58, %v7023_v58  ;;  %v7308_v0 = vadd.f32 %v7307_v29, %v7295_v46 }
 0x579   :  { %7332 = vmatmul.bf16.vlgmr.msra.gmra.mxu3 %v7027_v34 }
 0x57e   :  { %v7309_v45 = vpop.f32.mrf.mxu1 }
 0x5bc   :  { %v7320_v50 = vpop.f32.mrf.mxu2 }
 0x5bd   :  { %v7321_v19 = vadd.f32 %v7320_v50, %v7308_v0 }
 0x5c4   :  { %v7322_v3 = vpop.f32.mrf.mxu2 }
 0x5fc   :  { %v7333_v26 = vpop.f32.mrf.mxu3 }
 0x5fd   :  { %v7334_v10 = vadd.f32 %v7333_v26, %v7321_v19 }
 0x5ff   :  { %7337 = vst [vmem:[#allocation11] sm:$0xff] %v7334_v10 }
 0x600   :  { %7348 = dma.vmem_to_hbm [thread:$0]  %s7344_s25, 128, %s7346_s28, [#allocation4]  }
 0x604   :  { %v7335_v11 = vpop.f32.mrf.mxu3 }
 0x605   :  { %11884 = dma.done.wait [#allocation4], 128  }
 0x606   :  { %11885 = vsyncadd [#allocation4], 4294967168 }
 0x607   :  { %7353 = vsyncpa [#allocation3], 1 }
 0x608   :  { %7354 = vsyncpa [#allocation6], 1 }
 0x609   :  { %7355 = vsyncpa [#allocation9], 1 }
 0x60a   :  { %7356 = vsyncpa [#allocation4], 1 }

</bundles_post_ra>
